<compile_context>
chip_gen: v6e
topology: v6e:2x2x1
jax: 0.10.0
libtpu: 0.0.40
codegen_flags: <defaults>
</compile_context>

<pallas_src>
import math
import functools

import jax
import jax.numpy as jnp
import numpy as np
from jax.experimental import pallas as pl
from jax.experimental.pallas import tpu as pltpu


# ---------------------------------------------------------------------------
# Fused kernel: conv1 + lrelu + maxpool2 + conv2 + lrelu + fc, for TB images.
# ---------------------------------------------------------------------------
def disc_fused_kernel(patches_ref, w1_ref, w2p_ref, b2_ref, wfc_ref, bfc_ref,
                      o_ref, h1_ref, acc_ref, *, tb):
    # patches_ref : (TB*328, 128) conv1 im2col. row = b*328 + q, q = i*18 + j
    #               (conv2's zero-padded 18x18 coords; rows 324..327 pad).
    #               lane = p*32 + k, p = pool parity (2r+s), k = dy*5+dx (k<25),
    #               k==25 bias indicator (1.0 on valid rows), rest 0.
    # w1_ref      : (128, 256) block-diagonal conv1 weight (+bias row), lanes p*64+o.
    # w2p_ref     : (1920, 128) conv2 weight packed as 15 (128,128) tap-pair blocks:
    #               block t = 3*dy + g covers taps (dy, 2g) [rows 0:64] and
    #               (dy, 2g+1) [rows 64:128]; the nonexistent (dy,5) half is zero.
    # b2_ref      : (1, 128) conv2 bias.
    # wfc_ref     : (248, 128) fc weight scattered to padded rows (zeros elsewhere).
    # bfc_ref     : (1,) fc bias in SMEM.
    # o_ref       : (1, TB, 1) logits.
    # h1_ref      : (TB, 328, 128) scratch: [:, q, :64]=h1[q], [:, q, 64:]=h1[q+1].
    # acc_ref     : (TB*248, 128) f32 scratch accumulator for conv2.

    # ---- conv1 (+bias) for all 4 pool parities in one MXU matmul ------------
    y = jnp.dot(patches_ref[...], w1_ref[...],
                preferred_element_type=jnp.float32)            # (TB*328, 256)

    # ---- max-pool over the 4 parity lane-blocks, then leaky_relu ------------
    z = jnp.maximum(y[:, :128], y[:, 128:])                    # (TB*328, 128)
    h1 = jnp.maximum(z[:, :64], z[:, 64:])                     # (TB*328, 64)
    h1 = jnp.where(h1 >= 0, h1, 0.2 * h1)                      # halo rows stay exactly 0

    # ---- pack h1 (and its one-row shift) once into VMEM scratch -------------
    h1_3d = h1.reshape(tb, 328, 64)
    h1_ref[:, :, 0:64] = h1_3d
    h1_ref[:, 0:327, 64:128] = h1_3d[:, 1:328, :]
    h1_ref[:, 327:328, 64:128] = jnp.zeros((tb, 1, 64), jnp.float32)

    # ---- conv2: 15 accumulating K=128 dots (adjacent-dx tap pairs) -----------
    # Replaces the old materialized (TB*248,1600) im2col LHS + single huge dot.
    acc_ref[...] = jnp.zeros_like(acc_ref)
    for t in range(15):                                        # fully unrolled
        dy, g = divmod(t, 3)
        off = dy * 18 + 2 * g
        lhs = h1_ref[:, off:off + 248, :].reshape(tb * 248, 128)
        acc_ref[...] += jnp.dot(lhs, w2p_ref[t * 128:(t + 1) * 128, :],
                                preferred_element_type=jnp.float32)

    h2 = acc_ref[...] + b2_ref[...]
    h2 = jnp.where(h2 >= 0, h2, 0.2 * h2)                      # (TB*248, 128)

    # ---- fc: masked weighted sum (invalid rows hit exactly-zero fc weights) --
    prod = h2.reshape(tb, 248, 128) * wfc_ref[...][None, :, :]
    s = jnp.sum(prod, axis=2, keepdims=True)                   # (TB, 248, 1)
    s = jnp.sum(s, axis=1, keepdims=True)                      # (TB, 1, 1)
    o_ref[0] = s.reshape(tb, 1) + bfc_ref[0]


# ---------------------------------------------------------------------------
# Batch-tile heuristic (review item: even grid for v7x's 2 TCs, tb <= 8)
# ---------------------------------------------------------------------------
def _pick_tb(batch):
    cap = max(1, min(8, batch))
    for tb in range(cap, 0, -1):            # exact split with an even tile count
        nt = -(-batch // tb)
        if nt % 2 == 0 and nt * tb == batch:
            return tb
    for tb in range(cap, 0, -1):            # even tile count, some padding
        if (-(-batch // tb)) % 2 == 0:
            return tb
    return cap


# ---------------------------------------------------------------------------
# Wrapper: layout glue (im2col / weight permutation) in plain JAX, one pallas_call.
# ---------------------------------------------------------------------------
def discriminator_forward(img, params, *, tb=None):
    W1, B1, W2, B2, Wfc, bfc = params
    B = img.shape[0]
    if tb is None:
        tb = _pick_tb(B)
    ntiles = (B + tb - 1) // tb
    bp = ntiles * tb

    # ---- conv1 im2col, lane-dense, rows in conv2's padded 18x18 grid --------
    # TODO(synk): review item 8 (build conv1 patches in-kernel from the padded
    # 32x32 image to cut HBM staging ~40x, mainly for v5e) is not applied here.
    x = img[:, 0].astype(jnp.float32)                                    # (B, 28, 28)
    x_pad = jnp.pad(x, ((0, bp - B), (2, 2), (2, 2)))                    # (bp, 32, 32)

    blocks = []
    for p in range(4):
        r, s = divmod(p, 2)
        taps = [x_pad[:, r + dy: r + dy + 28: 2, s + dx: s + dx + 28: 2]
                for dy in range(5) for dx in range(5)]
        blocks.append(jnp.stack(taps, axis=-1))                          # (bp,14,14,25)
    A = jnp.stack(blocks, axis=3)                                        # (bp,14,14,4,25)

    P = jnp.zeros((bp, 18, 18, 4, 32), jnp.float32)
    P = P.at[:, 2:16, 2:16, :, :25].set(A)
    P = P.at[:, 2:16, 2:16, :, 25].set(1.0)      # bias-indicator column (valid rows only)
    P = P.reshape(bp, 324, 128)
    P = jnp.pad(P, ((0, 0), (0, 4), (0, 0)))                             # (bp, 328, 128)
    patches = P.reshape(bp * 328, 128)

    # ---- conv1 weight: block-diagonal, bias folded into row 25 of each block
    w1b = jnp.zeros((32, 64), jnp.float32)
    w1b = w1b.at[:25, :].set(jnp.transpose(W1.reshape(64, 25), (1, 0)))
    w1b = w1b.at[25, :].set(B1)
    w1bd = jnp.zeros((128, 256), jnp.float32)
    for p in range(4):
        w1bd = w1bd.at[p * 32:(p + 1) * 32, p * 64:(p + 1) * 64].set(w1b)

    # ---- conv2 weight packed as 15 (128,128) adjacent-dx tap-pair blocks -----
    w2cohw = jnp.transpose(W2, (1, 0, 2, 3))                             # [c, o, dy, dx]
    pair_blocks = []
    for dy in range(5):
        for g in range(3):
            dxb = 2 * g
            top = w2cohw[:, :, dy, dxb]                                  # (64, 128)
            bot = (w2cohw[:, :, dy, dxb + 1] if dxb + 1 <= 4
                   else jnp.zeros((64, 128), jnp.float32))
            pair_blocks.append(jnp.concatenate([top, bot], axis=0))      # (128, 128)
    w2p = jnp.concatenate(pair_blocks, axis=0)                           # (1920, 128)
    b2k = B2.reshape(1, 128)

    # ---- fc weight scattered to padded-row layout (row = I*18 + J) ----------
    wt = jnp.transpose(Wfc.reshape(128, 14, 14), (1, 2, 0))              # (14, 14, 128)
    wfck = jnp.zeros((14, 18, 128), jnp.float32).at[:, :14, :].set(wt)
    wfck = wfck.reshape(252, 128)[:248]                                  # (248, 128)
    bfck = bfc.reshape(1).astype(jnp.float32)

    out = pl.pallas_call(
        functools.partial(disc_fused_kernel, tb=tb),
        out_shape=jax.ShapeDtypeStruct((ntiles, tb, 1), jnp.float32),
        grid=(ntiles,),
        in_specs=[
            pl.BlockSpec((tb * 328, 128), lambda t: (t, 0)),
            pl.BlockSpec((128, 256), lambda t: (0, 0),
                         pipeline_mode=pl.Buffered(1)),
            pl.BlockSpec((1920, 128), lambda t: (0, 0),
                         pipeline_mode=pl.Buffered(1)),
            pl.BlockSpec((1, 128), lambda t: (0, 0),
                         pipeline_mode=pl.Buffered(1)),
            pl.BlockSpec((248, 128), lambda t: (0, 0),
                         pipeline_mode=pl.Buffered(1)),
            pl.BlockSpec(memory_space=pltpu.MemorySpace.SMEM),
        ],
        out_specs=pl.BlockSpec((1, tb, 1), lambda t: (t, 0, 0)),
        scratch_shapes=[
            pltpu.VMEM((tb, 328, 128), jnp.float32),     # packed h1
            pltpu.VMEM((tb * 248, 128), jnp.float32),    # conv2 accumulator
        ],
        compiler_params=pltpu.CompilerParams(
            dimension_semantics=("parallel",),
            # <= 48 MiB keeps the kernel inside v7x's 64 MiB physical VMEM;
            # on v6e/v5e (128 MiB) raise this together with a larger tb if desired.
            vmem_limit_bytes=48 * 1024 * 1024,
        ),
    )(patches, w1bd, w2p, b2k, wfck, bfck)

    return out.reshape(bp, 1)[:B]


# ---------------------------------------------------------------------------
# Deterministic parameter init (PyTorch-default-like uniform bounds)
# ---------------------------------------------------------------------------
def init_params(key):
    ks = jax.random.split(key, 6)
    b1 = 1.0 / math.sqrt(1 * 5 * 5)
    b2 = 1.0 / math.sqrt(64 * 5 * 5)
    b3 = 1.0 / math.sqrt(128 * 14 * 14)
    W1 = jax.random.uniform(ks[0], (64, 1, 5, 5), jnp.float32, -b1, b1)
    B1 = jax.random.uniform(ks[1], (64,), jnp.float32, -b1, b1)
    W2 = jax.random.uniform(ks[2], (128, 64, 5, 5), jnp.float32, -b2, b2)
    B2 = jax.random.uniform(ks[3], (128,), jnp.float32, -b2, b2)
    Wfc = jax.random.uniform(ks[4], (1, 128 * 14 * 14), jnp.float32, -b3, b3)
    bfc = jax.random.uniform(ks[5], (1,), jnp.float32, -b3, b3)
    return W1, B1, W2, B2, Wfc, bfc


# ---------------------------------------------------------------------------
# Pure-JAX reference (matches the PyTorch forward semantics)
# ---------------------------------------------------------------------------
def reference_forward(img, params):
    W1, B1, W2, B2, Wfc, bfc = params
    B = img.shape[0]
    y = jax.lax.conv_general_dilated(img, W1, (1, 1), ((2, 2), (2, 2)),
                                     dimension_numbers=("NCHW", "OIHW", "NCHW"))
    y = y + B1[None, :, None, None]
    y = jnp.where(y >= 0, y, 0.2 * y)
    y = y.reshape(B, 64, 14, 2, 14, 2).max(axis=(3, 5))            # maxpool 2
    z = jax.lax.conv_general_dilated(y, W2, (1, 1), ((2, 2), (2, 2)),
                                     dimension_numbers=("NCHW", "OIHW", "NCHW"))
    z = z + B2[None, :, None, None]
    z = jnp.where(z >= 0, z, 0.2 * z)
    flat = z.reshape(B, 128 * 14 * 14)
    return flat @ Wfc.T + bfc


if __name__ == "__main__":
    key = jax.random.PRNGKey(0)
    kp, kx = jax.random.split(key)
    params = init_params(kp)
    img = jax.random.normal(kx, (2, 1, 28, 28), jnp.float32)   # batch=2, MNIST-like

    fwd = jax.jit(discriminator_forward)
    out = fwd(img, params)
    jax.block_until_ready(out)

    ref = reference_forward(img, params)
    np.testing.assert_allclose(np.asarray(out), np.asarray(ref), rtol=1e-3, atol=1e-3)

    assert out.shape == (2, 1)
    print("KERNEL_OK")
</pallas_src>

<mosaic_0001>
module attributes {stable_mosaic.version = 11 : i64} {
  func.func @disc_fused_kernel(%arg0: i32, %arg1: memref<328x128xf32, #tpu.memory_space<vmem>>, %arg2: memref<128x256xf32, #tpu.memory_space<vmem>>, %arg3: memref<1920x128xf32, #tpu.memory_space<vmem>>, %arg4: memref<1x128xf32, #tpu.memory_space<vmem>>, %arg5: memref<248x128xf32, #tpu.memory_space<vmem>>, %arg6: memref<1xf32, #tpu.memory_space<smem>>, %arg7: memref<1x1x1xf32, #tpu.memory_space<vmem>>, %arg8: memref<1x328x128xf32, #tpu.memory_space<vmem>>, %arg9: memref<248x128xf32, #tpu.memory_space<vmem>>) attributes {dimension_semantics = [#tpu.dimension_semantics<parallel>], iteration_bounds = array<i64: 2>, scalar_prefetch = 0 : i64, scratch_operands = 2 : i64, tpu.core_type = #tpu.core_type<tc>, window_params = [{transform_indices = @transform_0, window_bounds = array<i64: 328, 128>}, {pipeline_mode = #tpu.pipeline_mode<synchronous>, transform_indices = @transform_1, window_bounds = array<i64: 128, 256>}, {pipeline_mode = #tpu.pipeline_mode<synchronous>, transform_indices = @transform_2, window_bounds = array<i64: 1920, 128>}, {pipeline_mode = #tpu.pipeline_mode<synchronous>, transform_indices = @transform_3, window_bounds = array<i64: 1, 128>}, {pipeline_mode = #tpu.pipeline_mode<synchronous>, transform_indices = @transform_4, window_bounds = array<i64: 248, 128>}, {transform_indices = @transform_5, window_bounds = array<i64: 1>}, {transform_indices = @transform_6, window_bounds = array<i64: 1, 1, 1>}]} {
    %c0 = arith.constant 0 : index
    %c0_0 = arith.constant 0 : index
    %0 = vector.load %arg1[%c0, %c0_0] : memref<328x128xf32, #tpu.memory_space<vmem>>, vector<328x128xf32>
    %c0_1 = arith.constant 0 : index
    %c0_2 = arith.constant 0 : index
    %1 = vector.load %arg2[%c0_1, %c0_2] : memref<128x256xf32, #tpu.memory_space<vmem>>, vector<128x256xf32>
    %cst = arith.constant dense<0.000000e+00> : vector<328x256xf32>
    %2 = tpu.matmul %0, %1, %cst {dimension_numbers = #tpu.dot_dimension_numbers<[1], [0], [0], [1], [0, 0, 1, 1], [], []>} : vector<328x128xf32>, vector<128x256xf32>, vector<328x256xf32> -> vector<328x256xf32>
    %3 = vector.extract_strided_slice %2 {offsets = [0, 0], sizes = [328, 128], strides = [1, 1]} : vector<328x256xf32> to vector<328x128xf32>
    %4 = vector.extract_strided_slice %2 {offsets = [0, 128], sizes = [328, 128], strides = [1, 1]} : vector<328x256xf32> to vector<328x128xf32>
    %5 = arith.maximumf %3, %4 : vector<328x128xf32>
    %6 = vector.extract_strided_slice %5 {offsets = [0, 0], sizes = [328, 64], strides = [1, 1]} : vector<328x128xf32> to vector<328x64xf32>
    %7 = vector.extract_strided_slice %5 {offsets = [0, 64], sizes = [328, 64], strides = [1, 1]} : vector<328x128xf32> to vector<328x64xf32>
    %8 = arith.maximumf %6, %7 : vector<328x64xf32>
    %cst_3 = arith.constant 0.000000e+00 : f32
    %9 = vector.broadcast %cst_3 : f32 to vector<328x64xf32>
    %10 = arith.cmpf oge, %8, %9 : vector<328x64xf32>
    %cst_4 = arith.constant 2.000000e-01 : f32
    %11 = vector.broadcast %cst_4 : f32 to vector<328x64xf32>
    %12 = arith.mulf %11, %8 : vector<328x64xf32>
    %13 = arith.select %10, %8, %12 : vector<328x64xi1>, vector<328x64xf32>
    %14 = vector.shape_cast %13 : vector<328x64xf32> to vector<1x328x64xf32>
    %c0_5 = arith.constant 0 : index
    %c0_6 = arith.constant 0 : index
    %c0_7 = arith.constant 0 : index
    %15 = vector.load %arg8[%c0_5, %c0_6, %c0_7] : memref<1x328x128xf32, #tpu.memory_space<vmem>>, vector<1x328x64xf32>
    tpu.vector_store %arg8[%c0_5, %c0_6, %c0_7], %14 {strides = array<i32>} : memref<1x328x128xf32, #tpu.memory_space<vmem>>, vector<1x328x64xf32>,
    %16 = vector.extract_strided_slice %14 {offsets = [0, 1, 0], sizes = [1, 327, 64], strides = [1, 1, 1]} : vector<1x328x64xf32> to vector<1x327x64xf32>
    %c0_8 = arith.constant 0 : index
    %c0_9 = arith.constant 0 : index
    %c64 = arith.constant 64 : index
    %17 = vector.load %arg8[%c0_8, %c0_9, %c64] : memref<1x328x128xf32, #tpu.memory_space<vmem>>, vector<1x327x64xf32>
    tpu.vector_store %arg8[%c0_8, %c0_9, %c64], %16 {strides = array<i32>} : memref<1x328x128xf32, #tpu.memory_space<vmem>>, vector<1x327x64xf32>,
    %cst_10 = arith.constant 0.000000e+00 : f32
    %18 = vector.broadcast %cst_10 : f32 to vector<1x1x64xf32>
    %c0_11 = arith.constant 0 : index
    %c327 = arith.constant 327 : index
    %c64_12 = arith.constant 64 : index
    %19 = vector.load %arg8[%c0_11, %c327, %c64_12] : memref<1x328x128xf32, #tpu.memory_space<vmem>>, vector<1x1x64xf32>
    tpu.vector_store %arg8[%c0_11, %c327, %c64_12], %18 {strides = array<i32>} : memref<1x328x128xf32, #tpu.memory_space<vmem>>, vector<1x1x64xf32>,
    %cst_13 = arith.constant 0.000000e+00 : f32
    %20 = vector.broadcast %cst_13 : f32 to vector<248x128xf32>
    %c0_14 = arith.constant 0 : index
    %c0_15 = arith.constant 0 : index
    %21 = vector.load %arg9[%c0_14, %c0_15] : memref<248x128xf32, #tpu.memory_space<vmem>>, vector<248x128xf32>
    tpu.vector_store %arg9[%c0_14, %c0_15], %20 {strides = array<i32>} : memref<248x128xf32, #tpu.memory_space<vmem>>, vector<248x128xf32>,
    %c0_16 = arith.constant 0 : index
    %c0_17 = arith.constant 0 : index
    %c0_18 = arith.constant 0 : index
    %22 = vector.load %arg8[%c0_16, %c0_17, %c0_18] : memref<1x328x128xf32, #tpu.memory_space<vmem>>, vector<1x248x128xf32>
    %23 = vector.shape_cast %22 : vector<1x248x128xf32> to vector<248x128xf32>
    %c0_19 = arith.constant 0 : index
    %c0_20 = arith.constant 0 : index
    %24 = vector.load %arg9[%c0_19, %c0_20] : memref<248x128xf32, #tpu.memory_space<vmem>>, vector<248x128xf32>
    %c0_21 = arith.constant 0 : index
    %c0_22 = arith.constant 0 : index
    %25 = vector.load %arg3[%c0_21, %c0_22] : memref<1920x128xf32, #tpu.memory_space<vmem>>, vector<128x128xf32>
    %cst_23 = arith.constant dense<0.000000e+00> : vector<248x128xf32>
    %26 = tpu.matmul %23, %25, %cst_23 {dimension_numbers = #tpu.dot_dimension_numbers<[1], [0], [0], [1], [0, 0, 1, 1], [], []>} : vector<248x128xf32>, vector<128x128xf32>, vector<248x128xf32> -> vector<248x128xf32>
    %27 = arith.addf %24, %26 : vector<248x128xf32>
    %c0_24 = arith.constant 0 : index
    %c0_25 = arith.constant 0 : index
    %28 = vector.load %arg9[%c0_24, %c0_25] : memref<248x128xf32, #tpu.memory_space<vmem>>, vector<248x128xf32>
    tpu.vector_store %arg9[%c0_24, %c0_25], %27 {strides = array<i32>} : memref<248x128xf32, #tpu.memory_space<vmem>>, vector<248x128xf32>,
    %c0_26 = arith.constant 0 : index
    %c2 = arith.constant 2 : index
    %c0_27 = arith.constant 0 : index
    %29 = vector.load %arg8[%c0_26, %c2, %c0_27] : memref<1x328x128xf32, #tpu.memory_space<vmem>>, vector<1x248x128xf32>
    %30 = vector.shape_cast %29 : vector<1x248x128xf32> to vector<248x128xf32>
    %c0_28 = arith.constant 0 : index
    %c0_29 = arith.constant 0 : index
    %31 = vector.load %arg9[%c0_28, %c0_29] : memref<248x128xf32, #tpu.memory_space<vmem>>, vector<248x128xf32>
    %c128 = arith.constant 128 : index
    %c0_30 = arith.constant 0 : index
    %32 = vector.load %arg3[%c128, %c0_30] : memref<1920x128xf32, #tpu.memory_space<vmem>>, vector<128x128xf32>
    %cst_31 = arith.constant dense<0.000000e+00> : vector<248x128xf32>
    %33 = tpu.matmul %30, %32, %cst_31 {dimension_numbers = #tpu.dot_dimension_numbers<[1], [0], [0], [1], [0, 0, 1, 1], [], []>} : vector<248x128xf32>, vector<128x128xf32>, vector<248x128xf32> -> vector<248x128xf32>
    %34 = arith.addf %31, %33 : vector<248x128xf32>
    %c0_32 = arith.constant 0 : index
    %c0_33 = arith.constant 0 : index
    %35 = vector.load %arg9[%c0_32, %c0_33] : memref<248x128xf32, #tpu.memory_space<vmem>>, vector<248x128xf32>
    tpu.vector_store %arg9[%c0_32, %c0_33], %34 {strides = array<i32>} : memref<248x128xf32, #tpu.memory_space<vmem>>, vector<248x128xf32>,
    %c0_34 = arith.constant 0 : index
    %c4 = arith.constant 4 : index
    %c0_35 = arith.constant 0 : index
    %36 = vector.load %arg8[%c0_34, %c4, %c0_35] : memref<1x328x128xf32, #tpu.memory_space<vmem>>, vector<1x248x128xf32>
    %37 = vector.shape_cast %36 : vector<1x248x128xf32> to vector<248x128xf32>
    %c0_36 = arith.constant 0 : index
    %c0_37 = arith.constant 0 : index
    %38 = vector.load %arg9[%c0_36, %c0_37] : memref<248x128xf32, #tpu.memory_space<vmem>>, vector<248x128xf32>
    %c256 = arith.constant 256 : index
    %c0_38 = arith.constant 0 : index
    %39 = vector.load %arg3[%c256, %c0_38] : memref<1920x128xf32, #tpu.memory_space<vmem>>, vector<128x128xf32>
    %cst_39 = arith.constant dense<0.000000e+00> : vector<248x128xf32>
    %40 = tpu.matmul %37, %39, %cst_39 {dimension_numbers = #tpu.dot_dimension_numbers<[1], [0], [0], [1], [0, 0, 1, 1], [], []>} : vector<248x128xf32>, vector<128x128xf32>, vector<248x128xf32> -> vector<248x128xf32>
    %41 = arith.addf %38, %40 : vector<248x128xf32>
    %c0_40 = arith.constant 0 : index
    %c0_41 = arith.constant 0 : index
    %42 = vector.load %arg9[%c0_40, %c0_41] : memref<248x128xf32, #tpu.memory_space<vmem>>, vector<248x128xf32>
    tpu.vector_store %arg9[%c0_40, %c0_41], %41 {strides = array<i32>} : memref<248x128xf32, #tpu.memory_space<vmem>>, vector<248x128xf32>,
    %c0_42 = arith.constant 0 : index
    %c18 = arith.constant 18 : index
    %c0_43 = arith.constant 0 : index
    %43 = vector.load %arg8[%c0_42, %c18, %c0_43] : memref<1x328x128xf32, #tpu.memory_space<vmem>>, vector<1x248x128xf32>
    %44 = vector.shape_cast %43 : vector<1x248x128xf32> to vector<248x128xf32>
    %c0_44 = arith.constant 0 : index
    %c0_45 = arith.constant 0 : index
    %45 = vector.load %arg9[%c0_44, %c0_45] : memref<248x128xf32, #tpu.memory_space<vmem>>, vector<248x128xf32>
    %c384 = arith.constant 384 : index
    %c0_46 = arith.constant 0 : index
    %46 = vector.load %arg3[%c384, %c0_46] : memref<1920x128xf32, #tpu.memory_space<vmem>>, vector<128x128xf32>
    %cst_47 = arith.constant dense<0.000000e+00> : vector<248x128xf32>
    %47 = tpu.matmul %44, %46, %cst_47 {dimension_numbers = #tpu.dot_dimension_numbers<[1], [0], [0], [1], [0, 0, 1, 1], [], []>} : vector<248x128xf32>, vector<128x128xf32>, vector<248x128xf32> -> vector<248x128xf32>
    %48 = arith.addf %45, %47 : vector<248x128xf32>
    %c0_48 = arith.constant 0 : index
    %c0_49 = arith.constant 0 : index
    %49 = vector.load %arg9[%c0_48, %c0_49] : memref<248x128xf32, #tpu.memory_space<vmem>>, vector<248x128xf32>
    tpu.vector_store %arg9[%c0_48, %c0_49], %48 {strides = array<i32>} : memref<248x128xf32, #tpu.memory_space<vmem>>, vector<248x128xf32>,
    %c0_50 = arith.constant 0 : index
    %c20 = arith.constant 20 : index
    %c0_51 = arith.constant 0 : index
    %50 = vector.load %arg8[%c0_50, %c20, %c0_51] : memref<1x328x128xf32, #tpu.memory_space<vmem>>, vector<1x248x128xf32>
    %51 = vector.shape_cast %50 : vector<1x248x128xf32> to vector<248x128xf32>
    %c0_52 = arith.constant 0 : index
    %c0_53 = arith.constant 0 : index
    %52 = vector.load %arg9[%c0_52, %c0_53] : memref<248x128xf32, #tpu.memory_space<vmem>>, vector<248x128xf32>
    %c512 = arith.constant 512 : index
    %c0_54 = arith.constant 0 : index
    %53 = vector.load %arg3[%c512, %c0_54] : memref<1920x128xf32, #tpu.memory_space<vmem>>, vector<128x128xf32>
    %cst_55 = arith.constant dense<0.000000e+00> : vector<248x128xf32>
    %54 = tpu.matmul %51, %53, %cst_55 {dimension_numbers = #tpu.dot_dimension_numbers<[1], [0], [0], [1], [0, 0, 1, 1], [], []>} : vector<248x128xf32>, vector<128x128xf32>, vector<248x128xf32> -> vector<248x128xf32>
    %55 = arith.addf %52, %54 : vector<248x128xf32>
    %c0_56 = arith.constant 0 : index
    %c0_57 = arith.constant 0 : index
    %56 = vector.load %arg9[%c0_56, %c0_57] : memref<248x128xf32, #tpu.memory_space<vmem>>, vector<248x128xf32>
    tpu.vector_store %arg9[%c0_56, %c0_57], %55 {strides = array<i32>} : memref<248x128xf32, #tpu.memory_space<vmem>>, vector<248x128xf32>,
    %c0_58 = arith.constant 0 : index
    %c22 = arith.constant 22 : index
    %c0_59 = arith.constant 0 : index
    %57 = vector.load %arg8[%c0_58, %c22, %c0_59] : memref<1x328x128xf32, #tpu.memory_space<vmem>>, vector<1x248x128xf32>
    %58 = vector.shape_cast %57 : vector<1x248x128xf32> to vector<248x128xf32>
    %c0_60 = arith.constant 0 : index
    %c0_61 = arith.constant 0 : index
    %59 = vector.load %arg9[%c0_60, %c0_61] : memref<248x128xf32, #tpu.memory_space<vmem>>, vector<248x128xf32>
    %c640 = arith.constant 640 : index
    %c0_62 = arith.constant 0 : index
    %60 = vector.load %arg3[%c640, %c0_62] : memref<1920x128xf32, #tpu.memory_space<vmem>>, vector<128x128xf32>
    %cst_63 = arith.constant dense<0.000000e+00> : vector<248x128xf32>
    %61 = tpu.matmul %58, %60, %cst_63 {dimension_numbers = #tpu.dot_dimension_numbers<[1], [0], [0], [1], [0, 0, 1, 1], [], []>} : vector<248x128xf32>, vector<128x128xf32>, vector<248x128xf32> -> vector<248x128xf32>
    %62 = arith.addf %59, %61 : vector<248x128xf32>
    %c0_64 = arith.constant 0 : index
    %c0_65 = arith.constant 0 : index
    %63 = vector.load %arg9[%c0_64, %c0_65] : memref<248x128xf32, #tpu.memory_space<vmem>>, vector<248x128xf32>
    tpu.vector_store %arg9[%c0_64, %c0_65], %62 {strides = array<i32>} : memref<248x128xf32, #tpu.memory_space<vmem>>, vector<248x128xf32>,
    %c0_66 = arith.constant 0 : index
    %c36 = arith.constant 36 : index
    %c0_67 = arith.constant 0 : index
    %64 = vector.load %arg8[%c0_66, %c36, %c0_67] : memref<1x328x128xf32, #tpu.memory_space<vmem>>, vector<1x248x128xf32>
    %65 = vector.shape_cast %64 : vector<1x248x128xf32> to vector<248x128xf32>
    %c0_68 = arith.constant 0 : index
    %c0_69 = arith.constant 0 : index
    %66 = vector.load %arg9[%c0_68, %c0_69] : memref<248x128xf32, #tpu.memory_space<vmem>>, vector<248x128xf32>
    %c768 = arith.constant 768 : index
    %c0_70 = arith.constant 0 : index
    %67 = vector.load %arg3[%c768, %c0_70] : memref<1920x128xf32, #tpu.memory_space<vmem>>, vector<128x128xf32>
    %cst_71 = arith.constant dense<0.000000e+00> : vector<248x128xf32>
    %68 = tpu.matmul %65, %67, %cst_71 {dimension_numbers = #tpu.dot_dimension_numbers<[1], [0], [0], [1], [0, 0, 1, 1], [], []>} : vector<248x128xf32>, vector<128x128xf32>, vector<248x128xf32> -> vector<248x128xf32>
    %69 = arith.addf %66, %68 : vector<248x128xf32>
    %c0_72 = arith.constant 0 : index
    %c0_73 = arith.constant 0 : index
    %70 = vector.load %arg9[%c0_72, %c0_73] : memref<248x128xf32, #tpu.memory_space<vmem>>, vector<248x128xf32>
    tpu.vector_store %arg9[%c0_72, %c0_73], %69 {strides = array<i32>} : memref<248x128xf32, #tpu.memory_space<vmem>>, vector<248x128xf32>,
    %c0_74 = arith.constant 0 : index
    %c38 = arith.constant 38 : index
    %c0_75 = arith.constant 0 : index
    %71 = vector.load %arg8[%c0_74, %c38, %c0_75] : memref<1x328x128xf32, #tpu.memory_space<vmem>>, vector<1x248x128xf32>
    %72 = vector.shape_cast %71 : vector<1x248x128xf32> to vector<248x128xf32>
    %c0_76 = arith.constant 0 : index
    %c0_77 = arith.constant 0 : index
    %73 = vector.load %arg9[%c0_76, %c0_77] : memref<248x128xf32, #tpu.memory_space<vmem>>, vector<248x128xf32>
    %c896 = arith.constant 896 : index
    %c0_78 = arith.constant 0 : index
    %74 = vector.load %arg3[%c896, %c0_78] : memref<1920x128xf32, #tpu.memory_space<vmem>>, vector<128x128xf32>
    %cst_79 = arith.constant dense<0.000000e+00> : vector<248x128xf32>
    %75 = tpu.matmul %72, %74, %cst_79 {dimension_numbers = #tpu.dot_dimension_numbers<[1], [0], [0], [1], [0, 0, 1, 1], [], []>} : vector<248x128xf32>, vector<128x128xf32>, vector<248x128xf32> -> vector<248x128xf32>
    %76 = arith.addf %73, %75 : vector<248x128xf32>
    %c0_80 = arith.constant 0 : index
    %c0_81 = arith.constant 0 : index
    %77 = vector.load %arg9[%c0_80, %c0_81] : memref<248x128xf32, #tpu.memory_space<vmem>>, vector<248x128xf32>
    tpu.vector_store %arg9[%c0_80, %c0_81], %76 {strides = array<i32>} : memref<248x128xf32, #tpu.memory_space<vmem>>, vector<248x128xf32>,
    %c0_82 = arith.constant 0 : index
    %c40 = arith.constant 40 : index
    %c0_83 = arith.constant 0 : index
    %78 = vector.load %arg8[%c0_82, %c40, %c0_83] : memref<1x328x128xf32, #tpu.memory_space<vmem>>, vector<1x248x128xf32>
    %79 = vector.shape_cast %78 : vector<1x248x128xf32> to vector<248x128xf32>
    %c0_84 = arith.constant 0 : index
    %c0_85 = arith.constant 0 : index
    %80 = vector.load %arg9[%c0_84, %c0_85] : memref<248x128xf32, #tpu.memory_space<vmem>>, vector<248x128xf32>
    %c1024 = arith.constant 1024 : index
    %c0_86 = arith.constant 0 : index
    %81 = vector.load %arg3[%c1024, %c0_86] : memref<1920x128xf32, #tpu.memory_space<vmem>>, vector<128x128xf32>
    %cst_87 = arith.constant dense<0.000000e+00> : vector<248x128xf32>
    %82 = tpu.matmul %79, %81, %cst_87 {dimension_numbers = #tpu.dot_dimension_numbers<[1], [0], [0], [1], [0, 0, 1, 1], [], []>} : vector<248x128xf32>, vector<128x128xf32>, vector<248x128xf32> -> vector<248x128xf32>
    %83 = arith.addf %80, %82 : vector<248x128xf32>
    %c0_88 = arith.constant 0 : index
    %c0_89 = arith.constant 0 : index
    %84 = vector.load %arg9[%c0_88, %c0_89] : memref<248x128xf32, #tpu.memory_space<vmem>>, vector<248x128xf32>
    tpu.vector_store %arg9[%c0_88, %c0_89], %83 {strides = array<i32>} : memref<248x128xf32, #tpu.memory_space<vmem>>, vector<248x128xf32>,
    %c0_90 = arith.constant 0 : index
    %c54 = arith.constant 54 : index
    %c0_91 = arith.constant 0 : index
    %85 = vector.load %arg8[%c0_90, %c54, %c0_91] : memref<1x328x128xf32, #tpu.memory_space<vmem>>, vector<1x248x128xf32>
    %86 = vector.shape_cast %85 : vector<1x248x128xf32> to vector<248x128xf32>
    %c0_92 = arith.constant 0 : index
    %c0_93 = arith.constant 0 : index
    %87 = vector.load %arg9[%c0_92, %c0_93] : memref<248x128xf32, #tpu.memory_space<vmem>>, vector<248x128xf32>
    %c1152 = arith.constant 1152 : index
    %c0_94 = arith.constant 0 : index
    %88 = vector.load %arg3[%c1152, %c0_94] : memref<1920x128xf32, #tpu.memory_space<vmem>>, vector<128x128xf32>
    %cst_95 = arith.constant dense<0.000000e+00> : vector<248x128xf32>
    %89 = tpu.matmul %86, %88, %cst_95 {dimension_numbers = #tpu.dot_dimension_numbers<[1], [0], [0], [1], [0, 0, 1, 1], [], []>} : vector<248x128xf32>, vector<128x128xf32>, vector<248x128xf32> -> vector<248x128xf32>
    %90 = arith.addf %87, %89 : vector<248x128xf32>
    %c0_96 = arith.constant 0 : index
    %c0_97 = arith.constant 0 : index
    %91 = vector.load %arg9[%c0_96, %c0_97] : memref<248x128xf32, #tpu.memory_space<vmem>>, vector<248x128xf32>
    tpu.vector_store %arg9[%c0_96, %c0_97], %90 {strides = array<i32>} : memref<248x128xf32, #tpu.memory_space<vmem>>, vector<248x128xf32>,
    %c0_98 = arith.constant 0 : index
    %c56 = arith.constant 56 : index
    %c0_99 = arith.constant 0 : index
    %92 = vector.load %arg8[%c0_98, %c56, %c0_99] : memref<1x328x128xf32, #tpu.memory_space<vmem>>, vector<1x248x128xf32>
    %93 = vector.shape_cast %92 : vector<1x248x128xf32> to vector<248x128xf32>
    %c0_100 = arith.constant 0 : index
    %c0_101 = arith.constant 0 : index
    %94 = vector.load %arg9[%c0_100, %c0_101] : memref<248x128xf32, #tpu.memory_space<vmem>>, vector<248x128xf32>
    %c1280 = arith.constant 1280 : index
    %c0_102 = arith.constant 0 : index
    %95 = vector.load %arg3[%c1280, %c0_102] : memref<1920x128xf32, #tpu.memory_space<vmem>>, vector<128x128xf32>
    %cst_103 = arith.constant dense<0.000000e+00> : vector<248x128xf32>
    %96 = tpu.matmul %93, %95, %cst_103 {dimension_numbers = #tpu.dot_dimension_numbers<[1], [0], [0], [1], [0, 0, 1, 1], [], []>} : vector<248x128xf32>, vector<128x128xf32>, vector<248x128xf32> -> vector<248x128xf32>
    %97 = arith.addf %94, %96 : vector<248x128xf32>
    %c0_104 = arith.constant 0 : index
    %c0_105 = arith.constant 0 : index
    %98 = vector.load %arg9[%c0_104, %c0_105] : memref<248x128xf32, #tpu.memory_space<vmem>>, vector<248x128xf32>
    tpu.vector_store %arg9[%c0_104, %c0_105], %97 {strides = array<i32>} : memref<248x128xf32, #tpu.memory_space<vmem>>, vector<248x128xf32>,
    %c0_106 = arith.constant 0 : index
    %c58 = arith.constant 58 : index
    %c0_107 = arith.constant 0 : index
    %99 = vector.load %arg8[%c0_106, %c58, %c0_107] : memref<1x328x128xf32, #tpu.memory_space<vmem>>, vector<1x248x128xf32>
    %100 = vector.shape_cast %99 : vector<1x248x128xf32> to vector<248x128xf32>
    %c0_108 = arith.constant 0 : index
    %c0_109 = arith.constant 0 : index
    %101 = vector.load %arg9[%c0_108, %c0_109] : memref<248x128xf32, #tpu.memory_space<vmem>>, vector<248x128xf32>
    %c1408 = arith.constant 1408 : index
    %c0_110 = arith.constant 0 : index
    %102 = vector.load %arg3[%c1408, %c0_110] : memref<1920x128xf32, #tpu.memory_space<vmem>>, vector<128x128xf32>
    %cst_111 = arith.constant dense<0.000000e+00> : vector<248x128xf32>
    %103 = tpu.matmul %100, %102, %cst_111 {dimension_numbers = #tpu.dot_dimension_numbers<[1], [0], [0], [1], [0, 0, 1, 1], [], []>} : vector<248x128xf32>, vector<128x128xf32>, vector<248x128xf32> -> vector<248x128xf32>
    %104 = arith.addf %101, %103 : vector<248x128xf32>
    %c0_112 = arith.constant 0 : index
    %c0_113 = arith.constant 0 : index
    %105 = vector.load %arg9[%c0_112, %c0_113] : memref<248x128xf32, #tpu.memory_space<vmem>>, vector<248x128xf32>
    tpu.vector_store %arg9[%c0_112, %c0_113], %104 {strides = array<i32>} : memref<248x128xf32, #tpu.memory_space<vmem>>, vector<248x128xf32>,
    %c0_114 = arith.constant 0 : index
    %c72 = arith.constant 72 : index
    %c0_115 = arith.constant 0 : index
    %106 = vector.load %arg8[%c0_114, %c72, %c0_115] : memref<1x328x128xf32, #tpu.memory_space<vmem>>, vector<1x248x128xf32>
    %107 = vector.shape_cast %106 : vector<1x248x128xf32> to vector<248x128xf32>
    %c0_116 = arith.constant 0 : index
    %c0_117 = arith.constant 0 : index
    %108 = vector.load %arg9[%c0_116, %c0_117] : memref<248x128xf32, #tpu.memory_space<vmem>>, vector<248x128xf32>
    %c1536 = arith.constant 1536 : index
    %c0_118 = arith.constant 0 : index
    %109 = vector.load %arg3[%c1536, %c0_118] : memref<1920x128xf32, #tpu.memory_space<vmem>>, vector<128x128xf32>
    %cst_119 = arith.constant dense<0.000000e+00> : vector<248x128xf32>
    %110 = tpu.matmul %107, %109, %cst_119 {dimension_numbers = #tpu.dot_dimension_numbers<[1], [0], [0], [1], [0, 0, 1, 1], [], []>} : vector<248x128xf32>, vector<128x128xf32>, vector<248x128xf32> -> vector<248x128xf32>
    %111 = arith.addf %108, %110 : vector<248x128xf32>
    %c0_120 = arith.constant 0 : index
    %c0_121 = arith.constant 0 : index
    %112 = vector.load %arg9[%c0_120, %c0_121] : memref<248x128xf32, #tpu.memory_space<vmem>>, vector<248x128xf32>
    tpu.vector_store %arg9[%c0_120, %c0_121], %111 {strides = array<i32>} : memref<248x128xf32, #tpu.memory_space<vmem>>, vector<248x128xf32>,
    %c0_122 = arith.constant 0 : index
    %c74 = arith.constant 74 : index
    %c0_123 = arith.constant 0 : index
    %113 = vector.load %arg8[%c0_122, %c74, %c0_123] : memref<1x328x128xf32, #tpu.memory_space<vmem>>, vector<1x248x128xf32>
    %114 = vector.shape_cast %113 : vector<1x248x128xf32> to vector<248x128xf32>
    %c0_124 = arith.constant 0 : index
    %c0_125 = arith.constant 0 : index
    %115 = vector.load %arg9[%c0_124, %c0_125] : memref<248x128xf32, #tpu.memory_space<vmem>>, vector<248x128xf32>
    %c1664 = arith.constant 1664 : index
    %c0_126 = arith.constant 0 : index
    %116 = vector.load %arg3[%c1664, %c0_126] : memref<1920x128xf32, #tpu.memory_space<vmem>>, vector<128x128xf32>
    %cst_127 = arith.constant dense<0.000000e+00> : vector<248x128xf32>
    %117 = tpu.matmul %114, %116, %cst_127 {dimension_numbers = #tpu.dot_dimension_numbers<[1], [0], [0], [1], [0, 0, 1, 1], [], []>} : vector<248x128xf32>, vector<128x128xf32>, vector<248x128xf32> -> vector<248x128xf32>
    %118 = arith.addf %115, %117 : vector<248x128xf32>
    %c0_128 = arith.constant 0 : index
    %c0_129 = arith.constant 0 : index
    %119 = vector.load %arg9[%c0_128, %c0_129] : memref<248x128xf32, #tpu.memory_space<vmem>>, vector<248x128xf32>
    tpu.vector_store %arg9[%c0_128, %c0_129], %118 {strides = array<i32>} : memref<248x128xf32, #tpu.memory_space<vmem>>, vector<248x128xf32>,
    %c0_130 = arith.constant 0 : index
    %c76 = arith.constant 76 : index
    %c0_131 = arith.constant 0 : index
    %120 = vector.load %arg8[%c0_130, %c76, %c0_131] : memref<1x328x128xf32, #tpu.memory_space<vmem>>, vector<1x248x128xf32>
    %121 = vector.shape_cast %120 : vector<1x248x128xf32> to vector<248x128xf32>
    %c0_132 = arith.constant 0 : index
    %c0_133 = arith.constant 0 : index
    %122 = vector.load %arg9[%c0_132, %c0_133] : memref<248x128xf32, #tpu.memory_space<vmem>>, vector<248x128xf32>
    %c1792 = arith.constant 1792 : index
    %c0_134 = arith.constant 0 : index
    %123 = vector.load %arg3[%c1792, %c0_134] : memref<1920x128xf32, #tpu.memory_space<vmem>>, vector<128x128xf32>
    %cst_135 = arith.constant dense<0.000000e+00> : vector<248x128xf32>
    %124 = tpu.matmul %121, %123, %cst_135 {dimension_numbers = #tpu.dot_dimension_numbers<[1], [0], [0], [1], [0, 0, 1, 1], [], []>} : vector<248x128xf32>, vector<128x128xf32>, vector<248x128xf32> -> vector<248x128xf32>
    %125 = arith.addf %122, %124 : vector<248x128xf32>
    %c0_136 = arith.constant 0 : index
    %c0_137 = arith.constant 0 : index
    %126 = vector.load %arg9[%c0_136, %c0_137] : memref<248x128xf32, #tpu.memory_space<vmem>>, vector<248x128xf32>
    tpu.vector_store %arg9[%c0_136, %c0_137], %125 {strides = array<i32>} : memref<248x128xf32, #tpu.memory_space<vmem>>, vector<248x128xf32>,
    %c0_138 = arith.constant 0 : index
    %c0_139 = arith.constant 0 : index
    %127 = vector.load %arg9[%c0_138, %c0_139] : memref<248x128xf32, #tpu.memory_space<vmem>>, vector<248x128xf32>
    %c0_140 = arith.constant 0 : index
    %c0_141 = arith.constant 0 : index
    %128 = vector.load %arg4[%c0_140, %c0_141] : memref<1x128xf32, #tpu.memory_space<vmem>>, vector<1x128xf32>
    %129 = vector.broadcast %128 : vector<1x128xf32> to vector<248x128xf32>
    %130 = arith.addf %127, %129 : vector<248x128xf32>
    %cst_142 = arith.constant 0.000000e+00 : f32
    %131 = vector.broadcast %cst_142 : f32 to vector<248x128xf32>
    %132 = arith.cmpf oge, %130, %131 : vector<248x128xf32>
    %cst_143 = arith.constant 2.000000e-01 : f32
    %133 = vector.broadcast %cst_143 : f32 to vector<248x128xf32>
    %134 = arith.mulf %133, %130 : vector<248x128xf32>
    %135 = arith.select %132, %130, %134 : vector<248x128xi1>, vector<248x128xf32>
    %136 = vector.shape_cast %135 : vector<248x128xf32> to vector<1x248x128xf32>
    %c0_144 = arith.constant 0 : index
    %c0_145 = arith.constant 0 : index
    %137 = vector.load %arg5[%c0_144, %c0_145] : memref<248x128xf32, #tpu.memory_space<vmem>>, vector<248x128xf32>
    %138 = vector.shape_cast %137 : vector<248x128xf32> to vector<1x248x128xf32>
    %139 = arith.mulf %136, %138 : vector<1x248x128xf32>
    %cst_146 = arith.constant dense<0.000000e+00> : vector<1x248xf32>
    %140 = vector.multi_reduction <add>, %139, %cst_146 [2] : vector<1x248x128xf32> to vector<1x248xf32>
    %141 = vector.shape_cast %140 : vector<1x248xf32> to vector<1x248x1xf32>
    %cst_147 = arith.constant dense<0.000000e+00> : vector<1x1xf32>
    %142 = vector.multi_reduction <add>, %141, %cst_147 [1] : vector<1x248x1xf32> to vector<1x1xf32>
    %143 = vector.shape_cast %142 : vector<1x1xf32> to vector<1x1x1xf32>
    %144 = vector.shape_cast %143 : vector<1x1x1xf32> to vector<1x1xf32>
    %c0_148 = arith.constant 0 : index
    %145 = memref.load %arg6[%c0_148] : memref<1xf32, #tpu.memory_space<smem>>
    %146 = vector.broadcast %145 : f32 to vector<1x1xf32>
    %147 = arith.addf %144, %146 : vector<1x1xf32>
    %c0_149 = arith.constant 0 : index
    %c0_150 = arith.constant 0 : index
    %c0_151 = arith.constant 0 : index
    %148 = vector.load %arg7[%c0_149, %c0_150, %c0_151] : memref<1x1x1xf32, #tpu.memory_space<vmem>>, vector<1x1x1xf32>
    %149 = vector.shape_cast %148 : vector<1x1x1xf32> to vector<1x1xf32>
    %150 = vector.shape_cast %147 : vector<1x1xf32> to vector<1x1x1xf32>
    tpu.vector_store %arg7[%c0_149, %c0_150, %c0_151], %150 {strides = array<i32>} : memref<1x1x1xf32, #tpu.memory_space<vmem>>, vector<1x1x1xf32>,
    return
  }
  func.func @transform_0(%arg0: i32) -> (i32, i32) {
    %c0_i32 = arith.constant 0 : i32
    %c0_i32_0 = arith.constant 0 : i32
    return %arg0, %c0_i32 : i32, i32
  }
  func.func @transform_1(%arg0: i32) -> (i32, i32) {
    %c0_i32 = arith.constant 0 : i32
    %c0_i32_0 = arith.constant 0 : i32
    %c0_i32_1 = arith.constant 0 : i32
    return %c0_i32, %c0_i32_0 : i32, i32
  }
  func.func @transform_2(%arg0: i32) -> (i32, i32) {
    %c0_i32 = arith.constant 0 : i32
    %c0_i32_0 = arith.constant 0 : i32
    %c0_i32_1 = arith.constant 0 : i32
    return %c0_i32, %c0_i32_0 : i32, i32
  }
  func.func @transform_3(%arg0: i32) -> (i32, i32) {
    %c0_i32 = arith.constant 0 : i32
    %c0_i32_0 = arith.constant 0 : i32
    %c0_i32_1 = arith.constant 0 : i32
    return %c0_i32, %c0_i32_0 : i32, i32
  }
  func.func @transform_4(%arg0: i32) -> (i32, i32) {
    %c0_i32 = arith.constant 0 : i32
    %c0_i32_0 = arith.constant 0 : i32
    %c0_i32_1 = arith.constant 0 : i32
    return %c0_i32, %c0_i32_0 : i32, i32
  }
  func.func @transform_5(%arg0: i32) -> i32 {
    %c0_i32 = arith.constant 0 : i32
    %c0_i32_0 = arith.constant 0 : i32
    return %c0_i32 : i32
  }
  func.func @transform_6(%arg0: i32) -> (i32, i32, i32) {
    %c0_i32 = arith.constant 0 : i32
    %c0_i32_0 = arith.constant 0 : i32
    %c0_i32_1 = arith.constant 0 : i32
    return %arg0, %c0_i32, %c0_i32_0 : i32, i32, i32
  }
}

</mosaic_0001>

<bundles_post_ra>
// kernel: discriminator_forward.1
= control target key start
LH: loop header
LB: loop body
LE: loop exit
PB: predicated region body
PF: predicated region fallthrough
CT: control target
= control target key end

     0   :  { %s9757_s23 = smov 0   ;;  %s14359_s0 = inlined_call_operand.vmem [shape: f32[656,128], index: 0, kind: input, shape index: {}]   ;;  %s14360_s1 = inlined_call_operand.vmem [shape: f32[128,256], index: 1, kind: input, shape index: {}]   ;;  %s14361_s2 = inlined_call_operand.vmem [shape: f32[1920,128], index: 2, kind: input, shape index: {}]   ;;  %s14362_s3 = inlined_call_operand.vmem [shape: f32[1,128], index: 3, kind: input, shape index: {}]   ;;  %s14363_s4 = inlined_call_operand.vmem [shape: f32[248,128], index: 4, kind: input, shape index: {}]   ;;  %s14364_s5 = inlined_call_operand.<no memory space> [shape: f32[1], index: 5, kind: input, shape index: {}]   ;;  %s14365_s6 = inlined_call_operand.vmem [shape: f32[2,1,1], index: 6, kind: output, shape index: {}]  }
   0x1   :  { %11 = sst [smem:[#allocation4]] %s14364_s5 }
   0x2 LB: > { %s9763_s24 = sadd.s32 4294967295, %s9714_s23   ;;  %p7064_p0 = scmp.ge.s32.totalorder %s9714_s23, 1  ;;  %s9714_s23 = sphi %s9757_s23, %s17_s23  }
   0x3   : > { %p214_p1 = scmp.lt.s32.totalorder %s9714_s23, 3 }
   0x5   : > { %p215_p2 = pnand %p7064_p0, %p214_p1 }
   0x7   : > { %218 = sbr.rel (%p215_p2) target bundleno = 1911 (0x777), region = 44 }
   0xc   : > { %v323_v0 = vld [vmem:[%s14360_s1 + $0xf8] sm:$0xff]  ;;  %v322_v1 = vld [vmem:[%s14360_s1 + $0xf0] sm:$0xff]  ;;  %v321_v2 = vld [vmem:[%s14360_s1 + $0xe8] sm:$0xff]  ;;  %v14391_v4 = vmov 0.0   ;;  %s242_s7 = smul.u32 41, %s9763_s24  ;;  %s9717_s25 = smov 64  }
   0xd   : > { %324 = vmatprep.subr.mxu0 %v323_v0  ;;  %v320_v3 = vld [vmem:[%s14360_s1 + $0xe0] sm:$0xff]  ;;  %388 = vmatprep.mubr.f32.mxu0 %v14391_v4  ;;  %v319_v5 = vld [vmem:[%s14360_s1 + $0xd8] sm:$0xff]  ;;  %v318_v6 = vld [vmem:[%s14360_s1 + $0xd0] sm:$0xff]  ;;  %vm1004_vm1 = vcmask 523264   ;;  %vm9718_vm3 = vmmov 0   ;;  %s7008_s20 = sld [smem:[#allocation4]] }
   0xe   : > { %325 = vmatpush1.msra.mxu0 %v322_v1  ;;  %7774 = vmatprep.subr.mxu1 %v14391_v4  ;;  %v317_v7 = vld [vmem:[%s14360_s1 + $0xc8] sm:$0xff]  ;;  %v316_v8 = vld [vmem:[%s14360_s1 + $0xc0] sm:$0xff]  ;;  %v315_v9 = vld [vmem:[%s14360_s1 + $0xb8] sm:$0xff]  ;;  %p243_p3 = scmp.lt.s32.totalorder %s242_s7, 81  ;;  %p248_p4 = scmp.lt.s32.totalorder %s9763_s24, 1 }
   0xf   : > { %326 = vmatprep.subr.mxu0 %v321_v2  ;;  %v314_v10 = vld [vmem:[%s14360_s1 + $0xb0] sm:$0xff]  ;;  %v313_v11 = vld [vmem:[%s14360_s1 + $0xa8] sm:$0xff]  ;;  %v312_v12 = vld [vmem:[%s14360_s1 + $0xa0] sm:$0xff]  ;;  %7806 = vmatprep.mubr.msk.f32.mxu1 %vm9718_vm3, %v14391_v4 }
  0x10   : > { %327 = vmatpush1.msra.mxu0 %v320_v3  ;;  %v311_v13 = vld [vmem:[%s14360_s1 + $0x98] sm:$0xff]  ;;  %v310_v14 = vld [vmem:[%s14360_s1 + $0x90] sm:$0xff]  ;;  %v309_v15 = vld [vmem:[%s14360_s1 + $0x88] sm:$0xff]  ;;  %s14878_s7 = smov (!%p243_p3, %s242_s7), 81  ;;  %s14880_s24 = smov (!%p248_p4, %s9763_s24), 1 }
  0x11   : > { %328 = vmatprep.subr.mxu0 %v319_v5  ;;  %v308_v16 = vld [vmem:[%s14360_s1 + $0x80] sm:$0xff]  ;;  %v307_v17 = vld [vmem:[%s14360_s1 + $0x78] sm:$0xff]  ;;  %v306_v18 = vld [vmem:[%s14360_s1 + $0x70] sm:$0xff]  ;;  %s7065_s10 = sshll.u32 %s14878_s7, 3  ;;  %s250_s26 = scalar_lea.vmem %s14365_s6, %s14880_s24 }
  0x12   : > { %329 = vmatpush1.msra.mxu0 %v318_v6  ;;  %v305_v19 = vld [vmem:[%s14360_s1 + $0x68] sm:$0xff]  ;;  %v304_v20 = vld [vmem:[%s14360_s1 + $0x60] sm:$0xff]  ;;  %v303_v21 = vld [vmem:[%s14360_s1 + $0x58] sm:$0xff]  ;;  %s9863_s19 = scalar_lea.vmem %s14359_s0, %s7065_s10 }
  0x13   : > { %330 = vmatprep.subr.mxu0 %v317_v7  ;;  %v302_v22 = vld [vmem:[%s14360_s1 + $0x50] sm:$0xff]  ;;  %v301_v23 = vld [vmem:[%s14360_s1 + $0x48] sm:$0xff]  ;;  %v300_v24 = vld [vmem:[%s14360_s1 + $0x40] sm:$0xff] }
  0x14   : > { %331 = vmatpush1.msra.mxu0 %v316_v8  ;;  %v299_v25 = vld [vmem:[%s14360_s1 + $0x38] sm:$0xff]  ;;  %v298_v26 = vld [vmem:[%s14360_s1 + $0x30] sm:$0xff]  ;;  %v297_v27 = vld [vmem:[%s14360_s1 + $0x28] sm:$0xff] }
  0x15   : > { %332 = vmatprep.subr.mxu0 %v315_v9  ;;  %v296_v28 = vld [vmem:[%s14360_s1 + $0x20] sm:$0xff]  ;;  %v295_v29 = vld [vmem:[%s14360_s1 + $0x18] sm:$0xff]  ;;  %v294_v30 = vld [vmem:[%s14360_s1 + $0x10] sm:$0xff] }
  0x16   : > { %333 = vmatpush1.msra.mxu0 %v314_v10  ;;  %v293_v31 = vld [vmem:[%s14360_s1 + $0x8] sm:$0xff]  ;;  %v292_v32 = vld [vmem:[%s14360_s1] sm:$0xff]  ;;  %v253_v35 = vld [vmem:[%s9863_s19 + $0x10] sm:$0xff] }
  0x17   : > { %334 = vmatprep.subr.mxu0 %v313_v11  ;;  %v251_v33 = vld [vmem:[%s9863_s19] sm:$0xff]  ;;  %v252_v34 = vld [vmem:[%s9863_s19 + $0x8] sm:$0xff]  ;;  %v254_v36 = vld [vmem:[%s9863_s19 + $0x18] sm:$0xff] }
  0x18   : > { %335 = vmatpush1.msra.mxu0 %v312_v12  ;;  %v255_v37 = vld [vmem:[%s9863_s19 + $0x20] sm:$0xff]  ;;  %v256_v38 = vld [vmem:[%s9863_s19 + $0x28] sm:$0xff]  ;;  %v257_v39 = vld [vmem:[%s9863_s19 + $0x30] sm:$0xff] }
  0x19   : > { %336 = vmatprep.subr.mxu0 %v311_v13  ;;  %v258_v40 = vld [vmem:[%s9863_s19 + $0x38] sm:$0xff]  ;;  %v259_v41 = vld [vmem:[%s9863_s19 + $0x40] sm:$0xff]  ;;  %v260_v42 = vld [vmem:[%s9863_s19 + $0x48] sm:$0xff] }
  0x1a   : > { %337 = vmatpush1.msra.mxu0 %v310_v14  ;;  %v261_v43 = vld [vmem:[%s9863_s19 + $0x50] sm:$0xff]  ;;  %v262_v44 = vld [vmem:[%s9863_s19 + $0x58] sm:$0xff]  ;;  %v263_v45 = vld [vmem:[%s9863_s19 + $0x60] sm:$0xff] }
  0x1b   : > { %338 = vmatprep.subr.mxu0 %v309_v15  ;;  %v264_v46 = vld [vmem:[%s9863_s19 + $0x68] sm:$0xff]  ;;  %v265_v47 = vld [vmem:[%s9863_s19 + $0x70] sm:$0xff]  ;;  %v266_v48 = vld [vmem:[%s9863_s19 + $0x78] sm:$0xff] }
  0x1c   : > { %339 = vmatpush1.msra.mxu0 %v308_v16  ;;  %v267_v49 = vld [vmem:[%s9863_s19 + $0x80] sm:$0xff]  ;;  %v268_v50 = vld [vmem:[%s9863_s19 + $0x88] sm:$0xff]  ;;  %v269_v51 = vld [vmem:[%s9863_s19 + $0x90] sm:$0xff] }
  0x1d   : > { %340 = vmatprep.subr.mxu0 %v307_v17  ;;  %v270_v52 = vld [vmem:[%s9863_s19 + $0x98] sm:$0xff]  ;;  %v271_v53 = vld [vmem:[%s9863_s19 + $0xa0] sm:$0xff]  ;;  %v272_v54 = vld [vmem:[%s9863_s19 + $0xa8] sm:$0xff] }
  0x1e   : > { %341 = vmatpush1.msra.mxu0 %v306_v18  ;;  %v273_v55 = vld [vmem:[%s9863_s19 + $0xb0] sm:$0xff]  ;;  %v274_v56 = vld [vmem:[%s9863_s19 + $0xb8] sm:$0xff]  ;;  %v275_v57 = vld [vmem:[%s9863_s19 + $0xc0] sm:$0xff] }
  0x1f   : > { %342 = vmatprep.subr.mxu0 %v305_v19  ;;  %v276_v58 = vld [vmem:[%s9863_s19 + $0xc8] sm:$0xff]  ;;  %v277_v59 = vld [vmem:[%s9863_s19 + $0xd0] sm:$0xff]  ;;  %v278_v60 = vld [vmem:[%s9863_s19 + $0xd8] sm:$0xff] }
  0x20   : > { %343 = vmatpush1.msra.mxu0 %v304_v20  ;;  %v279_v61 = vld [vmem:[%s9863_s19 + $0xe0] sm:$0xff]  ;;  %v280_v62 = vld [vmem:[%s9863_s19 + $0xe8] sm:$0xff]  ;;  %v281_v63 = vld [vmem:[%s9863_s19 + $0xf0] sm:$0xff] }
  0x21   : > { %344 = vmatprep.subr.mxu0 %v303_v21  ;;  %v282_v0 = vld [vmem:[%s9863_s19 + $0xf8] sm:$0xff]  ;;  %v283_v1 = vld [vmem:[%s9863_s19 + $0x100] sm:$0xff]  ;;  %v284_v2 = vld [vmem:[%s9863_s19 + $0x108] sm:$0xff] }
  0x22   : > { %345 = vmatpush1.msra.mxu0 %v302_v22 }
  0x23   : > { %346 = vmatprep.subr.mxu0 %v301_v23 }
  0x24   : > { %347 = vmatpush1.msra.mxu0 %v300_v24 }
  0x25   : > { %348 = vmatprep.subr.mxu0 %v299_v25 }
  0x26   : > { %349 = vmatpush1.msra.mxu0 %v298_v26 }
  0x27   : > { %350 = vmatprep.subr.mxu0 %v297_v27 }
  0x28   : > { %351 = vmatpush1.msra.mxu0 %v296_v28 }
  0x29   : > { %352 = vmatprep.subr.mxu0 %v295_v29 }
  0x2a   : > { %353 = vmatpush1.msra.mxu0 %v294_v30 }
  0x2b   : > { %354 = vmatprep.subr.mxu0 %v293_v31 }
  0x2c   : > { %355 = vmatpush1.msra.mxu0 %v292_v32 }
  0x2d   : > { %389 = vmatmul.mubr.f32.vlgmr.msra.gmra.mxu0 %v251_v33  ;;  %8024 = vmatprep.subr.mxu0 %v14391_v4 }
  0x2e   : > { %394 = vmatprep.mubr.f32.mxu0 %v14391_v4 }
  0x31   : > { %395 = vmatmul.mubr.f32.gmra.mxu0 %v252_v34 }
  0x32   : > { %400 = vmatprep.mubr.f32.mxu0 %v14391_v4 }
  0x35   : > { %401 = vmatmul.mubr.f32.gmra.mxu0 %v253_v35 }
  0x36   : > { %406 = vmatprep.mubr.f32.mxu0 %v14391_v4 }
  0x39   : > { %407 = vmatmul.mubr.f32.gmra.mxu0 %v254_v36 }
  0x3a   : > { %412 = vmatprep.mubr.f32.mxu0 %v14391_v4 }
  0x3d   : > { %413 = vmatmul.mubr.f32.gmra.mxu0 %v255_v37 }
  0x3e   : > { %418 = vmatprep.mubr.f32.mxu0 %v14391_v4 }
  0x41   : > { %419 = vmatmul.mubr.f32.gmra.mxu0 %v256_v38 }
  0x42   : > { %424 = vmatprep.mubr.f32.mxu0 %v14391_v4 }
  0x45   : > { %425 = vmatmul.mubr.f32.gmra.mxu0 %v257_v39 }
  0x46   : > { %430 = vmatprep.mubr.f32.mxu0 %v14391_v4 }
  0x49   : > { %431 = vmatmul.mubr.f32.gmra.mxu0 %v258_v40 }
  0x4a   : > { %436 = vmatprep.mubr.f32.mxu0 %v14391_v4 }
  0x4d   : > { %437 = vmatmul.mubr.f32.gmra.mxu0 %v259_v41 }
  0x4e   : > { %442 = vmatprep.mubr.f32.mxu0 %v14391_v4 }
  0x51   : > { %443 = vmatmul.mubr.f32.gmra.mxu0 %v260_v42 }
  0x52   : > { %448 = vmatprep.mubr.f32.mxu0 %v14391_v4 }
  0x55   : > { %449 = vmatmul.mubr.f32.gmra.mxu0 %v261_v43 }
  0x56   : > { %454 = vmatprep.mubr.f32.mxu0 %v14391_v4 }
  0x59   : > { %455 = vmatmul.mubr.f32.gmra.mxu0 %v262_v44 }
  0x5a   : > { %460 = vmatprep.mubr.f32.mxu0 %v14391_v4 }
  0x5d   : > { %461 = vmatmul.mubr.f32.gmra.mxu0 %v263_v45 }
  0x5e   : > { %466 = vmatprep.mubr.f32.mxu0 %v14391_v4 }
  0x61   : > { %467 = vmatmul.mubr.f32.gmra.mxu0 %v264_v46 }
  0x62   : > { %472 = vmatprep.mubr.f32.mxu0 %v14391_v4 }
  0x65   : > { %473 = vmatmul.mubr.f32.gmra.mxu0 %v265_v47 }
  0x66   : > { %478 = vmatprep.mubr.f32.mxu0 %v14391_v4 }
  0x69   : > { %479 = vmatmul.mubr.f32.gmra.mxu0 %v266_v48 }
  0x6a   : > { %484 = vmatprep.mubr.f32.mxu0 %v14391_v4 }
  0x6d   : > { %485 = vmatmul.mubr.f32.gmra.mxu0 %v267_v49 }
  0x6e   : > { %490 = vmatprep.mubr.f32.mxu0 %v14391_v4 }
  0x71   : > { %491 = vmatmul.mubr.f32.gmra.mxu0 %v268_v50  ;;  %v1363_v50 = vld [vmem:[%s14361_s2 + $0x78] sm:$0xff] }
  0x72   : > { %496 = vmatprep.mubr.f32.mxu0 %v14391_v4  ;;  %7775 = vmatpush3.msra.mxu1 %v1363_v50 }
  0x73   : > { %7776 = vmatprep.subr.mxu1 %v14391_v4 }
  0x75   : > { %497 = vmatmul.mubr.f32.gmra.mxu0 %v269_v51  ;;  %v2083_v51 = vld [vmem:[%s14361_s2 + $0x178] sm:$0xff] }
  0x76   : > { %502 = vmatprep.mubr.f32.mxu0 %v14391_v4  ;;  %8025 = vmatpush3.msra.mxu0 %v2083_v51  ;;  %v1351_v51 = vld [vmem:[%s14361_s2 + $0x18] sm:$0xff] }
  0x77   : > { %8026 = vmatprep.subr.mxu0 %v14391_v4 }
  0x79   : > { %503 = vmatmul.mubr.f32.gmra.mxu0 %v270_v52  ;;  %v1362_v52 = vld [vmem:[%s14361_s2 + $0x70] sm:$0xff] }
  0x7a   : > { %508 = vmatprep.mubr.f32.mxu0 %v14391_v4  ;;  %7777 = vmatpush3.msra.mxu1 %v1362_v52  ;;  %v2071_v52 = vld [vmem:[%s14361_s2 + $0x118] sm:$0xff] }
  0x7b   : > { %7778 = vmatprep.subr.mxu1 %v14391_v4 }
  0x7d   : > { %509 = vmatmul.mubr.f32.gmra.mxu0 %v271_v53 }
  0x7e   : > { %514 = vmatprep.mubr.f32.mxu0 %v14391_v4 }
  0x81   : > { %515 = vmatmul.mubr.f32.gmra.mxu0 %v272_v54  ;;  %v2082_v54 = vld [vmem:[%s14361_s2 + $0x170] sm:$0xff] }
  0x82   : > { %520 = vmatprep.mubr.f32.mxu0 %v14391_v4  ;;  %8027 = vmatpush3.msra.mxu0 %v2082_v54  ;;  %v2070_v54 = vld [vmem:[%s14361_s2 + $0x110] sm:$0xff] }
  0x83   : > { %8028 = vmatprep.subr.mxu0 %v14391_v4 }
  0x85   : > { %521 = vmatmul.mubr.f32.gmra.mxu0 %v273_v55  ;;  %v285_v55 = vld [vmem:[%s9863_s19 + $0x110] sm:$0xff] }
  0x86   : > { %526 = vmatprep.mubr.f32.mxu0 %v14391_v4 }
  0x89   : > { %527 = vmatmul.mubr.f32.gmra.mxu0 %v274_v56 }
  0x8a   : > { %532 = vmatprep.mubr.f32.mxu0 %v14391_v4 }
  0x8d   : > { %533 = vmatmul.mubr.f32.gmra.mxu0 %v275_v57 }
  0x8e   : > { %538 = vmatprep.mubr.f32.mxu0 %v14391_v4 }
  0x91   : > { %539 = vmatmul.mubr.f32.gmra.mxu0 %v276_v58  ;;  %v1361_v58 = vld [vmem:[%s14361_s2 + $0x68] sm:$0xff] }
  0x92   : > { %544 = vmatprep.mubr.f32.mxu0 %v14391_v4  ;;  %7779 = vmatpush3.msra.mxu1 %v1361_v58 }
  0x93   : > { %7780 = vmatprep.subr.mxu1 %v14391_v4 }
  0x95   : > { %545 = vmatmul.mubr.f32.gmra.mxu0 %v277_v59  ;;  %v2081_v59 = vld [vmem:[%s14361_s2 + $0x168] sm:$0xff] }
  0x96   : > { %550 = vmatprep.mubr.f32.mxu0 %v14391_v4  ;;  %8029 = vmatpush3.msra.mxu0 %v2081_v59 }
  0x97   : > { %8030 = vmatprep.subr.mxu0 %v14391_v4 }
  0x99   : > { %551 = vmatmul.mubr.f32.gmra.mxu0 %v278_v60 }
  0x9a   : > { %556 = vmatprep.mubr.f32.mxu0 %v14391_v4 }
  0x9d   : > { %557 = vmatmul.mubr.f32.gmra.mxu0 %v279_v61 }
  0x9e   : > { %562 = vmatprep.mubr.f32.mxu0 %v14391_v4 }
  0xa1   : > { %563 = vmatmul.mubr.f32.gmra.mxu0 %v280_v62  ;;  %v1360_v62 = vld [vmem:[%s14361_s2 + $0x60] sm:$0xff] }
  0xa2   : > { %568 = vmatprep.mubr.f32.mxu0 %v14391_v4  ;;  %7781 = vmatpush3.msra.mxu1 %v1360_v62  ;;  %v2069_v62 = vld [vmem:[%s14361_s2 + $0x108] sm:$0xff] }
  0xa3   : > { %7782 = vmatprep.subr.mxu1 %v14391_v4 }
  0xa5   : > { %569 = vmatmul.mubr.f32.gmra.mxu0 %v281_v63  ;;  %v2080_v63 = vld [vmem:[%s14361_s2 + $0x160] sm:$0xff] }
  0xa6   : > { %574 = vmatprep.mubr.f32.mxu0 %v14391_v4  ;;  %8031 = vmatpush3.msra.mxu0 %v2080_v63 }
  0xa7   : > { %8032 = vmatprep.subr.mxu0 %v14391_v4 }
  0xa9   : > { %575 = vmatmul.mubr.f32.gmra.mxu0 %v282_v0 }
  0xaa   : > { %580 = vmatprep.mubr.f32.mxu0 %v14391_v4 }
  0xad   : > { %581 = vmatmul.mubr.f32.gmra.mxu0 %v283_v1  ;;  %v286_v1 = vld [vmem:[%s9863_s19 + $0x118] sm:$0xff] }
  0xae   : > { %586 = vmatprep.mubr.f32.mxu0 %v14391_v4 }
  0xb1   : > { %587 = vmatmul.mubr.f32.gmra.mxu0 %v284_v2  ;;  %v1359_v2 = vld [vmem:[%s14361_s2 + $0x58] sm:$0xff] }
  0xb2   : > { %592 = vmatprep.mubr.f32.mxu0 %v14391_v4  ;;  %7783 = vmatpush3.msra.mxu1 %v1359_v2  ;;  %v2068_v2 = vld [vmem:[%s14361_s2 + $0x100] sm:$0xff] }
  0xb3   : > { %7784 = vmatprep.subr.mxu1 %v14391_v4 }
  0xb5   : > { %593 = vmatmul.mubr.f32.gmra.mxu0 %v285_v55 }
  0xb6   : > { %598 = vmatprep.mubr.f32.mxu0 %v14391_v4 }
  0xb9   : > { %599 = vmatmul.mubr.f32.gmra.mxu0 %v286_v1 }
  0xba   : > { %604 = vmatprep.mubr.f32.mxu0 %v14391_v4 }
  0xed   : > { %v390_v3 = vpop.f32.mrf.mxu0 }
  0xef   : > { %v392_v5 = vpop.f32.mrf.mxu0 }
  0xf0   : > { %v9940_v6 = vmax.f32 %v390_v3, %v392_v5  ;;  %v2079_v5 = vld [vmem:[%s14361_s2 + $0x158] sm:$0xff] }
  0xf1   : > { %v396_v7 = vpop.f32.mrf.mxu0  ;;  %8033 = vmatpush3.msra.mxu0 %v2079_v5 }
  0xf2   : > { %717 = vrot.lane.b32.xlu0 %v9940_v6, %s9717_s25  ;;  %8034 = vmatprep.subr.mxu0 %v14391_v4 }
  0xf3   : > { %v398_v8 = vpop.f32.mrf.mxu0 }
  0xf4   : > { %v9944_v9 = vmax.f32 %v396_v7, %v398_v8  ;;  %v1358_v8 = vld [vmem:[%s14361_s2 + $0x50] sm:$0xff] }
  0xf5   : > { %v402_v10 = vpop.f32.mrf.mxu0  ;;  %7785 = vmatpush3.msra.mxu1 %v1358_v8 }
  0xf6   : > { %719 = vrot.lane.b32.xlu0 %v9944_v9, %s9717_s25  ;;  %7786 = vmatprep.subr.mxu1 %v14391_v4 }
  0xf7   : > { %v404_v11 = vpop.f32.mrf.mxu0 }
  0xf8   : > { %v9948_v12 = vmax.f32 %v402_v10, %v404_v11  ;;  %v2078_v10 = vld [vmem:[%s14361_s2 + $0x150] sm:$0xff]  ;;  %v287_v11 = vld [vmem:[%s9863_s19 + $0x120] sm:$0xff] }
  0xf9   : > { %v408_v13 = vpop.f32.mrf.mxu0  ;;  %8035 = vmatpush3.msra.mxu0 %v2078_v10 }
  0xfa   : > { %721 = vrot.lane.b32.xlu1 %v9948_v12, %s9717_s25  ;;  %605 = vmatmul.mubr.f32.gmra.mxu0 %v287_v11 }
  0xfb   : > { %v410_v14 = vpop.f32.mrf.mxu0  ;;  %8036 = vmatprep.subr.mxu0 %v14391_v4  ;;  %610 = vmatprep.mubr.f32.mxu0 %v14391_v4 }
  0xfc   : > { %v9952_v15 = vmax.f32 %v408_v13, %v410_v14  ;;  %v1357_v13 = vld [vmem:[%s14361_s2 + $0x48] sm:$0xff] }
  0xfd   : > { %v414_v16 = vpop.f32.mrf.mxu0  ;;  %v2077_v14 = vld [vmem:[%s14361_s2 + $0x148] sm:$0xff]  ;;  %7787 = vmatpush3.msra.mxu1 %v1357_v13 }
  0xfe   : > { %723 = vrot.lane.b32.xlu1 %v9952_v15, %s9717_s25  ;;  %8037 = vmatpush3.msra.mxu0 %v2077_v14 }
  0xff   : > { %v416_v17 = vpop.f32.mrf.mxu0  ;;  %7788 = vmatprep.subr.mxu1 %v14391_v4  ;;  %8038 = vmatprep.subr.mxu0 %v14391_v4 }
 0x100   : > { %v9956_v18 = vmax.f32 %v414_v16, %v416_v17  ;;  %v1356_v17 = vld [vmem:[%s14361_s2 + $0x40] sm:$0xff] }
 0x101   : > { %v420_v19 = vpop.f32.mrf.mxu0  ;;  %7789 = vmatpush3.msra.mxu1 %v1356_v17 }
 0x102   : > { %725 = vrot.lane.b32.xlu0 %v9956_v18, %s9717_s25  ;;  %7790 = vmatprep.subr.mxu1 %v14391_v4 }
 0x103   : > { %v422_v20 = vpop.f32.mrf.mxu0 }
 0x104   : > { %v9960_v21 = vmax.f32 %v420_v19, %v422_v20  ;;  %v2076_v19 = vld [vmem:[%s14361_s2 + $0x140] sm:$0xff]  ;;  %v288_v20 = vld [vmem:[%s9863_s19 + $0x128] sm:$0xff] }
 0x105   : > { %v426_v22 = vpop.f32.mrf.mxu0  ;;  %8039 = vmatpush3.msra.mxu0 %v2076_v19 }
 0x106   : > { %727 = vrot.lane.b32.xlu1 %v9960_v21, %s9717_s25  ;;  %611 = vmatmul.mubr.f32.gmra.mxu0 %v288_v20 }
 0x107   : > { %v428_v23 = vpop.f32.mrf.mxu0  ;;  %8040 = vmatprep.subr.mxu0 %v14391_v4  ;;  %616 = vmatprep.mubr.f32.mxu0 %v14391_v4 }
 0x108   : > { %v9964_v24 = vmax.f32 %v426_v22, %v428_v23  ;;  %v1355_v22 = vld [vmem:[%s14361_s2 + $0x38] sm:$0xff] }
 0x109   : > { %v432_v25 = vpop.f32.mrf.mxu0  ;;  %7791 = vmatpush3.msra.mxu1 %v1355_v22 }
 0x10a   : > { %729 = vrot.lane.b32.xlu0 %v9964_v24, %s9717_s25  ;;  %7792 = vmatprep.subr.mxu1 %v14391_v4 }
 0x10b   : > { %v434_v26 = vpop.f32.mrf.mxu0 }
 0x10c   : > { %v9968_v27 = vmax.f32 %v432_v25, %v434_v26  ;;  %v2075_v25 = vld [vmem:[%s14361_s2 + $0x138] sm:$0xff]  ;;  %v1354_v26 = vld [vmem:[%s14361_s2 + $0x30] sm:$0xff] }
 0x10d   : > { %v438_v28 = vpop.f32.mrf.mxu0  ;;  %8041 = vmatpush3.msra.mxu0 %v2075_v25  ;;  %7793 = vmatpush3.msra.mxu1 %v1354_v26 }
 0x10e   : > { %731 = vrot.lane.b32.xlu1 %v9968_v27, %s9717_s25  ;;  %8042 = vmatprep.subr.mxu0 %v14391_v4 }
 0x10f   : > { %v440_v29 = vpop.f32.mrf.mxu0  ;;  %7794 = vmatprep.subr.mxu1 %v14391_v4 }
 0x110   : > { %v9972_v30 = vmax.f32 %v438_v28, %v440_v29  ;;  %v2074_v28 = vld [vmem:[%s14361_s2 + $0x130] sm:$0xff] }
 0x111   : > { %v444_v31 = vpop.f32.mrf.mxu0  ;;  %8043 = vmatpush3.msra.mxu0 %v2074_v28 }
 0x112   : > { %733 = vrot.lane.b32.xlu0 %v9972_v30, %s9717_s25  ;;  %8044 = vmatprep.subr.mxu0 %v14391_v4 }
 0x113   : > { %v446_v32 = vpop.f32.mrf.mxu0 }
 0x114   : > { %v9976_v33 = vmax.f32 %v444_v31, %v446_v32 }
 0x115   : > { %v450_v34 = vpop.f32.mrf.mxu0 }
 0x116   : > { %735 = vrot.lane.b32.xlu1 %v9976_v33, %s9717_s25 }
 0x117   : > { %v452_v35 = vpop.f32.mrf.mxu0 }
 0x118   : > { %v9980_v36 = vmax.f32 %v450_v34, %v452_v35 }
 0x119   : > { %v456_v37 = vpop.f32.mrf.mxu0 }
 0x11a   : > { %737 = vrot.lane.b32.xlu0 %v9980_v36, %s9717_s25 }
 0x11b   : > { %v458_v38 = vpop.f32.mrf.mxu0 }
 0x11c   : > { %v9984_v39 = vmax.f32 %v456_v37, %v458_v38 }
 0x11d   : > { %v462_v40 = vpop.f32.mrf.mxu0 }
 0x11e   : > { %739 = vrot.lane.b32.xlu1 %v9984_v39, %s9717_s25 }
 0x11f   : > { %v464_v41 = vpop.f32.mrf.mxu0 }
 0x120   : > { %v9988_v42 = vmax.f32 %v462_v40, %v464_v41  ;;  %v289_v40 = vld [vmem:[%s9863_s19 + $0x130] sm:$0xff] }
 0x121   : > { %v468_v43 = vpop.f32.mrf.mxu0  ;;  %617 = vmatmul.mubr.f32.gmra.mxu0 %v289_v40 }
 0x122   : > { %741 = vrot.lane.b32.xlu0 %v9988_v42, %s9717_s25  ;;  %622 = vmatprep.mubr.f32.mxu0 %v14391_v4 }
 0x123   : > { %v470_v44 = vpop.f32.mrf.mxu0 }
 0x124   : > { %v9992_v45 = vmax.f32 %v468_v43, %v470_v44  ;;  %v1353_v43 = vld [vmem:[%s14361_s2 + $0x28] sm:$0xff] }
 0x125   : > { %v474_v46 = vpop.f32.mrf.mxu0  ;;  %v2073_v44 = vld [vmem:[%s14361_s2 + $0x128] sm:$0xff]  ;;  %7795 = vmatpush3.msra.mxu1 %v1353_v43 }
 0x126   : > { %743 = vrot.lane.b32.xlu1 %v9992_v45, %s9717_s25  ;;  %8045 = vmatpush3.msra.mxu0 %v2073_v44 }
 0x127   : > { %v476_v47 = vpop.f32.mrf.mxu0  ;;  %7796 = vmatprep.subr.mxu1 %v14391_v4  ;;  %8046 = vmatprep.subr.mxu0 %v14391_v4 }
 0x128   : > { %v9996_v48 = vmax.f32 %v474_v46, %v476_v47  ;;  %v1352_v46 = vld [vmem:[%s14361_s2 + $0x20] sm:$0xff] }
 0x129   : > { %v480_v49 = vpop.f32.mrf.mxu0  ;;  %v2072_v47 = vld [vmem:[%s14361_s2 + $0x120] sm:$0xff]  ;;  %7797 = vmatpush3.msra.mxu1 %v1352_v46 }
 0x12a   : > { %745 = vrot.lane.b32.xlu0 %v9996_v48, %s9717_s25  ;;  %8047 = vmatpush3.msra.mxu0 %v2072_v47 }
 0x12b   : > { %v482_v53 = vpop.f32.mrf.mxu0  ;;  %7798 = vmatprep.subr.mxu1 %v14391_v4  ;;  %8048 = vmatprep.subr.mxu0 %v14391_v4 }
 0x12c   : > { %v10013_v56 = vmax.f32 %v480_v49, %v482_v53  ;;  %v290_v49 = vld [vmem:[%s9863_s19 + $0x138] sm:$0xff]  ;;  %7799 = vmatpush3.msra.mxu1 %v1351_v51  ;;  %8049 = vmatpush3.msra.mxu0 %v2071_v52  ;;  %v1350_v53 = vld [vmem:[%s14361_s2 + $0x10] sm:$0xff] }
 0x12d   : > { %v486_v57 = vpop.f32.mrf.mxu0  ;;  %623 = vmatmul.mubr.f32.gmra.mxu0 %v290_v49  ;;  %7800 = vmatprep.subr.mxu1 %v14391_v4 }
 0x12e   : > { %747 = vrot.lane.b32.xlu1 %v10013_v56, %s9717_s25  ;;  %8050 = vmatprep.subr.mxu0 %v14391_v4 }
 0x12f   : > { %v488_v60 = vpop.f32.mrf.mxu0  ;;  %628 = vmatprep.mubr.f32.mxu0 %v14391_v4  ;;  %7801 = vmatpush3.msra.mxu1 %v1350_v53 }
 0x130   : > { %v10027_v61 = vmax.f32 %v486_v57, %v488_v60  ;;  %v291_v57 = vld [vmem:[%s9863_s19 + $0x140] sm:$0xff]  ;;  %v1349_v60 = vld [vmem:[%s14361_s2 + $0x8] sm:$0xff]  ;;  %8051 = vmatpush3.msra.mxu0 %v2070_v54  ;;  %7802 = vmatprep.subr.mxu1 %v14391_v4 }
 0x131   : > { %v10035_v0 = vpop.f32.mrf.mxu0  ;;  %629 = vmatmul.mubr.f32.gmra.mxu0 %v291_v57  ;;  %8052 = vmatprep.subr.mxu0 %v14391_v4 }
 0x132   : > { %749 = vrot.lane.b32.xlu0 %v10027_v61, %s9717_s25  ;;  %7803 = vmatpush3.msra.mxu1 %v1349_v60 }
 0x133   : > { %v10046_v3 = vpop.f32.mrf.mxu0  ;;  %8053 = vmatpush3.msra.mxu0 %v2069_v62  ;;  %7804 = vmatprep.subr.mxu1 %v14391_v4 }
 0x134   : > { %8054 = vmatprep.subr.mxu0 %v14391_v4  ;;  %8056 = vmatprep.mubr.msk.f32.mxu0 %vm9718_vm3, %v14391_v4 }
 0x135   : > { %v10052_v7 = vpop.f32.mrf.mxu0  ;;  %8055 = vmatpush3.msra.mxu0 %v2068_v2 }
 0x136   : > { %8274 = vmatprep.subr.mxu0 %v14391_v4 }
 0x137   : > { %v10071_v16 = vpop.f32.mrf.mxu0 }
 0x139   : > { %v10088_v23 = vpop.f32.mrf.mxu0 }
 0x13b   : > { %v10102_v29 = vpop.f32.mrf.mxu0 }
 0x13c   : > { %v10213_v28 = vmax.f32 %v10088_v23, %v10102_v29 }
 0x13d   : > { %v10108_v31 = vpop.f32.mrf.mxu0 }
 0x13f   : > { %v10110_v32 = vpop.f32.mrf.mxu0 }
 0x140   : > { %v10224_v44 = vmax.f32 %v10108_v31, %v10110_v32 }
 0x141   : > { %v10112_v34 = vpop.f32.mrf.mxu0 }
 0x143   : > { %v10114_v35 = vpop.f32.mrf.mxu0 }
 0x144   : > { %v10233_v49 = vmax.f32 %v10112_v34, %v10114_v35 }
 0x145   : > { %v10116_v37 = vpop.f32.mrf.mxu0 }
 0x147   : > { %v10118_v38 = vpop.f32.mrf.mxu0 }
 0x148   : > { %v10242_v53 = vmax.f32 %v10116_v37, %v10118_v38 }
 0x149   : > { %v10121_v41 = vpop.f32.mrf.mxu0 }
 0x14b   : > { %v10139_v50 = vpop.f32.mrf.mxu0 }
 0x14c   : > { %v10251_v57 = vmax.f32 %v10121_v41, %v10139_v50 }
 0x14d   : > { %v10159_v59 = vpop.f32.mrf.mxu0 }
 0x14f   : > { %v10177_v10 = vpop.f32.mrf.mxu0 }
 0x150   : > { %v10260_v62 = vmax.f32 %v10159_v59, %v10177_v10 }
 0x151   : > { %v10193_v19 = vpop.f32.mrf.mxu0 }
 0x153   : > { %v10205_v25 = vpop.f32.mrf.mxu0 }
 0x155   : > { %v10216_v40 = vpop.f32.mrf.mxu0 }
 0x157   : > { %v548_v46 = vpop.f32.mrf.mxu0 }
 0x158   : > { %v10277_v10 = vmax.f32 %v10216_v40, %v548_v46 }
 0x164   : > { %v718_v55 = vpop.permute.xlu0 %717 }
 0x165   : > { %v840_v58 = vmax.f32 %v9940_v6, %v718_v55  ;;  %v1348_v6 = vld [vmem:[%s14361_s2] sm:$0xff] }
 0x166   : > { %7805 = vmatpush3.msra.mxu1 %v1348_v6 }
 0x167   : > { %vm881_vm0 = vcmp.ge.f32.partialorder %v840_v58, 0.0  ;;  %v922_v63 = vmul.f32 0.2, %v840_v58  ;;  %7899 = vmatprep.subr.mxu1 %v14391_v4 }
 0x168   : > { %v720_v1 = vpop.permute.xlu0 %719 }
 0x169   : > { %v841_v5 = vmax.f32 %v9944_v9, %v720_v1  ;;  %v963_v8 = vsel %vm881_vm0, %v840_v58, %v922_v63  ;;  %v10187_v9 = vmax.f32 %v10035_v0, %v10046_v3  ;;  %v10202_v3 = vmax.f32 %v10052_v7, %v10071_v16 }
 0x16a   : > { %1005 = vst.msk [vmem:[#allocation2] sm:$0xff] %vm1004_vm1, %v963_v8  ;;  %1087 = vrot.lane.b32.xlu1 %v963_v8, %s9717_s25  ;;  %v10269_v1 = vmax.f32 %v10193_v19, %v10205_v25 }
 0x16b   : > { %vm882_vm2 = vcmp.ge.f32.partialorder %v841_v5, 0.0  ;;  %v923_v11 = vmul.f32 0.2, %v841_v5 }
 0x16c   : > { %v722_v13 = vpop.permute.xlu1 %721 }
 0x16d   : > { %v842_v14 = vmax.f32 %v9948_v12, %v722_v13  ;;  %v964_v17 = vsel %vm882_vm2, %v841_v5, %v923_v11 }
 0x16e   : > { %1006 = vst.msk [vmem:[#allocation2 + $0x8] sm:$0xff] %vm1004_vm1, %v964_v17  ;;  %1089 = vrot.lane.b32.xlu0 %v964_v17, %s9717_s25  ;;  %751 = vrot.lane.b32.xlu1 %v10187_v9, %s9717_s25 }
 0x16f   : > { %vm883_vm4 = vcmp.ge.f32.partialorder %v842_v14, 0.0  ;;  %v924_v0 = vmul.f32 0.2, %v842_v14 }
 0x170   : > { %v724_v20 = vpop.permute.xlu1 %723 }
 0x171   : > { %v843_v12 = vmax.f32 %v9952_v15, %v724_v20  ;;  %v965_v22 = vsel %vm883_vm4, %v842_v14, %v924_v0 }
 0x172   : > { %1007 = vst.msk [vmem:[#allocation2 + $0x10] sm:$0xff] %vm1004_vm1, %v965_v22  ;;  %1091 = vrot.lane.b32.xlu0 %v965_v22, %s9717_s25  ;;  %753 = vrot.lane.b32.xlu1 %v10202_v3, %s9717_s25 }
 0x173   : > { %vm884_vm5 = vcmp.ge.f32.partialorder %v843_v12, 0.0  ;;  %v925_v26 = vmul.f32 0.2, %v843_v12 }
 0x174   : > { %v726_v7 = vpop.permute.xlu0 %725 }
 0x175   : > { %v844_v16 = vmax.f32 %v9956_v18, %v726_v7  ;;  %v966_v15 = vsel %vm884_vm5, %v843_v12, %v925_v26  ;;  %vm1210_vm5 = vcmask 1048065  }
 0x176   : > { %1008 = vst.msk [vmem:[#allocation2 + $0x18] sm:$0xff] %vm1004_vm1, %v966_v15  ;;  %1093 = vrot.lane.b32.xlu0 %v966_v15, %s9717_s25  ;;  %755 = vrot.lane.b32.xlu1 %v10213_v28, %s9717_s25 }
 0x177   : > { %vm885_vm6 = vcmp.ge.f32.partialorder %v844_v16, 0.0  ;;  %v926_v43 = vmul.f32 0.2, %v844_v16 }
 0x178   : > { %v728_v23 = vpop.permute.xlu1 %727 }
 0x179   : > { %v845_v29 = vmax.f32 %v9960_v21, %v728_v23  ;;  %v967_v18 = vsel %vm885_vm6, %v844_v16, %v926_v43  ;;  %v552_v21 = vpop.f32.mrf.mxu0  ;;  %vm1212_vm6 = vcmask 1048064  }
 0x17a   : > { %1009 = vst.msk [vmem:[#allocation2 + $0x20] sm:$0xff] %vm1004_vm1, %v967_v18  ;;  %1095 = vrot.lane.b32.xlu0 %v967_v18, %s9717_s25  ;;  %757 = vrot.lane.b32.xlu1 %v10224_v44, %s9717_s25 }
 0x17b   : > { %vm886_vm7 = vcmp.ge.f32.partialorder %v845_v29, 0.0  ;;  %v927_v47 = vmul.f32 0.2, %v845_v29 }
 0x17c   : > { %v730_v31 = vpop.permute.xlu0 %729 }
 0x17d   : > { %v846_v32 = vmax.f32 %v9964_v24, %v730_v31  ;;  %v968_v51 = vsel %vm886_vm7, %v845_v29, %v927_v47  ;;  %v554_v24 = vpop.f32.mrf.mxu0 }
 0x17e   : > { %1010 = vst.msk [vmem:[#allocation2 + $0x28] sm:$0xff] %vm1004_vm1, %v968_v51  ;;  %1097 = vrot.lane.b32.xlu0 %v968_v51, %s9717_s25  ;;  %759 = vrot.lane.b32.xlu1 %v10233_v49, %s9717_s25  ;;  %v10284_v19 = vmax.f32 %v552_v21, %v554_v24 }
 0x17f   : > { %vm887_vm8 = vcmp.ge.f32.partialorder %v846_v32, 0.0  ;;  %v928_v52 = vmul.f32 0.2, %v846_v32 }
 0x180   : > { %v732_v34 = vpop.permute.xlu1 %731 }
 0x181   : > { %v847_v35 = vmax.f32 %v9968_v27, %v732_v34  ;;  %v969_v54 = vsel %vm887_vm8, %v846_v32, %v928_v52  ;;  %v558_v27 = vpop.f32.mrf.mxu0 }
 0x182   : > { %1011 = vst.msk [vmem:[#allocation2 + $0x30] sm:$0xff] %vm1004_vm1, %v969_v54  ;;  %1099 = vrot.lane.b32.xlu0 %v969_v54, %s9717_s25  ;;  %761 = vrot.lane.b32.xlu1 %v10242_v53, %s9717_s25 }
 0x183   : > { %vm888_vm9 = vcmp.ge.f32.partialorder %v847_v35, 0.0  ;;  %v929_v55 = vmul.f32 0.2, %v847_v35 }
 0x184   : > { %v734_v37 = vpop.permute.xlu0 %733 }
 0x185   : > { %v848_v38 = vmax.f32 %v9972_v30, %v734_v37  ;;  %v970_v58 = vsel %vm888_vm9, %v847_v35, %v929_v55  ;;  %v560_v30 = vpop.f32.mrf.mxu0 }
 0x186   : > { %1012 = vst.msk [vmem:[#allocation2 + $0x38] sm:$0xff] %vm1004_vm1, %v970_v58  ;;  %1101 = vrot.lane.b32.xlu0 %v970_v58, %s9717_s25  ;;  %763 = vrot.lane.b32.xlu1 %v10251_v57, %s9717_s25  ;;  %v10291_v25 = vmax.f32 %v558_v27, %v560_v30 }
 0x187   : > { %vm889_vm10 = vcmp.ge.f32.partialorder %v848_v38, 0.0  ;;  %v930_v60 = vmul.f32 0.2, %v848_v38 }
 0x188   : > { %v736_v41 = vpop.permute.xlu1 %735 }
 0x189   : > { %v849_v50 = vmax.f32 %v9976_v33, %v736_v41  ;;  %v971_v63 = vsel %vm889_vm10, %v848_v38, %v930_v60  ;;  %v564_v33 = vpop.f32.mrf.mxu0 }
 0x18a   : > { %1013 = vst.msk [vmem:[#allocation2 + $0x40] sm:$0xff] %vm1004_vm1, %v971_v63  ;;  %1103 = vrot.lane.b32.xlu0 %v971_v63, %s9717_s25  ;;  %765 = vrot.lane.b32.xlu1 %v10260_v62, %s9717_s25 }
 0x18b   : > { %vm890_vm11 = vcmp.ge.f32.partialorder %v849_v50, 0.0  ;;  %v931_v6 = vmul.f32 0.2, %v849_v50  ;;  %v566_v17 = vpop.f32.mrf.mxu0 }
 0x18c   : > { %v738_v59 = vpop.permute.xlu0 %737  ;;  %v10298_v40 = vmax.f32 %v564_v33, %v566_v17 }
 0x18d   : > { %v850_v2 = vmax.f32 %v9980_v36, %v738_v59  ;;  %v972_v5 = vsel %vm890_vm11, %v849_v50, %v931_v6  ;;  %v570_v22 = vpop.f32.mrf.mxu0 }
 0x18e   : > { %1014 = vst.msk [vmem:[#allocation2 + $0x48] sm:$0xff] %vm1004_vm1, %v972_v5  ;;  %1105 = vrot.lane.b32.xlu0 %v972_v5, %s9717_s25  ;;  %767 = vrot.lane.b32.xlu1 %v10269_v1, %s9717_s25 }
 0x18f   : > { %vm891_vm12 = vcmp.ge.f32.partialorder %v850_v2, 0.0  ;;  %v932_v8 = vmul.f32 0.2, %v850_v2  ;;  %v572_v15 = vpop.f32.mrf.mxu0 }
 0x190   : > { %v740_v11 = vpop.permute.xlu1 %739  ;;  %v10305_v46 = vmax.f32 %v570_v22, %v572_v15  ;;  %v1721_v22 = vld [vmem:[%s14361_s2 + $0xe8] sm:$0xff] }
 0x191   : > { %v851_v13 = vmax.f32 %v9984_v39, %v740_v11  ;;  %v973_v14 = vsel %vm891_vm12, %v850_v2, %v932_v8  ;;  %v576_v18 = vpop.f32.mrf.mxu0 }
 0x192   : > { %1015 = vst.msk [vmem:[#allocation2 + $0x50] sm:$0xff] %vm1004_vm1, %v973_v14  ;;  %1107 = vrot.lane.b32.xlu0 %v973_v14, %s9717_s25  ;;  %769 = vrot.lane.b32.xlu1 %v10277_v10, %s9717_s25 }
 0x193   : > { %vm892_vm13 = vcmp.ge.f32.partialorder %v851_v13, 0.0  ;;  %v933_v36 = vmul.f32 0.2, %v851_v13  ;;  %v578_v32 = vpop.f32.mrf.mxu0 }
 0x194   : > { %v742_v0 = vpop.permute.xlu0 %741  ;;  %v10312_v21 = vmax.f32 %v576_v18, %v578_v32  ;;  %v1719_v32 = vld [vmem:[%s14361_s2 + $0xd8] sm:$0xff] }
 0x195   : > { %v852_v20 = vmax.f32 %v9988_v42, %v742_v0  ;;  %v974_v12 = vsel %vm892_vm13, %v851_v13, %v933_v36  ;;  %v1722_v13 = vld [vmem:[%s14361_s2 + $0xf0] sm:$0xff] }
 0x196   : > { %1016 = vst.msk [vmem:[#allocation2 + $0x58] sm:$0xff] %vm1004_vm1, %v974_v12  ;;  %1109 = vrot.lane.b32.xlu0 %v974_v12, %s9717_s25  ;;  %771 = vrot.lane.b32.xlu1 %v10284_v19, %s9717_s25 }
 0x197   : > { %vm893_vm14 = vcmp.ge.f32.partialorder %v852_v20, 0.0  ;;  %v934_v39 = vmul.f32 0.2, %v852_v20 }
 0x198   : > { %v744_v26 = vpop.permute.xlu1 %743 }
 0x199   : > { %v853_v7 = vmax.f32 %v9992_v45, %v744_v26  ;;  %v975_v16 = vsel %vm893_vm14, %v852_v20, %v934_v39 }
 0x19a   : > { %1017 = vst.msk [vmem:[#allocation2 + $0x60] sm:$0xff] %vm1004_vm1, %v975_v16  ;;  %1111 = vrot.lane.b32.xlu0 %v975_v16, %s9717_s25  ;;  %773 = vrot.lane.b32.xlu1 %v10291_v25, %s9717_s25 }
 0x19b   : > { %vm894_vm15 = vcmp.ge.f32.partialorder %v853_v7, 0.0  ;;  %v935_v42 = vmul.f32 0.2, %v853_v7 }
 0x19c   : > { %v746_v43 = vpop.permute.xlu0 %745 }
 0x19d   : > { %v854_v23 = vmax.f32 %v9996_v48, %v746_v43  ;;  %v976_v29 = vsel %vm894_vm15, %v853_v7, %v935_v42  ;;  %v1720_v43 = vld [vmem:[%s14361_s2 + $0xe0] sm:$0xff] }
 0x19e   : > { %1018 = vst.msk [vmem:[#allocation2 + $0x68] sm:$0xff] %vm1004_vm1, %v976_v29  ;;  %1113 = vrot.lane.b32.xlu0 %v976_v29, %s9717_s25  ;;  %775 = vrot.lane.b32.xlu1 %v10298_v40, %s9717_s25 }
 0x19f   : > { %vm895_vm0 = vcmp.ge.f32.partialorder %v854_v23, 0.0  ;;  %v936_v45 = vmul.f32 0.2, %v854_v23 }
 0x1a0   : > { %v748_v47 = vpop.permute.xlu1 %747 }
 0x1a1   : > { %v855_v31 = vmax.f32 %v10013_v56, %v748_v47  ;;  %v977_v51 = vsel %vm895_vm0, %v854_v23, %v936_v45 }
 0x1a2   : > { %1019 = vst.msk [vmem:[#allocation2 + $0x70] sm:$0xff] %vm1004_vm1, %v977_v51  ;;  %1115 = vrot.lane.b32.xlu0 %v977_v51, %s9717_s25  ;;  %777 = vrot.lane.b32.xlu1 %v10305_v46, %s9717_s25 }
 0x1a3   : > { %v937_v48 = vmul.f32 0.2, %v855_v31  ;;  %vm896_vm2 = vcmp.ge.f32.partialorder %v855_v31, 0.0 }
 0x1a4   : > { %v750_v52 = vpop.permute.xlu0 %749 }
 0x1a5   : > { %v856_v34 = vmax.f32 %v10027_v61, %v750_v52  ;;  %v978_v35 = vsel %vm896_vm2, %v855_v31, %v937_v48 }
 0x1a6   : > { %1020 = vst.msk [vmem:[#allocation2 + $0x78] sm:$0xff] %vm1004_vm1, %v978_v35  ;;  %1117 = vrot.lane.b32.xlu0 %v978_v35, %s9717_s25  ;;  %779 = vrot.lane.b32.xlu1 %v10312_v21, %s9717_s25 }
 0x1a7   : > { %v938_v56 = vmul.f32 0.2, %v856_v34  ;;  %vm897_vm4 = vcmp.ge.f32.partialorder %v856_v34, 0.0 }
 0x1a9   : > { %v979_v54 = vsel %vm897_vm4, %v856_v34, %v938_v56 }
 0x1aa   : > { %1119 = vrot.lane.b32.xlu0 %v979_v54, %s9717_s25  ;;  %1021 = vst.msk [vmem:[#allocation2 + $0x80] sm:$0xff] %vm1004_vm1, %v979_v54  ;;  %v1718_v54 = vld [vmem:[%s14361_s2 + $0xd0] sm:$0xff] }
 0x1dc   : > { %v1088_v24 = vpop.permute.xlu1 %1087 }
 0x1dd   : > { %1211 = vst.msk [vmem:[#allocation2 - $0x1] sm:$0xfe] %vm1210_vm5, %v1088_v24 }
 0x1e0   : > { %v1090_v61 = vpop.permute.xlu0 %1089  ;;  %v752_v55 = vpop.permute.xlu1 %751 }
 0x1e1   : > { %1213 = vst.msk [vmem:[#allocation2 + $0x7] sm:$0xff] %vm1212_vm6, %v1090_v61  ;;  %v857_v37 = vmax.f32 %v10187_v9, %v752_v55  ;;  %v1723_v9 = vld [vmem:[%s14361_s2 + $0xf8] sm:$0xff] }
 0x1e2   : > { %v2803_v55 = vld [vmem:[%s14361_s2 + $0x278] sm:$0xff] }
 0x1e3   : > { %v939_v38 = vmul.f32 0.2, %v857_v37  ;;  %vm898_vm7 = vcmp.ge.f32.partialorder %v857_v37, 0.0 }
 0x1e4   : > { %v1092_v58 = vpop.permute.xlu0 %1091  ;;  %v754_v27 = vpop.permute.xlu1 %753 }
 0x1e5   : > { %1214 = vst.msk [vmem:[#allocation2 + $0xf] sm:$0xff] %vm1212_vm6, %v1092_v58  ;;  %v858_v60 = vmax.f32 %v10202_v3, %v754_v27  ;;  %v980_v41 = vsel %vm898_vm7, %v857_v37, %v939_v38 }
 0x1e6   : > { %1022 = vst.msk [vmem:[#allocation2 + $0x88] sm:$0xff] %vm1004_vm1, %v980_v41  ;;  %1121 = vrot.lane.b32.xlu1 %v980_v41, %s9717_s25 }
 0x1e7   : > { %v940_v50 = vmul.f32 0.2, %v858_v60  ;;  %vm899_vm8 = vcmp.ge.f32.partialorder %v858_v60, 0.0 }
 0x1e8   : > { %v1094_v63 = vpop.permute.xlu0 %1093  ;;  %v756_v30 = vpop.permute.xlu1 %755  ;;  %v1286_v6 = vld [vmem:[#allocation2] sm:$0xff] }
 0x1e9   : > { %v2006_v59 = vld [vmem:[#allocation2 + $0x4] sm:$0xff]  ;;  %1215 = vst.msk [vmem:[#allocation2 + $0x17] sm:$0xff] %vm1212_vm6, %v1094_v63  ;;  %v859_v2 = vmax.f32 %v10213_v28, %v756_v30  ;;  %7807 = vmatmul.mubr.f32.vlgmr.msra.gmra.mxu1 %v1286_v6  ;;  %v981_v3 = vsel %vm899_vm8, %v858_v60, %v940_v50 }
 0x1ea   : > { %8057 = vmatmul.mubr.f32.vlgmr.msra.gmra.mxu0 %v2006_v59  ;;  %1123 = vrot.lane.b32.xlu0 %v981_v3, %s9717_s25  ;;  %1023 = vst.msk [vmem:[#allocation2 + $0x90] sm:$0xff] %vm1004_vm1, %v981_v3  ;;  %v1717_v60 = vld [vmem:[%s14361_s2 + $0xc8] sm:$0xff] }
 0x1eb   : > { %7809 = vmatprep.mubr.msk.f32.mxu1 %vm9718_vm3, %v14391_v4  ;;  %v941_v5 = vmul.f32 0.2, %v859_v2  ;;  %8059 = vmatprep.mubr.msk.f32.mxu0 %vm9718_vm3, %v14391_v4  ;;  %vm900_vm9 = vcmp.ge.f32.partialorder %v859_v2, 0.0 }
 0x1ec   : > { %7900 = vmatpush3.msra.mxu1 %v1723_v9  ;;  %v1096_v33 = vpop.permute.xlu0 %1095  ;;  %v758_v8 = vpop.permute.xlu1 %757  ;;  %v1287_v11 = vld [vmem:[#allocation2 + $0x8] sm:$0xff]  ;;  %8275 = vmatpush3.msra.mxu0 %v2803_v55  ;;  %v1716_v9 = vld [vmem:[%s14361_s2 + $0xc0] sm:$0xff] }
 0x1ed   : > { %v2007_v28 = vld [vmem:[#allocation2 + $0xc] sm:$0xff]  ;;  %7901 = vmatprep.subr.mxu1 %v14391_v4  ;;  %1216 = vst.msk [vmem:[#allocation2 + $0x1f] sm:$0xff] %vm1212_vm6, %v1096_v33  ;;  %v860_v14 = vmax.f32 %v10224_v44, %v758_v8  ;;  %7810 = vmatmul.mubr.f32.gmra.mxu1 %v1287_v11  ;;  %v982_v17 = vsel %vm900_vm9, %v859_v2, %v941_v5 }
 0x1ee   : > { %8060 = vmatmul.mubr.f32.gmra.mxu0 %v2007_v28  ;;  %1024 = vst.msk [vmem:[#allocation2 + $0x98] sm:$0xff] %vm1004_vm1, %v982_v17  ;;  %1125 = vrot.lane.b32.xlu1 %v982_v17, %s9717_s25  ;;  %v2802_v5 = vld [vmem:[%s14361_s2 + $0x270] sm:$0xff] }
 0x1ef   : > { %7812 = vmatprep.mubr.msk.f32.mxu1 %vm9718_vm3, %v14391_v4  ;;  %v942_v36 = vmul.f32 0.2, %v860_v14  ;;  %8062 = vmatprep.mubr.msk.f32.mxu0 %vm9718_vm3, %v14391_v4  ;;  %vm901_vm10 = vcmp.ge.f32.partialorder %v860_v14, 0.0 }
 0x1f0   : > { %7902 = vmatpush3.msra.mxu1 %v1722_v13  ;;  %v1098_v0 = vpop.permute.xlu0 %1097  ;;  %v760_v20 = vpop.permute.xlu1 %759  ;;  %v1288_v12 = vld [vmem:[#allocation2 + $0x10] sm:$0xff]  ;;  %8276 = vmatprep.subr.mxu0 %v14391_v4  ;;  %v1715_v13 = vld [vmem:[%s14361_s2 + $0xb8] sm:$0xff] }
 0x1f1   : > { %v10350_v44 = vld [vmem:[#allocation2 + $0x14] sm:$0xff]  ;;  %7903 = vmatprep.subr.mxu1 %v14391_v4  ;;  %1217 = vst.msk [vmem:[#allocation2 + $0x27] sm:$0xff] %vm1212_vm6, %v1098_v0  ;;  %v861_v39 = vmax.f32 %v10233_v49, %v760_v20  ;;  %7813 = vmatmul.mubr.f32.gmra.mxu1 %v1288_v12  ;;  %v983_v26 = vsel %vm901_vm10, %v860_v14, %v942_v36 }
 0x1f2   : > { %8063 = vmatmul.mubr.f32.gmra.mxu0 %v10350_v44  ;;  %1127 = vrot.lane.b32.xlu0 %v983_v26, %s9717_s25  ;;  %1025 = vst.msk [vmem:[#allocation2 + $0xa0] sm:$0xff] %vm1004_vm1, %v983_v26 }
 0x1f3   : > { %7815 = vmatprep.mubr.msk.f32.mxu1 %vm9718_vm3, %v14391_v4  ;;  %v943_v7 = vmul.f32 0.2, %v861_v39  ;;  %8065 = vmatprep.mubr.msk.f32.mxu0 %vm9718_vm3, %v14391_v4  ;;  %vm902_vm11 = vcmp.ge.f32.partialorder %v861_v39, 0.0 }
 0x1f4   : > { %7904 = vmatpush3.msra.mxu1 %v1721_v22  ;;  %v1100_v16 = vpop.permute.xlu0 %1099  ;;  %v762_v15 = vpop.permute.xlu1 %761  ;;  %v1289_v49 = vld [vmem:[#allocation2 + $0x18] sm:$0xff]  ;;  %8277 = vmatpush3.msra.mxu0 %v2802_v5  ;;  %v1714_v22 = vld [vmem:[%s14361_s2 + $0xb0] sm:$0xff] }
 0x1f5   : > { %v10365_v42 = vld [vmem:[#allocation2 + $0x1c] sm:$0xff]  ;;  %7905 = vmatprep.subr.mxu1 %v14391_v4  ;;  %1218 = vst.msk [vmem:[#allocation2 + $0x2f] sm:$0xff] %vm1212_vm6, %v1100_v16  ;;  %v862_v23 = vmax.f32 %v10242_v53, %v762_v15  ;;  %7816 = vmatmul.mubr.f32.gmra.mxu1 %v1289_v49  ;;  %v984_v29 = vsel %vm902_vm11, %v861_v39, %v943_v7  ;;  %v2801_v7 = vld [vmem:[%s14361_s2 + $0x268] sm:$0xff] }
 0x1f6   : > { %8066 = vmatmul.mubr.f32.gmra.mxu0 %v10365_v42  ;;  %1026 = vst.msk [vmem:[#allocation2 + $0xa8] sm:$0xff] %vm1004_vm1, %v984_v29  ;;  %1129 = vrot.lane.b32.xlu1 %v984_v29, %s9717_s25  ;;  %v1713_v29 = vld [vmem:[%s14361_s2 + $0xa8] sm:$0xff] }
 0x1f7   : > { %7818 = vmatprep.mubr.msk.f32.mxu1 %vm9718_vm3, %v14391_v4  ;;  %v944_v18 = vmul.f32 0.2, %v862_v23  ;;  %8068 = vmatprep.mubr.msk.f32.mxu0 %vm9718_vm3, %v14391_v4  ;;  %vm903_vm12 = vcmp.ge.f32.partialorder %v862_v23, 0.0 }
 0x1f8   : > { %7906 = vmatpush3.msra.mxu1 %v1720_v43  ;;  %v1102_v45 = vpop.permute.xlu0 %1101  ;;  %v764_v47 = vpop.permute.xlu1 %763  ;;  %v1290_v53 = vld [vmem:[#allocation2 + $0x20] sm:$0xff]  ;;  %8278 = vmatprep.subr.mxu0 %v14391_v4 }
 0x1f9   : > { %v10380_v31 = vld [vmem:[#allocation2 + $0x24] sm:$0xff]  ;;  %7907 = vmatprep.subr.mxu1 %v14391_v4  ;;  %1219 = vst.msk [vmem:[#allocation2 + $0x37] sm:$0xff] %vm1212_vm6, %v1102_v45  ;;  %v863_v51 = vmax.f32 %v10251_v57, %v764_v47  ;;  %7819 = vmatmul.mubr.f32.gmra.mxu1 %v1290_v53  ;;  %v985_v48 = vsel %vm903_vm12, %v862_v23, %v944_v18 }
 0x1fa   : > { %8069 = vmatmul.mubr.f32.gmra.mxu0 %v10380_v31  ;;  %1131 = vrot.lane.b32.xlu0 %v985_v48, %s9717_s25  ;;  %1027 = vst.msk [vmem:[#allocation2 + $0xb0] sm:$0xff] %vm1004_vm1, %v985_v48 }
 0x1fb   : > { %7821 = vmatprep.mubr.msk.f32.mxu1 %vm9718_vm3, %v14391_v4  ;;  %v945_v52 = vmul.f32 0.2, %v863_v51  ;;  %8071 = vmatprep.mubr.msk.f32.mxu0 %vm9718_vm3, %v14391_v4  ;;  %vm904_vm13 = vcmp.ge.f32.partialorder %v863_v51, 0.0 }
 0x1fc   : > { %7908 = vmatpush3.msra.mxu1 %v1719_v32  ;;  %v1104_v34 = vpop.permute.xlu0 %1103  ;;  %v766_v35 = vpop.permute.xlu1 %765  ;;  %v1291_v57 = vld [vmem:[#allocation2 + $0x28] sm:$0xff]  ;;  %8279 = vmatpush3.msra.mxu0 %v2801_v7  ;;  %v2788_v7 = vld [vmem:[%s14361_s2 + $0x200] sm:$0xff] }
 0x1fd   : > { %v10395_v56 = vld [vmem:[#allocation2 + $0x2c] sm:$0xff]  ;;  %7909 = vmatprep.subr.mxu1 %v14391_v4  ;;  %1220 = vst.msk [vmem:[#allocation2 + $0x3f] sm:$0xff] %vm1212_vm6, %v1104_v34  ;;  %v864_v24 = vmax.f32 %v10260_v62, %v766_v35  ;;  %7822 = vmatmul.mubr.f32.gmra.mxu1 %v1291_v57  ;;  %v986_v61 = vsel %vm904_vm13, %v863_v51, %v945_v52  ;;  %v1712_v52 = vld [vmem:[%s14361_s2 + $0xa0] sm:$0xff] }
 0x1fe   : > { %8072 = vmatmul.mubr.f32.gmra.mxu0 %v10395_v56  ;;  %1028 = vst.msk [vmem:[#allocation2 + $0xb8] sm:$0xff] %vm1004_vm1, %v986_v61  ;;  %1133 = vrot.lane.b32.xlu1 %v986_v61, %s9717_s25  ;;  %v2800_v57 = vld [vmem:[%s14361_s2 + $0x260] sm:$0xff] }
 0x1ff   : > { %7824 = vmatprep.mubr.msk.f32.mxu1 %vm9718_vm3, %v14391_v4  ;;  %v946_v37 = vmul.f32 0.2, %v864_v24  ;;  %8074 = vmatprep.mubr.msk.f32.mxu0 %vm9718_vm3, %v14391_v4  ;;  %vm905_vm14 = vcmp.ge.f32.partialorder %v864_v24, 0.0 }
 0x200   : > { %7910 = vmatpush3.msra.mxu1 %v1718_v54  ;;  %v1106_v62 = vpop.permute.xlu0 %1105  ;;  %v768_v38 = vpop.permute.xlu1 %767  ;;  %v1292_v58 = vld [vmem:[#allocation2 + $0x30] sm:$0xff]  ;;  %8280 = vmatprep.subr.mxu0 %v14391_v4 }
 0x201   : > { %v10413_v27 = vld [vmem:[#allocation2 + $0x34] sm:$0xff]  ;;  %7911 = vmatprep.subr.mxu1 %v14391_v4  ;;  %1221 = vst.msk [vmem:[#allocation2 + $0x47] sm:$0xff] %vm1212_vm6, %v1106_v62  ;;  %v865_v41 = vmax.f32 %v10269_v1, %v768_v38  ;;  %7825 = vmatmul.mubr.f32.gmra.mxu1 %v1292_v58  ;;  %v987_v50 = vsel %vm905_vm14, %v864_v24, %v946_v37 }
 0x202   : > { %8075 = vmatmul.mubr.f32.gmra.mxu0 %v10413_v27  ;;  %1135 = vrot.lane.b32.xlu0 %v987_v50, %s9717_s25  ;;  %1029 = vst.msk [vmem:[#allocation2 + $0xc0] sm:$0xff] %vm1004_vm1, %v987_v50  ;;  %v1711_v62 = vld [vmem:[%s14361_s2 + $0x98] sm:$0xff] }
 0x203   : > { %7827 = vmatprep.mubr.msk.f32.mxu1 %vm9718_vm3, %v14391_v4  ;;  %v947_v63 = vmul.f32 0.2, %v865_v41  ;;  %8077 = vmatprep.mubr.msk.f32.mxu0 %vm9718_vm3, %v14391_v4  ;;  %vm906_vm15 = vcmp.ge.f32.partialorder %v865_v41, 0.0 }
 0x204   : > { %7912 = vmatpush3.msra.mxu1 %v1717_v60  ;;  %v1108_v30 = vpop.permute.xlu0 %1107  ;;  %v770_v6 = vpop.permute.xlu1 %769  ;;  %v1293_v1 = vld [vmem:[#allocation2 + $0x38] sm:$0xff]  ;;  %8281 = vmatpush3.msra.mxu0 %v2800_v57 }
 0x205   : > { %v10428_v59 = vld [vmem:[#allocation2 + $0x3c] sm:$0xff]  ;;  %7913 = vmatprep.subr.mxu1 %v14391_v4  ;;  %1222 = vst.msk [vmem:[#allocation2 + $0x4f] sm:$0xff] %vm1212_vm6, %v1108_v30  ;;  %v866_v2 = vmax.f32 %v10277_v10, %v770_v6  ;;  %7828 = vmatmul.mubr.f32.gmra.mxu1 %v1293_v1  ;;  %v988_v3 = vsel %vm906_vm15, %v865_v41, %v947_v63  ;;  %v1710_v1 = vld [vmem:[%s14361_s2 + $0x90] sm:$0xff] }
 0x206   : > { %8078 = vmatmul.mubr.f32.gmra.mxu0 %v10428_v59  ;;  %1030 = vst.msk [vmem:[#allocation2 + $0xc8] sm:$0xff] %vm1004_vm1, %v988_v3  ;;  %1137 = vrot.lane.b32.xlu1 %v988_v3, %s9717_s25 }
 0x207   : > { %7830 = vmatprep.mubr.msk.f32.mxu1 %vm9718_vm3, %v14391_v4  ;;  %v948_v33 = vmul.f32 0.2, %v866_v2  ;;  %8080 = vmatprep.mubr.msk.f32.mxu0 %vm9718_vm3, %v14391_v4  ;;  %vm907_vm0 = vcmp.ge.f32.partialorder %v866_v2, 0.0 }
 0x208   : > { %7914 = vmatpush3.msra.mxu1 %v1716_v9  ;;  %v1110_v10 = vpop.permute.xlu0 %1109  ;;  %v772_v8 = vpop.permute.xlu1 %771  ;;  %v1294_v11 = vld [vmem:[#allocation2 + $0x40] sm:$0xff]  ;;  %8282 = vmatprep.subr.mxu0 %v14391_v4  ;;  %v2799_v9 = vld [vmem:[%s14361_s2 + $0x258] sm:$0xff] }
 0x209   : > { %v10447_v28 = vld [vmem:[#allocation2 + $0x44] sm:$0xff]  ;;  %7915 = vmatprep.subr.mxu1 %v14391_v4  ;;  %1223 = vst.msk [vmem:[#allocation2 + $0x57] sm:$0xff] %vm1212_vm6, %v1110_v10  ;;  %v867_v14 = vmax.f32 %v10284_v19, %v772_v8  ;;  %7831 = vmatmul.mubr.f32.gmra.mxu1 %v1294_v11  ;;  %v989_v17 = vsel %vm907_vm0, %v866_v2, %v948_v33  ;;  %v2798_v33 = vld [vmem:[%s14361_s2 + $0x250] sm:$0xff] }
 0x20a   : > { %8081 = vmatmul.mubr.f32.gmra.mxu0 %v10447_v28  ;;  %1139 = vrot.lane.b32.xlu0 %v989_v17, %s9717_s25  ;;  %1031 = vst.msk [vmem:[#allocation2 + $0xd0] sm:$0xff] %vm1004_vm1, %v989_v17  ;;  %v1709_v11 = vld [vmem:[%s14361_s2 + $0x88] sm:$0xff]  ;;  %v2796_v17 = vld [vmem:[%s14361_s2 + $0x240] sm:$0xff] }
 0x20b   : > { %7833 = vmatprep.mubr.msk.f32.mxu1 %vm9718_vm3, %v14391_v4  ;;  %v949_v36 = vmul.f32 0.2, %v867_v14  ;;  %8083 = vmatprep.mubr.msk.f32.mxu0 %vm9718_vm3, %v14391_v4  ;;  %vm908_vm2 = vcmp.ge.f32.partialorder %v867_v14, 0.0 }
 0x20c   : > { %7916 = vmatpush3.msra.mxu1 %v1715_v13  ;;  %v1112_v0 = vpop.permute.xlu0 %1111  ;;  %v774_v20 = vpop.permute.xlu1 %773  ;;  %v1295_v19 = vld [vmem:[#allocation2 + $0x48] sm:$0xff]  ;;  %8283 = vmatpush3.msra.mxu0 %v2799_v9 }
 0x20d   : > { %v10462_v12 = vld [vmem:[#allocation2 + $0x4c] sm:$0xff]  ;;  %7917 = vmatprep.subr.mxu1 %v14391_v4  ;;  %1224 = vst.msk [vmem:[#allocation2 + $0x5f] sm:$0xff] %vm1212_vm6, %v1112_v0  ;;  %v868_v39 = vmax.f32 %v10291_v25, %v774_v20  ;;  %7834 = vmatmul.mubr.f32.gmra.mxu1 %v1295_v19  ;;  %v990_v26 = vsel %vm908_vm2, %v867_v14, %v949_v36  ;;  %v582_v25 = vpop.f32.mrf.mxu0  ;;  %v1708_v14 = vld [vmem:[%s14361_s2 + $0x80] sm:$0xff]  ;;  %v2795_v36 = vld [vmem:[%s14361_s2 + $0x238] sm:$0xff] }
 0x20e   : > { %8084 = vmatmul.mubr.f32.gmra.mxu0 %v10462_v12  ;;  %1032 = vst.msk [vmem:[#allocation2 + $0xd8] sm:$0xff] %vm1004_vm1, %v990_v26  ;;  %1141 = vrot.lane.b32.xlu1 %v990_v26, %s9717_s25  ;;  %v2797_v13 = vld [vmem:[%s14361_s2 + $0x248] sm:$0xff]  ;;  %v2794_v0 = vld [vmem:[%s14361_s2 + $0x230] sm:$0xff]  ;;  %v2792_v19 = vld [vmem:[%s14361_s2 + $0x220] sm:$0xff] }
 0x20f   : > { %7836 = vmatprep.mubr.msk.f32.mxu1 %vm9718_vm3, %v14391_v4  ;;  %v950_v16 = vmul.f32 0.2, %v868_v39  ;;  %8086 = vmatprep.mubr.msk.f32.mxu0 %vm9718_vm3, %v14391_v4  ;;  %vm909_vm4 = vcmp.ge.f32.partialorder %v868_v39, 0.0  ;;  %v584_v53 = vpop.f32.mrf.mxu0  ;;  %v2793_v20 = vld [vmem:[%s14361_s2 + $0x228] sm:$0xff] }
 0x210   : > { %7918 = vmatpush3.msra.mxu1 %v1714_v22  ;;  %v1114_v15 = vpop.permute.xlu0 %1113  ;;  %v776_v49 = vpop.permute.xlu1 %775  ;;  %v1296_v43 = vld [vmem:[#allocation2 + $0x50] sm:$0xff]  ;;  %v10526_v60 = vmax.f32 %v582_v25, %v584_v53  ;;  %8284 = vmatprep.subr.mxu0 %v14391_v4  ;;  %v2791_v22 = vld [vmem:[%s14361_s2 + $0x218] sm:$0xff]  ;;  %v2789_v26 = vld [vmem:[%s14361_s2 + $0x208] sm:$0xff] }
 0x211   : > { %v10481_v23 = vld [vmem:[#allocation2 + $0x54] sm:$0xff]  ;;  %7919 = vmatprep.subr.mxu1 %v14391_v4  ;;  %1225 = vst.msk [vmem:[#allocation2 + $0x67] sm:$0xff] %vm1212_vm6, %v1114_v15  ;;  %v869_v18 = vmax.f32 %v10298_v40, %v776_v49  ;;  %7837 = vmatmul.mubr.f32.gmra.mxu1 %v1296_v43  ;;  %v991_v45 = vsel %vm909_vm4, %v868_v39, %v950_v16 }
 0x212   : > { %8087 = vmatmul.mubr.f32.gmra.mxu0 %v10481_v23  ;;  %1143 = vrot.lane.b32.xlu0 %v991_v45, %s9717_s25  ;;  %1033 = vst.msk [vmem:[#allocation2 + $0xe0] sm:$0xff] %vm1004_vm1, %v991_v45  ;;  %v2790_v39 = vld [vmem:[%s14361_s2 + $0x210] sm:$0xff] }
 0x213   : > { %7839 = vmatprep.mubr.msk.f32.mxu1 %vm9718_vm3, %v14391_v4  ;;  %v951_v47 = vmul.f32 0.2, %v869_v18  ;;  %8089 = vmatprep.mubr.msk.f32.mxu0 %vm9718_vm3, %v14391_v4  ;;  %vm910_vm5 = vcmp.ge.f32.partialorder %v869_v18, 0.0 }
 0x214   : > { %7920 = vmatpush3.msra.mxu1 %v1713_v29  ;;  %v1116_v32 = vpop.permute.xlu0 %1115  ;;  %v778_v40 = vpop.permute.xlu1 %777  ;;  %v1297_v51 = vld [vmem:[#allocation2 + $0x58] sm:$0xff]  ;;  %8285 = vmatpush3.msra.mxu0 %v2798_v33 }
 0x215   : > { %v10496_v48 = vld [vmem:[#allocation2 + $0x5c] sm:$0xff]  ;;  %7921 = vmatprep.subr.mxu1 %v14391_v4  ;;  %1226 = vst.msk [vmem:[#allocation2 + $0x6f] sm:$0xff] %vm1212_vm6, %v1116_v32  ;;  %v870_v34 = vmax.f32 %v10305_v46, %v778_v40  ;;  %7840 = vmatmul.mubr.f32.gmra.mxu1 %v1297_v51  ;;  %v992_v35 = vsel %vm910_vm5, %v869_v18, %v951_v47  ;;  %v588_v46 = vpop.f32.mrf.mxu0 }
 0x216   : > { %8090 = vmatmul.mubr.f32.gmra.mxu0 %v10496_v48  ;;  %1034 = vst.msk [vmem:[#allocation2 + $0xe8] sm:$0xff] %vm1004_vm1, %v992_v35  ;;  %1145 = vrot.lane.b32.xlu1 %v992_v35, %s9717_s25 }
 0x217   : > { %7842 = vmatprep.mubr.msk.f32.mxu1 %vm9718_vm3, %v14391_v4  ;;  %v952_v54 = vmul.f32 0.2, %v870_v34  ;;  %8092 = vmatprep.mubr.msk.f32.mxu0 %vm9718_vm3, %v14391_v4  ;;  %vm911_vm7 = vcmp.ge.f32.partialorder %v870_v34, 0.0  ;;  %v590_v50 = vpop.f32.mrf.mxu0 }
 0x218   : > { %7922 = vmatpush3.msra.mxu1 %v1712_v52  ;;  %v1118_v24 = vpop.permute.xlu0 %1117  ;;  %v780_v61 = vpop.permute.xlu1 %779  ;;  %v1298_v55 = vld [vmem:[#allocation2 + $0x60] sm:$0xff]  ;;  %v10548_v2 = vmax.f32 %v588_v46, %v590_v50  ;;  %8286 = vmatprep.subr.mxu0 %v14391_v4 }
 0x219   : > { %v10515_v37 = vld [vmem:[#allocation2 + $0x64] sm:$0xff]  ;;  %7923 = vmatprep.subr.mxu1 %v14391_v4  ;;  %1227 = vst.msk [vmem:[#allocation2 + $0x77] sm:$0xff] %vm1212_vm6, %v1118_v24  ;;  %v871_v38 = vmax.f32 %v10312_v21, %v780_v61  ;;  %7843 = vmatmul.mubr.f32.gmra.mxu1 %v1298_v55  ;;  %v993_v58 = vsel %vm911_vm7, %v870_v34, %v952_v54  ;;  %v10662_v54 = vpop.f32.mrf.mxu0 }
 0x21a   : > { %8093 = vmatmul.mubr.f32.gmra.mxu0 %v10515_v37  ;;  %1147 = vrot.lane.b32.xlu0 %v993_v58, %s9717_s25  ;;  %1035 = vst.msk [vmem:[#allocation2 + $0xf0] sm:$0xff] %vm1004_vm1, %v993_v58 }
 0x21b   : > { %7845 = vmatprep.mubr.msk.f32.mxu1 %vm9718_vm3, %v14391_v4  ;;  %v953_v41 = vmul.f32 0.2, %v871_v38  ;;  %8095 = vmatprep.mubr.msk.f32.mxu0 %vm9718_vm3, %v14391_v4  ;;  %vm912_vm8 = vcmp.ge.f32.partialorder %v871_v38, 0.0  ;;  %v10672_v55 = vpop.f32.mrf.mxu0 }
 0x21c   : > { %7924 = vmatpush3.msra.mxu1 %v1711_v62  ;;  %v1120_v21 = vpop.permute.xlu0 %1119  ;;  %v1299_v63 = vld [vmem:[#allocation2 + $0x68] sm:$0xff]  ;;  %8287 = vmatpush3.msra.mxu0 %v2797_v13 }
 0x21d   : > { %v10532_v30 = vld [vmem:[#allocation2 + $0x6c] sm:$0xff]  ;;  %7925 = vmatprep.subr.mxu1 %v14391_v4  ;;  %1228 = vst.msk [vmem:[#allocation2 + $0x7f] sm:$0xff] %vm1212_vm6, %v1120_v21  ;;  %7846 = vmatmul.mubr.f32.gmra.mxu1 %v1299_v63  ;;  %v994_v6 = vsel %vm912_vm8, %v871_v38, %v953_v41  ;;  %v10682_v41 = vpop.f32.mrf.mxu0 }
 0x21e   : > { %8096 = vmatmul.mubr.f32.gmra.mxu0 %v10532_v30  ;;  %1149 = vrot.lane.b32.xlu1 %v994_v6, %s9717_s25  ;;  %1036 = vst.msk [vmem:[#allocation2 + $0xf8] sm:$0xff] %vm1004_vm1, %v994_v6 }
 0x21f   : > { %781 = vrot.lane.b32.xlu0 %v10526_v60, %s9717_s25  ;;  %7848 = vmatprep.mubr.msk.f32.mxu1 %vm9718_vm3, %v14391_v4  ;;  %v10692_v6 = vpop.f32.mrf.mxu0 }
 0x220   : > { %8098 = vmatprep.mubr.msk.f32.mxu0 %vm9718_vm3, %v14391_v4  ;;  %v1300_v3 = vld [vmem:[#allocation2 + $0x70] sm:$0xff]  ;;  %7926 = vmatpush3.msra.mxu1 %v1710_v1 }
 0x221   : > { %v10554_v5 = vld [vmem:[#allocation2 + $0x74] sm:$0xff]  ;;  %7849 = vmatmul.mubr.f32.gmra.mxu1 %v1300_v3  ;;  %7927 = vmatprep.subr.mxu1 %v14391_v4  ;;  %v10702_v33 = vpop.f32.mrf.mxu0 }
 0x222   : > { %8099 = vmatmul.mubr.f32.gmra.mxu0 %v10554_v5  ;;  %783 = vrot.lane.b32.xlu1 %v10548_v2, %s9717_s25 }
 0x223   : > { %7851 = vmatprep.mubr.msk.f32.mxu1 %vm9718_vm3, %v14391_v4  ;;  %8101 = vmatprep.mubr.msk.f32.mxu0 %vm9718_vm3, %v14391_v4 }
 0x224   : > { %v1301_v10 = vld [vmem:[#allocation2 + $0x78] sm:$0xff]  ;;  %7928 = vmatpush3.msra.mxu1 %v1709_v11  ;;  %8288 = vmatprep.subr.mxu0 %v14391_v4 }
 0x225   : > { %v10567_v8 = vld [vmem:[#allocation2 + $0x7c] sm:$0xff]  ;;  %7852 = vmatmul.mubr.f32.gmra.mxu1 %v1301_v10  ;;  %7929 = vmatprep.subr.mxu1 %v14391_v4 }
 0x226   : > { %8102 = vmatmul.mubr.f32.gmra.mxu0 %v10567_v8  ;;  %7854 = vmatprep.mubr.msk.f32.mxu1 %vm9718_vm3, %v14391_v4 }
 0x227   : > { %8104 = vmatprep.mubr.msk.f32.mxu0 %vm9718_vm3, %v14391_v4  ;;  %7930 = vmatpush3.msra.mxu1 %v1708_v14  ;;  %v10712_v14 = vpop.f32.mrf.mxu0 }
 0x228   : > { %8289 = vmatpush3.msra.mxu0 %v2796_v17  ;;  %8149 = vmatprep.subr.mxu1 %v14391_v4 }
 0x229   : > { %8290 = vmatprep.subr.mxu0 %v14391_v4 }
 0x22a   : > { %8291 = vmatpush3.msra.mxu0 %v2795_v36 }
 0x22b   : > { %8292 = vmatprep.subr.mxu0 %v14391_v4 }
 0x22c   : > { %8293 = vmatpush3.msra.mxu0 %v2794_v0 }
 0x22d   : > { %8294 = vmatprep.subr.mxu0 %v14391_v4 }
 0x22e   : > { %8295 = vmatpush3.msra.mxu0 %v2793_v20  ;;  %v10722_v20 = vpop.f32.mrf.mxu0 }
 0x22f   : > { %8296 = vmatprep.subr.mxu0 %v14391_v4 }
 0x230   : > { %8297 = vmatpush3.msra.mxu0 %v2792_v19 }
 0x231   : > { %8298 = vmatprep.subr.mxu0 %v14391_v4 }
 0x232   : > { %8299 = vmatpush3.msra.mxu0 %v2791_v22 }
 0x233   : > { %8300 = vmatprep.subr.mxu0 %v14391_v4 }
 0x234   : > { %8301 = vmatpush3.msra.mxu0 %v2790_v39 }
 0x235   : > { %8302 = vmatprep.subr.mxu0 %v14391_v4 }
 0x236   : > { %8303 = vmatpush3.msra.mxu0 %v2789_v26  ;;  %v10732_v26 = vpop.f32.mrf.mxu0 }
 0x237   : > { %8304 = vmatprep.subr.mxu0 %v14391_v4 }
 0x238   : > { %8305 = vmatpush3.msra.mxu0 %v2788_v7 }
 0x239   : > { %8524 = vmatprep.subr.mxu0 %v14391_v4 }
 0x258   : > { %v1122_v16 = vpop.permute.xlu1 %1121 }
 0x259   : > { %1229 = vst.msk [vmem:[#allocation2 + $0x87] sm:$0xff] %vm1212_vm6, %v1122_v16 }
 0x25c   : > { %v1124_v25 = vpop.permute.xlu0 %1123 }
 0x25d   : > { %1230 = vst.msk [vmem:[#allocation2 + $0x8f] sm:$0xff] %vm1212_vm6, %v1124_v25 }
 0x260   : > { %v1126_v15 = vpop.permute.xlu1 %1125  ;;  %v1302_v49 = vld [vmem:[#allocation2 + $0x80] sm:$0xff] }
 0x261   : > { %v10626_v43 = vld [vmem:[#allocation2 + $0x84] sm:$0xff]  ;;  %1231 = vst.msk [vmem:[#allocation2 + $0x97] sm:$0xff] %vm1212_vm6, %v1126_v15  ;;  %7855 = vmatmul.mubr.f32.gmra.mxu1 %v1302_v49 }
 0x262   : > { %8105 = vmatmul.mubr.f32.gmra.mxu0 %v10626_v43  ;;  %7857 = vmatprep.mubr.msk.f32.mxu1 %vm9718_vm3, %v14391_v4 }
 0x263   : > { %8107 = vmatprep.mubr.msk.f32.mxu0 %vm9718_vm3, %v14391_v4 }
 0x264   : > { %v1128_v29 = vpop.permute.xlu0 %1127  ;;  %v1303_v18 = vld [vmem:[#allocation2 + $0x88] sm:$0xff] }
 0x265   : > { %v10634_v45 = vld [vmem:[#allocation2 + $0x8c] sm:$0xff]  ;;  %1232 = vst.msk [vmem:[#allocation2 + $0x9f] sm:$0xff] %vm1212_vm6, %v1128_v29  ;;  %7858 = vmatmul.mubr.f32.gmra.mxu1 %v1303_v18  ;;  %v10743_v29 = vpop.f32.mrf.mxu0 }
 0x266   : > { %8108 = vmatmul.mubr.f32.gmra.mxu0 %v10634_v45  ;;  %7860 = vmatprep.mubr.msk.f32.mxu1 %vm9718_vm3, %v14391_v4 }
 0x267   : > { %8110 = vmatprep.mubr.msk.f32.mxu0 %vm9718_vm3, %v14391_v4 }
 0x268   : > { %v1130_v47 = vpop.permute.xlu1 %1129  ;;  %v1304_v53 = vld [vmem:[#allocation2 + $0x90] sm:$0xff] }
 0x269   : > { %v10642_v32 = vld [vmem:[#allocation2 + $0x94] sm:$0xff]  ;;  %1233 = vst.msk [vmem:[#allocation2 + $0xa7] sm:$0xff] %vm1212_vm6, %v1130_v47  ;;  %7861 = vmatmul.mubr.f32.gmra.mxu1 %v1304_v53 }
 0x26a   : > { %8111 = vmatmul.mubr.f32.gmra.mxu0 %v10642_v32  ;;  %7863 = vmatprep.mubr.msk.f32.mxu1 %vm9718_vm3, %v14391_v4 }
 0x26b   : > { %8113 = vmatprep.mubr.msk.f32.mxu0 %vm9718_vm3, %v14391_v4 }
 0x26c   : > { %v1132_v40 = vpop.permute.xlu0 %1131  ;;  %v1305_v51 = vld [vmem:[#allocation2 + $0x98] sm:$0xff] }
 0x26d   : > { %v10650_v52 = vld [vmem:[#allocation2 + $0x9c] sm:$0xff]  ;;  %1234 = vst.msk [vmem:[#allocation2 + $0xaf] sm:$0xff] %vm1212_vm6, %v1132_v40  ;;  %7864 = vmatmul.mubr.f32.gmra.mxu1 %v1305_v51 }
 0x26e   : > { %8114 = vmatmul.mubr.f32.gmra.mxu0 %v10650_v52  ;;  %7866 = vmatprep.mubr.msk.f32.mxu1 %vm9718_vm3, %v14391_v4 }
 0x26f   : > { %8116 = vmatprep.mubr.msk.f32.mxu0 %vm9718_vm3, %v14391_v4 }
 0x270   : > { %v1134_v34 = vpop.permute.xlu1 %1133  ;;  %v1306_v35 = vld [vmem:[#allocation2 + $0xa0] sm:$0xff] }
 0x271   : > { %v10658_v57 = vld [vmem:[#allocation2 + $0xa4] sm:$0xff]  ;;  %1235 = vst.msk [vmem:[#allocation2 + $0xb7] sm:$0xff] %vm1212_vm6, %v1134_v34  ;;  %7867 = vmatmul.mubr.f32.gmra.mxu1 %v1306_v35  ;;  %v10753_v34 = vpop.f32.mrf.mxu0  ;;  %v10757_v35 = vmax.f32 %v10662_v54, %v10672_v55 }
 0x272   : > { %8117 = vmatmul.mubr.f32.gmra.mxu0 %v10658_v57  ;;  %7869 = vmatprep.mubr.msk.f32.mxu1 %vm9718_vm3, %v14391_v4 }
 0x273   : > { %8119 = vmatprep.mubr.msk.f32.mxu0 %vm9718_vm3, %v14391_v4  ;;  %v10768_v55 = vpop.f32.mrf.mxu0 }
 0x274   : > { %v1136_v46 = vpop.permute.xlu0 %1135  ;;  %v1307_v24 = vld [vmem:[#allocation2 + $0xa8] sm:$0xff] }
 0x275   : > { %v10668_v61 = vld [vmem:[#allocation2 + $0xac] sm:$0xff]  ;;  %1236 = vst.msk [vmem:[#allocation2 + $0xbf] sm:$0xff] %vm1212_vm6, %v1136_v46  ;;  %7870 = vmatmul.mubr.f32.gmra.mxu1 %v1307_v24 }
 0x276   : > { %8120 = vmatmul.mubr.f32.gmra.mxu0 %v10668_v61  ;;  %7872 = vmatprep.mubr.msk.f32.mxu1 %vm9718_vm3, %v14391_v4 }
 0x277   : > { %8122 = vmatprep.mubr.msk.f32.mxu0 %vm9718_vm3, %v14391_v4 }
 0x278   : > { %v1138_v62 = vpop.permute.xlu1 %1137  ;;  %v1308_v38 = vld [vmem:[#allocation2 + $0xb0] sm:$0xff] }
 0x279   : > { %v10678_v58 = vld [vmem:[#allocation2 + $0xb4] sm:$0xff]  ;;  %1237 = vst.msk [vmem:[#allocation2 + $0xc7] sm:$0xff] %vm1212_vm6, %v1138_v62  ;;  %7873 = vmatmul.mubr.f32.gmra.mxu1 %v1308_v38  ;;  %v10772_v62 = vmax.f32 %v10682_v41, %v10692_v6  ;;  %v10786_v41 = vpop.f32.mrf.mxu0  ;;  %v1647_v6 = vld [vmem:[#allocation2 + $0xa] sm:$0xff] }
 0x27a   : > { %8123 = vmatmul.mubr.f32.gmra.mxu0 %v10678_v58  ;;  %7875 = vmatprep.mubr.msk.f32.mxu1 %vm9718_vm3, %v14391_v4  ;;  %v2443_v38 = vld [vmem:[%s14361_s2 + $0x1f8] sm:$0xff] }
 0x27b   : > { %8125 = vmatprep.mubr.msk.f32.mxu0 %vm9718_vm3, %v14391_v4 }
 0x27c   : > { %v1140_v50 = vpop.permute.xlu0 %1139  ;;  %v1309_v21 = vld [vmem:[#allocation2 + $0xb8] sm:$0xff] }
 0x27d   : > { %v10688_v63 = vld [vmem:[#allocation2 + $0xbc] sm:$0xff]  ;;  %1238 = vst.msk [vmem:[#allocation2 + $0xcf] sm:$0xff] %vm1212_vm6, %v1140_v50  ;;  %7876 = vmatmul.mubr.f32.gmra.mxu1 %v1309_v21 }
 0x27e   : > { %8126 = vmatmul.mubr.f32.gmra.mxu0 %v10688_v63  ;;  %7878 = vmatprep.mubr.msk.f32.mxu1 %vm9718_vm3, %v14391_v4  ;;  %v1646_v50 = vld [vmem:[#allocation2 + $0x2] sm:$0xff]  ;;  %v3523_v21 = vld [vmem:[%s14361_s2 + $0x378] sm:$0xff] }
 0x27f   : > { %8128 = vmatprep.mubr.msk.f32.mxu0 %vm9718_vm3, %v14391_v4 }
 0x280   : > { %v1142_v1 = vpop.permute.xlu1 %1141  ;;  %v1310_v9 = vld [vmem:[#allocation2 + $0xc0] sm:$0xff] }
 0x281   : > { %v10698_v3 = vld [vmem:[#allocation2 + $0xc4] sm:$0xff]  ;;  %1239 = vst.msk [vmem:[#allocation2 + $0xd7] sm:$0xff] %vm1212_vm6, %v1142_v1  ;;  %7879 = vmatmul.mubr.f32.gmra.mxu1 %v1310_v9  ;;  %v10802_v1 = vpop.f32.mrf.mxu0  ;;  %v3522_v9 = vld [vmem:[%s14361_s2 + $0x370] sm:$0xff] }
 0x282   : > { %8129 = vmatmul.mubr.f32.gmra.mxu0 %v10698_v3  ;;  %7881 = vmatprep.mubr.msk.f32.mxu1 %vm9718_vm3, %v14391_v4  ;;  %14396 = vst [vmem:[#allocation5_spill] sm:$0xff] %v10802_v1 }
 0x283   : > { %8131 = vmatprep.mubr.msk.f32.mxu0 %vm9718_vm3, %v14391_v4 }
 0x284   : > { %v1144_v10 = vpop.permute.xlu0 %1143  ;;  %v1311_v11 = vld [vmem:[#allocation2 + $0xc8] sm:$0xff] }
 0x285   : > { %v10708_v13 = vld [vmem:[#allocation2 + $0xcc] sm:$0xff]  ;;  %1240 = vst.msk [vmem:[#allocation2 + $0xdf] sm:$0xff] %vm1212_vm6, %v1144_v10  ;;  %7882 = vmatmul.mubr.f32.gmra.mxu1 %v1311_v11  ;;  %v10820_v11 = vpop.f32.mrf.mxu0 }
 0x286   : > { %8132 = vmatmul.mubr.f32.gmra.mxu0 %v10708_v13  ;;  %7884 = vmatprep.mubr.msk.f32.mxu1 %vm9718_vm3, %v14391_v4  ;;  %v10812_v10 = vld [vmem:[#allocation2 + $0x12] sm:$0xff]  ;;  %14397 = vst [vmem:[#allocation6_spill] sm:$0xff] %v10820_v11 }
 0x287   : > { %8134 = vmatprep.mubr.msk.f32.mxu0 %vm9718_vm3, %v14391_v4 }
 0x288   : > { %v1146_v17 = vpop.permute.xlu1 %1145  ;;  %v1312_v36 = vld [vmem:[#allocation2 + $0xd0] sm:$0xff] }
 0x289   : > { %v10718_v0 = vld [vmem:[#allocation2 + $0xd4] sm:$0xff]  ;;  %1241 = vst.msk [vmem:[#allocation2 + $0xe7] sm:$0xff] %vm1212_vm6, %v1146_v17  ;;  %7885 = vmatmul.mubr.f32.gmra.mxu1 %v1312_v36  ;;  %v3521_v17 = vld [vmem:[%s14361_s2 + $0x368] sm:$0xff] }
 0x28a   : > { %8135 = vmatmul.mubr.f32.gmra.mxu0 %v10718_v0  ;;  %7887 = vmatprep.mubr.msk.f32.mxu1 %vm9718_vm3, %v14391_v4  ;;  %v10830_v36 = vld [vmem:[#allocation2 + $0x1a] sm:$0xff] }
 0x28b   : > { %8137 = vmatprep.mubr.msk.f32.mxu0 %vm9718_vm3, %v14391_v4 }
 0x28c   : > { %v1148_v19 = vpop.permute.xlu0 %1147  ;;  %v1313_v22 = vld [vmem:[#allocation2 + $0xd8] sm:$0xff] }
 0x28d   : > { %v10728_v39 = vld [vmem:[#allocation2 + $0xdc] sm:$0xff]  ;;  %1242 = vst.msk [vmem:[#allocation2 + $0xef] sm:$0xff] %vm1212_vm6, %v1148_v19  ;;  %7888 = vmatmul.mubr.f32.gmra.mxu1 %v1313_v22 }
 0x28e   : > { %8138 = vmatmul.mubr.f32.gmra.mxu0 %v10728_v39  ;;  %7890 = vmatprep.mubr.msk.f32.mxu1 %vm9718_vm3, %v14391_v4 }
 0x28f   : > { %8140 = vmatprep.mubr.msk.f32.mxu0 %vm9718_vm3, %v14391_v4 }
 0x290   : > { %v1150_v7 = vpop.permute.xlu1 %1149  ;;  %v1314_v25 = vld [vmem:[#allocation2 + $0xe0] sm:$0xff] }
 0x291   : > { %v782_v16 = vpop.permute.xlu0 %781  ;;  %v10738_v15 = vld [vmem:[#allocation2 + $0xe4] sm:$0xff]  ;;  %1243 = vst.msk [vmem:[#allocation2 + $0xf7] sm:$0xff] %vm1212_vm6, %v1150_v7  ;;  %7891 = vmatmul.mubr.f32.gmra.mxu1 %v1314_v25 }
 0x292   : > { %v872_v49 = vmax.f32 %v10526_v60, %v782_v16  ;;  %8141 = vmatmul.mubr.f32.gmra.mxu0 %v10738_v15  ;;  %7893 = vmatprep.mubr.msk.f32.mxu1 %vm9718_vm3, %v14391_v4  ;;  %v3520_v7 = vld [vmem:[%s14361_s2 + $0x360] sm:$0xff] }
 0x293   : > { %8143 = vmatprep.mubr.msk.f32.mxu0 %vm9718_vm3, %v14391_v4 }
 0x294   : > { %v954_v18 = vmul.f32 0.2, %v872_v49  ;;  %vm913_vm9 = vcmp.ge.f32.partialorder %v872_v49, 0.0  ;;  %v784_v47 = vpop.permute.xlu1 %783  ;;  %v1315_v53 = vld [vmem:[#allocation2 + $0xe8] sm:$0xff] }
 0x295   : > { %v10749_v40 = vld [vmem:[#allocation2 + $0xec] sm:$0xff]  ;;  %v873_v51 = vmax.f32 %v10548_v2, %v784_v47  ;;  %7894 = vmatmul.mubr.f32.gmra.mxu1 %v1315_v53  ;;  %v3519_v53 = vld [vmem:[%s14361_s2 + $0x358] sm:$0xff] }
 0x296   : > { %8144 = vmatmul.mubr.f32.gmra.mxu0 %v10749_v40  ;;  %v995_v60 = vsel %vm913_vm9, %v872_v49, %v954_v18  ;;  %7896 = vmatprep.mubr.msk.f32.mxu1 %vm9718_vm3, %v14391_v4  ;;  %v10850_v49 = vld [vmem:[#allocation2 + $0x22] sm:$0xff] }
 0x297   : > { %1151 = vrot.lane.b32.xlu0 %v995_v60, %s9717_s25  ;;  %1037 = vst.msk [vmem:[#allocation2 + $0x100] sm:$0xff] %vm1004_vm1, %v995_v60  ;;  %v955_v46 = vmul.f32 0.2, %v873_v51  ;;  %8146 = vmatprep.mubr.msk.f32.mxu0 %vm9718_vm3, %v14391_v4  ;;  %vm914_vm10 = vcmp.ge.f32.partialorder %v873_v51, 0.0 }
 0x298   : > { %v1316_v2 = vld [vmem:[#allocation2 + $0xf0] sm:$0xff] }
 0x299   : > { %v10765_v24 = vld [vmem:[#allocation2 + $0xf4] sm:$0xff]  ;;  %7897 = vmatmul.mubr.f32.gmra.mxu1 %v1316_v2  ;;  %v996_v54 = vsel %vm914_vm10, %v873_v51, %v955_v46  ;;  %v10870_v46 = vld [vmem:[#allocation2 + $0x2a] sm:$0xff] }
 0x29a   : > { %8147 = vmatmul.mubr.f32.gmra.mxu0 %v10765_v24  ;;  %1153 = vrot.lane.b32.xlu1 %v996_v54, %s9717_s25  ;;  %1038 = vst.msk [vmem:[#allocation2 + $0x108] sm:$0xff] %vm1004_vm1, %v996_v54 }
 0x29b   : > { %785 = vrot.lane.b32.xlu0 %v10757_v35, %s9717_s25  ;;  %7931 = vmatprep.mubr.msk.f32.mxu1 %vm9718_vm3, %v14391_v4 }
 0x29c   : > { %8306 = vmatprep.mubr.msk.f32.mxu0 %vm9718_vm3, %v14391_v4 }
 0x29d   : > { %7932 = vmatmul.mubr.f32.vlgmr.msra.gmra.mxu1 %v1646_v50 }
 0x29e   : > { %8307 = vmatmul.mubr.f32.vlgmr.msra.gmra.mxu0 %v10350_v44  ;;  %8150 = vmatpush3.msra.mxu1 %v2443_v38  ;;  %v2442_v44 = vld [vmem:[%s14361_s2 + $0x1f0] sm:$0xff] }
 0x29f   : > { %787 = vrot.lane.b32.xlu1 %v10772_v62, %s9717_s25  ;;  %7934 = vmatprep.mubr.msk.f32.mxu1 %vm9718_vm3, %v14391_v4  ;;  %v3518_v38 = vld [vmem:[%s14361_s2 + $0x350] sm:$0xff] }
 0x2a0   : > { %8309 = vmatprep.mubr.msk.f32.mxu0 %vm9718_vm3, %v14391_v4  ;;  %8151 = vmatprep.subr.mxu1 %v14391_v4 }
 0x2a1   : > { %8525 = vmatpush3.msra.mxu0 %v3523_v21  ;;  %7935 = vmatmul.mubr.f32.gmra.mxu1 %v1647_v6  ;;  %v10890_v6 = vld [vmem:[#allocation2 + $0x32] sm:$0xff] }
 0x2a2   : > { %8310 = vmatmul.mubr.f32.gmra.mxu0 %v10365_v42  ;;  %7937 = vmatprep.mubr.msk.f32.mxu1 %vm9718_vm3, %v14391_v4  ;;  %v2441_v42 = vld [vmem:[%s14361_s2 + $0x1e8] sm:$0xff] }
 0x2a3   : > { %8312 = vmatprep.mubr.msk.f32.mxu0 %vm9718_vm3, %v14391_v4  ;;  %8152 = vmatpush3.msra.mxu1 %v2442_v44 }
 0x2a4   : > { %8526 = vmatprep.subr.mxu0 %v14391_v4  ;;  %8153 = vmatprep.subr.mxu1 %v14391_v4 }
 0x2a5   : > { %8527 = vmatpush3.msra.mxu0 %v3522_v9  ;;  %7938 = vmatmul.mubr.f32.gmra.mxu1 %v10812_v10 }
 0x2a6   : > { %8313 = vmatmul.mubr.f32.gmra.mxu0 %v10380_v31  ;;  %7940 = vmatprep.mubr.msk.f32.mxu1 %vm9718_vm3, %v14391_v4  ;;  %v2440_v31 = vld [vmem:[%s14361_s2 + $0x1e0] sm:$0xff] }
 0x2a7   : > { %8315 = vmatprep.mubr.msk.f32.mxu0 %vm9718_vm3, %v14391_v4  ;;  %8154 = vmatpush3.msra.mxu1 %v2441_v42  ;;  %v3517_v42 = vld [vmem:[%s14361_s2 + $0x348] sm:$0xff] }
 0x2a8   : > { %8528 = vmatprep.subr.mxu0 %v14391_v4  ;;  %8155 = vmatprep.subr.mxu1 %v14391_v4 }
 0x2a9   : > { %8529 = vmatpush3.msra.mxu0 %v3521_v17  ;;  %v10836_v19 = vpop.f32.mrf.mxu1  ;;  %7941 = vmatmul.mubr.f32.gmra.mxu1 %v10830_v36 }
 0x2aa   : > { %v10839_v22 = vpop.f32.mrf.mxu0  ;;  %8316 = vmatmul.mubr.f32.gmra.mxu0 %v10395_v56  ;;  %7943 = vmatprep.mubr.msk.f32.mxu1 %vm9718_vm3, %v14391_v4  ;;  %v2439_v56 = vld [vmem:[%s14361_s2 + $0x1d8] sm:$0xff] }
 0x2ab   : > { %8318 = vmatprep.mubr.msk.f32.mxu0 %vm9718_vm3, %v14391_v4  ;;  %v7808_v16 = vpop.f32.mrf.mxu1  ;;  %8156 = vmatpush3.msra.mxu1 %v2440_v31 }
 0x2ac   : > { %v8058_v25 = vpop.f32.mrf.mxu0  ;;  %8530 = vmatprep.subr.mxu0 %v14391_v4  ;;  %8157 = vmatprep.subr.mxu1 %v14391_v4 }
 0x2ad   : > { %8531 = vmatpush3.msra.mxu0 %v3520_v7  ;;  %v10856_v18 = vpop.f32.mrf.mxu1  ;;  %7944 = vmatmul.mubr.f32.gmra.mxu1 %v10850_v49  ;;  %v10910_v7 = vld [vmem:[#allocation2 + $0x3a] sm:$0xff] }
 0x2ae   : > { %v10859_v47 = vpop.f32.mrf.mxu0  ;;  %8319 = vmatmul.mubr.f32.gmra.mxu0 %v10413_v27  ;;  %7946 = vmatprep.mubr.msk.f32.mxu1 %vm9718_vm3, %v14391_v4  ;;  %v2438_v27 = vld [vmem:[%s14361_s2 + $0x1d0] sm:$0xff] }
 0x2af   : > { %8321 = vmatprep.mubr.msk.f32.mxu0 %vm9718_vm3, %v14391_v4  ;;  %v7811_v51 = vpop.f32.mrf.mxu1  ;;  %8158 = vmatpush3.msra.mxu1 %v2439_v56  ;;  %v3516_v56 = vld [vmem:[%s14361_s2 + $0x340] sm:$0xff] }
 0x2b0   : > { %v8061_v60 = vpop.f32.mrf.mxu0  ;;  %8532 = vmatprep.subr.mxu0 %v14391_v4  ;;  %8159 = vmatprep.subr.mxu1 %v14391_v4 }
 0x2b1   : > { %8533 = vmatpush3.msra.mxu0 %v3519_v53  ;;  %v10876_v2 = vpop.f32.mrf.mxu1  ;;  %7947 = vmatmul.mubr.f32.gmra.mxu1 %v10870_v46  ;;  %v10930_v60 = vld [vmem:[#allocation2 + $0x42] sm:$0xff] }
 0x2b2   : > { %v10879_v54 = vpop.f32.mrf.mxu0  ;;  %8322 = vmatmul.mubr.f32.gmra.mxu0 %v10428_v59  ;;  %7949 = vmatprep.mubr.msk.f32.mxu1 %vm9718_vm3, %v14391_v4  ;;  %v2437_v59 = vld [vmem:[%s14361_s2 + $0x1c8] sm:$0xff] }
 0x2b3   : > { %8324 = vmatprep.mubr.msk.f32.mxu0 %vm9718_vm3, %v14391_v4  ;;  %v7814_v50 = vpop.f32.mrf.mxu1  ;;  %8160 = vmatpush3.msra.mxu1 %v2438_v27 }
 0x2b4   : > { %v8064_v21 = vpop.f32.mrf.mxu0  ;;  %8534 = vmatprep.subr.mxu0 %v14391_v4  ;;  %8161 = vmatprep.subr.mxu1 %v14391_v4  ;;  %v3515_v50 = vld [vmem:[%s14361_s2 + $0x338] sm:$0xff] }
 0x2b5   : > { %8535 = vmatpush3.msra.mxu0 %v3518_v38  ;;  %v10896_v44 = vpop.f32.mrf.mxu1  ;;  %7950 = vmatmul.mubr.f32.gmra.mxu1 %v10890_v6 }
 0x2b6   : > { %v10899_v9 = vpop.f32.mrf.mxu0  ;;  %8325 = vmatmul.mubr.f32.gmra.mxu0 %v10447_v28  ;;  %7952 = vmatprep.mubr.msk.f32.mxu1 %vm9718_vm3, %v14391_v4  ;;  %v2436_v28 = vld [vmem:[%s14361_s2 + $0x1c0] sm:$0xff] }
 0x2b7   : > { %8327 = vmatprep.mubr.msk.f32.mxu0 %vm9718_vm3, %v14391_v4  ;;  %v7817_v17 = vpop.f32.mrf.mxu1  ;;  %8162 = vmatpush3.msra.mxu1 %v2437_v59 }
 0x2b8   : > { %v8067_v31 = vpop.f32.mrf.mxu0  ;;  %8536 = vmatprep.subr.mxu0 %v14391_v4  ;;  %8163 = vmatprep.subr.mxu1 %v14391_v4 }
 0x2b9   : > { %8537 = vmatpush3.msra.mxu0 %v3517_v42  ;;  %v10916_v16 = vpop.f32.mrf.mxu1  ;;  %7953 = vmatmul.mubr.f32.gmra.mxu1 %v10910_v7  ;;  %v10950_v42 = vld [vmem:[#allocation2 + $0x4a] sm:$0xff] }
 0x2ba   : > { %v10919_v25 = vpop.f32.mrf.mxu0  ;;  %8328 = vmatmul.mubr.f32.gmra.mxu0 %v10462_v12  ;;  %7955 = vmatprep.mubr.msk.f32.mxu1 %vm9718_vm3, %v14391_v4  ;;  %v2435_v12 = vld [vmem:[%s14361_s2 + $0x1b8] sm:$0xff] }
 0x2bb   : > { %8330 = vmatprep.mubr.msk.f32.mxu0 %vm9718_vm3, %v14391_v4  ;;  %v7820_v53 = vpop.f32.mrf.mxu1  ;;  %8164 = vmatpush3.msra.mxu1 %v2436_v28  ;;  %v3514_v28 = vld [vmem:[%s14361_s2 + $0x330] sm:$0xff] }
 0x2bc   : > { %v8070_v51 = vpop.f32.mrf.mxu0  ;;  %8538 = vmatprep.subr.mxu0 %v14391_v4  ;;  %8165 = vmatprep.subr.mxu1 %v14391_v4 }
 0x2bd   : > { %8539 = vmatpush3.msra.mxu0 %v3516_v56  ;;  %v10936_v27 = vpop.f32.mrf.mxu1  ;;  %7956 = vmatmul.mubr.f32.gmra.mxu1 %v10930_v60  ;;  %v10970_v51 = vld [vmem:[#allocation2 + $0x52] sm:$0xff] }
 0x2be   : > { %v10939_v38 = vpop.f32.mrf.mxu0  ;;  %8331 = vmatmul.mubr.f32.gmra.mxu0 %v10481_v23  ;;  %7958 = vmatprep.mubr.msk.f32.mxu1 %vm9718_vm3, %v14391_v4  ;;  %v2434_v23 = vld [vmem:[%s14361_s2 + $0x1b0] sm:$0xff] }
 0x2bf   : > { %8333 = vmatprep.mubr.msk.f32.mxu0 %vm9718_vm3, %v14391_v4  ;;  %v7823_v21 = vpop.f32.mrf.mxu1  ;;  %8166 = vmatpush3.msra.mxu1 %v2435_v12 }
 0x2c0   : > { %v8073_v59 = vpop.f32.mrf.mxu0  ;;  %8540 = vmatprep.subr.mxu0 %v14391_v4  ;;  %8167 = vmatprep.subr.mxu1 %v14391_v4  ;;  %v3513_v21 = vld [vmem:[%s14361_s2 + $0x328] sm:$0xff] }
 0x2c1   : > { %8541 = vmatpush3.msra.mxu0 %v3515_v50  ;;  %v10956_v17 = vpop.f32.mrf.mxu1  ;;  %7959 = vmatmul.mubr.f32.gmra.mxu1 %v10950_v42 }
 0x2c2   : > { %v10959_v31 = vpop.f32.mrf.mxu0  ;;  %8334 = vmatmul.mubr.f32.gmra.mxu0 %v10496_v48  ;;  %7961 = vmatprep.mubr.msk.f32.mxu1 %vm9718_vm3, %v14391_v4  ;;  %v2433_v48 = vld [vmem:[%s14361_s2 + $0x1a8] sm:$0xff] }
 0x2c3   : > { %8336 = vmatprep.mubr.msk.f32.mxu0 %vm9718_vm3, %v14391_v4  ;;  %v7826_v56 = vpop.f32.mrf.mxu1  ;;  %8168 = vmatpush3.msra.mxu1 %v2434_v23 }
 0x2c4   : > { %v8076_v53 = vpop.f32.mrf.mxu0  ;;  %8542 = vmatprep.subr.mxu0 %v14391_v4  ;;  %8169 = vmatprep.subr.mxu1 %v14391_v4 }
 0x2c5   : > { %8543 = vmatpush3.msra.mxu0 %v3514_v28  ;;  %v10976_v12 = vpop.f32.mrf.mxu1  ;;  %7962 = vmatmul.mubr.f32.gmra.mxu1 %v10970_v51  ;;  %v10990_v28 = vld [vmem:[#allocation2 + $0x5a] sm:$0xff] }
 0x2c6   : > { %v10979_v50 = vpop.f32.mrf.mxu0  ;;  %8337 = vmatmul.mubr.f32.gmra.mxu0 %v10515_v37  ;;  %7964 = vmatprep.mubr.msk.f32.mxu1 %vm9718_vm3, %v14391_v4  ;;  %v2432_v37 = vld [vmem:[%s14361_s2 + $0x1a0] sm:$0xff] }
 0x2c7   : > { %8339 = vmatprep.mubr.msk.f32.mxu0 %vm9718_vm3, %v14391_v4  ;;  %v7829_v59 = vpop.f32.mrf.mxu1  ;;  %8170 = vmatpush3.msra.mxu1 %v2433_v48  ;;  %v3512_v48 = vld [vmem:[%s14361_s2 + $0x320] sm:$0xff] }
 0x2c8   : > { %v8079_v23 = vpop.f32.mrf.mxu0  ;;  %8544 = vmatprep.subr.mxu0 %v14391_v4  ;;  %8171 = vmatprep.subr.mxu1 %v14391_v4 }
 0x2c9   : > { %8545 = vmatpush3.msra.mxu0 %v3513_v21  ;;  %v10996_v56 = vpop.f32.mrf.mxu1  ;;  %7965 = vmatmul.mubr.f32.gmra.mxu1 %v10990_v28  ;;  %v11010_v23 = vld [vmem:[#allocation2 + $0x62] sm:$0xff] }
 0x2ca   : > { %v10999_v53 = vpop.f32.mrf.mxu0  ;;  %8340 = vmatmul.mubr.f32.gmra.mxu0 %v10532_v30  ;;  %7967 = vmatprep.mubr.msk.f32.mxu1 %vm9718_vm3, %v14391_v4  ;;  %v2431_v30 = vld [vmem:[%s14361_s2 + $0x198] sm:$0xff] }
 0x2cb   : > { %14398 = vst [vmem:[#allocation7_spill] sm:$0xff] %v10999_v53  ;;  %8342 = vmatprep.mubr.msk.f32.mxu0 %vm9718_vm3, %v14391_v4  ;;  %v7832_v59 = vpop.f32.mrf.mxu1  ;;  %8172 = vmatpush3.msra.mxu1 %v2432_v37  ;;  %v3511_v37 = vld [vmem:[%s14361_s2 + $0x318] sm:$0xff] }
 0x2cc   : > { %v8082_v21 = vpop.f32.mrf.mxu0  ;;  %8546 = vmatprep.subr.mxu0 %v14391_v4  ;;  %8173 = vmatprep.subr.mxu1 %v14391_v4 }
 0x2cd   : > { %8547 = vmatpush3.msra.mxu0 %v3512_v48  ;;  %v11016_v1 = vpop.f32.mrf.mxu1  ;;  %7968 = vmatmul.mubr.f32.gmra.mxu1 %v11010_v23  ;;  %v11030_v21 = vld [vmem:[#allocation2 + $0x6a] sm:$0xff] }
 0x2ce   : > { %v11019_v11 = vpop.f32.mrf.mxu0  ;;  %8343 = vmatmul.mubr.f32.gmra.mxu0 %v10554_v5  ;;  %7970 = vmatprep.mubr.msk.f32.mxu1 %vm9718_vm3, %v14391_v4  ;;  %v2430_v5 = vld [vmem:[%s14361_s2 + $0x190] sm:$0xff] }
 0x2cf   : > { %14399 = vst [vmem:[#allocation8_spill] sm:$0xff] %v11019_v11  ;;  %8345 = vmatprep.mubr.msk.f32.mxu0 %vm9718_vm3, %v14391_v4  ;;  %v7835_v59 = vpop.f32.mrf.mxu1  ;;  %8174 = vmatpush3.msra.mxu1 %v2431_v30  ;;  %v3510_v30 = vld [vmem:[%s14361_s2 + $0x310] sm:$0xff] }
 0x2d0   : > { %v8085_v48 = vpop.f32.mrf.mxu0  ;;  %8548 = vmatprep.subr.mxu0 %v14391_v4  ;;  %8175 = vmatprep.subr.mxu1 %v14391_v4 }
 0x2d1   : > { %8549 = vmatpush3.msra.mxu0 %v3511_v37  ;;  %v11036_v11 = vpop.f32.mrf.mxu1  ;;  %7971 = vmatmul.mubr.f32.gmra.mxu1 %v11030_v21  ;;  %v11050_v48 = vld [vmem:[#allocation2 + $0x72] sm:$0xff] }
 0x2d2   : > { %14400 = vst [vmem:[#allocation9_spill] sm:$0xff] %v11036_v11  ;;  %v11039_v53 = vpop.f32.mrf.mxu0  ;;  %8346 = vmatmul.mubr.f32.gmra.mxu0 %v10567_v8  ;;  %7973 = vmatprep.mubr.msk.f32.mxu1 %vm9718_vm3, %v14391_v4  ;;  %v2429_v8 = vld [vmem:[%s14361_s2 + $0x188] sm:$0xff] }
 0x2d3   : > { %14401 = vst [vmem:[#allocation10_spill] sm:$0xff] %v11039_v53  ;;  %8348 = vmatprep.mubr.msk.f32.mxu0 %vm9718_vm3, %v14391_v4  ;;  %v7838_v59 = vpop.f32.mrf.mxu1  ;;  %8176 = vmatpush3.msra.mxu1 %v2430_v5  ;;  %v3509_v5 = vld [vmem:[%s14361_s2 + $0x308] sm:$0xff] }
 0x2d4   : > { %v8088_v37 = vpop.f32.mrf.mxu0  ;;  %8550 = vmatprep.subr.mxu0 %v14391_v4  ;;  %8177 = vmatprep.subr.mxu1 %v14391_v4 }
 0x2d5   : > { %8551 = vmatpush3.msra.mxu0 %v3510_v30  ;;  %v11056_v53 = vpop.f32.mrf.mxu1  ;;  %7974 = vmatmul.mubr.f32.gmra.mxu1 %v11050_v48  ;;  %v11070_v37 = vld [vmem:[#allocation2 + $0x7a] sm:$0xff] }
 0x2d6   : > { %14402 = vst [vmem:[#allocation11_spill] sm:$0xff] %v11056_v53  ;;  %v11059_v11 = vpop.f32.mrf.mxu0  ;;  %8349 = vmatmul.mubr.f32.gmra.mxu0 %v10626_v43  ;;  %7976 = vmatprep.mubr.msk.f32.mxu1 %vm9718_vm3, %v14391_v4  ;;  %v2428_v43 = vld [vmem:[%s14361_s2 + $0x180] sm:$0xff] }
 0x2d7   : > { %14403 = vst [vmem:[#allocation12_spill] sm:$0xff] %v11059_v11  ;;  %8351 = vmatprep.mubr.msk.f32.mxu0 %vm9718_vm3, %v14391_v4  ;;  %v7841_v59 = vpop.f32.mrf.mxu1  ;;  %8178 = vmatpush3.msra.mxu1 %v2429_v8  ;;  %v3508_v8 = vld [vmem:[%s14361_s2 + $0x300] sm:$0xff] }
 0x2d8   : > { %v8091_v30 = vpop.f32.mrf.mxu0  ;;  %8552 = vmatprep.subr.mxu0 %v14391_v4  ;;  %8179 = vmatprep.subr.mxu1 %v14391_v4 }
 0x2d9   : > { %8553 = vmatpush3.msra.mxu0 %v3509_v5  ;;  %v11076_v11 = vpop.f32.mrf.mxu1  ;;  %7977 = vmatmul.mubr.f32.gmra.mxu1 %v11070_v37  ;;  %v11090_v30 = vld [vmem:[#allocation2 + $0x82] sm:$0xff] }
 0x2da   : > { %14404 = vst [vmem:[#allocation13_spill] sm:$0xff] %v11076_v11  ;;  %v11079_v53 = vpop.f32.mrf.mxu0  ;;  %8352 = vmatmul.mubr.f32.gmra.mxu0 %v10634_v45  ;;  %7979 = vmatprep.mubr.msk.f32.mxu1 %vm9718_vm3, %v14391_v4 }
 0x2db   : > { %14405 = vst [vmem:[#allocation14_spill] sm:$0xff] %v11079_v53  ;;  %8354 = vmatprep.mubr.msk.f32.mxu0 %vm9718_vm3, %v14391_v4  ;;  %v7844_v59 = vpop.f32.mrf.mxu1  ;;  %8180 = vmatpush3.msra.mxu1 %v2428_v43 }
 0x2dc   : > { %v8094_v5 = vpop.f32.mrf.mxu0  ;;  %8554 = vmatprep.subr.mxu0 %v14391_v4  ;;  %8399 = vmatprep.subr.mxu1 %v14391_v4 }
 0x2dd   : > { %8555 = vmatpush3.msra.mxu0 %v3508_v8  ;;  %v11093_v45 = vpop.f32.mrf.mxu1  ;;  %7980 = vmatmul.mubr.f32.gmra.mxu1 %v11090_v30  ;;  %v11104_v5 = vld [vmem:[#allocation2 + $0x8a] sm:$0xff] }
 0x2de   : > { %14406 = vst [vmem:[#allocation15_spill] sm:$0xff] %v11093_v45  ;;  %v11096_v53 = vpop.f32.mrf.mxu0  ;;  %8355 = vmatmul.mubr.f32.gmra.mxu0 %v10642_v32  ;;  %7982 = vmatprep.mubr.msk.f32.mxu1 %vm9718_vm3, %v14391_v4 }
 0x2df   : > { %14407 = vst [vmem:[#allocation16_spill] sm:$0xff] %v11096_v53  ;;  %8357 = vmatprep.mubr.msk.f32.mxu0 %vm9718_vm3, %v14391_v4  ;;  %v7847_v43 = vpop.f32.mrf.mxu1  ;;  %8774 = vmatprep.subr.mxu0 %v14391_v4 }
 0x2e0   : > { %v8097_v59 = vpop.f32.mrf.mxu0 }
 0x2e1   : > { %v11106_v8 = vpop.f32.mrf.mxu1  ;;  %7983 = vmatmul.mubr.f32.gmra.mxu1 %v11104_v5  ;;  %v11116_v59 = vld [vmem:[#allocation2 + $0x92] sm:$0xff] }
 0x2e2   : > { %14408 = vst [vmem:[#allocation17_spill] sm:$0xff] %v11106_v8  ;;  %v11109_v45 = vpop.f32.mrf.mxu0  ;;  %8358 = vmatmul.mubr.f32.gmra.mxu0 %v10650_v52  ;;  %7985 = vmatprep.mubr.msk.f32.mxu1 %vm9718_vm3, %v14391_v4 }
 0x2e3   : > { %14409 = vst [vmem:[#allocation18_spill] sm:$0xff] %v11109_v45  ;;  %8360 = vmatprep.mubr.msk.f32.mxu0 %vm9718_vm3, %v14391_v4  ;;  %v7850_v32 = vpop.f32.mrf.mxu1 }
 0x2e4   : > { %v8100_v43 = vpop.f32.mrf.mxu0  ;;  %v11128_v32 = vld [vmem:[#allocation2 + $0x9a] sm:$0xff] }
 0x2e5   : > { %v11118_v53 = vpop.f32.mrf.mxu1  ;;  %7986 = vmatmul.mubr.f32.gmra.mxu1 %v11116_v59 }
 0x2e6   : > { %14410 = vst [vmem:[#allocation19_spill] sm:$0xff] %v11118_v53  ;;  %v11121_v8 = vpop.f32.mrf.mxu0  ;;  %8361 = vmatmul.mubr.f32.gmra.mxu0 %v10658_v57  ;;  %7988 = vmatprep.mubr.msk.f32.mxu1 %vm9718_vm3, %v14391_v4  ;;  %v11136_v57 = vld [vmem:[#allocation2 + $0xa2] sm:$0xff]  ;;  %v11211_v53 = vld [vmem:[#allocation2 + $0xea] sm:$0xff] }
 0x2e7   : > { %14411 = vst [vmem:[#allocation20_spill] sm:$0xff] %v11121_v8  ;;  %8363 = vmatprep.mubr.msk.f32.mxu0 %vm9718_vm3, %v14391_v4  ;;  %v7853_v52 = vpop.f32.mrf.mxu1 }
 0x2e8   : > { %v8103_v45 = vpop.f32.mrf.mxu0  ;;  %v11201_v52 = vld [vmem:[#allocation2 + $0xe2] sm:$0xff] }
 0x2e9   : > { %7989 = vmatmul.mubr.f32.gmra.mxu1 %v11128_v32  ;;  %v11144_v45 = vld [vmem:[#allocation2 + $0xaa] sm:$0xff] }
 0x2ea   : > { %8364 = vmatmul.mubr.f32.gmra.mxu0 %v10668_v61  ;;  %7991 = vmatprep.mubr.msk.f32.mxu1 %vm9718_vm3, %v14391_v4  ;;  %v11152_v61 = vld [vmem:[#allocation2 + $0xb2] sm:$0xff] }
 0x2eb   : > { %8366 = vmatprep.mubr.msk.f32.mxu0 %vm9718_vm3, %v14391_v4 }
 0x2ed   : > { %7992 = vmatmul.mubr.f32.gmra.mxu1 %v11136_v57 }
 0x2ee   : > { %8367 = vmatmul.mubr.f32.gmra.mxu0 %v10678_v58  ;;  %7994 = vmatprep.mubr.msk.f32.mxu1 %vm9718_vm3, %v14391_v4  ;;  %v11160_v58 = vld [vmem:[#allocation2 + $0xba] sm:$0xff] }
 0x2ef   : > { %8369 = vmatprep.mubr.msk.f32.mxu0 %vm9718_vm3, %v14391_v4 }
 0x2f1   : > { %7995 = vmatmul.mubr.f32.gmra.mxu1 %v11144_v45 }
 0x2f2   : > { %8370 = vmatmul.mubr.f32.gmra.mxu0 %v10688_v63  ;;  %7997 = vmatprep.mubr.msk.f32.mxu1 %vm9718_vm3, %v14391_v4  ;;  %v11168_v63 = vld [vmem:[#allocation2 + $0xc2] sm:$0xff] }
 0x2f3   : > { %8372 = vmatprep.mubr.msk.f32.mxu0 %vm9718_vm3, %v14391_v4 }
 0x2f5   : > { %7998 = vmatmul.mubr.f32.gmra.mxu1 %v11152_v61 }
 0x2f6   : > { %8373 = vmatmul.mubr.f32.gmra.mxu0 %v10698_v3  ;;  %8000 = vmatprep.mubr.msk.f32.mxu1 %vm9718_vm3, %v14391_v4  ;;  %v11176_v3 = vld [vmem:[#allocation2 + $0xca] sm:$0xff] }
 0x2f7   : > { %8375 = vmatprep.mubr.msk.f32.mxu0 %vm9718_vm3, %v14391_v4 }
 0x2f9   : > { %8001 = vmatmul.mubr.f32.gmra.mxu1 %v11160_v58 }
 0x2fa   : > { %8376 = vmatmul.mubr.f32.gmra.mxu0 %v10708_v13  ;;  %8003 = vmatprep.mubr.msk.f32.mxu1 %vm9718_vm3, %v14391_v4  ;;  %v11184_v13 = vld [vmem:[#allocation2 + $0xd2] sm:$0xff] }
 0x2fb   : > { %8378 = vmatprep.mubr.msk.f32.mxu0 %vm9718_vm3, %v14391_v4 }
 0x2fd   : > { %8004 = vmatmul.mubr.f32.gmra.mxu1 %v11168_v63 }
 0x2fe   : > { %8379 = vmatmul.mubr.f32.gmra.mxu0 %v10718_v0  ;;  %8006 = vmatprep.mubr.msk.f32.mxu1 %vm9718_vm3, %v14391_v4 }
 0x2ff   : > { %8381 = vmatprep.mubr.msk.f32.mxu0 %vm9718_vm3, %v14391_v4 }
 0x301   : > { %8007 = vmatmul.mubr.f32.gmra.mxu1 %v11176_v3 }
 0x302   : > { %8382 = vmatmul.mubr.f32.gmra.mxu0 %v10728_v39  ;;  %8009 = vmatprep.mubr.msk.f32.mxu1 %vm9718_vm3, %v14391_v4  ;;  %v11192_v39 = vld [vmem:[#allocation2 + $0xda] sm:$0xff] }
 0x303   : > { %8384 = vmatprep.mubr.msk.f32.mxu0 %vm9718_vm3, %v14391_v4 }
 0x305   : > { %8010 = vmatmul.mubr.f32.gmra.mxu1 %v11184_v13 }
 0x306   : > { %8385 = vmatmul.mubr.f32.gmra.mxu0 %v10738_v15  ;;  %8012 = vmatprep.mubr.msk.f32.mxu1 %vm9718_vm3, %v14391_v4 }
 0x307   : > { %8387 = vmatprep.mubr.msk.f32.mxu0 %vm9718_vm3, %v14391_v4 }
 0x309   : > { %v1152_v0 = vpop.permute.xlu0 %1151  ;;  %8013 = vmatmul.mubr.f32.gmra.mxu1 %v11192_v39 }
 0x30a   : > { %1244 = vst.msk [vmem:[#allocation2 + $0xff] sm:$0xff] %vm1212_vm6, %v1152_v0  ;;  %8388 = vmatmul.mubr.f32.gmra.mxu0 %v10749_v40  ;;  %8015 = vmatprep.mubr.msk.f32.mxu1 %vm9718_vm3, %v14391_v4 }
 0x30b   : > { %8390 = vmatprep.mubr.msk.f32.mxu0 %vm9718_vm3, %v14391_v4 }
 0x30c   : > { %v1154_v15 = vpop.permute.xlu1 %1153 }
 0x30d   : > { %v786_v43 = vpop.permute.xlu0 %785  ;;  %1245 = vst.msk [vmem:[#allocation2 + $0x107] sm:$0xff] %vm1212_vm6, %v1154_v15  ;;  %8016 = vmatmul.mubr.f32.gmra.mxu1 %v11201_v52 }
 0x30e   : > { %v874_v8 = vmax.f32 %v10757_v35, %v786_v43  ;;  %8391 = vmatmul.mubr.f32.gmra.mxu0 %v10765_v24  ;;  %8018 = vmatprep.mubr.msk.f32.mxu1 %vm9718_vm3, %v14391_v4  ;;  %v11220_v24 = vmax.f32 %v10702_v33, %v10712_v14  ;;  %v11236_v14 = vmax.f32 %v10722_v20, %v10732_v26  ;;  %v4243_v20 = vld [vmem:[%s14361_s2 + $0x478] sm:$0xff]  ;;  %v3447_v26 = vld [vmem:[#allocation2 + $0x2c] sm:$0xff] }
 0x30f   : > { %8393 = vmatprep.mubr.msk.f32.mxu0 %vm9718_vm3, %v14391_v4 }
 0x310   : > { %v956_v40 = vmul.f32 0.2, %v874_v8  ;;  %vm915_vm11 = vcmp.ge.f32.partialorder %v874_v8, 0.0 }
 0x311   : > { %v788_v0 = vpop.permute.xlu1 %787  ;;  %v11213_v11 = vld [vmem:[#allocation2 + $0xfc] sm:$0xff]  ;;  %8019 = vmatmul.mubr.f32.gmra.mxu1 %v11211_v53 }
 0x312   : > { %v875_v15 = vmax.f32 %v10772_v62, %v788_v0  ;;  %8394 = vmatmul.mubr.f32.gmra.mxu0 %v11213_v11  ;;  %v997_v35 = vsel %vm915_vm11, %v874_v8, %v956_v40  ;;  %8021 = vmatprep.mubr.msk.f32.mxu1 %vm9718_vm3, %v14391_v4  ;;  %v11228_v62 = vld [vmem:[#allocation2 + $0xf2] sm:$0xff]  ;;  %v3446_v40 = vld [vmem:[#allocation2 + $0x24] sm:$0xff] }
 0x313   : > { %1155 = vrot.lane.b32.xlu0 %v997_v35, %s9717_s25  ;;  %1039 = vst.msk [vmem:[#allocation2 + $0x110] sm:$0xff] %vm1004_vm1, %v997_v35  ;;  %8396 = vmatprep.mubr.msk.f32.mxu0 %vm9718_vm3, %v14391_v4  ;;  %v3163_v8 = vld [vmem:[%s14361_s2 + $0x2f8] sm:$0xff] }
 0x314   : > { %v957_v43 = vmul.f32 0.2, %v875_v15  ;;  %vm916_vm12 = vcmp.ge.f32.partialorder %v875_v15, 0.0  ;;  %v11230_v0 = vld [vmem:[#allocation2 + $0x104] sm:$0xff]  ;;  %v3448_v35 = vld [vmem:[#allocation2 + $0x34] sm:$0xff] }
 0x315   : > { %8022 = vmatmul.mubr.f32.gmra.mxu1 %v11228_v62 }
 0x316   : > { %8397 = vmatmul.mubr.f32.gmra.mxu0 %v11230_v0  ;;  %v998_v33 = vsel %vm916_vm12, %v875_v15, %v957_v43  ;;  %8181 = vmatprep.mubr.msk.f32.mxu1 %vm9718_vm3, %v14391_v4  ;;  %v4242_v15 = vld [vmem:[%s14361_s2 + $0x470] sm:$0xff] }
 0x317   : > { %1157 = vrot.lane.b32.xlu1 %v998_v33, %s9717_s25  ;;  %1040 = vst.msk [vmem:[#allocation2 + $0x118] sm:$0xff] %vm1004_vm1, %v998_v33  ;;  %789 = vrot.lane.b32.xlu0 %v11220_v24, %s9717_s25 }
 0x318   : > { %8556 = vmatprep.mubr.msk.f32.mxu0 %vm9718_vm3, %v14391_v4 }
 0x319   : > { %8182 = vmatmul.mubr.f32.vlgmr.msra.gmra.mxu1 %v10812_v10  ;;  %v3162_v10 = vld [vmem:[%s14361_s2 + $0x2f0] sm:$0xff] }
 0x31a   : > { %8557 = vmatmul.mubr.f32.vlgmr.msra.gmra.mxu0 %v3446_v40  ;;  %8400 = vmatpush3.msra.mxu1 %v3163_v8  ;;  %v4241_v8 = vld [vmem:[%s14361_s2 + $0x468] sm:$0xff] }
 0x31b   : > { %791 = vrot.lane.b32.xlu0 %v11236_v14, %s9717_s25  ;;  %8184 = vmatprep.mubr.msk.f32.mxu1 %vm9718_vm3, %v14391_v4 }
 0x31c   : > { %8559 = vmatprep.mubr.msk.f32.mxu0 %vm9718_vm3, %v14391_v4  ;;  %8401 = vmatprep.subr.mxu1 %v14391_v4 }
 0x31d   : > { %8775 = vmatpush3.msra.mxu0 %v4243_v20  ;;  %8185 = vmatmul.mubr.f32.gmra.mxu1 %v10830_v36  ;;  %v3161_v36 = vld [vmem:[%s14361_s2 + $0x2e8] sm:$0xff] }
 0x31e   : > { %8560 = vmatmul.mubr.f32.gmra.mxu0 %v3447_v26  ;;  %8187 = vmatprep.mubr.msk.f32.mxu1 %vm9718_vm3, %v14391_v4  ;;  %v3449_v26 = vld [vmem:[#allocation2 + $0x3c] sm:$0xff] }
 0x31f   : > { %8562 = vmatprep.mubr.msk.f32.mxu0 %vm9718_vm3, %v14391_v4  ;;  %8402 = vmatpush3.msra.mxu1 %v3162_v10 }
 0x320   : > { %8776 = vmatprep.subr.mxu0 %v14391_v4  ;;  %8403 = vmatprep.subr.mxu1 %v14391_v4 }
 0x321   : > { %8777 = vmatpush3.msra.mxu0 %v4242_v15  ;;  %v11276_v43 = vpop.f32.mrf.mxu1  ;;  %8188 = vmatmul.mubr.f32.gmra.mxu1 %v10850_v49  ;;  %v3160_v49 = vld [vmem:[%s14361_s2 + $0x2e0] sm:$0xff] }
 0x322   : > { %v11278_v33 = vpop.f32.mrf.mxu0  ;;  %8563 = vmatmul.mubr.f32.gmra.mxu0 %v3448_v35  ;;  %8190 = vmatprep.mubr.msk.f32.mxu1 %vm9718_vm3, %v14391_v4  ;;  %v4240_v35 = vld [vmem:[%s14361_s2 + $0x460] sm:$0xff] }
 0x323   : > { %8565 = vmatprep.mubr.msk.f32.mxu0 %vm9718_vm3, %v14391_v4  ;;  %v7856_v40 = vpop.f32.mrf.mxu1  ;;  %8404 = vmatpush3.msra.mxu1 %v3161_v36 }
 0x324   : > { %v8106_v20 = vpop.f32.mrf.mxu0  ;;  %8778 = vmatprep.subr.mxu0 %v14391_v4  ;;  %8405 = vmatprep.subr.mxu1 %v14391_v4 }
 0x325   : > { %8779 = vmatpush3.msra.mxu0 %v4241_v8  ;;  %v11293_v10 = vpop.f32.mrf.mxu1  ;;  %8191 = vmatmul.mubr.f32.gmra.mxu1 %v10870_v46  ;;  %v3450_v8 = vld [vmem:[#allocation2 + $0x44] sm:$0xff]  ;;  %v3159_v46 = vld [vmem:[%s14361_s2 + $0x2d8] sm:$0xff] }
 0x326   : > { %v11295_v15 = vpop.f32.mrf.mxu0  ;;  %8566 = vmatmul.mubr.f32.gmra.mxu0 %v3449_v26  ;;  %8193 = vmatprep.mubr.msk.f32.mxu1 %vm9718_vm3, %v14391_v4 }
 0x327   : > { %8568 = vmatprep.mubr.msk.f32.mxu0 %vm9718_vm3, %v14391_v4  ;;  %v7859_v36 = vpop.f32.mrf.mxu1  ;;  %8406 = vmatpush3.msra.mxu1 %v3160_v49  ;;  %v4239_v49 = vld [vmem:[%s14361_s2 + $0x458] sm:$0xff] }
 0x328   : > { %v8109_v40 = vpop.f32.mrf.mxu0  ;;  %8780 = vmatprep.subr.mxu0 %v14391_v4  ;;  %8407 = vmatprep.subr.mxu1 %v14391_v4 }
 0x329   : > { %8781 = vmatpush3.msra.mxu0 %v4240_v35  ;;  %v11310_v20 = vpop.f32.mrf.mxu1  ;;  %8194 = vmatmul.mubr.f32.gmra.mxu1 %v10890_v6  ;;  %v3451_v35 = vld [vmem:[#allocation2 + $0x4c] sm:$0xff] }
 0x32a   : > { %v11312_v26 = vpop.f32.mrf.mxu0  ;;  %8569 = vmatmul.mubr.f32.gmra.mxu0 %v3450_v8  ;;  %8196 = vmatprep.mubr.msk.f32.mxu1 %vm9718_vm3, %v14391_v4  ;;  %v3158_v6 = vld [vmem:[%s14361_s2 + $0x2d0] sm:$0xff] }
 0x32b   : > { %14412 = vst [vmem:[#allocation21_spill] sm:$0xff] %v11312_v26  ;;  %8571 = vmatprep.mubr.msk.f32.mxu0 %vm9718_vm3, %v14391_v4  ;;  %v7862_v36 = vpop.f32.mrf.mxu1  ;;  %8408 = vmatpush3.msra.mxu1 %v3159_v46  ;;  %v4238_v46 = vld [vmem:[%s14361_s2 + $0x450] sm:$0xff] }
 0x32c   : > { %v8112_v40 = vpop.f32.mrf.mxu0  ;;  %8782 = vmatprep.subr.mxu0 %v14391_v4  ;;  %8409 = vmatprep.subr.mxu1 %v14391_v4 }
 0x32d   : > { %8783 = vmatpush3.msra.mxu0 %v4239_v49  ;;  %v11327_v8 = vpop.f32.mrf.mxu1  ;;  %8197 = vmatmul.mubr.f32.gmra.mxu1 %v10910_v7  ;;  %v3452_v49 = vld [vmem:[#allocation2 + $0x54] sm:$0xff]  ;;  %v3157_v7 = vld [vmem:[%s14361_s2 + $0x2c8] sm:$0xff] }
 0x32e   : > { %v11329_v26 = vpop.f32.mrf.mxu0  ;;  %8572 = vmatmul.mubr.f32.gmra.mxu0 %v3451_v35  ;;  %8199 = vmatprep.mubr.msk.f32.mxu1 %vm9718_vm3, %v14391_v4 }
 0x32f   : > { %14413 = vst [vmem:[#allocation22_spill] sm:$0xff] %v11329_v26  ;;  %8574 = vmatprep.mubr.msk.f32.mxu0 %vm9718_vm3, %v14391_v4  ;;  %v7865_v36 = vpop.f32.mrf.mxu1  ;;  %8410 = vmatpush3.msra.mxu1 %v3158_v6  ;;  %v4237_v6 = vld [vmem:[%s14361_s2 + $0x448] sm:$0xff] }
 0x330   : > { %v8115_v40 = vpop.f32.mrf.mxu0  ;;  %8784 = vmatprep.subr.mxu0 %v14391_v4  ;;  %8411 = vmatprep.subr.mxu1 %v14391_v4 }
 0x331   : > { %8785 = vmatpush3.msra.mxu0 %v4238_v46  ;;  %v11344_v35 = vpop.f32.mrf.mxu1  ;;  %8200 = vmatmul.mubr.f32.gmra.mxu1 %v10930_v60  ;;  %v3453_v46 = vld [vmem:[#allocation2 + $0x5c] sm:$0xff] }
 0x332   : > { %14414 = vst [vmem:[#allocation23_spill] sm:$0xff] %v11344_v35  ;;  %v11346_v26 = vpop.f32.mrf.mxu0  ;;  %8575 = vmatmul.mubr.f32.gmra.mxu0 %v3452_v49  ;;  %8202 = vmatprep.mubr.msk.f32.mxu1 %vm9718_vm3, %v14391_v4  ;;  %v3156_v60 = vld [vmem:[%s14361_s2 + $0x2c0] sm:$0xff] }
 0x333   : > { %14415 = vst [vmem:[#allocation24_spill] sm:$0xff] %v11346_v26  ;;  %8577 = vmatprep.mubr.msk.f32.mxu0 %vm9718_vm3, %v14391_v4  ;;  %v7868_v36 = vpop.f32.mrf.mxu1  ;;  %8412 = vmatpush3.msra.mxu1 %v3157_v7  ;;  %v4236_v7 = vld [vmem:[%s14361_s2 + $0x440] sm:$0xff] }
 0x334   : > { %v8118_v40 = vpop.f32.mrf.mxu0  ;;  %8786 = vmatprep.subr.mxu0 %v14391_v4  ;;  %8413 = vmatprep.subr.mxu1 %v14391_v4 }
 0x335   : > { %8787 = vmatpush3.msra.mxu0 %v4237_v6  ;;  %v11361_v49 = vpop.f32.mrf.mxu1  ;;  %8203 = vmatmul.mubr.f32.gmra.mxu1 %v10950_v42  ;;  %v3454_v6 = vld [vmem:[#allocation2 + $0x64] sm:$0xff]  ;;  %v3155_v42 = vld [vmem:[%s14361_s2 + $0x2b8] sm:$0xff] }
 0x336   : > { %14416 = vst [vmem:[#allocation25_spill] sm:$0xff] %v11361_v49  ;;  %v11363_v26 = vpop.f32.mrf.mxu0  ;;  %8578 = vmatmul.mubr.f32.gmra.mxu0 %v3453_v46  ;;  %8205 = vmatprep.mubr.msk.f32.mxu1 %vm9718_vm3, %v14391_v4 }
 0x337   : > { %14417 = vst [vmem:[#allocation26_spill] sm:$0xff] %v11363_v26  ;;  %8580 = vmatprep.mubr.msk.f32.mxu0 %vm9718_vm3, %v14391_v4  ;;  %v7871_v36 = vpop.f32.mrf.mxu1  ;;  %8414 = vmatpush3.msra.mxu1 %v3156_v60  ;;  %v4235_v60 = vld [vmem:[%s14361_s2 + $0x438] sm:$0xff] }
 0x338   : > { %v8121_v40 = vpop.f32.mrf.mxu0  ;;  %8788 = vmatprep.subr.mxu0 %v14391_v4  ;;  %8415 = vmatprep.subr.mxu1 %v14391_v4 }
 0x339   : > { %8789 = vmatpush3.msra.mxu0 %v4236_v7  ;;  %v11378_v46 = vpop.f32.mrf.mxu1  ;;  %8206 = vmatmul.mubr.f32.gmra.mxu1 %v10970_v51  ;;  %v3455_v7 = vld [vmem:[#allocation2 + $0x6c] sm:$0xff] }
 0x33a   : > { %14418 = vst [vmem:[#allocation27_spill] sm:$0xff] %v11378_v46  ;;  %v11380_v26 = vpop.f32.mrf.mxu0  ;;  %8581 = vmatmul.mubr.f32.gmra.mxu0 %v3454_v6  ;;  %8208 = vmatprep.mubr.msk.f32.mxu1 %vm9718_vm3, %v14391_v4  ;;  %v3154_v51 = vld [vmem:[%s14361_s2 + $0x2b0] sm:$0xff]  ;;  %v3877_v46 = vld [vmem:[%s14361_s2 + $0x3c8] sm:$0xff] }
 0x33b   : > { %14419 = vst [vmem:[#allocation28_spill] sm:$0xff] %v11380_v26  ;;  %8583 = vmatprep.mubr.msk.f32.mxu0 %vm9718_vm3, %v14391_v4  ;;  %v7874_v36 = vpop.f32.mrf.mxu1  ;;  %8416 = vmatpush3.msra.mxu1 %v3155_v42  ;;  %v4234_v42 = vld [vmem:[%s14361_s2 + $0x430] sm:$0xff] }
 0x33c   : > { %v8124_v40 = vpop.f32.mrf.mxu0  ;;  %8790 = vmatprep.subr.mxu0 %v14391_v4  ;;  %8417 = vmatprep.subr.mxu1 %v14391_v4 }
 0x33d   : > { %8791 = vmatpush3.msra.mxu0 %v4235_v60  ;;  %v11395_v6 = vpop.f32.mrf.mxu1  ;;  %8209 = vmatmul.mubr.f32.gmra.mxu1 %v10990_v28  ;;  %v3456_v60 = vld [vmem:[#allocation2 + $0x74] sm:$0xff]  ;;  %v3153_v28 = vld [vmem:[%s14361_s2 + $0x2a8] sm:$0xff] }
 0x33e   : > { %14420 = vst [vmem:[#allocation29_spill] sm:$0xff] %v11395_v6  ;;  %v11397_v26 = vpop.f32.mrf.mxu0  ;;  %8584 = vmatmul.mubr.f32.gmra.mxu0 %v3455_v7  ;;  %8211 = vmatprep.mubr.msk.f32.mxu1 %vm9718_vm3, %v14391_v4 }
 0x33f   : > { %14421 = vst [vmem:[#allocation30_spill] sm:$0xff] %v11397_v26  ;;  %8586 = vmatprep.mubr.msk.f32.mxu0 %vm9718_vm3, %v14391_v4  ;;  %v7877_v36 = vpop.f32.mrf.mxu1  ;;  %8418 = vmatpush3.msra.mxu1 %v3154_v51  ;;  %v4233_v51 = vld [vmem:[%s14361_s2 + $0x428] sm:$0xff] }
 0x340   : > { %v8127_v40 = vpop.f32.mrf.mxu0  ;;  %8792 = vmatprep.subr.mxu0 %v14391_v4  ;;  %8419 = vmatprep.subr.mxu1 %v14391_v4 }
 0x341   : > { %8793 = vmatpush3.msra.mxu0 %v4234_v42  ;;  %v11412_v7 = vpop.f32.mrf.mxu1  ;;  %8212 = vmatmul.mubr.f32.gmra.mxu1 %v11010_v23  ;;  %v3457_v42 = vld [vmem:[#allocation2 + $0x7c] sm:$0xff] }
 0x342   : > { %14422 = vst [vmem:[#allocation31_spill] sm:$0xff] %v11412_v7  ;;  %v11414_v26 = vpop.f32.mrf.mxu0  ;;  %8587 = vmatmul.mubr.f32.gmra.mxu0 %v3456_v60  ;;  %8214 = vmatprep.mubr.msk.f32.mxu1 %vm9718_vm3, %v14391_v4  ;;  %v3152_v23 = vld [vmem:[%s14361_s2 + $0x2a0] sm:$0xff] }
 0x343   : > { %14423 = vst [vmem:[#allocation32_spill] sm:$0xff] %v11414_v26  ;;  %8589 = vmatprep.mubr.msk.f32.mxu0 %vm9718_vm3, %v14391_v4  ;;  %v7880_v36 = vpop.f32.mrf.mxu1  ;;  %8420 = vmatpush3.msra.mxu1 %v3153_v28  ;;  %v4232_v28 = vld [vmem:[%s14361_s2 + $0x420] sm:$0xff] }
 0x344   : > { %v8130_v40 = vpop.f32.mrf.mxu0  ;;  %8794 = vmatprep.subr.mxu0 %v14391_v4  ;;  %8421 = vmatprep.subr.mxu1 %v14391_v4 }
 0x345   : > { %8795 = vmatpush3.msra.mxu0 %v4233_v51  ;;  %v11429_v60 = vpop.f32.mrf.mxu1  ;;  %8215 = vmatmul.mubr.f32.gmra.mxu1 %v11030_v21  ;;  %v3458_v51 = vld [vmem:[#allocation2 + $0x84] sm:$0xff]  ;;  %v3151_v21 = vld [vmem:[%s14361_s2 + $0x298] sm:$0xff] }
 0x346   : > { %14424 = vst [vmem:[#allocation33_spill] sm:$0xff] %v11429_v60  ;;  %v11431_v26 = vpop.f32.mrf.mxu0  ;;  %8590 = vmatmul.mubr.f32.gmra.mxu0 %v3457_v42  ;;  %8217 = vmatprep.mubr.msk.f32.mxu1 %vm9718_vm3, %v14391_v4  ;;  %v3878_v60 = vld [vmem:[%s14361_s2 + $0x3d0] sm:$0xff] }
 0x347   : > { %14425 = vst [vmem:[#allocation34_spill] sm:$0xff] %v11431_v26  ;;  %8592 = vmatprep.mubr.msk.f32.mxu0 %vm9718_vm3, %v14391_v4  ;;  %v7883_v36 = vpop.f32.mrf.mxu1  ;;  %8422 = vmatpush3.msra.mxu1 %v3152_v23  ;;  %v4231_v23 = vld [vmem:[%s14361_s2 + $0x418] sm:$0xff] }
 0x348   : > { %v8133_v40 = vpop.f32.mrf.mxu0  ;;  %8796 = vmatprep.subr.mxu0 %v14391_v4  ;;  %8423 = vmatprep.subr.mxu1 %v14391_v4 }
 0x349   : > { %8797 = vmatpush3.msra.mxu0 %v4232_v28  ;;  %v11446_v42 = vpop.f32.mrf.mxu1  ;;  %8218 = vmatmul.mubr.f32.gmra.mxu1 %v11050_v48  ;;  %v3459_v28 = vld [vmem:[#allocation2 + $0x8c] sm:$0xff] }
 0x34a   : > { %14426 = vst [vmem:[#allocation35_spill] sm:$0xff] %v11446_v42  ;;  %v11448_v26 = vpop.f32.mrf.mxu0  ;;  %8593 = vmatmul.mubr.f32.gmra.mxu0 %v3458_v51  ;;  %8220 = vmatprep.mubr.msk.f32.mxu1 %vm9718_vm3, %v14391_v4  ;;  %v3150_v48 = vld [vmem:[%s14361_s2 + $0x290] sm:$0xff] }
 0x34b   : > { %14427 = vst [vmem:[#allocation36_spill] sm:$0xff] %v11448_v26  ;;  %8595 = vmatprep.mubr.msk.f32.mxu0 %vm9718_vm3, %v14391_v4  ;;  %v7886_v36 = vpop.f32.mrf.mxu1  ;;  %8424 = vmatpush3.msra.mxu1 %v3151_v21  ;;  %v4230_v21 = vld [vmem:[%s14361_s2 + $0x410] sm:$0xff] }
 0x34c   : > { %v8136_v40 = vpop.f32.mrf.mxu0  ;;  %8798 = vmatprep.subr.mxu0 %v14391_v4  ;;  %8425 = vmatprep.subr.mxu1 %v14391_v4 }
 0x34d   : > { %8799 = vmatpush3.msra.mxu0 %v4231_v23  ;;  %v11463_v51 = vpop.f32.mrf.mxu1  ;;  %8221 = vmatmul.mubr.f32.gmra.mxu1 %v11070_v37  ;;  %v3460_v23 = vld [vmem:[#allocation2 + $0x94] sm:$0xff]  ;;  %v3149_v37 = vld [vmem:[%s14361_s2 + $0x288] sm:$0xff] }
 0x34e   : > { %14428 = vst [vmem:[#allocation37_spill] sm:$0xff] %v11463_v51  ;;  %v11465_v26 = vpop.f32.mrf.mxu0  ;;  %8596 = vmatmul.mubr.f32.gmra.mxu0 %v3459_v28  ;;  %8223 = vmatprep.mubr.msk.f32.mxu1 %vm9718_vm3, %v14391_v4 }
 0x34f   : > { %14429 = vst [vmem:[#allocation38_spill] sm:$0xff] %v11465_v26  ;;  %8598 = vmatprep.mubr.msk.f32.mxu0 %vm9718_vm3, %v14391_v4  ;;  %v7889_v36 = vpop.f32.mrf.mxu1  ;;  %8426 = vmatpush3.msra.mxu1 %v3150_v48  ;;  %v4229_v48 = vld [vmem:[%s14361_s2 + $0x408] sm:$0xff] }
 0x350   : > { %v8139_v40 = vpop.f32.mrf.mxu0  ;;  %8800 = vmatprep.subr.mxu0 %v14391_v4  ;;  %8427 = vmatprep.subr.mxu1 %v14391_v4 }
 0x351   : > { %8801 = vmatpush3.msra.mxu0 %v4230_v21  ;;  %v11480_v28 = vpop.f32.mrf.mxu1  ;;  %8224 = vmatmul.mubr.f32.gmra.mxu1 %v11090_v30  ;;  %v3461_v21 = vld [vmem:[#allocation2 + $0x9c] sm:$0xff] }
 0x352   : > { %14430 = vst [vmem:[#allocation39_spill] sm:$0xff] %v11480_v28  ;;  %v11482_v26 = vpop.f32.mrf.mxu0  ;;  %8599 = vmatmul.mubr.f32.gmra.mxu0 %v3460_v23  ;;  %8226 = vmatprep.mubr.msk.f32.mxu1 %vm9718_vm3, %v14391_v4  ;;  %v3148_v30 = vld [vmem:[%s14361_s2 + $0x280] sm:$0xff]  ;;  %v3879_v28 = vld [vmem:[%s14361_s2 + $0x3d8] sm:$0xff] }
 0x353   : > { %14431 = vst [vmem:[#allocation40_spill] sm:$0xff] %v11482_v26  ;;  %8601 = vmatprep.mubr.msk.f32.mxu0 %vm9718_vm3, %v14391_v4  ;;  %v7892_v36 = vpop.f32.mrf.mxu1  ;;  %8428 = vmatpush3.msra.mxu1 %v3149_v37  ;;  %v4228_v37 = vld [vmem:[%s14361_s2 + $0x400] sm:$0xff] }
 0x354   : > { %v8142_v40 = vpop.f32.mrf.mxu0  ;;  %8802 = vmatprep.subr.mxu0 %v14391_v4  ;;  %8429 = vmatprep.subr.mxu1 %v14391_v4 }
 0x355   : > { %8803 = vmatpush3.msra.mxu0 %v4229_v48  ;;  %v11497_v23 = vpop.f32.mrf.mxu1  ;;  %8227 = vmatmul.mubr.f32.gmra.mxu1 %v11104_v5  ;;  %v3462_v48 = vld [vmem:[#allocation2 + $0xa4] sm:$0xff] }
 0x356   : > { %14432 = vst [vmem:[#allocation41_spill] sm:$0xff] %v11497_v23  ;;  %v11499_v26 = vpop.f32.mrf.mxu0  ;;  %8602 = vmatmul.mubr.f32.gmra.mxu0 %v3461_v21  ;;  %8229 = vmatprep.mubr.msk.f32.mxu1 %vm9718_vm3, %v14391_v4 }
 0x357   : > { %14433 = vst [vmem:[#allocation42_spill] sm:$0xff] %v11499_v26  ;;  %8604 = vmatprep.mubr.msk.f32.mxu0 %vm9718_vm3, %v14391_v4  ;;  %v7895_v36 = vpop.f32.mrf.mxu1  ;;  %8430 = vmatpush3.msra.mxu1 %v3148_v30 }
 0x358   : > { %v8145_v40 = vpop.f32.mrf.mxu0  ;;  %8804 = vmatprep.subr.mxu0 %v14391_v4  ;;  %8649 = vmatprep.subr.mxu1 %v14391_v4 }
 0x359   : > { %8805 = vmatpush3.msra.mxu0 %v4228_v37  ;;  %v11511_v5 = vpop.f32.mrf.mxu1  ;;  %8230 = vmatmul.mubr.f32.gmra.mxu1 %v11116_v59  ;;  %v3463_v40 = vld [vmem:[#allocation2 + $0xac] sm:$0xff] }
 0x35a   : > { %14434 = vst [vmem:[#allocation43_spill] sm:$0xff] %v11511_v5  ;;  %v11513_v21 = vpop.f32.mrf.mxu0  ;;  %8605 = vmatmul.mubr.f32.gmra.mxu0 %v3462_v48  ;;  %8232 = vmatprep.mubr.msk.f32.mxu1 %vm9718_vm3, %v14391_v4 }
 0x35b   : > { %14435 = vst [vmem:[#allocation44_spill] sm:$0xff] %v11513_v21  ;;  %8607 = vmatprep.mubr.msk.f32.mxu0 %vm9718_vm3, %v14391_v4  ;;  %v7898_v30 = vpop.f32.mrf.mxu1  ;;  %9024 = vmatprep.subr.mxu0 %v14391_v4 }
 0x35c   : > { %v8148_v36 = vpop.f32.mrf.mxu0  ;;  %v3464_v30 = vld [vmem:[#allocation2 + $0xb4] sm:$0xff] }
 0x35d   : > { %v11521_v26 = vpop.f32.mrf.mxu1  ;;  %8233 = vmatmul.mubr.f32.gmra.mxu1 %v11128_v32 }
 0x35e   : > { %v11524_v37 = vpop.f32.mrf.mxu0  ;;  %8608 = vmatmul.mubr.f32.gmra.mxu0 %v3463_v40  ;;  %8235 = vmatprep.mubr.msk.f32.mxu1 %vm9718_vm3, %v14391_v4 }
 0x35f   : > { %14436 = vst [vmem:[#allocation45_spill] sm:$0xff] %v11524_v37  ;;  %8610 = vmatprep.mubr.msk.f32.mxu0 %vm9718_vm3, %v14391_v4  ;;  %v7933_v59 = vpop.f32.mrf.mxu1  ;;  %v3465_v37 = vld [vmem:[#allocation2 + $0xbc] sm:$0xff] }
 0x360   : > { %v8308_v48 = vpop.f32.mrf.mxu0 }
 0x361   : > { %v11530_v36 = vpop.f32.mrf.mxu1  ;;  %8236 = vmatmul.mubr.f32.gmra.mxu1 %v11136_v57 }
 0x362   : > { %v11533_v21 = vpop.f32.mrf.mxu0  ;;  %8611 = vmatmul.mubr.f32.gmra.mxu0 %v3464_v30  ;;  %8238 = vmatprep.mubr.msk.f32.mxu1 %vm9718_vm3, %v14391_v4  ;;  %v3466_v30 = vld [vmem:[#allocation2 + $0xc4] sm:$0xff] }
 0x363   : > { %14437 = vst [vmem:[#allocation46_spill] sm:$0xff] %v11533_v21  ;;  %8613 = vmatprep.mubr.msk.f32.mxu0 %vm9718_vm3, %v14391_v4  ;;  %v7936_v32 = vpop.f32.mrf.mxu1 }
 0x364   : > { %v8311_v40 = vpop.f32.mrf.mxu0 }
 0x365   : > { %v11539_v5 = vpop.f32.mrf.mxu1  ;;  %8239 = vmatmul.mubr.f32.gmra.mxu1 %v11144_v45  ;;  %v3467_v40 = vld [vmem:[#allocation2 + $0xcc] sm:$0xff] }
 0x366   : > { %v11542_v59 = vpop.f32.mrf.mxu0  ;;  %8614 = vmatmul.mubr.f32.gmra.mxu0 %v3465_v37  ;;  %8241 = vmatprep.mubr.msk.f32.mxu1 %vm9718_vm3, %v14391_v4 }
 0x367   : > { %14438 = vst [vmem:[#allocation47_spill] sm:$0xff] %v11542_v59  ;;  %8616 = vmatprep.mubr.msk.f32.mxu0 %vm9718_vm3, %v14391_v4  ;;  %v7939_v57 = vpop.f32.mrf.mxu1 }
 0x368   : > { %v8314_v48 = vpop.f32.mrf.mxu0 }
 0x369   : > { %v11548_v21 = vpop.f32.mrf.mxu1  ;;  %8242 = vmatmul.mubr.f32.gmra.mxu1 %v11152_v61 }
 0x36a   : > { %v11551_v32 = vpop.f32.mrf.mxu0  ;;  %8617 = vmatmul.mubr.f32.gmra.mxu0 %v3466_v30  ;;  %8244 = vmatprep.mubr.msk.f32.mxu1 %vm9718_vm3, %v14391_v4  ;;  %v3468_v30 = vld [vmem:[#allocation2 + $0xd4] sm:$0xff] }
 0x36b   : > { %14439 = vst [vmem:[#allocation48_spill] sm:$0xff] %v11551_v32  ;;  %8619 = vmatprep.mubr.msk.f32.mxu0 %vm9718_vm3, %v14391_v4  ;;  %v7942_v45 = vpop.f32.mrf.mxu1 }
 0x36c   : > { %v8317_v37 = vpop.f32.mrf.mxu0 }
 0x36d   : > { %v11557_v59 = vpop.f32.mrf.mxu1  ;;  %8245 = vmatmul.mubr.f32.gmra.mxu1 %v11160_v58 }
 0x36e   : > { %v11560_v57 = vpop.f32.mrf.mxu0  ;;  %8620 = vmatmul.mubr.f32.gmra.mxu0 %v3467_v40  ;;  %8247 = vmatprep.mubr.msk.f32.mxu1 %vm9718_vm3, %v14391_v4  ;;  %v3469_v40 = vld [vmem:[#allocation2 + $0xdc] sm:$0xff] }
 0x36f   : > { %14440 = vst [vmem:[#allocation49_spill] sm:$0xff] %v11560_v57  ;;  %8622 = vmatprep.mubr.msk.f32.mxu0 %vm9718_vm3, %v14391_v4  ;;  %v7945_v61 = vpop.f32.mrf.mxu1 }
 0x370   : > { %v8320_v48 = vpop.f32.mrf.mxu0 }
 0x371   : > { %v11566_v32 = vpop.f32.mrf.mxu1  ;;  %8248 = vmatmul.mubr.f32.gmra.mxu1 %v11168_v63 }
 0x372   : > { %v11569_v45 = vpop.f32.mrf.mxu0  ;;  %8623 = vmatmul.mubr.f32.gmra.mxu0 %v3468_v30  ;;  %8250 = vmatprep.mubr.msk.f32.mxu1 %vm9718_vm3, %v14391_v4  ;;  %v3470_v30 = vld [vmem:[#allocation2 + $0xe4] sm:$0xff] }
 0x373   : > { %14441 = vst [vmem:[#allocation50_spill] sm:$0xff] %v11569_v45  ;;  %8625 = vmatprep.mubr.msk.f32.mxu0 %vm9718_vm3, %v14391_v4  ;;  %v7948_v58 = vpop.f32.mrf.mxu1 }
 0x374   : > { %v8323_v37 = vpop.f32.mrf.mxu0 }
 0x375   : > { %v11575_v57 = vpop.f32.mrf.mxu1  ;;  %8251 = vmatmul.mubr.f32.gmra.mxu1 %v11176_v3 }
 0x376   : > { %v11578_v61 = vpop.f32.mrf.mxu0  ;;  %8626 = vmatmul.mubr.f32.gmra.mxu0 %v3469_v40  ;;  %8253 = vmatprep.mubr.msk.f32.mxu1 %vm9718_vm3, %v14391_v4  ;;  %v3471_v40 = vld [vmem:[#allocation2 + $0xec] sm:$0xff] }
 0x377   : > { %14442 = vst [vmem:[#allocation51_spill] sm:$0xff] %v11578_v61  ;;  %8628 = vmatprep.mubr.msk.f32.mxu0 %vm9718_vm3, %v14391_v4  ;;  %v7951_v63 = vpop.f32.mrf.mxu1 }
 0x378   : > { %v8326_v48 = vpop.f32.mrf.mxu0 }
 0x379   : > { %v11584_v45 = vpop.f32.mrf.mxu1  ;;  %8254 = vmatmul.mubr.f32.gmra.mxu1 %v11184_v13 }
 0x37a   : > { %v11587_v58 = vpop.f32.mrf.mxu0  ;;  %8629 = vmatmul.mubr.f32.gmra.mxu0 %v3470_v30  ;;  %8256 = vmatprep.mubr.msk.f32.mxu1 %vm9718_vm3, %v14391_v4  ;;  %v3472_v30 = vld [vmem:[#allocation2 + $0xf4] sm:$0xff] }
 0x37b   : > { %14443 = vst [vmem:[#allocation52_spill] sm:$0xff] %v11587_v58  ;;  %8631 = vmatprep.mubr.msk.f32.mxu0 %vm9718_vm3, %v14391_v4  ;;  %v7954_v3 = vpop.f32.mrf.mxu1 }
 0x37c   : > { %v8329_v37 = vpop.f32.mrf.mxu0 }
 0x37d   : > { %v11593_v61 = vpop.f32.mrf.mxu1  ;;  %8257 = vmatmul.mubr.f32.gmra.mxu1 %v11192_v39 }
 0x37e   : > { %v11596_v63 = vpop.f32.mrf.mxu0  ;;  %8632 = vmatmul.mubr.f32.gmra.mxu0 %v3471_v40  ;;  %8259 = vmatprep.mubr.msk.f32.mxu1 %vm9718_vm3, %v14391_v4 }
 0x37f   : > { %14444 = vst [vmem:[#allocation53_spill] sm:$0xff] %v11596_v63  ;;  %8634 = vmatprep.mubr.msk.f32.mxu0 %vm9718_vm3, %v14391_v4  ;;  %v7957_v13 = vpop.f32.mrf.mxu1 }
 0x380   : > { %v8332_v48 = vpop.f32.mrf.mxu0 }
 0x381   : > { %v11602_v58 = vpop.f32.mrf.mxu1  ;;  %8260 = vmatmul.mubr.f32.gmra.mxu1 %v11201_v52 }
 0x382   : > { %v11605_v3 = vpop.f32.mrf.mxu0  ;;  %8635 = vmatmul.mubr.f32.gmra.mxu0 %v3472_v30  ;;  %8262 = vmatprep.mubr.msk.f32.mxu1 %vm9718_vm3, %v14391_v4 }
 0x383   : > { %14445 = vst [vmem:[#allocation54_spill] sm:$0xff] %v11605_v3  ;;  %8637 = vmatprep.mubr.msk.f32.mxu0 %vm9718_vm3, %v14391_v4  ;;  %v7960_v39 = vpop.f32.mrf.mxu1 }
 0x384   : > { %v8335_v37 = vpop.f32.mrf.mxu0 }
 0x385   : > { %v1156_v40 = vpop.permute.xlu0 %1155  ;;  %v11612_v13 = vpop.f32.mrf.mxu1  ;;  %8263 = vmatmul.mubr.f32.gmra.mxu1 %v11211_v53 }
 0x386   : > { %1246 = vst.msk [vmem:[#allocation2 + $0x10f] sm:$0xff] %vm1212_vm6, %v1156_v40  ;;  %v11615_v48 = vpop.f32.mrf.mxu0  ;;  %8638 = vmatmul.mubr.f32.gmra.mxu0 %v11213_v11  ;;  %8265 = vmatprep.mubr.msk.f32.mxu1 %vm9718_vm3, %v14391_v4 }
 0x387   : > { %14446 = vst [vmem:[#allocation55_spill] sm:$0xff] %v11615_v48  ;;  %8640 = vmatprep.mubr.msk.f32.mxu0 %vm9718_vm3, %v14391_v4  ;;  %v7963_v52 = vpop.f32.mrf.mxu1 }
 0x388   : > { %v8338_v30 = vpop.f32.mrf.mxu0 }
 0x389   : > { %v1158_v39 = vpop.permute.xlu1 %1157  ;;  %v790_v37 = vpop.permute.xlu0 %789  ;;  %8266 = vmatmul.mubr.f32.gmra.mxu1 %v11228_v62 }
 0x38a   : > { %1247 = vst.msk [vmem:[#allocation2 + $0x117] sm:$0xff] %vm1212_vm6, %v1158_v39  ;;  %v876_v40 = vmax.f32 %v11220_v24, %v790_v37  ;;  %v11624_v3 = vpop.f32.mrf.mxu1  ;;  %v11627_v53 = vpop.f32.mrf.mxu0  ;;  %8641 = vmatmul.mubr.f32.gmra.mxu0 %v11230_v0  ;;  %8268 = vmatprep.mubr.msk.f32.mxu1 %vm9718_vm3, %v14391_v4  ;;  %v2395_v24 = vld [vmem:[#allocation2 + $0xfa] sm:$0xff] }
 0x38b   : > { %14447 = vst [vmem:[#allocation56_spill] sm:$0xff] %v11627_v53  ;;  %8643 = vmatprep.mubr.msk.f32.mxu0 %vm9718_vm3, %v14391_v4 }
 0x38c   : > { %v958_v11 = vmul.f32 0.2, %v876_v40  ;;  %v7966_v52 = vpop.f32.mrf.mxu1  ;;  %v8341_v30 = vpop.f32.mrf.mxu0  ;;  %vm917_vm13 = vcmp.ge.f32.partialorder %v876_v40, 0.0 }
 0x38d   : > { %v792_v39 = vpop.permute.xlu0 %791  ;;  %v3475_v37 = vld [vmem:[#allocation2 + $0x10c] sm:$0xff]  ;;  %8269 = vmatmul.mubr.f32.gmra.mxu1 %v2395_v24 }
 0x38e   : > { %v877_v48 = vmax.f32 %v11236_v14, %v792_v39  ;;  %v11635_v62 = vpop.f32.mrf.mxu1  ;;  %v11637_v53 = vpop.f32.mrf.mxu0  ;;  %8644 = vmatmul.mubr.f32.gmra.mxu0 %v3475_v37  ;;  %v999_v0 = vsel %vm917_vm13, %v876_v40, %v958_v11  ;;  %8271 = vmatprep.mubr.msk.f32.mxu1 %vm9718_vm3, %v14391_v4  ;;  %v11647_v14 = vmax.f32 %v10743_v29, %v10753_v34  ;;  %v2396_v39 = vld [vmem:[#allocation2 + $0x102] sm:$0xff]  ;;  %v3883_v29 = vld [vmem:[%s14361_s2 + $0x3f8] sm:$0xff] }
 0x38f   : > { %14448 = vst [vmem:[#allocation57_spill] sm:$0xff] %v11637_v53  ;;  %1159 = vrot.lane.b32.xlu1 %v999_v0, %s9717_s25  ;;  %1041 = vst.msk [vmem:[#allocation2 + $0x120] sm:$0xff] %vm1004_vm1, %v999_v0  ;;  %8646 = vmatprep.mubr.msk.f32.mxu0 %vm9718_vm3, %v14391_v4  ;;  %v11666_v34 = vmax.f32 %v10768_v55, %v10786_v41  ;;  %v3087_v55 = vld [vmem:[#allocation2 + $0x1e] sm:$0xff]  ;;  %v4167_v41 = vld [vmem:[#allocation2 + $0x30] sm:$0xff] }
 0x390   : > { %v959_v52 = vmul.f32 0.2, %v877_v48  ;;  %v7969_v30 = vpop.f32.mrf.mxu1  ;;  %v8344_v63 = vpop.f32.mrf.mxu0  ;;  %vm918_vm14 = vcmp.ge.f32.partialorder %v877_v48, 0.0 }
 0x391   : > { %v3476_v40 = vld [vmem:[#allocation2 + $0x114] sm:$0xff]  ;;  %8272 = vmatmul.mubr.f32.gmra.mxu1 %v2396_v39 }
 0x392   : > { %v11649_v11 = vpop.f32.mrf.mxu1  ;;  %v11651_v24 = vpop.f32.mrf.mxu0  ;;  %8647 = vmatmul.mubr.f32.gmra.mxu0 %v3476_v40  ;;  %v1000_v37 = vsel %vm918_vm14, %v877_v48, %v959_v52  ;;  %8431 = vmatprep.mubr.msk.f32.mxu1 %vm9718_vm3, %v14391_v4  ;;  %v3086_v48 = vld [vmem:[#allocation2 + $0x16] sm:$0xff]  ;;  %v4166_v52 = vld [vmem:[#allocation2 + $0x28] sm:$0xff] }
 0x393   : > { %14449 = vst [vmem:[#allocation58_spill] sm:$0xff] %v11651_v24  ;;  %1161 = vrot.lane.b32.xlu0 %v1000_v37, %s9717_s25  ;;  %1042 = vst.msk [vmem:[#allocation2 + $0x128] sm:$0xff] %vm1004_vm1, %v1000_v37  ;;  %793 = vrot.lane.b32.xlu1 %v11647_v14, %s9717_s25  ;;  %v4963_v40 = vld [vmem:[%s14361_s2 + $0x578] sm:$0xff]  ;;  %v3880_v24 = vld [vmem:[%s14361_s2 + $0x3e0] sm:$0xff] }
 0x394   : > { %v7972_v63 = vpop.f32.mrf.mxu1  ;;  %v8347_v0 = vpop.f32.mrf.mxu0  ;;  %8806 = vmatprep.mubr.msk.f32.mxu0 %vm9718_vm3, %v14391_v4 }
 0x395   : > { %8432 = vmatmul.mubr.f32.vlgmr.msra.gmra.mxu1 %v3086_v48  ;;  %v3882_v0 = vld [vmem:[%s14361_s2 + $0x3f0] sm:$0xff] }
 0x396   : > { %v11668_v30 = vpop.f32.mrf.mxu1  ;;  %v11670_v39 = vpop.f32.mrf.mxu0  ;;  %8807 = vmatmul.mubr.f32.vlgmr.msra.gmra.mxu0 %v4166_v52  ;;  %8650 = vmatpush3.msra.mxu1 %v3883_v29  ;;  %v4962_v52 = vld [vmem:[%s14361_s2 + $0x570] sm:$0xff] }
 0x397   : > { %14450 = vst [vmem:[#allocation59_spill] sm:$0xff] %v11670_v39  ;;  %795 = vrot.lane.b32.xlu0 %v11666_v34, %s9717_s25  ;;  %8434 = vmatprep.mubr.msk.f32.mxu1 %vm9718_vm3, %v14391_v4 }
 0x398   : > { %v7975_v37 = vpop.f32.mrf.mxu1  ;;  %v8350_v63 = vpop.f32.mrf.mxu0  ;;  %8809 = vmatprep.mubr.msk.f32.mxu0 %vm9718_vm3, %v14391_v4  ;;  %8651 = vmatprep.subr.mxu1 %v14391_v4 }
 0x399   : > { %9025 = vmatpush3.msra.mxu0 %v4963_v40  ;;  %8435 = vmatmul.mubr.f32.gmra.mxu1 %v3087_v55  ;;  %v11697_v40 = vld [vmem:[#allocation2 + $0x26] sm:$0xff] }
 0x39a   : > { %v11685_v29 = vpop.f32.mrf.mxu1  ;;  %v11687_v48 = vpop.f32.mrf.mxu0  ;;  %8810 = vmatmul.mubr.f32.gmra.mxu0 %v4167_v41  ;;  %8437 = vmatprep.mubr.msk.f32.mxu1 %vm9718_vm3, %v14391_v4  ;;  %v3881_v55 = vld [vmem:[%s14361_s2 + $0x3e8] sm:$0xff] }
 0x39b   : > { %14451 = vst [vmem:[#allocation60_spill] sm:$0xff] %v11687_v48  ;;  %8812 = vmatprep.mubr.msk.f32.mxu0 %vm9718_vm3, %v14391_v4  ;;  %8652 = vmatpush3.msra.mxu1 %v3882_v0  ;;  %v11699_v48 = vld [vmem:[#allocation2 + $0x38] sm:$0xff]  ;;  %v4961_v0 = vld [vmem:[%s14361_s2 + $0x568] sm:$0xff] }
 0x39c   : > { %v7978_v37 = vpop.f32.mrf.mxu1  ;;  %v8353_v63 = vpop.f32.mrf.mxu0  ;;  %9026 = vmatprep.subr.mxu0 %v14391_v4  ;;  %8653 = vmatprep.subr.mxu1 %v14391_v4 }
 0x39d   : > { %9027 = vmatpush3.msra.mxu0 %v4962_v52  ;;  %8438 = vmatmul.mubr.f32.gmra.mxu1 %v11697_v40  ;;  %v11719_v63 = vld [vmem:[#allocation2 + $0x2e] sm:$0xff] }
 0x39e   : > { %v11705_v41 = vpop.f32.mrf.mxu1  ;;  %v11707_v39 = vpop.f32.mrf.mxu0  ;;  %8813 = vmatmul.mubr.f32.gmra.mxu0 %v11699_v48  ;;  %8440 = vmatprep.mubr.msk.f32.mxu1 %vm9718_vm3, %v14391_v4 }
 0x39f   : > { %14452 = vst [vmem:[#allocation61_spill] sm:$0xff] %v11707_v39  ;;  %8815 = vmatprep.mubr.msk.f32.mxu0 %vm9718_vm3, %v14391_v4  ;;  %8654 = vmatpush3.msra.mxu1 %v3881_v55  ;;  %v11721_v39 = vld [vmem:[#allocation2 + $0x40] sm:$0xff] }
 0x3a0   : > { %v7981_v37 = vpop.f32.mrf.mxu1  ;;  %v8356_v52 = vpop.f32.mrf.mxu0  ;;  %9028 = vmatprep.subr.mxu0 %v14391_v4  ;;  %8655 = vmatprep.subr.mxu1 %v14391_v4  ;;  %v4960_v55 = vld [vmem:[%s14361_s2 + $0x560] sm:$0xff] }
 0x3a1   : > { %9029 = vmatpush3.msra.mxu0 %v4961_v0  ;;  %8441 = vmatmul.mubr.f32.gmra.mxu1 %v11719_v63  ;;  %v11741_v52 = vld [vmem:[#allocation2 + $0x36] sm:$0xff] }
 0x3a2   : > { %v11727_v53 = vpop.f32.mrf.mxu1  ;;  %v11729_v23 = vpop.f32.mrf.mxu0  ;;  %8816 = vmatmul.mubr.f32.gmra.mxu0 %v11721_v39  ;;  %8443 = vmatprep.mubr.msk.f32.mxu1 %vm9718_vm3, %v14391_v4 }
 0x3a3   : > { %14453 = vst [vmem:[#allocation62_spill] sm:$0xff] %v11729_v23  ;;  %8818 = vmatprep.mubr.msk.f32.mxu0 %vm9718_vm3, %v14391_v4  ;;  %8656 = vmatpush3.msra.mxu1 %v3880_v24  ;;  %v11743_v23 = vld [vmem:[#allocation2 + $0x48] sm:$0xff]  ;;  %v4959_v24 = vld [vmem:[%s14361_s2 + $0x558] sm:$0xff] }
 0x3a4   : > { %v7984_v37 = vpop.f32.mrf.mxu1  ;;  %v8359_v0 = vpop.f32.mrf.mxu0  ;;  %9030 = vmatprep.subr.mxu0 %v14391_v4  ;;  %8657 = vmatprep.subr.mxu1 %v14391_v4 }
 0x3a5   : > { %9031 = vmatpush3.msra.mxu0 %v4960_v55  ;;  %8444 = vmatmul.mubr.f32.gmra.mxu1 %v11741_v52  ;;  %v11763_v0 = vld [vmem:[#allocation2 + $0x3e] sm:$0xff] }
 0x3a6   : > { %v11749_v51 = vpop.f32.mrf.mxu1  ;;  %v11751_v42 = vpop.f32.mrf.mxu0  ;;  %8819 = vmatmul.mubr.f32.gmra.mxu0 %v11743_v23  ;;  %8446 = vmatprep.mubr.msk.f32.mxu1 %vm9718_vm3, %v14391_v4 }
 0x3a7   : > { %14454 = vst [vmem:[#allocation63_spill] sm:$0xff] %v11751_v42  ;;  %8821 = vmatprep.mubr.msk.f32.mxu0 %vm9718_vm3, %v14391_v4  ;;  %8658 = vmatpush3.msra.mxu1 %v3879_v28  ;;  %v11765_v42 = vld [vmem:[#allocation2 + $0x50] sm:$0xff] }
 0x3a8   : > { %v7987_v37 = vpop.f32.mrf.mxu1  ;;  %v8362_v55 = vpop.f32.mrf.mxu0  ;;  %9032 = vmatprep.subr.mxu0 %v14391_v4  ;;  %8659 = vmatprep.subr.mxu1 %v14391_v4  ;;  %v4958_v28 = vld [vmem:[%s14361_s2 + $0x550] sm:$0xff] }
 0x3a9   : > { %9033 = vmatpush3.msra.mxu0 %v4959_v24  ;;  %8447 = vmatmul.mubr.f32.gmra.mxu1 %v11763_v0  ;;  %v11785_v55 = vld [vmem:[#allocation2 + $0x46] sm:$0xff] }
 0x3aa   : > { %v11771_v7 = vpop.f32.mrf.mxu1  ;;  %v11773_v6 = vpop.f32.mrf.mxu0  ;;  %8822 = vmatmul.mubr.f32.gmra.mxu0 %v11765_v42  ;;  %8449 = vmatprep.mubr.msk.f32.mxu1 %vm9718_vm3, %v14391_v4  ;;  %14456 = vst [vmem:[#allocation65_spill] sm:$0xff] %v11785_v55 }
 0x3ab   : > { %14455 = vst [vmem:[#allocation64_spill] sm:$0xff] %v11773_v6  ;;  %8824 = vmatprep.mubr.msk.f32.mxu0 %vm9718_vm3, %v14391_v4  ;;  %8660 = vmatpush3.msra.mxu1 %v3878_v60  ;;  %v11787_v6 = vld [vmem:[#allocation2 + $0x58] sm:$0xff]  ;;  %v4957_v60 = vld [vmem:[%s14361_s2 + $0x548] sm:$0xff] }
 0x3ac   : > { %v7990_v37 = vpop.f32.mrf.mxu1  ;;  %v8365_v24 = vpop.f32.mrf.mxu0  ;;  %9034 = vmatprep.subr.mxu0 %v14391_v4  ;;  %14457 = vst [vmem:[#allocation66_spill] sm:$0xff] %v11787_v6  ;;  %8661 = vmatprep.subr.mxu1 %v14391_v4 }
 0x3ad   : > { %9035 = vmatpush3.msra.mxu0 %v4958_v28  ;;  %8450 = vmatmul.mubr.f32.gmra.mxu1 %v11785_v55  ;;  %v11807_v24 = vld [vmem:[#allocation2 + $0x4e] sm:$0xff] }
 0x3ae   : > { %v11793_v49 = vpop.f32.mrf.mxu1  ;;  %v11795_v35 = vpop.f32.mrf.mxu0  ;;  %8825 = vmatmul.mubr.f32.gmra.mxu0 %v11787_v6  ;;  %8452 = vmatprep.mubr.msk.f32.mxu1 %vm9718_vm3, %v14391_v4  ;;  %14460 = vst [vmem:[#allocation69_spill] sm:$0xff] %v11807_v24 }
 0x3af   : > { %14458 = vst [vmem:[#allocation67_spill] sm:$0xff] %v11793_v49  ;;  %14459 = vst [vmem:[#allocation68_spill] sm:$0xff] %v11795_v35  ;;  %8827 = vmatprep.mubr.msk.f32.mxu0 %vm9718_vm3, %v14391_v4  ;;  %8662 = vmatpush3.msra.mxu1 %v3877_v46  ;;  %v11809_v35 = vld [vmem:[#allocation2 + $0x60] sm:$0xff] }
 0x3b0   : > { %v7993_v37 = vpop.f32.mrf.mxu1  ;;  %v8368_v28 = vpop.f32.mrf.mxu0  ;;  %9036 = vmatprep.subr.mxu0 %v14391_v4  ;;  %14461 = vst [vmem:[#allocation70_spill] sm:$0xff] %v11809_v35  ;;  %8663 = vmatprep.subr.mxu1 %v14391_v4  ;;  %v3876_v49 = vld [vmem:[%s14361_s2 + $0x3c0] sm:$0xff] }
 0x3b1   : > { %9037 = vmatpush3.msra.mxu0 %v4957_v60  ;;  %8453 = vmatmul.mubr.f32.gmra.mxu1 %v11807_v24  ;;  %v4956_v46 = vld [vmem:[%s14361_s2 + $0x540] sm:$0xff]  ;;  %v11829_v28 = vld [vmem:[#allocation2 + $0x56] sm:$0xff] }
 0x3b2   : > { %v11815_v6 = vpop.f32.mrf.mxu1  ;;  %v11817_v55 = vpop.f32.mrf.mxu0  ;;  %8828 = vmatmul.mubr.f32.gmra.mxu0 %v11809_v35  ;;  %8455 = vmatprep.mubr.msk.f32.mxu1 %vm9718_vm3, %v14391_v4  ;;  %14464 = vst [vmem:[#allocation73_spill] sm:$0xff] %v11829_v28 }
 0x3b3   : > { %14462 = vst [vmem:[#allocation71_spill] sm:$0xff] %v11815_v6  ;;  %14463 = vst [vmem:[#allocation72_spill] sm:$0xff] %v11817_v55  ;;  %8830 = vmatprep.mubr.msk.f32.mxu0 %vm9718_vm3, %v14391_v4  ;;  %8664 = vmatpush3.msra.mxu1 %v3876_v49  ;;  %v11831_v55 = vld [vmem:[#allocation2 + $0x68] sm:$0xff]  ;;  %v3875_v6 = vld [vmem:[%s14361_s2 + $0x3b8] sm:$0xff] }
 0x3b4   : > { %v7996_v37 = vpop.f32.mrf.mxu1  ;;  %v8371_v60 = vpop.f32.mrf.mxu0  ;;  %9038 = vmatprep.subr.mxu0 %v14391_v4  ;;  %14465 = vst [vmem:[#allocation74_spill] sm:$0xff] %v11831_v55  ;;  %8665 = vmatprep.subr.mxu1 %v14391_v4  ;;  %v4955_v49 = vld [vmem:[%s14361_s2 + $0x538] sm:$0xff] }
 0x3b5   : > { %9039 = vmatpush3.msra.mxu0 %v4956_v46  ;;  %8456 = vmatmul.mubr.f32.gmra.mxu1 %v11829_v28  ;;  %v11851_v60 = vld [vmem:[#allocation2 + $0x5e] sm:$0xff] }
 0x3b6   : > { %v11837_v35 = vpop.f32.mrf.mxu1  ;;  %v11839_v24 = vpop.f32.mrf.mxu0  ;;  %8831 = vmatmul.mubr.f32.gmra.mxu0 %v11831_v55  ;;  %8458 = vmatprep.mubr.msk.f32.mxu1 %vm9718_vm3, %v14391_v4  ;;  %14468 = vst [vmem:[#allocation77_spill] sm:$0xff] %v11851_v60 }
 0x3b7   : > { %14466 = vst [vmem:[#allocation75_spill] sm:$0xff] %v11837_v35  ;;  %14467 = vst [vmem:[#allocation76_spill] sm:$0xff] %v11839_v24  ;;  %8833 = vmatprep.mubr.msk.f32.mxu0 %vm9718_vm3, %v14391_v4  ;;  %8666 = vmatpush3.msra.mxu1 %v3875_v6  ;;  %v11853_v24 = vld [vmem:[#allocation2 + $0x70] sm:$0xff] }
 0x3b8   : > { %v7999_v37 = vpop.f32.mrf.mxu1  ;;  %v8374_v46 = vpop.f32.mrf.mxu0  ;;  %9040 = vmatprep.subr.mxu0 %v14391_v4  ;;  %14469 = vst [vmem:[#allocation78_spill] sm:$0xff] %v11853_v24  ;;  %8667 = vmatprep.subr.mxu1 %v14391_v4  ;;  %v3874_v35 = vld [vmem:[%s14361_s2 + $0x3b0] sm:$0xff] }
 0x3b9   : > { %9041 = vmatpush3.msra.mxu0 %v4955_v49  ;;  %8459 = vmatmul.mubr.f32.gmra.mxu1 %v11851_v60  ;;  %v4954_v6 = vld [vmem:[%s14361_s2 + $0x530] sm:$0xff]  ;;  %v11873_v46 = vld [vmem:[#allocation2 + $0x66] sm:$0xff] }
 0x3ba   : > { %v11859_v55 = vpop.f32.mrf.mxu1  ;;  %v11861_v28 = vpop.f32.mrf.mxu0  ;;  %8834 = vmatmul.mubr.f32.gmra.mxu0 %v11853_v24  ;;  %8461 = vmatprep.mubr.msk.f32.mxu1 %vm9718_vm3, %v14391_v4  ;;  %14472 = vst [vmem:[#allocation81_spill] sm:$0xff] %v11873_v46 }
 0x3bb   : > { %14470 = vst [vmem:[#allocation79_spill] sm:$0xff] %v11859_v55  ;;  %14471 = vst [vmem:[#allocation80_spill] sm:$0xff] %v11861_v28  ;;  %8836 = vmatprep.mubr.msk.f32.mxu0 %vm9718_vm3, %v14391_v4  ;;  %8668 = vmatpush3.msra.mxu1 %v3874_v35  ;;  %v11875_v28 = vld [vmem:[#allocation2 + $0x78] sm:$0xff]  ;;  %v3873_v55 = vld [vmem:[%s14361_s2 + $0x3a8] sm:$0xff] }
 0x3bc   : > { %v8002_v37 = vpop.f32.mrf.mxu1  ;;  %v8377_v49 = vpop.f32.mrf.mxu0  ;;  %9042 = vmatprep.subr.mxu0 %v14391_v4  ;;  %14473 = vst [vmem:[#allocation82_spill] sm:$0xff] %v11875_v28  ;;  %8669 = vmatprep.subr.mxu1 %v14391_v4  ;;  %v4953_v35 = vld [vmem:[%s14361_s2 + $0x528] sm:$0xff] }
 0x3bd   : > { %9043 = vmatpush3.msra.mxu0 %v4954_v6  ;;  %8462 = vmatmul.mubr.f32.gmra.mxu1 %v11873_v46  ;;  %v11895_v49 = vld [vmem:[#allocation2 + $0x6e] sm:$0xff] }
 0x3be   : > { %v11881_v24 = vpop.f32.mrf.mxu1  ;;  %v11883_v60 = vpop.f32.mrf.mxu0  ;;  %8837 = vmatmul.mubr.f32.gmra.mxu0 %v11875_v28  ;;  %8464 = vmatprep.mubr.msk.f32.mxu1 %vm9718_vm3, %v14391_v4  ;;  %14476 = vst [vmem:[#allocation85_spill] sm:$0xff] %v11895_v49 }
 0x3bf   : > { %14474 = vst [vmem:[#allocation83_spill] sm:$0xff] %v11881_v24  ;;  %14475 = vst [vmem:[#allocation84_spill] sm:$0xff] %v11883_v60  ;;  %8839 = vmatprep.mubr.msk.f32.mxu0 %vm9718_vm3, %v14391_v4  ;;  %8670 = vmatpush3.msra.mxu1 %v3873_v55  ;;  %v11897_v60 = vld [vmem:[#allocation2 + $0x80] sm:$0xff] }
 0x3c0   : > { %v8005_v37 = vpop.f32.mrf.mxu1  ;;  %v8380_v6 = vpop.f32.mrf.mxu0  ;;  %9044 = vmatprep.subr.mxu0 %v14391_v4  ;;  %14477 = vst [vmem:[#allocation86_spill] sm:$0xff] %v11897_v60  ;;  %8671 = vmatprep.subr.mxu1 %v14391_v4  ;;  %v3872_v24 = vld [vmem:[%s14361_s2 + $0x3a0] sm:$0xff] }
 0x3c1   : > { %9045 = vmatpush3.msra.mxu0 %v4953_v35  ;;  %8465 = vmatmul.mubr.f32.gmra.mxu1 %v11895_v49  ;;  %v4952_v55 = vld [vmem:[%s14361_s2 + $0x520] sm:$0xff]  ;;  %v11917_v6 = vld [vmem:[#allocation2 + $0x76] sm:$0xff] }
 0x3c2   : > { %v11903_v28 = vpop.f32.mrf.mxu1  ;;  %v11905_v46 = vpop.f32.mrf.mxu0  ;;  %8840 = vmatmul.mubr.f32.gmra.mxu0 %v11897_v60  ;;  %8467 = vmatprep.mubr.msk.f32.mxu1 %vm9718_vm3, %v14391_v4  ;;  %14480 = vst [vmem:[#allocation89_spill] sm:$0xff] %v11917_v6 }
 0x3c3   : > { %14478 = vst [vmem:[#allocation87_spill] sm:$0xff] %v11903_v28  ;;  %14479 = vst [vmem:[#allocation88_spill] sm:$0xff] %v11905_v46  ;;  %8842 = vmatprep.mubr.msk.f32.mxu0 %vm9718_vm3, %v14391_v4  ;;  %8672 = vmatpush3.msra.mxu1 %v3872_v24  ;;  %v11919_v46 = vld [vmem:[#allocation2 + $0x88] sm:$0xff]  ;;  %v3871_v28 = vld [vmem:[%s14361_s2 + $0x398] sm:$0xff] }
 0x3c4   : > { %v8008_v37 = vpop.f32.mrf.mxu1  ;;  %v8383_v35 = vpop.f32.mrf.mxu0  ;;  %9046 = vmatprep.subr.mxu0 %v14391_v4  ;;  %14481 = vst [vmem:[#allocation90_spill] sm:$0xff] %v11919_v46  ;;  %8673 = vmatprep.subr.mxu1 %v14391_v4  ;;  %v4951_v24 = vld [vmem:[%s14361_s2 + $0x518] sm:$0xff] }
 0x3c5   : > { %9047 = vmatpush3.msra.mxu0 %v4952_v55  ;;  %8468 = vmatmul.mubr.f32.gmra.mxu1 %v11917_v6  ;;  %v11939_v35 = vld [vmem:[#allocation2 + $0x7e] sm:$0xff] }
 0x3c6   : > { %v11925_v60 = vpop.f32.mrf.mxu1  ;;  %v11927_v49 = vpop.f32.mrf.mxu0  ;;  %8843 = vmatmul.mubr.f32.gmra.mxu0 %v11919_v46  ;;  %8470 = vmatprep.mubr.msk.f32.mxu1 %vm9718_vm3, %v14391_v4  ;;  %14484 = vst [vmem:[#allocation93_spill] sm:$0xff] %v11939_v35 }
 0x3c7   : > { %14482 = vst [vmem:[#allocation91_spill] sm:$0xff] %v11925_v60  ;;  %14483 = vst [vmem:[#allocation92_spill] sm:$0xff] %v11927_v49  ;;  %8845 = vmatprep.mubr.msk.f32.mxu0 %vm9718_vm3, %v14391_v4  ;;  %8674 = vmatpush3.msra.mxu1 %v3871_v28  ;;  %v11941_v49 = vld [vmem:[#allocation2 + $0x90] sm:$0xff] }
 0x3c8   : > { %v8011_v37 = vpop.f32.mrf.mxu1  ;;  %v8386_v55 = vpop.f32.mrf.mxu0  ;;  %9048 = vmatprep.subr.mxu0 %v14391_v4  ;;  %14485 = vst [vmem:[#allocation94_spill] sm:$0xff] %v11941_v49  ;;  %8675 = vmatprep.subr.mxu1 %v14391_v4  ;;  %v3870_v60 = vld [vmem:[%s14361_s2 + $0x390] sm:$0xff] }
 0x3c9   : > { %9049 = vmatpush3.msra.mxu0 %v4951_v24  ;;  %8471 = vmatmul.mubr.f32.gmra.mxu1 %v11939_v35  ;;  %v4950_v28 = vld [vmem:[%s14361_s2 + $0x510] sm:$0xff]  ;;  %v11961_v55 = vld [vmem:[#allocation2 + $0x86] sm:$0xff] }
 0x3ca   : > { %v11947_v46 = vpop.f32.mrf.mxu1  ;;  %v11949_v6 = vpop.f32.mrf.mxu0  ;;  %8846 = vmatmul.mubr.f32.gmra.mxu0 %v11941_v49  ;;  %8473 = vmatprep.mubr.msk.f32.mxu1 %vm9718_vm3, %v14391_v4  ;;  %14488 = vst [vmem:[#allocation97_spill] sm:$0xff] %v11961_v55 }
 0x3cb   : > { %14486 = vst [vmem:[#allocation95_spill] sm:$0xff] %v11947_v46  ;;  %14487 = vst [vmem:[#allocation96_spill] sm:$0xff] %v11949_v6  ;;  %8848 = vmatprep.mubr.msk.f32.mxu0 %vm9718_vm3, %v14391_v4  ;;  %8676 = vmatpush3.msra.mxu1 %v3870_v60  ;;  %v11963_v6 = vld [vmem:[#allocation2 + $0x98] sm:$0xff]  ;;  %v3869_v46 = vld [vmem:[%s14361_s2 + $0x388] sm:$0xff] }
 0x3cc   : > { %v8014_v37 = vpop.f32.mrf.mxu1  ;;  %v8389_v24 = vpop.f32.mrf.mxu0  ;;  %9050 = vmatprep.subr.mxu0 %v14391_v4  ;;  %14489 = vst [vmem:[#allocation98_spill] sm:$0xff] %v11963_v6  ;;  %8677 = vmatprep.subr.mxu1 %v14391_v4  ;;  %v4949_v60 = vld [vmem:[%s14361_s2 + $0x508] sm:$0xff] }
 0x3cd   : > { %9051 = vmatpush3.msra.mxu0 %v4950_v28  ;;  %8474 = vmatmul.mubr.f32.gmra.mxu1 %v11961_v55  ;;  %v11983_v24 = vld [vmem:[#allocation2 + $0x8e] sm:$0xff] }
 0x3ce   : > { %v11969_v49 = vpop.f32.mrf.mxu1  ;;  %v11971_v35 = vpop.f32.mrf.mxu0  ;;  %8849 = vmatmul.mubr.f32.gmra.mxu0 %v11963_v6  ;;  %8476 = vmatprep.mubr.msk.f32.mxu1 %vm9718_vm3, %v14391_v4  ;;  %14492 = vst [vmem:[#allocation101_spill] sm:$0xff] %v11983_v24 }
 0x3cf   : > { %14490 = vst [vmem:[#allocation99_spill] sm:$0xff] %v11969_v49  ;;  %14491 = vst [vmem:[#allocation100_spill] sm:$0xff] %v11971_v35  ;;  %8851 = vmatprep.mubr.msk.f32.mxu0 %vm9718_vm3, %v14391_v4  ;;  %8678 = vmatpush3.msra.mxu1 %v3869_v46  ;;  %v11985_v35 = vld [vmem:[#allocation2 + $0xa0] sm:$0xff] }
 0x3d0   : > { %v8017_v37 = vpop.f32.mrf.mxu1  ;;  %v8392_v28 = vpop.f32.mrf.mxu0  ;;  %9052 = vmatprep.subr.mxu0 %v14391_v4  ;;  %14493 = vst [vmem:[#allocation102_spill] sm:$0xff] %v11985_v35  ;;  %8679 = vmatprep.subr.mxu1 %v14391_v4  ;;  %v3868_v49 = vld [vmem:[%s14361_s2 + $0x380] sm:$0xff] }
 0x3d1   : > { %9053 = vmatpush3.msra.mxu0 %v4949_v60  ;;  %8477 = vmatmul.mubr.f32.gmra.mxu1 %v11983_v24  ;;  %v4948_v46 = vld [vmem:[%s14361_s2 + $0x500] sm:$0xff]  ;;  %v1944_v28 = vadd.f32 %v11521_v26, %v10836_v19 }
 0x3d2   : > { %v11991_v6 = vpop.f32.mrf.mxu1  ;;  %v11993_v55 = vpop.f32.mrf.mxu0  ;;  %8852 = vmatmul.mubr.f32.gmra.mxu0 %v11985_v35  ;;  %8479 = vmatprep.mubr.msk.f32.mxu1 %vm9718_vm3, %v14391_v4 }
 0x3d3   : > { %14494 = vst [vmem:[#allocation103_spill] sm:$0xff] %v11991_v6  ;;  %14495 = vst [vmem:[#allocation104_spill] sm:$0xff] %v11993_v55  ;;  %8854 = vmatprep.mubr.msk.f32.mxu0 %vm9718_vm3, %v14391_v4  ;;  %8680 = vmatpush3.msra.mxu1 %v3868_v49  ;;  %v12007_v55 = vld [vmem:[#allocation2 + $0x96] sm:$0xff]  ;;  %v12009_v6 = vld [vmem:[#allocation2 + $0xa8] sm:$0xff]  ;;  %v1945_v49 = vadd.f32 %v11530_v36, %v10856_v18  ;;  %v1946_v36 = vadd.f32 %v11539_v5, %v10876_v2 }
 0x3d4   : > { %v8020_v37 = vpop.f32.mrf.mxu1  ;;  %v8395_v60 = vpop.f32.mrf.mxu0  ;;  %9054 = vmatprep.subr.mxu0 %v14391_v4  ;;  %8899 = vmatprep.subr.mxu1 %v14391_v4  ;;  %v1947_v5 = vadd.f32 %v11548_v21, %v10896_v44  ;;  %v1948_v21 = vadd.f32 %v11557_v59, %v10916_v16  ;;  %v1949_v59 = vadd.f32 %v11566_v32, %v10936_v27 }
 0x3d5   : > { %9055 = vmatpush3.msra.mxu0 %v4948_v46  ;;  %8480 = vmatmul.mubr.f32.gmra.mxu1 %v12007_v55  ;;  %v2304_v46 = vadd.f32 %v10839_v22, %v1944_v28  ;;  %v12026_v37 = vld [vmem:[#allocation2 + $0x9e] sm:$0xff]  ;;  %v12028_v60 = vld [vmem:[#allocation2 + $0xb0] sm:$0xff]  ;;  %v2305_v28 = vadd.f32 %v10859_v47, %v1945_v49  ;;  %v2306_v49 = vadd.f32 %v10879_v54, %v1946_v36 }
 0x3d6   : > { %v12012_v35 = vpop.f32.mrf.mxu1  ;;  %v12014_v24 = vpop.f32.mrf.mxu0  ;;  %8855 = vmatmul.mubr.f32.gmra.mxu0 %v12009_v6  ;;  %8482 = vmatprep.mubr.msk.f32.mxu1 %vm9718_vm3, %v14391_v4  ;;  %14498 = vst [vmem:[#allocation107_spill] sm:$0xff] %v12028_v60  ;;  %v2307_v36 = vadd.f32 %v10899_v9, %v1947_v5  ;;  %v2308_v5 = vadd.f32 %v10919_v25, %v1948_v21 }
 0x3d7   : > { %14496 = vst [vmem:[#allocation105_spill] sm:$0xff] %v12012_v35  ;;  %14497 = vst [vmem:[#allocation106_spill] sm:$0xff] %v12014_v24  ;;  %8857 = vmatprep.mubr.msk.f32.mxu0 %vm9718_vm3, %v14391_v4  ;;  %9274 = vmatprep.subr.mxu0 %v14391_v4  ;;  %v1950_v32 = vadd.f32 %v11575_v57, %v10956_v17  ;;  %v2309_v21 = vadd.f32 %v10939_v38, %v1949_v59 }
 0x3d8   : > { %v8023_v19 = vpop.f32.mrf.mxu1  ;;  %v8398_v26 = vpop.f32.mrf.mxu0  ;;  %v1951_v57 = vadd.f32 %v11584_v45, %v10976_v12  ;;  %v1952_v45 = vadd.f32 %v11593_v61, %v10996_v56  ;;  %v1953_v61 = vadd.f32 %v11602_v58, %v11016_v1 }
 0x3d9   : > { %8483 = vmatmul.mubr.f32.gmra.mxu1 %v12026_v37  ;;  %v12043_v26 = vld [vmem:[#allocation2 + $0xa6] sm:$0xff]  ;;  %v2310_v59 = vadd.f32 %v10959_v31, %v1950_v32 }
 0x3da   : > { %v2510_v24 = vpop.f32.mrf.mxu1  ;;  %v12031_v35 = vpop.f32.mrf.mxu0  ;;  %8858 = vmatmul.mubr.f32.gmra.mxu0 %v12028_v60  ;;  %8485 = vmatprep.mubr.msk.f32.mxu1 %vm9718_vm3, %v14391_v4  ;;  %v2311_v32 = vadd.f32 %v10979_v50, %v1951_v57  ;;  %v14509_v57 = vld [vmem:[#allocation7_spill] sm:$0xff] }
 0x3db   : > { %14499 = vst [vmem:[#allocation108_spill] sm:$0xff] %v12031_v35  ;;  %v12034_v19 = vadd.f32 %v2510_v24, %v2304_v46  ;;  %8860 = vmatprep.mubr.msk.f32.mxu0 %vm9718_vm3, %v14391_v4  ;;  %v12045_v35 = vld [vmem:[#allocation2 + $0xb8] sm:$0xff] }
 0x3dc   : > { %v8183_v22 = vpop.f32.mrf.mxu1  ;;  %v8558_v18 = vpop.f32.mrf.mxu0 }
 0x3dd   : > { %8486 = vmatmul.mubr.f32.gmra.mxu1 %v12043_v26  ;;  %v12060_v22 = vld [vmem:[#allocation2 + $0xae] sm:$0xff]  ;;  %v12062_v18 = vld [vmem:[#allocation2 + $0xc0] sm:$0xff] }
 0x3de   : > { %v2515_v60 = vpop.f32.mrf.mxu1  ;;  %v12048_v24 = vpop.f32.mrf.mxu0  ;;  %8861 = vmatmul.mubr.f32.gmra.mxu0 %v12045_v35  ;;  %8488 = vmatprep.mubr.msk.f32.mxu1 %vm9718_vm3, %v14391_v4 }
 0x3df   : > { %14500 = vst [vmem:[#allocation109_spill] sm:$0xff] %v12048_v24  ;;  %v12051_v46 = vadd.f32 %v2515_v60, %v2305_v28  ;;  %8863 = vmatprep.mubr.msk.f32.mxu0 %vm9718_vm3, %v14391_v4 }
 0x3e0   : > { %v8186_v47 = vpop.f32.mrf.mxu1  ;;  %v8561_v2 = vpop.f32.mrf.mxu0 }
 0x3e1   : > { %8489 = vmatmul.mubr.f32.gmra.mxu1 %v12060_v22  ;;  %v12077_v47 = vld [vmem:[#allocation2 + $0xb6] sm:$0xff]  ;;  %v12079_v2 = vld [vmem:[#allocation2 + $0xc8] sm:$0xff] }
 0x3e2   : > { %v2520_v24 = vpop.f32.mrf.mxu1  ;;  %v12065_v60 = vpop.f32.mrf.mxu0  ;;  %8864 = vmatmul.mubr.f32.gmra.mxu0 %v12062_v18  ;;  %8491 = vmatprep.mubr.msk.f32.mxu1 %vm9718_vm3, %v14391_v4 }
 0x3e3   : > { %14501 = vst [vmem:[#allocation110_spill] sm:$0xff] %v12065_v60  ;;  %v12068_v28 = vadd.f32 %v2520_v24, %v2306_v49  ;;  %8866 = vmatprep.mubr.msk.f32.mxu0 %vm9718_vm3, %v14391_v4 }
 0x3e4   : > { %v8189_v54 = vpop.f32.mrf.mxu1  ;;  %v8564_v44 = vpop.f32.mrf.mxu0 }
 0x3e5   : > { %8492 = vmatmul.mubr.f32.gmra.mxu1 %v12077_v47  ;;  %v12094_v54 = vld [vmem:[#allocation2 + $0xbe] sm:$0xff]  ;;  %v12096_v44 = vld [vmem:[#allocation2 + $0xd0] sm:$0xff] }
 0x3e6   : > { %v2525_v60 = vpop.f32.mrf.mxu1  ;;  %v12082_v24 = vpop.f32.mrf.mxu0  ;;  %8867 = vmatmul.mubr.f32.gmra.mxu0 %v12079_v2  ;;  %8494 = vmatprep.mubr.msk.f32.mxu1 %vm9718_vm3, %v14391_v4 }
 0x3e7   : > { %14502 = vst [vmem:[#allocation111_spill] sm:$0xff] %v12082_v24  ;;  %v12085_v49 = vadd.f32 %v2525_v60, %v2307_v36  ;;  %8869 = vmatprep.mubr.msk.f32.mxu0 %vm9718_vm3, %v14391_v4 }
 0x3e8   : > { %v8192_v9 = vpop.f32.mrf.mxu1  ;;  %v8567_v16 = vpop.f32.mrf.mxu0 }
 0x3e9   : > { %8495 = vmatmul.mubr.f32.gmra.mxu1 %v12094_v54  ;;  %v12111_v9 = vld [vmem:[#allocation2 + $0xc6] sm:$0xff]  ;;  %v12113_v16 = vld [vmem:[#allocation2 + $0xd8] sm:$0xff] }
 0x3ea   : > { %v2530_v24 = vpop.f32.mrf.mxu1  ;;  %v12099_v60 = vpop.f32.mrf.mxu0  ;;  %8870 = vmatmul.mubr.f32.gmra.mxu0 %v12096_v44  ;;  %8497 = vmatprep.mubr.msk.f32.mxu1 %vm9718_vm3, %v14391_v4 }
 0x3eb   : > { %14503 = vst [vmem:[#allocation112_spill] sm:$0xff] %v12099_v60  ;;  %v12102_v36 = vadd.f32 %v2530_v24, %v2308_v5  ;;  %8872 = vmatprep.mubr.msk.f32.mxu0 %vm9718_vm3, %v14391_v4 }
 0x3ec   : > { %v8195_v25 = vpop.f32.mrf.mxu1  ;;  %v8570_v27 = vpop.f32.mrf.mxu0 }
 0x3ed   : > { %8498 = vmatmul.mubr.f32.gmra.mxu1 %v12111_v9  ;;  %v12128_v25 = vld [vmem:[#allocation2 + $0xce] sm:$0xff]  ;;  %v12130_v27 = vld [vmem:[#allocation2 + $0xe0] sm:$0xff] }
 0x3ee   : > { %v2535_v60 = vpop.f32.mrf.mxu1  ;;  %v12116_v24 = vpop.f32.mrf.mxu0  ;;  %8873 = vmatmul.mubr.f32.gmra.mxu0 %v12113_v16  ;;  %8500 = vmatprep.mubr.msk.f32.mxu1 %vm9718_vm3, %v14391_v4 }
 0x3ef   : > { %14504 = vst [vmem:[#allocation113_spill] sm:$0xff] %v12116_v24  ;;  %v12119_v5 = vadd.f32 %v2535_v60, %v2309_v21  ;;  %8875 = vmatprep.mubr.msk.f32.mxu0 %vm9718_vm3, %v14391_v4 }
 0x3f0   : > { %v8198_v38 = vpop.f32.mrf.mxu1  ;;  %v8573_v17 = vpop.f32.mrf.mxu0 }
 0x3f1   : > { %8501 = vmatmul.mubr.f32.gmra.mxu1 %v12128_v25  ;;  %v12145_v38 = vld [vmem:[#allocation2 + $0xd6] sm:$0xff]  ;;  %v12147_v17 = vld [vmem:[#allocation2 + $0xe8] sm:$0xff] }
 0x3f2   : > { %v2540_v24 = vpop.f32.mrf.mxu1  ;;  %v12133_v60 = vpop.f32.mrf.mxu0  ;;  %8876 = vmatmul.mubr.f32.gmra.mxu0 %v12130_v27  ;;  %8503 = vmatprep.mubr.msk.f32.mxu1 %vm9718_vm3, %v14391_v4 }
 0x3f3   : > { %14505 = vst [vmem:[#allocation114_spill] sm:$0xff] %v12133_v60  ;;  %v12136_v21 = vadd.f32 %v2540_v24, %v2310_v59  ;;  %8878 = vmatprep.mubr.msk.f32.mxu0 %vm9718_vm3, %v14391_v4 }
 0x3f4   : > { %v8201_v31 = vpop.f32.mrf.mxu1  ;;  %v8576_v12 = vpop.f32.mrf.mxu0 }
 0x3f5   : > { %14506 = vst [vmem:[#allocation115_spill] sm:$0xff] %v12136_v21  ;;  %8504 = vmatmul.mubr.f32.gmra.mxu1 %v12145_v38  ;;  %v2312_v31 = vadd.f32 %v14509_v57, %v1952_v45  ;;  %v12162_v12 = vld [vmem:[#allocation2 + $0xde] sm:$0xff]  ;;  %v14513_v45 = vld [vmem:[#allocation9_spill] sm:$0xff] }
 0x3f6   : > { %v2545_v60 = vpop.f32.mrf.mxu1  ;;  %v12150_v24 = vpop.f32.mrf.mxu0  ;;  %8879 = vmatmul.mubr.f32.gmra.mxu0 %v12147_v17  ;;  %8506 = vmatprep.mubr.msk.f32.mxu1 %vm9718_vm3, %v14391_v4 }
 0x3f7   : > { %14507 = vst [vmem:[#allocation116_spill] sm:$0xff] %v12150_v24  ;;  %v12153_v59 = vadd.f32 %v2545_v60, %v2311_v32  ;;  %8881 = vmatprep.mubr.msk.f32.mxu0 %vm9718_vm3, %v14391_v4  ;;  %v12164_v24 = vld [vmem:[#allocation2 + $0xf0] sm:$0xff] }
 0x3f8   : > { %v8204_v50 = vpop.f32.mrf.mxu1  ;;  %v8579_v56 = vpop.f32.mrf.mxu0  ;;  %14510 = vst [vmem:[#allocation7_spill] sm:$0xff] %v12164_v24 }
 0x3f9   : > { %14508 = vst [vmem:[#allocation117_spill] sm:$0xff] %v12153_v59  ;;  %8507 = vmatmul.mubr.f32.gmra.mxu1 %v12162_v12  ;;  %v1954_v50 = vadd.f32 %v11612_v13, %v14513_v45  ;;  %v14514_v56 = vld [vmem:[#allocation8_spill] sm:$0xff] }
 0x3fa   : > { %v2550_v21 = vpop.f32.mrf.mxu1  ;;  %v12167_v60 = vpop.f32.mrf.mxu0  ;;  %8882 = vmatmul.mubr.f32.gmra.mxu0 %v12164_v24  ;;  %8509 = vmatprep.mubr.msk.f32.mxu1 %vm9718_vm3, %v14391_v4  ;;  %v2313_v57 = vadd.f32 %v14514_v56, %v1953_v61  ;;  %v12179_v59 = vld [vmem:[#allocation2 + $0xe6] sm:$0xff]  ;;  %v14519_v56 = vld [vmem:[#allocation10_spill] sm:$0xff] }
 0x3fb   : > { %14511 = vst [vmem:[#allocation118_spill] sm:$0xff] %v12167_v60  ;;  %v12170_v32 = vadd.f32 %v2550_v21, %v2312_v31  ;;  %8884 = vmatprep.mubr.msk.f32.mxu0 %vm9718_vm3, %v14391_v4  ;;  %14515 = vst [vmem:[#allocation9_spill] sm:$0xff] %v12179_v59  ;;  %v12181_v60 = vld [vmem:[#allocation2 + $0xf8] sm:$0xff] }
 0x3fc   : > { %v8207_v1 = vpop.f32.mrf.mxu1  ;;  %v8582_v58 = vpop.f32.mrf.mxu0 }
 0x3fd   : > { %14512 = vst [vmem:[#allocation119_spill] sm:$0xff] %v12170_v32  ;;  %8510 = vmatmul.mubr.f32.gmra.mxu1 %v12179_v59  ;;  %v14518_v1 = vld [vmem:[#allocation11_spill] sm:$0xff]  ;;  %v2314_v32 = vadd.f32 %v14519_v56, %v1954_v50  ;;  %v12196_v59 = vld [vmem:[#allocation2 + $0xee] sm:$0xff] }
 0x3fe   : > { %v2555_v24 = vpop.f32.mrf.mxu1  ;;  %v12184_v21 = vpop.f32.mrf.mxu0  ;;  %8885 = vmatmul.mubr.f32.gmra.mxu0 %v12181_v60  ;;  %8512 = vmatprep.mubr.msk.f32.mxu1 %vm9718_vm3, %v14391_v4  ;;  %v1955_v58 = vadd.f32 %v11624_v3, %v14518_v1  ;;  %14520 = vst [vmem:[#allocation11_spill] sm:$0xff] %v12196_v59 }
 0x3ff   : > { %14516 = vst [vmem:[#allocation8_spill] sm:$0xff] %v12184_v21  ;;  %v12187_v31 = vadd.f32 %v2555_v24, %v2313_v57  ;;  %8887 = vmatprep.mubr.msk.f32.mxu0 %vm9718_vm3, %v14391_v4  ;;  %v12198_v21 = vld [vmem:[#allocation2 + $0x100] sm:$0xff] }
 0x400   : > { %v8210_v13 = vpop.f32.mrf.mxu1  ;;  %v8585_v61 = vpop.f32.mrf.mxu0  ;;  %14521 = vst [vmem:[#allocation10_spill] sm:$0xff] %v12198_v21 }
 0x401   : > { %14517 = vst [vmem:[#allocation120_spill] sm:$0xff] %v12187_v31  ;;  %v1160_v45 = vpop.permute.xlu1 %1159  ;;  %8513 = vmatmul.mubr.f32.gmra.mxu1 %v12196_v59  ;;  %v14524_v61 = vld [vmem:[#allocation13_spill] sm:$0xff]  ;;  %v14525_v31 = vld [vmem:[#allocation12_spill] sm:$0xff] }
 0x402   : > { %1248 = vst.msk [vmem:[#allocation2 + $0x11f] sm:$0xff] %vm1212_vm6, %v1160_v45  ;;  %v2560_v24 = vpop.f32.mrf.mxu1  ;;  %v12202_v57 = vpop.f32.mrf.mxu0  ;;  %8888 = vmatmul.mubr.f32.gmra.mxu0 %v12198_v21  ;;  %8515 = vmatprep.mubr.msk.f32.mxu1 %vm9718_vm3, %v14391_v4  ;;  %v1956_v1 = vadd.f32 %v11635_v62, %v14524_v61  ;;  %v2315_v59 = vadd.f32 %v14525_v31, %v1955_v58  ;;  %v12216_v21 = vld [vmem:[#allocation2 + $0x108] sm:$0xff] }
 0x403   : > { %14522 = vst [vmem:[#allocation121_spill] sm:$0xff] %v12202_v57  ;;  %v12205_v13 = vadd.f32 %v2560_v24, %v2314_v32  ;;  %8890 = vmatprep.mubr.msk.f32.mxu0 %vm9718_vm3, %v14391_v4  ;;  %v12214_v57 = vld [vmem:[#allocation2 + $0xf6] sm:$0xff] }
 0x404   : > { %v8213_v3 = vpop.f32.mrf.mxu1  ;;  %v8588_v50 = vpop.f32.mrf.mxu0 }
 0x405   : > { %14523 = vst [vmem:[#allocation122_spill] sm:$0xff] %v12205_v13  ;;  %v1162_v45 = vpop.permute.xlu0 %1161  ;;  %v794_v56 = vpop.permute.xlu1 %793  ;;  %8516 = vmatmul.mubr.f32.gmra.mxu1 %v12214_v57  ;;  %v12233_v13 = vld [vmem:[#allocation2 + $0xfe] sm:$0xff] }
 0x406   : > { %1249 = vst.msk [vmem:[#allocation2 + $0x127] sm:$0xff] %vm1212_vm6, %v1162_v45  ;;  %v878_v32 = vmax.f32 %v11647_v14, %v794_v56  ;;  %v2565_v24 = vpop.f32.mrf.mxu1  ;;  %v12221_v3 = vpop.f32.mrf.mxu0  ;;  %8891 = vmatmul.mubr.f32.gmra.mxu0 %v12216_v21  ;;  %8518 = vmatprep.mubr.msk.f32.mxu1 %vm9718_vm3, %v14391_v4  ;;  %v14528_v14 = vld [vmem:[#allocation15_spill] sm:$0xff]  ;;  %v14529_v56 = vld [vmem:[#allocation14_spill] sm:$0xff] }
 0x407   : > { %14526 = vst [vmem:[#allocation13_spill] sm:$0xff] %v12221_v3  ;;  %v12224_v62 = vadd.f32 %v2565_v24, %v2315_v59  ;;  %8893 = vmatprep.mubr.msk.f32.mxu0 %vm9718_vm3, %v14391_v4  ;;  %v1957_v61 = vadd.f32 %v11649_v11, %v14528_v14  ;;  %v2316_v3 = vadd.f32 %v14529_v56, %v1956_v1  ;;  %14530 = vst [vmem:[#allocation15_spill] sm:$0xff] %v12233_v13  ;;  %v12235_v59 = vld [vmem:[#allocation2 + $0x110] sm:$0xff]  ;;  %v14534_v11 = vmov 0.0   ;;  %v14536_v56 = vld [vmem:[#allocation5_spill] sm:$0xff] }
 0x408   : > { %v960_v31 = vmul.f32 0.2, %v878_v32  ;;  %v8216_v58 = vpop.f32.mrf.mxu1  ;;  %v8591_v50 = vpop.f32.mrf.mxu0  ;;  %vm919_vm15 = vcmp.ge.f32.partialorder %v878_v32, 0.0  ;;  %14531 = vst [vmem:[#allocation14_spill] sm:$0xff] %v12235_v59 }
 0x409   : > { %14527 = vst [vmem:[#allocation12_spill] sm:$0xff] %v12224_v62  ;;  %v796_v45 = vpop.permute.xlu0 %795  ;;  %8519 = vmatmul.mubr.f32.gmra.mxu1 %v12233_v13 }
 0x40a   : > { %v879_v24 = vmax.f32 %v11666_v34, %v796_v45  ;;  %v2570_v62 = vpop.f32.mrf.mxu1  ;;  %v12239_v4 = vpop.f32.mrf.mxu0  ;;  %8894 = vmatmul.mubr.f32.gmra.mxu0 %v12235_v59  ;;  %v1001_v58 = vsel %vm919_vm15, %v878_v32, %v960_v31  ;;  %8521 = vmatprep.mubr.msk.f32.mxu1 %vm9718_vm3, %v14534_v11  ;;  %v14535_v45 = vld [vmem:[#allocation6_spill] sm:$0xff]  ;;  %v14537_v32 = vld [vmem:[#allocation17_spill] sm:$0xff] }
 0x40b   : > { %14532 = vst [vmem:[#allocation123_spill] sm:$0xff] %v12239_v4  ;;  %v12242_v50 = vadd.f32 %v2570_v62, %v2316_v3  ;;  %1163 = vrot.lane.b32.xlu1 %v1001_v58, %s9717_s25  ;;  %1043 = vst.msk [vmem:[#allocation2 + $0x130] sm:$0xff] %vm1004_vm1, %v1001_v58  ;;  %8896 = vmatprep.mubr.msk.f32.mxu0 %vm9718_vm3, %v14534_v11  ;;  %v12252_v4 = vmax.f32 %v14536_v56, %v14535_v45  ;;  %v14538_v62 = vld [vmem:[#allocation16_spill] sm:$0xff]  ;;  %v14540_v45 = vld [vmem:[#allocation18_spill] sm:$0xff] }
 0x40c   : > { %v961_v1 = vmul.f32 0.2, %v879_v24  ;;  %v8219_v14 = vpop.f32.mrf.mxu1  ;;  %v8594_v34 = vpop.f32.mrf.mxu0  ;;  %vm920_vm0 = vcmp.ge.f32.partialorder %v879_v24, 0.0  ;;  %v1958_v3 = vadd.f32 %v11668_v30, %v14537_v32  ;;  %v2317_v31 = vadd.f32 %v14538_v62, %v1957_v61  ;;  %v12257_v58 = vld [vmem:[#allocation2 + $0x106] sm:$0xff] }
 0x40d   : > { %14533 = vst [vmem:[#allocation124_spill] sm:$0xff] %v12242_v50  ;;  %v12259_v50 = vld [vmem:[#allocation2 + $0x118] sm:$0xff]  ;;  %8522 = vmatmul.mubr.f32.gmra.mxu1 %v12257_v58 }
 0x40e   : > { %v2575_v59 = vpop.f32.mrf.mxu1  ;;  %v12262_v14 = vpop.f32.mrf.mxu0  ;;  %8897 = vmatmul.mubr.f32.gmra.mxu0 %v12259_v50  ;;  %v1002_v34 = vsel %vm920_vm0, %v879_v24, %v961_v1  ;;  %8681 = vmatprep.mubr.msk.f32.mxu1 %vm9718_vm3, %v14534_v11  ;;  %v14539_v24 = vld [vmem:[#allocation19_spill] sm:$0xff]  ;;  %v2318_v56 = vadd.f32 %v14540_v45, %v1958_v3 }
 0x40f   : > { %v12265_v13 = vadd.f32 %v2575_v59, %v2317_v31  ;;  %1165 = vrot.lane.b32.xlu0 %v1002_v34, %s9717_s25  ;;  %1044 = vst.msk [vmem:[#allocation2 + $0x138] sm:$0xff] %vm1004_vm1, %v1002_v34  ;;  %797 = vrot.lane.b32.xlu1 %v12252_v4, %s9717_s25  ;;  %v4603_v59 = vld [vmem:[%s14361_s2 + $0x4f8] sm:$0xff]  ;;  %v1959_v1 = vadd.f32 %v11685_v29, %v14539_v24  ;;  %v4602_v31 = vld [vmem:[%s14361_s2 + $0x4f0] sm:$0xff] }
 0x410   : > { %v8222_v30 = vpop.f32.mrf.mxu1  ;;  %v8597_v61 = vpop.f32.mrf.mxu0  ;;  %9056 = vmatprep.mubr.msk.f32.mxu0 %vm9718_vm3, %v14534_v11  ;;  %v5683_v34 = vld [vmem:[%s14361_s2 + $0x678] sm:$0xff] }
 0x411   : > { %8682 = vmatmul.mubr.f32.vlgmr.msra.gmra.mxu1 %v11697_v40  ;;  %v14541_v40 = vld [vmem:[#allocation20_spill] sm:$0xff] }
 0x412   : > { %v2580_v32 = vpop.f32.mrf.mxu1  ;;  %v12281_v62 = vpop.f32.mrf.mxu0  ;;  %9057 = vmatmul.mubr.f32.vlgmr.msra.gmra.mxu0 %v11699_v48  ;;  %8900 = vmatpush3.msra.mxu1 %v4603_v59  ;;  %v1960_v48 = vadd.f32 %v11705_v41, %v11276_v43  ;;  %v2319_v61 = vadd.f32 %v14541_v40, %v1959_v1  ;;  %v4601_v59 = vld [vmem:[%s14361_s2 + $0x4e8] sm:$0xff]  ;;  %v4599_v40 = vld [vmem:[%s14361_s2 + $0x4d8] sm:$0xff] }
 0x413   : > { %v12291_v30 = vadd.f32 %v2580_v32, %v2318_v56  ;;  %8684 = vmatprep.mubr.msk.f32.mxu1 %vm9718_vm3, %v14534_v11  ;;  %9059 = vmatprep.mubr.msk.f32.mxu0 %vm9718_vm3, %v14534_v11  ;;  %v5682_v56 = vld [vmem:[%s14361_s2 + $0x670] sm:$0xff] }
 0x414   : > { %v8225_v29 = vpop.f32.mrf.mxu1  ;;  %v8600_v3 = vpop.f32.mrf.mxu0  ;;  %8901 = vmatprep.subr.mxu1 %v14534_v11  ;;  %9275 = vmatpush3.msra.mxu0 %v5683_v34  ;;  %v2320_v1 = vadd.f32 %v11278_v33, %v1960_v48  ;;  %v4600_v34 = vld [vmem:[%s14361_s2 + $0x4e0] sm:$0xff] }
 0x415   : > { %8902 = vmatpush3.msra.mxu1 %v4602_v31  ;;  %9276 = vmatprep.subr.mxu0 %v14534_v11  ;;  %v5681_v29 = vld [vmem:[%s14361_s2 + $0x668] sm:$0xff] }
 0x416   : > { %v2585_v24 = vpop.f32.mrf.mxu1  ;;  %v12301_v45 = vpop.f32.mrf.mxu0  ;;  %8685 = vmatmul.mubr.f32.gmra.mxu1 %v11719_v63  ;;  %9060 = vmatmul.mubr.f32.gmra.mxu0 %v11721_v39  ;;  %v1961_v39 = vadd.f32 %v11727_v53, %v11293_v10 }
 0x417   : > { %v12311_v43 = vadd.f32 %v2585_v24, %v2319_v61  ;;  %8687 = vmatprep.mubr.msk.f32.mxu1 %vm9718_vm3, %v14534_v11  ;;  %9062 = vmatprep.mubr.msk.f32.mxu0 %vm9718_vm3, %v14534_v11  ;;  %v5680_v61 = vld [vmem:[%s14361_s2 + $0x660] sm:$0xff] }
 0x418   : > { %v8228_v41 = vpop.f32.mrf.mxu1  ;;  %v8603_v63 = vpop.f32.mrf.mxu0  ;;  %8903 = vmatprep.subr.mxu1 %v14534_v11  ;;  %9277 = vmatpush3.msra.mxu0 %v5682_v56 }
 0x419   : > { %8904 = vmatpush3.msra.mxu1 %v4601_v59  ;;  %9278 = vmatprep.subr.mxu0 %v14534_v11  ;;  %v14544_v41 = vld [vmem:[#allocation65_spill] sm:$0xff]  ;;  %v14545_v63 = vld [vmem:[#allocation66_spill] sm:$0xff] }
 0x41a   : > { %v2590_v32 = vpop.f32.mrf.mxu1  ;;  %v12322_v31 = vpop.f32.mrf.mxu0  ;;  %8688 = vmatmul.mubr.f32.gmra.mxu1 %v11741_v52  ;;  %9063 = vmatmul.mubr.f32.gmra.mxu0 %v11743_v23  ;;  %v1962_v23 = vadd.f32 %v11749_v51, %v11310_v20  ;;  %v2321_v52 = vadd.f32 %v11295_v15, %v1961_v39  ;;  %v4598_v39 = vld [vmem:[%s14361_s2 + $0x4d0] sm:$0xff] }
 0x41b   : > { %v12332_v10 = vadd.f32 %v2590_v32, %v2320_v1  ;;  %8690 = vmatprep.mubr.msk.f32.mxu1 %vm9718_vm3, %v14534_v11  ;;  %9065 = vmatprep.mubr.msk.f32.mxu0 %vm9718_vm3, %v14534_v11  ;;  %v5679_v1 = vld [vmem:[%s14361_s2 + $0x658] sm:$0xff] }
 0x41c   : > { %v8231_v33 = vpop.f32.mrf.mxu1  ;;  %v8606_v53 = vpop.f32.mrf.mxu0  ;;  %8905 = vmatprep.subr.mxu1 %v14534_v11  ;;  %9279 = vmatpush3.msra.mxu0 %v5681_v29  ;;  %v14547_v29 = vld [vmem:[#allocation67_spill] sm:$0xff] }
 0x41d   : > { %8906 = vmatpush3.msra.mxu1 %v4600_v34  ;;  %9280 = vmatprep.subr.mxu0 %v14534_v11  ;;  %v14546_v34 = vld [vmem:[#allocation23_spill] sm:$0xff]  ;;  %v14548_v53 = vld [vmem:[#allocation22_spill] sm:$0xff] }
 0x41e   : > { %v2595_v3 = vpop.f32.mrf.mxu1  ;;  %v12343_v48 = vpop.f32.mrf.mxu0  ;;  %8691 = vmatmul.mubr.f32.gmra.mxu1 %v11763_v0  ;;  %9066 = vmatmul.mubr.f32.gmra.mxu0 %v11765_v42  ;;  %v1963_v42 = vadd.f32 %v11771_v7, %v11327_v8  ;;  %v14542_v0 = vld [vmem:[#allocation21_spill] sm:$0xff]  ;;  %v1964_v33 = vadd.f32 %v14547_v29, %v14546_v34  ;;  %v14557_v29 = vld [vmem:[#allocation74_spill] sm:$0xff] }
 0x41f   : > { %v12353_v20 = vadd.f32 %v2595_v3, %v2321_v52  ;;  %8693 = vmatprep.mubr.msk.f32.mxu1 %vm9718_vm3, %v14534_v11  ;;  %9068 = vmatprep.mubr.msk.f32.mxu0 %vm9718_vm3, %v14534_v11  ;;  %v2322_v24 = vadd.f32 %v14542_v0, %v1962_v23  ;;  %v14556_v34 = vld [vmem:[#allocation73_spill] sm:$0xff] }
 0x420   : > { %v8234_v15 = vpop.f32.mrf.mxu1  ;;  %v8609_v51 = vpop.f32.mrf.mxu0  ;;  %8907 = vmatprep.subr.mxu1 %v14534_v11  ;;  %9281 = vmatpush3.msra.mxu0 %v5680_v61  ;;  %v2323_v23 = vadd.f32 %v14548_v53, %v1963_v42  ;;  %v14551_v61 = vld [vmem:[#allocation70_spill] sm:$0xff]  ;;  %v4596_v53 = vld [vmem:[%s14361_s2 + $0x4c0] sm:$0xff] }
 0x421   : > { %8908 = vmatpush3.msra.mxu1 %v4599_v40  ;;  %9282 = vmatprep.subr.mxu0 %v14534_v11  ;;  %v14550_v40 = vld [vmem:[#allocation69_spill] sm:$0xff]  ;;  %v5678_v51 = vld [vmem:[%s14361_s2 + $0x650] sm:$0xff] }
 0x422   : > { %v2600_v59 = vpop.f32.mrf.mxu1  ;;  %v12364_v56 = vpop.f32.mrf.mxu0  ;;  %8694 = vmatmul.mubr.f32.gmra.mxu1 %v14544_v41  ;;  %9069 = vmatmul.mubr.f32.gmra.mxu0 %v14545_v63  ;;  %v4597_v15 = vld [vmem:[%s14361_s2 + $0x4c8] sm:$0xff]  ;;  %v14553_v41 = vld [vmem:[#allocation71_spill] sm:$0xff] }
 0x423   : > { %14543 = vst [vmem:[#allocation6_spill] sm:$0xff] %v12364_v56  ;;  %v12374_v8 = vadd.f32 %v2600_v59, %v2322_v24  ;;  %8696 = vmatprep.mubr.msk.f32.mxu1 %vm9718_vm3, %v14534_v11  ;;  %9071 = vmatprep.mubr.msk.f32.mxu0 %vm9718_vm3, %v14534_v11  ;;  %v14552_v59 = vld [vmem:[#allocation25_spill] sm:$0xff]  ;;  %v14598_v56 = vld [vmem:[#allocation102_spill] sm:$0xff] }
 0x424   : > { %v8237_v7 = vpop.f32.mrf.mxu1  ;;  %v8612_v32 = vpop.f32.mrf.mxu0  ;;  %8909 = vmatprep.subr.mxu1 %v14534_v11  ;;  %9283 = vmatpush3.msra.mxu0 %v5679_v1  ;;  %v1965_v63 = vadd.f32 %v14553_v41, %v14552_v59 }
 0x425   : > { %8910 = vmatpush3.msra.mxu1 %v4598_v39  ;;  %9284 = vmatprep.subr.mxu0 %v14534_v11  ;;  %v14554_v39 = vld [vmem:[#allocation24_spill] sm:$0xff] }
 0x426   : > { %v2605_v52 = vpop.f32.mrf.mxu1  ;;  %v12385_v3 = vpop.f32.mrf.mxu0  ;;  %8697 = vmatmul.mubr.f32.gmra.mxu1 %v14550_v40  ;;  %9072 = vmatmul.mubr.f32.gmra.mxu0 %v14551_v61  ;;  %v2324_v1 = vadd.f32 %v14554_v39, %v1964_v33  ;;  %v14558_v61 = vld [vmem:[#allocation27_spill] sm:$0xff]  ;;  %v14562_v39 = vld [vmem:[#allocation77_spill] sm:$0xff] }
 0x427   : > { %14549 = vst [vmem:[#allocation5_spill] sm:$0xff] %v12385_v3  ;;  %v12395_v0 = vadd.f32 %v2605_v52, %v2323_v23  ;;  %8699 = vmatprep.mubr.msk.f32.mxu1 %vm9718_vm3, %v14534_v11  ;;  %9074 = vmatprep.mubr.msk.f32.mxu0 %vm9718_vm3, %v14534_v11  ;;  %v5677_v23 = vld [vmem:[%s14361_s2 + $0x648] sm:$0xff]  ;;  %v14593_v3 = vld [vmem:[#allocation98_spill] sm:$0xff] }
 0x428   : > { %v8240_v42 = vpop.f32.mrf.mxu1  ;;  %v8615_v24 = vpop.f32.mrf.mxu0  ;;  %8911 = vmatprep.subr.mxu1 %v14534_v11  ;;  %9285 = vmatpush3.msra.mxu0 %v5678_v51 }
 0x429   : > { %8912 = vmatpush3.msra.mxu1 %v4597_v15  ;;  %9286 = vmatprep.subr.mxu0 %v14534_v11  ;;  %v14559_v15 = vld [vmem:[#allocation75_spill] sm:$0xff]  ;;  %v14560_v42 = vld [vmem:[#allocation26_spill] sm:$0xff] }
 0x42a   : > { %v2610_v7 = vpop.f32.mrf.mxu1  ;;  %v12406_v32 = vpop.f32.mrf.mxu0  ;;  %8700 = vmatmul.mubr.f32.gmra.mxu1 %v14556_v34  ;;  %9075 = vmatmul.mubr.f32.gmra.mxu0 %v14557_v29  ;;  %v1966_v51 = vadd.f32 %v14559_v15, %v14558_v61  ;;  %v2325_v24 = vadd.f32 %v14560_v42, %v1965_v63  ;;  %v5676_v34 = vld [vmem:[%s14361_s2 + $0x640] sm:$0xff] }
 0x42b   : > { %14555 = vst [vmem:[#allocation17_spill] sm:$0xff] %v12406_v32  ;;  %v12416_v52 = vadd.f32 %v2610_v7, %v2324_v1  ;;  %8702 = vmatprep.mubr.msk.f32.mxu1 %vm9718_vm3, %v14534_v11  ;;  %9077 = vmatprep.mubr.msk.f32.mxu0 %vm9718_vm3, %v14534_v11  ;;  %v14563_v1 = vld [vmem:[#allocation78_spill] sm:$0xff]  ;;  %v4595_v7 = vld [vmem:[%s14361_s2 + $0x4b8] sm:$0xff]  ;;  %v14566_v61 = vld [vmem:[#allocation28_spill] sm:$0xff] }
 0x42c   : > { %v8243_v33 = vpop.f32.mrf.mxu1  ;;  %v8618_v40 = vpop.f32.mrf.mxu0  ;;  %8913 = vmatprep.subr.mxu1 %v14534_v11  ;;  %9287 = vmatpush3.msra.mxu0 %v5677_v23  ;;  %v14564_v23 = vld [vmem:[#allocation29_spill] sm:$0xff]  ;;  %v2326_v15 = vadd.f32 %v14566_v61, %v1966_v51  ;;  %v14572_v61 = vld [vmem:[#allocation30_spill] sm:$0xff] }
 0x42d   : > { %8914 = vmatpush3.msra.mxu1 %v4596_v53  ;;  %9288 = vmatprep.subr.mxu0 %v14534_v11  ;;  %v14565_v33 = vld [vmem:[#allocation79_spill] sm:$0xff]  ;;  %v14587_v32 = vld [vmem:[#allocation94_spill] sm:$0xff] }
 0x42e   : > { %v2615_v59 = vpop.f32.mrf.mxu1  ;;  %v12427_v41 = vpop.f32.mrf.mxu0  ;;  %8703 = vmatmul.mubr.f32.gmra.mxu1 %v14562_v39  ;;  %9078 = vmatmul.mubr.f32.gmra.mxu0 %v14563_v1  ;;  %v1967_v40 = vadd.f32 %v14565_v33, %v14564_v23  ;;  %v14569_v39 = vld [vmem:[#allocation82_spill] sm:$0xff]  ;;  %v14571_v23 = vld [vmem:[#allocation83_spill] sm:$0xff] }
 0x42f   : > { %14561 = vst [vmem:[#allocation16_spill] sm:$0xff] %v12427_v41  ;;  %v12437_v29 = vadd.f32 %v2615_v59, %v2325_v24  ;;  %8705 = vmatprep.mubr.msk.f32.mxu1 %vm9718_vm3, %v14534_v11  ;;  %9080 = vmatprep.mubr.msk.f32.mxu0 %vm9718_vm3, %v14534_v11  ;;  %v14568_v59 = vld [vmem:[#allocation81_spill] sm:$0xff]  ;;  %v4594_v1 = vld [vmem:[%s14361_s2 + $0x4b0] sm:$0xff] }
 0x430   : > { %v8246_v63 = vpop.f32.mrf.mxu1  ;;  %v8621_v53 = vpop.f32.mrf.mxu0  ;;  %8915 = vmatprep.subr.mxu1 %v14534_v11  ;;  %9289 = vmatpush3.msra.mxu0 %v5676_v34  ;;  %v14570_v34 = vld [vmem:[#allocation31_spill] sm:$0xff]  ;;  %v14581_v41 = vld [vmem:[#allocation90_spill] sm:$0xff] }
 0x431   : > { %8916 = vmatpush3.msra.mxu1 %v4595_v7  ;;  %v5675_v63 = vld [vmem:[%s14361_s2 + $0x638] sm:$0xff]  ;;  %9290 = vmatprep.subr.mxu0 %v14534_v11  ;;  %v1968_v33 = vadd.f32 %v14571_v23, %v14570_v34 }
 0x432   : > { %v2620_v42 = vpop.f32.mrf.mxu1  ;;  %v12448_v24 = vpop.f32.mrf.mxu0  ;;  %8706 = vmatmul.mubr.f32.gmra.mxu1 %v14568_v59  ;;  %9081 = vmatmul.mubr.f32.gmra.mxu0 %v14569_v39  ;;  %v2327_v59 = vadd.f32 %v14572_v61, %v1967_v40  ;;  %v14574_v39 = vld [vmem:[#allocation85_spill] sm:$0xff]  ;;  %v14578_v61 = vld [vmem:[#allocation32_spill] sm:$0xff] }
 0x433   : > { %14567 = vst [vmem:[#allocation19_spill] sm:$0xff] %v12448_v24  ;;  %v12458_v53 = vadd.f32 %v2620_v42, %v2326_v15  ;;  %8708 = vmatprep.mubr.msk.f32.mxu1 %vm9718_vm3, %v14534_v11  ;;  %9083 = vmatprep.mubr.msk.f32.mxu0 %vm9718_vm3, %v14534_v11  ;;  %v14575_v24 = vld [vmem:[#allocation86_spill] sm:$0xff] }
 0x434   : > { %v8249_v51 = vpop.f32.mrf.mxu1  ;;  %v8624_v7 = vpop.f32.mrf.mxu0  ;;  %8917 = vmatprep.subr.mxu1 %v14534_v11  ;;  %9291 = vmatpush3.msra.mxu0 %v5675_v63  ;;  %v14577_v63 = vld [vmem:[#allocation87_spill] sm:$0xff] }
 0x435   : > { %8918 = vmatpush3.msra.mxu1 %v4594_v1  ;;  %v4593_v51 = vld [vmem:[%s14361_s2 + $0x4a8] sm:$0xff]  ;;  %v5674_v7 = vld [vmem:[%s14361_s2 + $0x630] sm:$0xff]  ;;  %9292 = vmatprep.subr.mxu0 %v14534_v11 }
 0x436   : > { %v2625_v15 = vpop.f32.mrf.mxu1  ;;  %v12469_v42 = vpop.f32.mrf.mxu0  ;;  %8709 = vmatmul.mubr.f32.gmra.mxu1 %v14574_v39  ;;  %9084 = vmatmul.mubr.f32.gmra.mxu0 %v14575_v24  ;;  %v14576_v24 = vld [vmem:[#allocation33_spill] sm:$0xff]  ;;  %v2328_v39 = vadd.f32 %v14578_v61, %v1968_v33 }
 0x437   : > { %14573 = vst [vmem:[#allocation18_spill] sm:$0xff] %v12469_v42  ;;  %v12479_v34 = vadd.f32 %v2625_v15, %v2327_v59  ;;  %8711 = vmatprep.mubr.msk.f32.mxu1 %vm9718_vm3, %v14534_v11  ;;  %9086 = vmatprep.mubr.msk.f32.mxu0 %vm9718_vm3, %v14534_v11  ;;  %v1969_v23 = vadd.f32 %v14577_v63, %v14576_v24  ;;  %v14580_v42 = vld [vmem:[#allocation89_spill] sm:$0xff]  ;;  %v14584_v63 = vld [vmem:[#allocation34_spill] sm:$0xff] }
 0x438   : > { %v8252_v40 = vpop.f32.mrf.mxu1  ;;  %v8627_v1 = vpop.f32.mrf.mxu0  ;;  %8919 = vmatprep.subr.mxu1 %v14534_v11  ;;  %9293 = vmatpush3.msra.mxu0 %v5674_v7 }
 0x439   : > { %8920 = vmatpush3.msra.mxu1 %v4593_v51  ;;  %v4592_v40 = vld [vmem:[%s14361_s2 + $0x4a0] sm:$0xff]  ;;  %v5673_v1 = vld [vmem:[%s14361_s2 + $0x628] sm:$0xff]  ;;  %9294 = vmatprep.subr.mxu0 %v14534_v11  ;;  %v14583_v51 = vld [vmem:[#allocation91_spill] sm:$0xff]  ;;  %v2329_v61 = vadd.f32 %v14584_v63, %v1969_v23 }
 0x43a   : > { %v2630_v59 = vpop.f32.mrf.mxu1  ;;  %v12490_v15 = vpop.f32.mrf.mxu0  ;;  %8712 = vmatmul.mubr.f32.gmra.mxu1 %v14580_v42  ;;  %9087 = vmatmul.mubr.f32.gmra.mxu0 %v14581_v41  ;;  %v14582_v41 = vld [vmem:[#allocation35_spill] sm:$0xff] }
 0x43b   : > { %14579 = vst [vmem:[#allocation20_spill] sm:$0xff] %v12490_v15  ;;  %v12500_v24 = vadd.f32 %v2630_v59, %v2328_v39  ;;  %8714 = vmatprep.mubr.msk.f32.mxu1 %vm9718_vm3, %v14534_v11  ;;  %9089 = vmatprep.mubr.msk.f32.mxu0 %vm9718_vm3, %v14534_v11  ;;  %v1970_v7 = vadd.f32 %v14583_v51, %v14582_v41  ;;  %v14586_v15 = vld [vmem:[#allocation93_spill] sm:$0xff]  ;;  %v14590_v51 = vld [vmem:[#allocation36_spill] sm:$0xff] }
 0x43c   : > { %v8255_v33 = vpop.f32.mrf.mxu1  ;;  %v8630_v42 = vpop.f32.mrf.mxu0  ;;  %8921 = vmatprep.subr.mxu1 %v14534_v11  ;;  %9295 = vmatpush3.msra.mxu0 %v5673_v1 }
 0x43d   : > { %8922 = vmatpush3.msra.mxu1 %v4592_v40  ;;  %v4591_v33 = vld [vmem:[%s14361_s2 + $0x498] sm:$0xff]  ;;  %v5672_v42 = vld [vmem:[%s14361_s2 + $0x620] sm:$0xff]  ;;  %9296 = vmatprep.subr.mxu0 %v14534_v11  ;;  %v2330_v63 = vadd.f32 %v14590_v51, %v1970_v7 }
 0x43e   : > { %v2635_v39 = vpop.f32.mrf.mxu1  ;;  %v12511_v59 = vpop.f32.mrf.mxu0  ;;  %8715 = vmatmul.mubr.f32.gmra.mxu1 %v14586_v15  ;;  %9090 = vmatmul.mubr.f32.gmra.mxu0 %v14587_v32  ;;  %v14588_v32 = vld [vmem:[#allocation37_spill] sm:$0xff]  ;;  %v14589_v40 = vld [vmem:[#allocation95_spill] sm:$0xff] }
 0x43f   : > { %14585 = vst [vmem:[#allocation21_spill] sm:$0xff] %v12511_v59  ;;  %v12521_v41 = vadd.f32 %v2635_v39, %v2329_v61  ;;  %8717 = vmatprep.mubr.msk.f32.mxu1 %vm9718_vm3, %v14534_v11  ;;  %9092 = vmatprep.mubr.msk.f32.mxu0 %vm9718_vm3, %v14534_v11  ;;  %v1971_v1 = vadd.f32 %v14589_v40, %v14588_v32  ;;  %v14592_v59 = vld [vmem:[#allocation97_spill] sm:$0xff]  ;;  %v14596_v40 = vld [vmem:[#allocation38_spill] sm:$0xff] }
 0x440   : > { %v8258_v23 = vpop.f32.mrf.mxu1  ;;  %v8633_v15 = vpop.f32.mrf.mxu0  ;;  %8923 = vmatprep.subr.mxu1 %v14534_v11  ;;  %9297 = vmatpush3.msra.mxu0 %v5672_v42 }
 0x441   : > { %8924 = vmatpush3.msra.mxu1 %v4591_v33  ;;  %v4590_v23 = vld [vmem:[%s14361_s2 + $0x490] sm:$0xff]  ;;  %v5671_v15 = vld [vmem:[%s14361_s2 + $0x618] sm:$0xff]  ;;  %9298 = vmatprep.subr.mxu0 %v14534_v11  ;;  %v2331_v51 = vadd.f32 %v14596_v40, %v1971_v1 }
 0x442   : > { %v2640_v61 = vpop.f32.mrf.mxu1  ;;  %v12532_v39 = vpop.f32.mrf.mxu0  ;;  %8718 = vmatmul.mubr.f32.gmra.mxu1 %v14592_v59  ;;  %9093 = vmatmul.mubr.f32.gmra.mxu0 %v14593_v3  ;;  %v14594_v3 = vld [vmem:[#allocation39_spill] sm:$0xff] }
 0x443   : > { %14591 = vst [vmem:[#allocation65_spill] sm:$0xff] %v12532_v39  ;;  %v12542_v32 = vadd.f32 %v2640_v61, %v2330_v63  ;;  %8720 = vmatprep.mubr.msk.f32.mxu1 %vm9718_vm3, %v14534_v11  ;;  %9095 = vmatprep.mubr.msk.f32.mxu0 %vm9718_vm3, %v14534_v11  ;;  %v14595_v33 = vld [vmem:[#allocation99_spill] sm:$0xff]  ;;  %v14597_v39 = vld [vmem:[#allocation101_spill] sm:$0xff] }
 0x444   : > { %v8261_v7 = vpop.f32.mrf.mxu1  ;;  %v8636_v59 = vpop.f32.mrf.mxu0  ;;  %8925 = vmatprep.subr.mxu1 %v14534_v11  ;;  %v1972_v42 = vadd.f32 %v14595_v33, %v14594_v3  ;;  %9299 = vmatpush3.msra.mxu0 %v5671_v15  ;;  %v14601_v33 = vld [vmem:[#allocation40_spill] sm:$0xff] }
 0x445   : > { %8926 = vmatpush3.msra.mxu1 %v4590_v23  ;;  %v4589_v7 = vld [vmem:[%s14361_s2 + $0x488] sm:$0xff]  ;;  %v5670_v59 = vld [vmem:[%s14361_s2 + $0x610] sm:$0xff]  ;;  %9300 = vmatprep.subr.mxu0 %v14534_v11  ;;  %v14600_v23 = vld [vmem:[#allocation103_spill] sm:$0xff] }
 0x446   : > { %v2645_v63 = vpop.f32.mrf.mxu1  ;;  %v12553_v61 = vpop.f32.mrf.mxu0  ;;  %8721 = vmatmul.mubr.f32.gmra.mxu1 %v14597_v39  ;;  %9096 = vmatmul.mubr.f32.gmra.mxu0 %v14598_v56  ;;  %v14599_v56 = vld [vmem:[#allocation41_spill] sm:$0xff]  ;;  %v2332_v40 = vadd.f32 %v14601_v33, %v1972_v42 }
 0x447   : > { %v12563_v3 = vadd.f32 %v2645_v63, %v2331_v51  ;;  %8723 = vmatprep.mubr.msk.f32.mxu1 %vm9718_vm3, %v14534_v11  ;;  %9098 = vmatprep.mubr.msk.f32.mxu0 %vm9718_vm3, %v14534_v11  ;;  %v1973_v15 = vadd.f32 %v14600_v23, %v14599_v56  ;;  %v14605_v23 = vld [vmem:[#allocation42_spill] sm:$0xff] }
 0x448   : > { %v8264_v1 = vpop.f32.mrf.mxu1  ;;  %v8639_v39 = vpop.f32.mrf.mxu0  ;;  %8927 = vmatprep.subr.mxu1 %v14534_v11  ;;  %9301 = vmatpush3.msra.mxu0 %v5670_v59 }
 0x449   : > { %8928 = vmatpush3.msra.mxu1 %v4589_v7  ;;  %v4588_v1 = vld [vmem:[%s14361_s2 + $0x480] sm:$0xff]  ;;  %v5669_v39 = vld [vmem:[%s14361_s2 + $0x608] sm:$0xff]  ;;  %9302 = vmatprep.subr.mxu0 %v14534_v11  ;;  %v2333_v33 = vadd.f32 %v14605_v23, %v1973_v15 }
 0x44a   : > { %v2650_v51 = vpop.f32.mrf.mxu1  ;;  %v12574_v63 = vpop.f32.mrf.mxu0  ;;  %8724 = vmatmul.mubr.f32.gmra.mxu1 %v12007_v55  ;;  %9099 = vmatmul.mubr.f32.gmra.mxu0 %v12009_v6  ;;  %v14603_v6 = vld [vmem:[#allocation43_spill] sm:$0xff]  ;;  %v14604_v7 = vld [vmem:[#allocation105_spill] sm:$0xff] }
 0x44b   : > { %14602 = vst [vmem:[#allocation66_spill] sm:$0xff] %v12574_v63  ;;  %v12584_v56 = vadd.f32 %v2650_v51, %v2332_v40  ;;  %8726 = vmatprep.mubr.msk.f32.mxu1 %vm9718_vm3, %v14534_v11  ;;  %9101 = vmatprep.mubr.msk.f32.mxu0 %vm9718_vm3, %v14534_v11  ;;  %v1974_v59 = vadd.f32 %v14604_v7, %v14603_v6  ;;  %v14606_v63 = vld [vmem:[#allocation107_spill] sm:$0xff] }
 0x44c   : > { %v8267_v42 = vpop.f32.mrf.mxu1  ;;  %v8642_v55 = vpop.f32.mrf.mxu0  ;;  %8929 = vmatprep.subr.mxu1 %v14534_v11  ;;  %9303 = vmatpush3.msra.mxu0 %v5669_v39 }
 0x44d   : > { %8930 = vmatpush3.msra.mxu1 %v4588_v1  ;;  %v5668_v42 = vld [vmem:[%s14361_s2 + $0x600] sm:$0xff]  ;;  %9304 = vmatprep.subr.mxu0 %v14534_v11 }
 0x44e   : > { %v2655_v40 = vpop.f32.mrf.mxu1  ;;  %v12595_v51 = vpop.f32.mrf.mxu0  ;;  %8727 = vmatmul.mubr.f32.gmra.mxu1 %v12026_v37  ;;  %9102 = vmatmul.mubr.f32.gmra.mxu0 %v14606_v63  ;;  %v14607_v37 = vld [vmem:[#allocation44_spill] sm:$0xff] }
 0x44f   : > { %v12602_v55 = vadd.f32 %v2655_v40, %v2333_v33  ;;  %8729 = vmatprep.mubr.msk.f32.mxu1 %vm9718_vm3, %v14534_v11  ;;  %9104 = vmatprep.mubr.msk.f32.mxu0 %vm9718_vm3, %v14534_v11  ;;  %v2334_v63 = vadd.f32 %v14607_v37, %v1974_v59  ;;  %v14608_v59 = vld [vmem:[#allocation45_spill] sm:$0xff]  ;;  %v14609_v37 = vld [vmem:[#allocation46_spill] sm:$0xff] }
 0x450   : > { %v8270_v15 = vpop.f32.mrf.mxu1  ;;  %v8645_v1 = vpop.f32.mrf.mxu0  ;;  %9149 = vmatprep.subr.mxu1 %v14534_v11  ;;  %9305 = vmatpush3.msra.mxu0 %v5668_v42  ;;  %v3024_v40 = vadd.f32 %v14608_v59, %v12034_v19  ;;  %v3025_v19 = vadd.f32 %v14609_v37, %v12051_v46 }
 0x451   : > { %9524 = vmatprep.subr.mxu0 %v14534_v11 }
 0x452   : > { %v2660_v39 = vpop.f32.mrf.mxu1  ;;  %v12611_v6 = vpop.f32.mrf.mxu0  ;;  %8730 = vmatmul.mubr.f32.gmra.mxu1 %v12043_v26  ;;  %9105 = vmatmul.mubr.f32.gmra.mxu0 %v12045_v35 }
 0x453   : > { %v12615_v7 = vadd.f32 %v2660_v39, %v2334_v63  ;;  %8732 = vmatprep.mubr.msk.f32.mxu1 %vm9718_vm3, %v14534_v11  ;;  %9107 = vmatprep.mubr.msk.f32.mxu0 %vm9718_vm3, %v14534_v11 }
 0x454   : > { %v8273_v23 = vpop.f32.mrf.mxu1  ;;  %v8648_v33 = vpop.f32.mrf.mxu0 }
 0x455   : > { %v14610_v33 = vld [vmem:[#allocation47_spill] sm:$0xff] }
 0x456   : > { %v3230_v42 = vpop.f32.mrf.mxu1  ;;  %8733 = vmatmul.mubr.f32.gmra.mxu1 %v12060_v22  ;;  %v12625_v26 = vpop.f32.mrf.mxu0  ;;  %9108 = vmatmul.mubr.f32.gmra.mxu0 %v12062_v18  ;;  %v3026_v46 = vadd.f32 %v14610_v33, %v12068_v28 }
 0x457   : > { %v12628_v35 = vadd.f32 %v3230_v42, %v3024_v40  ;;  %8735 = vmatprep.mubr.msk.f32.mxu1 %vm9718_vm3, %v14534_v11  ;;  %9110 = vmatprep.mubr.msk.f32.mxu0 %vm9718_vm3, %v14534_v11 }
 0x458   : > { %v8433_v15 = vpop.f32.mrf.mxu1  ;;  %v8808_v1 = vpop.f32.mrf.mxu0 }
 0x459   : > { %v14611_v15 = vld [vmem:[#allocation48_spill] sm:$0xff] }
 0x45a   : > { %v3235_v63 = vpop.f32.mrf.mxu1  ;;  %8736 = vmatmul.mubr.f32.gmra.mxu1 %v12077_v47  ;;  %v12637_v22 = vpop.f32.mrf.mxu0  ;;  %9111 = vmatmul.mubr.f32.gmra.mxu0 %v12079_v2  ;;  %v3027_v28 = vadd.f32 %v14611_v15, %v12085_v49  ;;  %v14614_v15 = vld [vmem:[#allocation115_spill] sm:$0xff] }
 0x45b   : > { %v12640_v18 = vadd.f32 %v3235_v63, %v3025_v19  ;;  %8738 = vmatprep.mubr.msk.f32.mxu1 %vm9718_vm3, %v14534_v11  ;;  %9113 = vmatprep.mubr.msk.f32.mxu0 %vm9718_vm3, %v14534_v11  ;;  %v14612_v63 = vld [vmem:[#allocation49_spill] sm:$0xff] }
 0x45c   : > { %v8436_v39 = vpop.f32.mrf.mxu1  ;;  %v8811_v23 = vpop.f32.mrf.mxu0  ;;  %v3028_v49 = vadd.f32 %v14612_v63, %v12102_v36 }
 0x45e   : > { %v3240_v59 = vpop.f32.mrf.mxu1  ;;  %8739 = vmatmul.mubr.f32.gmra.mxu1 %v12094_v54  ;;  %v12649_v47 = vpop.f32.mrf.mxu0  ;;  %9114 = vmatmul.mubr.f32.gmra.mxu0 %v12096_v44 }
 0x45f   : > { %v12652_v2 = vadd.f32 %v3240_v59, %v3026_v46  ;;  %8741 = vmatprep.mubr.msk.f32.mxu1 %vm9718_vm3, %v14534_v11  ;;  %9116 = vmatprep.mubr.msk.f32.mxu0 %vm9718_vm3, %v14534_v11  ;;  %v14613_v46 = vld [vmem:[#allocation50_spill] sm:$0xff] }
 0x460   : > { %v8439_v40 = vpop.f32.mrf.mxu1  ;;  %v8814_v42 = vpop.f32.mrf.mxu0  ;;  %v3029_v36 = vadd.f32 %v14613_v46, %v12119_v5  ;;  %v14619_v46 = vld [vmem:[#allocation9_spill] sm:$0xff] }
 0x462   : > { %v3245_v1 = vpop.f32.mrf.mxu1  ;;  %8742 = vmatmul.mubr.f32.gmra.mxu1 %v12111_v9  ;;  %v12661_v54 = vpop.f32.mrf.mxu0  ;;  %9117 = vmatmul.mubr.f32.gmra.mxu0 %v12113_v16 }
 0x463   : > { %v12664_v44 = vadd.f32 %v3245_v1, %v3027_v28  ;;  %8744 = vmatprep.mubr.msk.f32.mxu1 %vm9718_vm3, %v14534_v11  ;;  %9119 = vmatprep.mubr.msk.f32.mxu0 %vm9718_vm3, %v14534_v11  ;;  %v14615_v28 = vld [vmem:[#allocation51_spill] sm:$0xff] }
 0x464   : > { %v8442_v37 = vpop.f32.mrf.mxu1  ;;  %v8817_v19 = vpop.f32.mrf.mxu0  ;;  %v3030_v5 = vadd.f32 %v14615_v28, %v14614_v15  ;;  %v14621_v15 = vld [vmem:[#allocation53_spill] sm:$0xff] }
 0x465   : > { %v14616_v37 = vld [vmem:[#allocation7_spill] sm:$0xff] }
 0x466   : > { %v3250_v39 = vpop.f32.mrf.mxu1  ;;  %8745 = vmatmul.mubr.f32.gmra.mxu1 %v12128_v25  ;;  %v12673_v9 = vpop.f32.mrf.mxu0  ;;  %9120 = vmatmul.mubr.f32.gmra.mxu0 %v12130_v27 }
 0x467   : > { %v12676_v16 = vadd.f32 %v3250_v39, %v3028_v49  ;;  %8747 = vmatprep.mubr.msk.f32.mxu1 %vm9718_vm3, %v14534_v11  ;;  %9122 = vmatprep.mubr.msk.f32.mxu0 %vm9718_vm3, %v14534_v11  ;;  %v14617_v49 = vld [vmem:[#allocation117_spill] sm:$0xff]  ;;  %v14618_v39 = vld [vmem:[#allocation52_spill] sm:$0xff] }
 0x468   : > { %v8445_v23 = vpop.f32.mrf.mxu1  ;;  %v8820_v33 = vpop.f32.mrf.mxu0 }
 0x469   : > { %v3031_v23 = vadd.f32 %v14618_v39, %v14617_v49  ;;  %v14625_v39 = vld [vmem:[#allocation120_spill] sm:$0xff] }
 0x46a   : > { %v3255_v59 = vpop.f32.mrf.mxu1  ;;  %8748 = vmatmul.mubr.f32.gmra.mxu1 %v12145_v38  ;;  %v12685_v25 = vpop.f32.mrf.mxu0  ;;  %9123 = vmatmul.mubr.f32.gmra.mxu0 %v12147_v17 }
 0x46b   : > { %v12688_v27 = vadd.f32 %v3255_v59, %v3029_v36  ;;  %8750 = vmatprep.mubr.msk.f32.mxu1 %vm9718_vm3, %v14534_v11  ;;  %9125 = vmatprep.mubr.msk.f32.mxu0 %vm9718_vm3, %v14534_v11 }
 0x46c   : > { %v8448_v40 = vpop.f32.mrf.mxu1  ;;  %v8823_v42 = vpop.f32.mrf.mxu0 }
 0x46d   : > { %v14620_v42 = vld [vmem:[#allocation119_spill] sm:$0xff] }
 0x46e   : > { %v3260_v1 = vpop.f32.mrf.mxu1  ;;  %8751 = vmatmul.mubr.f32.gmra.mxu1 %v12162_v12  ;;  %v12697_v38 = vpop.f32.mrf.mxu0  ;;  %9126 = vmatmul.mubr.f32.gmra.mxu0 %v14616_v37  ;;  %v3032_v28 = vadd.f32 %v14621_v15, %v14620_v42 }
 0x46f   : > { %v12700_v17 = vadd.f32 %v3260_v1, %v3030_v5  ;;  %8753 = vmatprep.mubr.msk.f32.mxu1 %vm9718_vm3, %v14534_v11  ;;  %9128 = vmatprep.mubr.msk.f32.mxu0 %vm9718_vm3, %v14534_v11  ;;  %v14622_v1 = vld [vmem:[#allocation11_spill] sm:$0xff] }
 0x470   : > { %v8451_v19 = vpop.f32.mrf.mxu1  ;;  %v8826_v63 = vpop.f32.mrf.mxu0 }
 0x471   : > { %v14624_v19 = vld [vmem:[#allocation10_spill] sm:$0xff] }
 0x472   : > { %v3265_v33 = vpop.f32.mrf.mxu1  ;;  %8754 = vmatmul.mubr.f32.gmra.mxu1 %v14619_v46  ;;  %v12709_v12 = vpop.f32.mrf.mxu0  ;;  %9129 = vmatmul.mubr.f32.gmra.mxu0 %v12181_v60 }
 0x473   : > { %v12712_v36 = vadd.f32 %v3265_v33, %v3031_v23  ;;  %8756 = vmatprep.mubr.msk.f32.mxu1 %vm9718_vm3, %v14534_v11  ;;  %9131 = vmatprep.mubr.msk.f32.mxu0 %vm9718_vm3, %v14534_v11  ;;  %v14626_v23 = vld [vmem:[#allocation54_spill] sm:$0xff] }
 0x474   : > { %v8454_v59 = vpop.f32.mrf.mxu1  ;;  %v8829_v40 = vpop.f32.mrf.mxu0  ;;  %v3033_v33 = vadd.f32 %v14626_v23, %v14625_v39 }
 0x476   : > { %v3270_v5 = vpop.f32.mrf.mxu1  ;;  %8757 = vmatmul.mubr.f32.gmra.mxu1 %v14622_v1  ;;  %v12721_v37 = vpop.f32.mrf.mxu0  ;;  %9132 = vmatmul.mubr.f32.gmra.mxu0 %v14624_v19  ;;  %v14629_v1 = vld [vmem:[#allocation55_spill] sm:$0xff] }
 0x477   : > { %14623 = vst [vmem:[#allocation23_spill] sm:$0xff] %v12721_v37  ;;  %v12724_v60 = vadd.f32 %v3270_v5, %v3032_v28  ;;  %8759 = vmatprep.mubr.msk.f32.mxu1 %vm9718_vm3, %v14534_v11  ;;  %9134 = vmatprep.mubr.msk.f32.mxu0 %vm9718_vm3, %v14534_v11  ;;  %v14628_v5 = vld [vmem:[#allocation122_spill] sm:$0xff] }
 0x478   : > { %v8457_v63 = vpop.f32.mrf.mxu1  ;;  %v8832_v49 = vpop.f32.mrf.mxu0  ;;  %v3034_v19 = vadd.f32 %v14629_v1, %v14628_v5 }
 0x479   : > { %v14630_v63 = vld [vmem:[#allocation15_spill] sm:$0xff]  ;;  %v14632_v49 = vld [vmem:[#allocation14_spill] sm:$0xff] }
 0x47a   : > { %v3275_v46 = vpop.f32.mrf.mxu1  ;;  %8760 = vmatmul.mubr.f32.gmra.mxu1 %v12214_v57  ;;  %v12733_v59 = vpop.f32.mrf.mxu0  ;;  %9135 = vmatmul.mubr.f32.gmra.mxu0 %v12216_v21 }
 0x47b   : > { %14627 = vst [vmem:[#allocation67_spill] sm:$0xff] %v12733_v59  ;;  %v12736_v40 = vadd.f32 %v3275_v46, %v3033_v33  ;;  %8762 = vmatprep.mubr.msk.f32.mxu1 %vm9718_vm3, %v14534_v11  ;;  %9137 = vmatprep.mubr.msk.f32.mxu0 %vm9718_vm3, %v14534_v11  ;;  %v5607_v59 = vld [vmem:[#allocation2 + $0x50] sm:$0xff] }
 0x47c   : > { %v8460_v42 = vpop.f32.mrf.mxu1  ;;  %v8835_v15 = vpop.f32.mrf.mxu0 }
 0x47d   : > { %v1164_v28 = vpop.permute.xlu1 %1163  ;;  %v14633_v15 = vld [vmem:[#allocation12_spill] sm:$0xff] }
 0x47e   : > { %1250 = vst.msk [vmem:[#allocation2 + $0x12f] sm:$0xff] %vm1212_vm6, %v1164_v28  ;;  %v3280_v57 = vpop.f32.mrf.mxu1  ;;  %8763 = vmatmul.mubr.f32.gmra.mxu1 %v14630_v63  ;;  %v12746_v21 = vpop.f32.mrf.mxu0  ;;  %9138 = vmatmul.mubr.f32.gmra.mxu0 %v14632_v49  ;;  %v14634_v28 = vld [vmem:[#allocation56_spill] sm:$0xff] }
 0x47f   : > { %14631 = vst [vmem:[#allocation22_spill] sm:$0xff] %v12746_v21  ;;  %v12749_v39 = vadd.f32 %v3280_v57, %v3034_v19  ;;  %8765 = vmatprep.mubr.msk.f32.mxu1 %vm9718_vm3, %v14534_v11  ;;  %9140 = vmatprep.mubr.msk.f32.mxu0 %vm9718_vm3, %v14534_v11  ;;  %v3035_v5 = vadd.f32 %v14634_v28, %v14633_v15  ;;  %v12773_v15 = vld [vmem:[#allocation2 + $0x120] sm:$0xff] }
 0x480   : > { %v8463_v23 = vpop.f32.mrf.mxu1  ;;  %v8838_v33 = vpop.f32.mrf.mxu0 }
 0x481   : > { %v1166_v46 = vpop.permute.xlu0 %1165  ;;  %v798_v42 = vpop.permute.xlu1 %797 }
 0x482   : > { %1251 = vst.msk [vmem:[#allocation2 + $0x137] sm:$0xff] %vm1212_vm6, %v1166_v46  ;;  %v880_v1 = vmax.f32 %v12252_v4, %v798_v42  ;;  %v3285_v63 = vpop.f32.mrf.mxu1  ;;  %8766 = vmatmul.mubr.f32.gmra.mxu1 %v12257_v58  ;;  %v12760_v19 = vpop.f32.mrf.mxu0  ;;  %9141 = vmatmul.mubr.f32.gmra.mxu0 %v12259_v50  ;;  %v14636_v4 = vld [vmem:[#allocation124_spill] sm:$0xff]  ;;  %v14637_v46 = vld [vmem:[#allocation57_spill] sm:$0xff] }
 0x483   : > { %14635 = vst [vmem:[#allocation69_spill] sm:$0xff] %v12760_v19  ;;  %v12763_v57 = vadd.f32 %v3285_v63, %v3035_v5  ;;  %8768 = vmatprep.mubr.msk.f32.mxu1 %vm9718_vm3, %v14534_v11  ;;  %9143 = vmatprep.mubr.msk.f32.mxu0 %vm9718_vm3, %v14534_v11  ;;  %v3036_v42 = vadd.f32 %v14637_v46, %v14636_v4  ;;  %v12771_v58 = vld [vmem:[#allocation2 + $0x10e] sm:$0xff] }
 0x484   : > { %v962_v49 = vmul.f32 0.2, %v880_v1  ;;  %v8466_v23 = vpop.f32.mrf.mxu1  ;;  %v8841_v33 = vpop.f32.mrf.mxu0  ;;  %vm921_vm2 = vcmp.ge.f32.partialorder %v880_v1, 0.0  ;;  %v14639_v4 = vld [vmem:[#allocation58_spill] sm:$0xff]  ;;  %v5606_v19 = vld [vmem:[#allocation2 + $0x48] sm:$0xff] }
 0x485   : > { %v3037_v46 = vadd.f32 %v14639_v4, %v12265_v13 }
 0x486   : > { %v3290_v50 = vpop.f32.mrf.mxu1  ;;  %8769 = vmatmul.mubr.f32.gmra.mxu1 %v12771_v58  ;;  %v12776_v28 = vpop.f32.mrf.mxu0  ;;  %9144 = vmatmul.mubr.f32.gmra.mxu0 %v12773_v15  ;;  %v1003_v5 = vsel %vm921_vm2, %v880_v1, %v962_v49  ;;  %v12791_v1 = vld [vmem:[#allocation2 + $0x128] sm:$0xff] }
 0x487   : > { %14638 = vst [vmem:[#allocation70_spill] sm:$0xff] %v12776_v28  ;;  %v12779_v63 = vadd.f32 %v3290_v50, %v3036_v42  ;;  %1167 = vrot.lane.b32.xlu1 %v1003_v5, %s9717_s25  ;;  %1045 = vst.msk [vmem:[#allocation2 + $0x140] sm:$0xff] %vm1004_vm1, %v1003_v5  ;;  %8771 = vmatprep.mubr.msk.f32.mxu1 %vm9718_vm3, %v14534_v11  ;;  %v12789_v28 = vld [vmem:[#allocation2 + $0x116] sm:$0xff] }
 0x488   : > { %v8469_v23 = vpop.f32.mrf.mxu1  ;;  %v8844_v33 = vpop.f32.mrf.mxu0  ;;  %9146 = vmatprep.mubr.msk.f32.mxu0 %vm9718_vm3, %v14534_v11 }
 0x489   : > { %v5323_v23 = vld [vmem:[%s14361_s2 + $0x5f8] sm:$0xff] }
 0x48a   : > { %v3295_v49 = vpop.f32.mrf.mxu1  ;;  %8772 = vmatmul.mubr.f32.gmra.mxu1 %v12789_v28  ;;  %v12794_v42 = vpop.f32.mrf.mxu0  ;;  %9147 = vmatmul.mubr.f32.gmra.mxu0 %v12791_v1  ;;  %v14641_v33 = vld [vmem:[#allocation59_spill] sm:$0xff] }
 0x48b   : > { %14640 = vst [vmem:[#allocation25_spill] sm:$0xff] %v12794_v42  ;;  %v12797_v50 = vadd.f32 %v3295_v49, %v3037_v46  ;;  %8931 = vmatprep.mubr.msk.f32.mxu1 %vm9718_vm3, %v14534_v11  ;;  %9306 = vmatprep.mubr.msk.f32.mxu0 %vm9718_vm3, %v14534_v11  ;;  %v3038_v4 = vadd.f32 %v14641_v33, %v12291_v30  ;;  %v4526_v42 = vld [vmem:[#allocation2 + $0x36] sm:$0xff] }
 0x48c   : > { %v8472_v13 = vpop.f32.mrf.mxu1  ;;  %v8847_v5 = vpop.f32.mrf.mxu0  ;;  %v5322_v49 = vld [vmem:[%s14361_s2 + $0x5f0] sm:$0xff] }
 0x48d   : > { %v6403_v13 = vld [vmem:[%s14361_s2 + $0x778] sm:$0xff] }
 0x48e   : > { %v3300_v21 = vpop.f32.mrf.mxu1  ;;  %v12808_v46 = vpop.f32.mrf.mxu0  ;;  %8932 = vmatmul.mubr.f32.vlgmr.msra.gmra.mxu1 %v4526_v42  ;;  %9307 = vmatmul.mubr.f32.vlgmr.msra.gmra.mxu0 %v5606_v19  ;;  %v14643_v19 = vld [vmem:[#allocation60_spill] sm:$0xff] }
 0x48f   : > { %14642 = vst [vmem:[#allocation71_spill] sm:$0xff] %v12808_v46  ;;  %v12816_v5 = vadd.f32 %v3300_v21, %v3038_v4  ;;  %9150 = vmatpush3.msra.mxu1 %v5323_v23  ;;  %8934 = vmatprep.mubr.msk.f32.mxu1 %vm9718_vm3, %v14534_v11  ;;  %v3039_v42 = vadd.f32 %v14643_v19, %v12311_v43  ;;  %v4527_v46 = vld [vmem:[#allocation2 + $0x3e] sm:$0xff]  ;;  %v5321_v23 = vld [vmem:[%s14361_s2 + $0x5e8] sm:$0xff] }
 0x490   : > { %v8475_v30 = vpop.f32.mrf.mxu1  ;;  %v8850_v33 = vpop.f32.mrf.mxu0  ;;  %9309 = vmatprep.mubr.msk.f32.mxu0 %vm9718_vm3, %v14534_v11  ;;  %9151 = vmatprep.subr.mxu1 %v14534_v11  ;;  %v5608_v19 = vld [vmem:[#allocation2 + $0x58] sm:$0xff] }
 0x491   : > { %9152 = vmatpush3.msra.mxu1 %v5322_v49  ;;  %9525 = vmatpush3.msra.mxu0 %v6403_v13  ;;  %v6402_v30 = vld [vmem:[%s14361_s2 + $0x770] sm:$0xff]  ;;  %v4528_v13 = vld [vmem:[#allocation2 + $0x46] sm:$0xff] }
 0x492   : > { %v3305_v21 = vpop.f32.mrf.mxu1  ;;  %v12825_v4 = vpop.f32.mrf.mxu0  ;;  %8935 = vmatmul.mubr.f32.gmra.mxu1 %v4527_v46  ;;  %9310 = vmatmul.mubr.f32.gmra.mxu0 %v5607_v59  ;;  %v14645_v59 = vld [vmem:[#allocation61_spill] sm:$0xff] }
 0x493   : > { %14644 = vst [vmem:[#allocation24_spill] sm:$0xff] %v12825_v4  ;;  %v12833_v33 = vadd.f32 %v3305_v21, %v3039_v42  ;;  %8937 = vmatprep.mubr.msk.f32.mxu1 %vm9718_vm3, %v14534_v11  ;;  %9312 = vmatprep.mubr.msk.f32.mxu0 %vm9718_vm3, %v14534_v11  ;;  %v3040_v46 = vadd.f32 %v14645_v59, %v12332_v10 }
 0x494   : > { %v8478_v43 = vpop.f32.mrf.mxu1  ;;  %v8853_v49 = vpop.f32.mrf.mxu0  ;;  %9153 = vmatprep.subr.mxu1 %v14534_v11  ;;  %9526 = vmatprep.subr.mxu0 %v14534_v11 }
 0x495   : > { %9154 = vmatpush3.msra.mxu1 %v5321_v23  ;;  %9527 = vmatpush3.msra.mxu0 %v6402_v30  ;;  %v5320_v43 = vld [vmem:[%s14361_s2 + $0x5e0] sm:$0xff]  ;;  %v6401_v49 = vld [vmem:[%s14361_s2 + $0x768] sm:$0xff]  ;;  %v14647_v30 = vld [vmem:[#allocation62_spill] sm:$0xff] }
 0x496   : > { %v3310_v42 = vpop.f32.mrf.mxu1  ;;  %v12843_v21 = vpop.f32.mrf.mxu0  ;;  %8938 = vmatmul.mubr.f32.gmra.mxu1 %v4528_v13  ;;  %9313 = vmatmul.mubr.f32.gmra.mxu0 %v5608_v19  ;;  %v3041_v59 = vadd.f32 %v14647_v30, %v12353_v20  ;;  %v4529_v13 = vld [vmem:[#allocation2 + $0x4e] sm:$0xff]  ;;  %v5609_v19 = vld [vmem:[#allocation2 + $0x60] sm:$0xff] }
 0x497   : > { %14646 = vst [vmem:[#allocation73_spill] sm:$0xff] %v12843_v21  ;;  %v12851_v4 = vadd.f32 %v3310_v42, %v3040_v46  ;;  %8940 = vmatprep.mubr.msk.f32.mxu1 %vm9718_vm3, %v14534_v11  ;;  %9315 = vmatprep.mubr.msk.f32.mxu0 %vm9718_vm3, %v14534_v11 }
 0x498   : > { %v8481_v10 = vpop.f32.mrf.mxu1  ;;  %v8856_v23 = vpop.f32.mrf.mxu0  ;;  %9155 = vmatprep.subr.mxu1 %v14534_v11  ;;  %9528 = vmatprep.subr.mxu0 %v14534_v11 }
 0x499   : > { %9156 = vmatpush3.msra.mxu1 %v5320_v43  ;;  %9529 = vmatpush3.msra.mxu0 %v6401_v49  ;;  %v5319_v10 = vld [vmem:[%s14361_s2 + $0x5d8] sm:$0xff]  ;;  %v6400_v23 = vld [vmem:[%s14361_s2 + $0x760] sm:$0xff] }
 0x49a   : > { %v3315_v46 = vpop.f32.mrf.mxu1  ;;  %v12861_v42 = vpop.f32.mrf.mxu0  ;;  %8941 = vmatmul.mubr.f32.gmra.mxu1 %v4529_v13  ;;  %9316 = vmatmul.mubr.f32.gmra.mxu0 %v5609_v19  ;;  %v14649_v49 = vld [vmem:[#allocation63_spill] sm:$0xff]  ;;  %v5610_v19 = vld [vmem:[#allocation2 + $0x68] sm:$0xff] }
 0x49b   : > { %14648 = vst [vmem:[#allocation74_spill] sm:$0xff] %v12861_v42  ;;  %v12869_v21 = vadd.f32 %v3315_v46, %v3041_v59  ;;  %8943 = vmatprep.mubr.msk.f32.mxu1 %vm9718_vm3, %v14534_v11  ;;  %9318 = vmatprep.mubr.msk.f32.mxu0 %vm9718_vm3, %v14534_v11  ;;  %v3042_v30 = vadd.f32 %v14649_v49, %v12374_v8  ;;  %v4530_v13 = vld [vmem:[#allocation2 + $0x56] sm:$0xff] }
 0x49c   : > { %v8484_v20 = vpop.f32.mrf.mxu1  ;;  %v8859_v43 = vpop.f32.mrf.mxu0  ;;  %9157 = vmatprep.subr.mxu1 %v14534_v11  ;;  %9530 = vmatprep.subr.mxu0 %v14534_v11 }
 0x49d   : > { %9158 = vmatpush3.msra.mxu1 %v5319_v10  ;;  %9531 = vmatpush3.msra.mxu0 %v6400_v23  ;;  %v5318_v20 = vld [vmem:[%s14361_s2 + $0x5d0] sm:$0xff]  ;;  %v6399_v43 = vld [vmem:[%s14361_s2 + $0x758] sm:$0xff]  ;;  %v14651_v23 = vld [vmem:[#allocation64_spill] sm:$0xff] }
 0x49e   : > { %v3320_v59 = vpop.f32.mrf.mxu1  ;;  %v12879_v46 = vpop.f32.mrf.mxu0  ;;  %8944 = vmatmul.mubr.f32.gmra.mxu1 %v4530_v13  ;;  %9319 = vmatmul.mubr.f32.gmra.mxu0 %v5610_v19  ;;  %v3043_v49 = vadd.f32 %v14651_v23, %v12395_v0  ;;  %v4531_v13 = vld [vmem:[#allocation2 + $0x5e] sm:$0xff]  ;;  %v5611_v19 = vld [vmem:[#allocation2 + $0x70] sm:$0xff] }
 0x49f   : > { %14650 = vst [vmem:[#allocation27_spill] sm:$0xff] %v12879_v46  ;;  %v12887_v42 = vadd.f32 %v3320_v59, %v3042_v30  ;;  %8946 = vmatprep.mubr.msk.f32.mxu1 %vm9718_vm3, %v14534_v11  ;;  %9321 = vmatprep.mubr.msk.f32.mxu0 %vm9718_vm3, %v14534_v11 }
 0x4a0   : > { %v8487_v8 = vpop.f32.mrf.mxu1  ;;  %v8862_v10 = vpop.f32.mrf.mxu0  ;;  %9159 = vmatprep.subr.mxu1 %v14534_v11  ;;  %9532 = vmatprep.subr.mxu0 %v14534_v11 }
 0x4a1   : > { %9160 = vmatpush3.msra.mxu1 %v5318_v20  ;;  %9533 = vmatpush3.msra.mxu0 %v6399_v43  ;;  %v5317_v8 = vld [vmem:[%s14361_s2 + $0x5c8] sm:$0xff]  ;;  %v6398_v10 = vld [vmem:[%s14361_s2 + $0x750] sm:$0xff]  ;;  %v14653_v43 = vld [vmem:[#allocation68_spill] sm:$0xff] }
 0x4a2   : > { %v3325_v30 = vpop.f32.mrf.mxu1  ;;  %v12897_v59 = vpop.f32.mrf.mxu0  ;;  %8947 = vmatmul.mubr.f32.gmra.mxu1 %v4531_v13  ;;  %9322 = vmatmul.mubr.f32.gmra.mxu0 %v5611_v19  ;;  %v3044_v23 = vadd.f32 %v14653_v43, %v12416_v52  ;;  %v4532_v13 = vld [vmem:[#allocation2 + $0x66] sm:$0xff]  ;;  %v5612_v19 = vld [vmem:[#allocation2 + $0x78] sm:$0xff] }
 0x4a3   : > { %14652 = vst [vmem:[#allocation75_spill] sm:$0xff] %v12897_v59  ;;  %v12905_v46 = vadd.f32 %v3325_v30, %v3043_v49  ;;  %8949 = vmatprep.mubr.msk.f32.mxu1 %vm9718_vm3, %v14534_v11  ;;  %9324 = vmatprep.mubr.msk.f32.mxu0 %vm9718_vm3, %v14534_v11 }
 0x4a4   : > { %v8490_v0 = vpop.f32.mrf.mxu1  ;;  %v8865_v20 = vpop.f32.mrf.mxu0  ;;  %9161 = vmatprep.subr.mxu1 %v14534_v11  ;;  %9534 = vmatprep.subr.mxu0 %v14534_v11 }
 0x4a5   : > { %9162 = vmatpush3.msra.mxu1 %v5317_v8  ;;  %9535 = vmatpush3.msra.mxu0 %v6398_v10  ;;  %v5316_v0 = vld [vmem:[%s14361_s2 + $0x5c0] sm:$0xff]  ;;  %v6397_v20 = vld [vmem:[%s14361_s2 + $0x748] sm:$0xff] }
 0x4a6   : > { %v3330_v49 = vpop.f32.mrf.mxu1  ;;  %v12915_v30 = vpop.f32.mrf.mxu0  ;;  %8950 = vmatmul.mubr.f32.gmra.mxu1 %v4532_v13  ;;  %9325 = vmatmul.mubr.f32.gmra.mxu0 %v5612_v19  ;;  %v14655_v10 = vld [vmem:[#allocation72_spill] sm:$0xff]  ;;  %v4533_v13 = vld [vmem:[#allocation2 + $0x6e] sm:$0xff] }
 0x4a7   : > { %14654 = vst [vmem:[#allocation26_spill] sm:$0xff] %v12915_v30  ;;  %v12923_v59 = vadd.f32 %v3330_v49, %v3044_v23  ;;  %8952 = vmatprep.mubr.msk.f32.mxu1 %vm9718_vm3, %v14534_v11  ;;  %9327 = vmatprep.mubr.msk.f32.mxu0 %vm9718_vm3, %v14534_v11  ;;  %v3045_v43 = vadd.f32 %v14655_v10, %v12437_v29  ;;  %v5613_v19 = vld [vmem:[#allocation2 + $0x80] sm:$0xff] }
 0x4a8   : > { %v8493_v52 = vpop.f32.mrf.mxu1  ;;  %v8868_v8 = vpop.f32.mrf.mxu0  ;;  %9163 = vmatprep.subr.mxu1 %v14534_v11  ;;  %9536 = vmatprep.subr.mxu0 %v14534_v11 }
 0x4a9   : > { %9164 = vmatpush3.msra.mxu1 %v5316_v0  ;;  %9537 = vmatpush3.msra.mxu0 %v6397_v20  ;;  %v5315_v52 = vld [vmem:[%s14361_s2 + $0x5b8] sm:$0xff]  ;;  %v6396_v8 = vld [vmem:[%s14361_s2 + $0x740] sm:$0xff] }
 0x4aa   : > { %v3335_v23 = vpop.f32.mrf.mxu1  ;;  %v12933_v49 = vpop.f32.mrf.mxu0  ;;  %8953 = vmatmul.mubr.f32.gmra.mxu1 %v4533_v13  ;;  %9328 = vmatmul.mubr.f32.gmra.mxu0 %v5613_v19  ;;  %v14657_v20 = vld [vmem:[#allocation76_spill] sm:$0xff]  ;;  %v4534_v13 = vld [vmem:[#allocation2 + $0x76] sm:$0xff]  ;;  %v5614_v19 = vld [vmem:[#allocation2 + $0x88] sm:$0xff] }
 0x4ab   : > { %14656 = vst [vmem:[#allocation77_spill] sm:$0xff] %v12933_v49  ;;  %v12941_v30 = vadd.f32 %v3335_v23, %v3045_v43  ;;  %8955 = vmatprep.mubr.msk.f32.mxu1 %vm9718_vm3, %v14534_v11  ;;  %9330 = vmatprep.mubr.msk.f32.mxu0 %vm9718_vm3, %v14534_v11  ;;  %v3046_v10 = vadd.f32 %v14657_v20, %v12458_v53 }
 0x4ac   : > { %v8496_v29 = vpop.f32.mrf.mxu1  ;;  %v8871_v0 = vpop.f32.mrf.mxu0  ;;  %9165 = vmatprep.subr.mxu1 %v14534_v11  ;;  %9538 = vmatprep.subr.mxu0 %v14534_v11 }
 0x4ad   : > { %9166 = vmatpush3.msra.mxu1 %v5315_v52  ;;  %9539 = vmatpush3.msra.mxu0 %v6396_v8  ;;  %v5314_v29 = vld [vmem:[%s14361_s2 + $0x5b0] sm:$0xff]  ;;  %v6395_v0 = vld [vmem:[%s14361_s2 + $0x738] sm:$0xff]  ;;  %v14659_v8 = vld [vmem:[#allocation80_spill] sm:$0xff] }
 0x4ae   : > { %v3340_v43 = vpop.f32.mrf.mxu1  ;;  %v12951_v23 = vpop.f32.mrf.mxu0  ;;  %8956 = vmatmul.mubr.f32.gmra.mxu1 %v4534_v13  ;;  %9331 = vmatmul.mubr.f32.gmra.mxu0 %v5614_v19  ;;  %v3047_v20 = vadd.f32 %v14659_v8, %v12479_v34  ;;  %v4535_v13 = vld [vmem:[#allocation2 + $0x7e] sm:$0xff]  ;;  %v5615_v19 = vld [vmem:[#allocation2 + $0x90] sm:$0xff] }
 0x4af   : > { %14658 = vst [vmem:[#allocation78_spill] sm:$0xff] %v12951_v23  ;;  %v12959_v49 = vadd.f32 %v3340_v43, %v3046_v10  ;;  %8958 = vmatprep.mubr.msk.f32.mxu1 %vm9718_vm3, %v14534_v11  ;;  %9333 = vmatprep.mubr.msk.f32.mxu0 %vm9718_vm3, %v14534_v11 }
 0x4b0   : > { %v8499_v53 = vpop.f32.mrf.mxu1  ;;  %v8874_v52 = vpop.f32.mrf.mxu0  ;;  %9167 = vmatprep.subr.mxu1 %v14534_v11  ;;  %9540 = vmatprep.subr.mxu0 %v14534_v11 }
 0x4b1   : > { %9168 = vmatpush3.msra.mxu1 %v5314_v29  ;;  %9541 = vmatpush3.msra.mxu0 %v6395_v0  ;;  %v5313_v53 = vld [vmem:[%s14361_s2 + $0x5a8] sm:$0xff]  ;;  %v6394_v52 = vld [vmem:[%s14361_s2 + $0x730] sm:$0xff]  ;;  %v14661_v0 = vld [vmem:[#allocation84_spill] sm:$0xff] }
 0x4b2   : > { %v3345_v10 = vpop.f32.mrf.mxu1  ;;  %v12969_v43 = vpop.f32.mrf.mxu0  ;;  %8959 = vmatmul.mubr.f32.gmra.mxu1 %v4535_v13  ;;  %9334 = vmatmul.mubr.f32.gmra.mxu0 %v5615_v19  ;;  %v3048_v8 = vadd.f32 %v14661_v0, %v12500_v24  ;;  %v4536_v13 = vld [vmem:[#allocation2 + $0x86] sm:$0xff]  ;;  %v5616_v19 = vld [vmem:[#allocation2 + $0x98] sm:$0xff] }
 0x4b3   : > { %14660 = vst [vmem:[#allocation29_spill] sm:$0xff] %v12969_v43  ;;  %v12977_v23 = vadd.f32 %v3345_v10, %v3047_v20  ;;  %8961 = vmatprep.mubr.msk.f32.mxu1 %vm9718_vm3, %v14534_v11  ;;  %9336 = vmatprep.mubr.msk.f32.mxu0 %vm9718_vm3, %v14534_v11 }
 0x4b4   : > { %v8502_v34 = vpop.f32.mrf.mxu1  ;;  %v8877_v29 = vpop.f32.mrf.mxu0  ;;  %9169 = vmatprep.subr.mxu1 %v14534_v11  ;;  %9542 = vmatprep.subr.mxu0 %v14534_v11 }
 0x4b5   : > { %9170 = vmatpush3.msra.mxu1 %v5313_v53  ;;  %9543 = vmatpush3.msra.mxu0 %v6394_v52  ;;  %v5312_v34 = vld [vmem:[%s14361_s2 + $0x5a0] sm:$0xff]  ;;  %v6393_v29 = vld [vmem:[%s14361_s2 + $0x728] sm:$0xff] }
 0x4b6   : > { %v3350_v20 = vpop.f32.mrf.mxu1  ;;  %v12987_v10 = vpop.f32.mrf.mxu0  ;;  %8962 = vmatmul.mubr.f32.gmra.mxu1 %v4536_v13  ;;  %9337 = vmatmul.mubr.f32.gmra.mxu0 %v5616_v19  ;;  %v14663_v52 = vld [vmem:[#allocation88_spill] sm:$0xff]  ;;  %v4537_v13 = vld [vmem:[#allocation2 + $0x8e] sm:$0xff] }
 0x4b7   : > { %14662 = vst [vmem:[#allocation79_spill] sm:$0xff] %v12987_v10  ;;  %v12995_v43 = vadd.f32 %v3350_v20, %v3048_v8  ;;  %8964 = vmatprep.mubr.msk.f32.mxu1 %vm9718_vm3, %v14534_v11  ;;  %9339 = vmatprep.mubr.msk.f32.mxu0 %vm9718_vm3, %v14534_v11  ;;  %v3049_v0 = vadd.f32 %v14663_v52, %v12521_v41  ;;  %v5617_v19 = vld [vmem:[#allocation2 + $0xa0] sm:$0xff] }
 0x4b8   : > { %v8505_v24 = vpop.f32.mrf.mxu1  ;;  %v8880_v53 = vpop.f32.mrf.mxu0  ;;  %9171 = vmatprep.subr.mxu1 %v14534_v11  ;;  %9544 = vmatprep.subr.mxu0 %v14534_v11 }
 0x4b9   : > { %9172 = vmatpush3.msra.mxu1 %v5312_v34  ;;  %9545 = vmatpush3.msra.mxu0 %v6393_v29  ;;  %v5311_v24 = vld [vmem:[%s14361_s2 + $0x598] sm:$0xff]  ;;  %v6392_v53 = vld [vmem:[%s14361_s2 + $0x720] sm:$0xff] }
 0x4ba   : > { %v3355_v8 = vpop.f32.mrf.mxu1  ;;  %v13005_v20 = vpop.f32.mrf.mxu0  ;;  %8965 = vmatmul.mubr.f32.gmra.mxu1 %v4537_v13  ;;  %9340 = vmatmul.mubr.f32.gmra.mxu0 %v5617_v19  ;;  %v14665_v29 = vld [vmem:[#allocation92_spill] sm:$0xff]  ;;  %v4538_v13 = vld [vmem:[#allocation2 + $0x96] sm:$0xff]  ;;  %v5618_v19 = vld [vmem:[#allocation2 + $0xa8] sm:$0xff] }
 0x4bb   : > { %14664 = vst [vmem:[#allocation28_spill] sm:$0xff] %v13005_v20  ;;  %v13013_v10 = vadd.f32 %v3355_v8, %v3049_v0  ;;  %8967 = vmatprep.mubr.msk.f32.mxu1 %vm9718_vm3, %v14534_v11  ;;  %9342 = vmatprep.mubr.msk.f32.mxu0 %vm9718_vm3, %v14534_v11  ;;  %v3050_v52 = vadd.f32 %v14665_v29, %v12542_v32 }
 0x4bc   : > { %v8508_v41 = vpop.f32.mrf.mxu1  ;;  %v8883_v34 = vpop.f32.mrf.mxu0  ;;  %9173 = vmatprep.subr.mxu1 %v14534_v11  ;;  %9546 = vmatprep.subr.mxu0 %v14534_v11 }
 0x4bd   : > { %9174 = vmatpush3.msra.mxu1 %v5311_v24  ;;  %9547 = vmatpush3.msra.mxu0 %v6392_v53  ;;  %v5310_v41 = vld [vmem:[%s14361_s2 + $0x590] sm:$0xff]  ;;  %v6391_v34 = vld [vmem:[%s14361_s2 + $0x718] sm:$0xff]  ;;  %v14667_v53 = vld [vmem:[#allocation96_spill] sm:$0xff] }
 0x4be   : > { %v3360_v0 = vpop.f32.mrf.mxu1  ;;  %v13023_v8 = vpop.f32.mrf.mxu0  ;;  %8968 = vmatmul.mubr.f32.gmra.mxu1 %v4538_v13  ;;  %9343 = vmatmul.mubr.f32.gmra.mxu0 %v5618_v19  ;;  %v3051_v29 = vadd.f32 %v14667_v53, %v12563_v3  ;;  %v4539_v13 = vld [vmem:[#allocation2 + $0x9e] sm:$0xff]  ;;  %v5619_v19 = vld [vmem:[#allocation2 + $0xb0] sm:$0xff] }
 0x4bf   : > { %14666 = vst [vmem:[#allocation81_spill] sm:$0xff] %v13023_v8  ;;  %v13031_v20 = vadd.f32 %v3360_v0, %v3050_v52  ;;  %8970 = vmatprep.mubr.msk.f32.mxu1 %vm9718_vm3, %v14534_v11  ;;  %9345 = vmatprep.mubr.msk.f32.mxu0 %vm9718_vm3, %v14534_v11 }
 0x4c0   : > { %v8511_v32 = vpop.f32.mrf.mxu1  ;;  %v8886_v24 = vpop.f32.mrf.mxu0  ;;  %9175 = vmatprep.subr.mxu1 %v14534_v11  ;;  %9548 = vmatprep.subr.mxu0 %v14534_v11 }
 0x4c1   : > { %9176 = vmatpush3.msra.mxu1 %v5310_v41  ;;  %9549 = vmatpush3.msra.mxu0 %v6391_v34  ;;  %v5309_v32 = vld [vmem:[%s14361_s2 + $0x588] sm:$0xff]  ;;  %v6390_v24 = vld [vmem:[%s14361_s2 + $0x710] sm:$0xff]  ;;  %v14669_v34 = vld [vmem:[#allocation100_spill] sm:$0xff] }
 0x4c2   : > { %v3365_v52 = vpop.f32.mrf.mxu1  ;;  %v13041_v0 = vpop.f32.mrf.mxu0  ;;  %8971 = vmatmul.mubr.f32.gmra.mxu1 %v4539_v13  ;;  %9346 = vmatmul.mubr.f32.gmra.mxu0 %v5619_v19  ;;  %v3052_v53 = vadd.f32 %v14669_v34, %v12584_v56  ;;  %v4540_v13 = vld [vmem:[#allocation2 + $0xa6] sm:$0xff]  ;;  %v5620_v19 = vld [vmem:[#allocation2 + $0xb8] sm:$0xff] }
 0x4c3   : > { %14668 = vst [vmem:[#allocation82_spill] sm:$0xff] %v13041_v0  ;;  %v13049_v8 = vadd.f32 %v3365_v52, %v3051_v29  ;;  %8973 = vmatprep.mubr.msk.f32.mxu1 %vm9718_vm3, %v14534_v11  ;;  %9348 = vmatprep.mubr.msk.f32.mxu0 %vm9718_vm3, %v14534_v11 }
 0x4c4   : > { %v8514_v3 = vpop.f32.mrf.mxu1  ;;  %v8889_v41 = vpop.f32.mrf.mxu0  ;;  %9177 = vmatprep.subr.mxu1 %v14534_v11  ;;  %9550 = vmatprep.subr.mxu0 %v14534_v11 }
 0x4c5   : > { %9178 = vmatpush3.msra.mxu1 %v5309_v32  ;;  %9551 = vmatpush3.msra.mxu0 %v6390_v24  ;;  %v5308_v3 = vld [vmem:[%s14361_s2 + $0x580] sm:$0xff]  ;;  %v6389_v41 = vld [vmem:[%s14361_s2 + $0x708] sm:$0xff] }
 0x4c6   : > { %v3370_v29 = vpop.f32.mrf.mxu1  ;;  %v13059_v52 = vpop.f32.mrf.mxu0  ;;  %8974 = vmatmul.mubr.f32.gmra.mxu1 %v4540_v13  ;;  %9349 = vmatmul.mubr.f32.gmra.mxu0 %v5620_v19  ;;  %v14671_v24 = vld [vmem:[#allocation104_spill] sm:$0xff]  ;;  %v4541_v13 = vld [vmem:[#allocation2 + $0xae] sm:$0xff] }
 0x4c7   : > { %14670 = vst [vmem:[#allocation31_spill] sm:$0xff] %v13059_v52  ;;  %v13067_v0 = vadd.f32 %v3370_v29, %v3052_v53  ;;  %8976 = vmatprep.mubr.msk.f32.mxu1 %vm9718_vm3, %v14534_v11  ;;  %9351 = vmatprep.mubr.msk.f32.mxu0 %vm9718_vm3, %v14534_v11  ;;  %v3053_v34 = vadd.f32 %v14671_v24, %v12602_v55  ;;  %v5621_v19 = vld [vmem:[#allocation2 + $0xc0] sm:$0xff] }
 0x4c8   : > { %v8517_v56 = vpop.f32.mrf.mxu1  ;;  %v8892_v32 = vpop.f32.mrf.mxu0  ;;  %9179 = vmatprep.subr.mxu1 %v14534_v11  ;;  %9552 = vmatprep.subr.mxu0 %v14534_v11  ;;  %v4543_v52 = vld [vmem:[#allocation2 + $0xbe] sm:$0xff] }
 0x4c9   : > { %9180 = vmatpush3.msra.mxu1 %v5308_v3  ;;  %9553 = vmatpush3.msra.mxu0 %v6389_v41  ;;  %v6388_v56 = vld [vmem:[%s14361_s2 + $0x700] sm:$0xff]  ;;  %v14673_v41 = vld [vmem:[#allocation106_spill] sm:$0xff] }
 0x4ca   : > { %v3375_v53 = vpop.f32.mrf.mxu1  ;;  %v13077_v29 = vpop.f32.mrf.mxu0  ;;  %8977 = vmatmul.mubr.f32.gmra.mxu1 %v4541_v13  ;;  %9352 = vmatmul.mubr.f32.gmra.mxu0 %v5621_v19  ;;  %v3054_v24 = vadd.f32 %v14673_v41, %v12615_v7  ;;  %v4542_v13 = vld [vmem:[#allocation2 + $0xb6] sm:$0xff]  ;;  %v5622_v19 = vld [vmem:[#allocation2 + $0xc8] sm:$0xff]  ;;  %v14675_v7 = vld [vmem:[#allocation108_spill] sm:$0xff] }
 0x4cb   : > { %14672 = vst [vmem:[#allocation83_spill] sm:$0xff] %v13077_v29  ;;  %v13082_v32 = vadd.f32 %v3375_v53, %v3053_v34  ;;  %8979 = vmatprep.mubr.msk.f32.mxu1 %vm9718_vm3, %v14534_v11  ;;  %9354 = vmatprep.mubr.msk.f32.mxu0 %vm9718_vm3, %v14534_v11  ;;  %v3744_v41 = vadd.f32 %v14675_v7, %v12628_v35 }
 0x4cc   : > { %v8520_v55 = vpop.f32.mrf.mxu1  ;;  %v8895_v3 = vpop.f32.mrf.mxu0  ;;  %9554 = vmatprep.subr.mxu0 %v14534_v11  ;;  %9399 = vmatprep.subr.mxu1 %v14534_v11 }
 0x4cd   : > { %9555 = vmatpush3.msra.mxu0 %v6388_v56  ;;  %v5623_v56 = vld [vmem:[#allocation2 + $0xd0] sm:$0xff] }
 0x4ce   : > { %v3380_v34 = vpop.f32.mrf.mxu1  ;;  %v13092_v53 = vpop.f32.mrf.mxu0  ;;  %8980 = vmatmul.mubr.f32.gmra.mxu1 %v4542_v13  ;;  %9355 = vmatmul.mubr.f32.gmra.mxu0 %v5622_v19 }
 0x4cf   : > { %14674 = vst [vmem:[#allocation30_spill] sm:$0xff] %v13092_v53  ;;  %v13094_v29 = vadd.f32 %v3380_v34, %v3054_v24  ;;  %8982 = vmatprep.mubr.msk.f32.mxu1 %vm9718_vm3, %v14534_v11  ;;  %9357 = vmatprep.mubr.msk.f32.mxu0 %vm9718_vm3, %v14534_v11  ;;  %v14677_v34 = vld [vmem:[#allocation109_spill] sm:$0xff] }
 0x4d0   : > { %v8523_v55 = vpop.f32.mrf.mxu1  ;;  %v8898_v3 = vpop.f32.mrf.mxu0  ;;  %v3745_v35 = vadd.f32 %v14677_v34, %v12640_v18  ;;  %v5625_v34 = vld [vmem:[#allocation2 + $0xe0] sm:$0xff] }
 0x4d1   : > { %v4544_v55 = vld [vmem:[#allocation2 + $0xc6] sm:$0xff]  ;;  %v5624_v3 = vld [vmem:[#allocation2 + $0xd8] sm:$0xff] }
 0x4d2   : > { %v3950_v37 = vpop.f32.mrf.mxu1  ;;  %8983 = vmatmul.mubr.f32.gmra.mxu1 %v4543_v52  ;;  %v13102_v53 = vpop.f32.mrf.mxu0  ;;  %9358 = vmatmul.mubr.f32.gmra.mxu0 %v5623_v56 }
 0x4d3   : > { %14676 = vst [vmem:[#allocation85_spill] sm:$0xff] %v13102_v53  ;;  %v13104_v24 = vadd.f32 %v3950_v37, %v3744_v41  ;;  %8985 = vmatprep.mubr.msk.f32.mxu1 %vm9718_vm3, %v14534_v11  ;;  %9360 = vmatprep.mubr.msk.f32.mxu0 %vm9718_vm3, %v14534_v11 }
 0x4d4   : > { %v8683_v13 = vpop.f32.mrf.mxu1  ;;  %v9058_v19 = vpop.f32.mrf.mxu0 }
 0x4d5   : > { %v14679_v13 = vld [vmem:[#allocation110_spill] sm:$0xff] }
 0x4d6   : > { %v3955_v7 = vpop.f32.mrf.mxu1  ;;  %8986 = vmatmul.mubr.f32.gmra.mxu1 %v4544_v55  ;;  %v13112_v52 = vpop.f32.mrf.mxu0  ;;  %9361 = vmatmul.mubr.f32.gmra.mxu0 %v5624_v3  ;;  %v3746_v18 = vadd.f32 %v14679_v13, %v12652_v2  ;;  %v4545_v19 = vld [vmem:[#allocation2 + $0xce] sm:$0xff] }
 0x4d7   : > { %14678 = vst [vmem:[#allocation86_spill] sm:$0xff] %v13112_v52  ;;  %v13114_v37 = vadd.f32 %v3955_v7, %v3745_v35  ;;  %8988 = vmatprep.mubr.msk.f32.mxu1 %vm9718_vm3, %v14534_v11  ;;  %9363 = vmatprep.mubr.msk.f32.mxu0 %vm9718_vm3, %v14534_v11  ;;  %v5626_v13 = vld [vmem:[#allocation2 + $0xe8] sm:$0xff] }
 0x4d8   : > { %v8686_v41 = vpop.f32.mrf.mxu1  ;;  %v9061_v56 = vpop.f32.mrf.mxu0 }
 0x4d9   : > { %v14681_v41 = vld [vmem:[#allocation111_spill] sm:$0xff] }
 0x4da   : > { %v3960_v53 = vpop.f32.mrf.mxu1  ;;  %8989 = vmatmul.mubr.f32.gmra.mxu1 %v4545_v19  ;;  %v13122_v55 = vpop.f32.mrf.mxu0  ;;  %9364 = vmatmul.mubr.f32.gmra.mxu0 %v5625_v34  ;;  %v3747_v2 = vadd.f32 %v14681_v41, %v12664_v44  ;;  %v4546_v56 = vld [vmem:[#allocation2 + $0xd6] sm:$0xff] }
 0x4db   : > { %14680 = vst [vmem:[#allocation33_spill] sm:$0xff] %v13122_v55  ;;  %v13124_v35 = vadd.f32 %v3960_v53, %v3746_v18  ;;  %8991 = vmatprep.mubr.msk.f32.mxu1 %vm9718_vm3, %v14534_v11  ;;  %9366 = vmatprep.mubr.msk.f32.mxu0 %vm9718_vm3, %v14534_v11  ;;  %v5627_v41 = vld [vmem:[#allocation2 + $0xf0] sm:$0xff] }
 0x4dc   : > { %v8689_v3 = vpop.f32.mrf.mxu1  ;;  %v9064_v7 = vpop.f32.mrf.mxu0 }
 0x4dd   : > { %v14683_v3 = vld [vmem:[#allocation112_spill] sm:$0xff] }
 0x4de   : > { %v3965_v52 = vpop.f32.mrf.mxu1  ;;  %8992 = vmatmul.mubr.f32.gmra.mxu1 %v4546_v56  ;;  %v13132_v19 = vpop.f32.mrf.mxu0  ;;  %9367 = vmatmul.mubr.f32.gmra.mxu0 %v5626_v13  ;;  %v3748_v44 = vadd.f32 %v14683_v3, %v12676_v16  ;;  %v4547_v7 = vld [vmem:[#allocation2 + $0xde] sm:$0xff] }
 0x4df   : > { %14682 = vst [vmem:[#allocation87_spill] sm:$0xff] %v13132_v19  ;;  %v13134_v53 = vadd.f32 %v3965_v52, %v3747_v2  ;;  %8994 = vmatprep.mubr.msk.f32.mxu1 %vm9718_vm3, %v14534_v11  ;;  %9369 = vmatprep.mubr.msk.f32.mxu0 %vm9718_vm3, %v14534_v11  ;;  %v5628_v3 = vld [vmem:[#allocation2 + $0xf8] sm:$0xff] }
 0x4e0   : > { %v8692_v18 = vpop.f32.mrf.mxu1  ;;  %v9067_v34 = vpop.f32.mrf.mxu0 }
 0x4e1   : > { %v14685_v18 = vld [vmem:[#allocation113_spill] sm:$0xff] }
 0x4e2   : > { %v3970_v55 = vpop.f32.mrf.mxu1  ;;  %8995 = vmatmul.mubr.f32.gmra.mxu1 %v4547_v7  ;;  %v13142_v56 = vpop.f32.mrf.mxu0  ;;  %9370 = vmatmul.mubr.f32.gmra.mxu0 %v5627_v41  ;;  %v3749_v16 = vadd.f32 %v14685_v18, %v12688_v27  ;;  %v4548_v34 = vld [vmem:[#allocation2 + $0xe6] sm:$0xff] }
 0x4e3   : > { %14684 = vst [vmem:[#allocation32_spill] sm:$0xff] %v13142_v56  ;;  %v13144_v52 = vadd.f32 %v3970_v55, %v3748_v44  ;;  %8997 = vmatprep.mubr.msk.f32.mxu1 %vm9718_vm3, %v14534_v11  ;;  %9372 = vmatprep.mubr.msk.f32.mxu0 %vm9718_vm3, %v14534_v11  ;;  %v5629_v18 = vld [vmem:[#allocation2 + $0x100] sm:$0xff] }
 0x4e4   : > { %v8695_v2 = vpop.f32.mrf.mxu1  ;;  %v9070_v13 = vpop.f32.mrf.mxu0 }
 0x4e5   : > { %v14687_v2 = vld [vmem:[#allocation114_spill] sm:$0xff] }
 0x4e6   : > { %v3975_v19 = vpop.f32.mrf.mxu1  ;;  %8998 = vmatmul.mubr.f32.gmra.mxu1 %v4548_v34  ;;  %v13152_v7 = vpop.f32.mrf.mxu0  ;;  %9373 = vmatmul.mubr.f32.gmra.mxu0 %v5628_v3  ;;  %v3750_v27 = vadd.f32 %v14687_v2, %v12700_v17  ;;  %v4549_v13 = vld [vmem:[#allocation2 + $0xee] sm:$0xff] }
 0x4e7   : > { %14686 = vst [vmem:[#allocation89_spill] sm:$0xff] %v13152_v7  ;;  %v13154_v55 = vadd.f32 %v3975_v19, %v3749_v16  ;;  %9000 = vmatprep.mubr.msk.f32.mxu1 %vm9718_vm3, %v14534_v11  ;;  %9375 = vmatprep.mubr.msk.f32.mxu0 %vm9718_vm3, %v14534_v11  ;;  %v5630_v2 = vld [vmem:[#allocation2 + $0x108] sm:$0xff] }
 0x4e8   : > { %v8698_v44 = vpop.f32.mrf.mxu1  ;;  %v9073_v41 = vpop.f32.mrf.mxu0 }
 0x4e9   : > { %v14689_v44 = vld [vmem:[#allocation116_spill] sm:$0xff]  ;;  %v4550_v41 = vld [vmem:[#allocation2 + $0xf6] sm:$0xff] }
 0x4ea   : > { %v3980_v56 = vpop.f32.mrf.mxu1  ;;  %9001 = vmatmul.mubr.f32.gmra.mxu1 %v4549_v13  ;;  %v13162_v34 = vpop.f32.mrf.mxu0  ;;  %9376 = vmatmul.mubr.f32.gmra.mxu0 %v5629_v18  ;;  %v3751_v17 = vadd.f32 %v14689_v44, %v12712_v36  ;;  %v5631_v44 = vld [vmem:[#allocation2 + $0x110] sm:$0xff] }
 0x4eb   : > { %14688 = vst [vmem:[#allocation90_spill] sm:$0xff] %v13162_v34  ;;  %v13164_v19 = vadd.f32 %v3980_v56, %v3750_v27  ;;  %9003 = vmatprep.mubr.msk.f32.mxu1 %vm9718_vm3, %v14534_v11  ;;  %9378 = vmatprep.mubr.msk.f32.mxu0 %vm9718_vm3, %v14534_v11 }
 0x4ec   : > { %v8701_v16 = vpop.f32.mrf.mxu1  ;;  %v9076_v3 = vpop.f32.mrf.mxu0 }
 0x4ed   : > { %v14691_v16 = vld [vmem:[#allocation118_spill] sm:$0xff]  ;;  %v4551_v3 = vld [vmem:[#allocation2 + $0xfe] sm:$0xff] }
 0x4ee   : > { %v3985_v7 = vpop.f32.mrf.mxu1  ;;  %9004 = vmatmul.mubr.f32.gmra.mxu1 %v4550_v41  ;;  %v13172_v13 = vpop.f32.mrf.mxu0  ;;  %9379 = vmatmul.mubr.f32.gmra.mxu0 %v5630_v2  ;;  %v3752_v36 = vadd.f32 %v14691_v16, %v12724_v60  ;;  %v5632_v16 = vld [vmem:[#allocation2 + $0x118] sm:$0xff] }
 0x4ef   : > { %14690 = vst [vmem:[#allocation35_spill] sm:$0xff] %v13172_v13  ;;  %v13174_v56 = vadd.f32 %v3985_v7, %v3751_v17  ;;  %9006 = vmatprep.mubr.msk.f32.mxu1 %vm9718_vm3, %v14534_v11  ;;  %9381 = vmatprep.mubr.msk.f32.mxu0 %vm9718_vm3, %v14534_v11 }
 0x4f0   : > { %v8704_v27 = vpop.f32.mrf.mxu1  ;;  %v9079_v18 = vpop.f32.mrf.mxu0 }
 0x4f1   : > { %v14693_v27 = vld [vmem:[#allocation8_spill] sm:$0xff] }
 0x4f2   : > { %v3990_v34 = vpop.f32.mrf.mxu1  ;;  %9007 = vmatmul.mubr.f32.gmra.mxu1 %v4551_v3  ;;  %v13182_v41 = vpop.f32.mrf.mxu0  ;;  %9382 = vmatmul.mubr.f32.gmra.mxu0 %v5631_v44  ;;  %v3753_v60 = vadd.f32 %v14693_v27, %v12736_v40  ;;  %v4552_v18 = vld [vmem:[#allocation2 + $0x106] sm:$0xff] }
 0x4f3   : > { %14692 = vst [vmem:[#allocation91_spill] sm:$0xff] %v13182_v41  ;;  %v13184_v7 = vadd.f32 %v3990_v34, %v3752_v36  ;;  %9009 = vmatprep.mubr.msk.f32.mxu1 %vm9718_vm3, %v14534_v11  ;;  %9384 = vmatprep.mubr.msk.f32.mxu0 %vm9718_vm3, %v14534_v11  ;;  %v14695_v40 = vld [vmem:[#allocation121_spill] sm:$0xff] }
 0x4f4   : > { %v8707_v17 = vpop.f32.mrf.mxu1  ;;  %v9082_v2 = vpop.f32.mrf.mxu0 }
 0x4f5   : > { %v3754_v2 = vadd.f32 %v14695_v40, %v12749_v39  ;;  %v14697_v39 = vld [vmem:[#allocation13_spill] sm:$0xff] }
 0x4f6   : > { %v3995_v13 = vpop.f32.mrf.mxu1  ;;  %9010 = vmatmul.mubr.f32.gmra.mxu1 %v4552_v18  ;;  %v13192_v3 = vpop.f32.mrf.mxu0  ;;  %9385 = vmatmul.mubr.f32.gmra.mxu0 %v5632_v16 }
 0x4f7   : > { %14694 = vst [vmem:[#allocation34_spill] sm:$0xff] %v13192_v3  ;;  %v13194_v34 = vadd.f32 %v3995_v13, %v3753_v60  ;;  %9012 = vmatprep.mubr.msk.f32.mxu1 %vm9718_vm3, %v14534_v11  ;;  %9387 = vmatprep.mubr.msk.f32.mxu0 %vm9718_vm3, %v14534_v11 }
 0x4f8   : > { %v8710_v36 = vpop.f32.mrf.mxu1  ;;  %v9085_v44 = vpop.f32.mrf.mxu0 }
 0x4f9   : > { %v1168_v17 = vpop.permute.xlu1 %1167  ;;  %v3755_v36 = vadd.f32 %v14697_v39, %v12763_v57 }
 0x4fa   : > { %1252 = vst.msk [vmem:[#allocation2 + $0x13f] sm:$0xff] %vm1212_vm6, %v1168_v17  ;;  %v4000_v27 = vpop.f32.mrf.mxu1  ;;  %9013 = vmatmul.mubr.f32.gmra.mxu1 %v12771_v58  ;;  %v13204_v18 = vpop.f32.mrf.mxu0  ;;  %9388 = vmatmul.mubr.f32.gmra.mxu0 %v12773_v15 }
 0x4fb   : > { %14696 = vst [vmem:[#allocation93_spill] sm:$0xff] %v13204_v18  ;;  %v13207_v13 = vadd.f32 %v4000_v27, %v3754_v2  ;;  %9015 = vmatprep.mubr.msk.f32.mxu1 %vm9718_vm3, %v14534_v11  ;;  %9390 = vmatprep.mubr.msk.f32.mxu0 %vm9718_vm3, %v14534_v11  ;;  %v14699_v2 = vld [vmem:[#allocation123_spill] sm:$0xff] }
 0x4fc   : > { %v8713_v60 = vpop.f32.mrf.mxu1  ;;  %v9088_v16 = vpop.f32.mrf.mxu0  ;;  %v3756_v57 = vadd.f32 %v14699_v2, %v12779_v63  ;;  %v4555_v27 = vld [vmem:[#allocation2 + $0x11e] sm:$0xff]  ;;  %v3757_v63 = vadd.f32 %v12262_v14, %v12797_v50  ;;  %v3758_v50 = vadd.f32 %v12281_v62, %v12816_v5  ;;  %v3759_v62 = vadd.f32 %v12301_v45, %v12833_v33 }
 0x4fd   : > { %v5635_v60 = vld [vmem:[#allocation2 + $0x130] sm:$0xff]  ;;  %v6043_v14 = vld [vmem:[%s14361_s2 + $0x6f8] sm:$0xff]  ;;  %v5247_v5 = vld [vmem:[#allocation2 + $0x42] sm:$0xff] }
 0x4fe   : > { %v4005_v44 = vpop.f32.mrf.mxu1  ;;  %9016 = vmatmul.mubr.f32.gmra.mxu1 %v12789_v28  ;;  %v13216_v58 = vpop.f32.mrf.mxu0  ;;  %9391 = vmatmul.mubr.f32.gmra.mxu0 %v12791_v1 }
 0x4ff   : > { %14698 = vst [vmem:[#allocation94_spill] sm:$0xff] %v13216_v58  ;;  %v13219_v15 = vadd.f32 %v4005_v44, %v3755_v36  ;;  %9018 = vmatprep.mubr.msk.f32.mxu1 %vm9718_vm3, %v14534_v11  ;;  %9393 = vmatprep.mubr.msk.f32.mxu0 %vm9718_vm3, %v14534_v11  ;;  %v4556_v44 = vld [vmem:[#allocation2 + $0x126] sm:$0xff] }
 0x500   : > { %v8716_v17 = vpop.f32.mrf.mxu1  ;;  %v9091_v40 = vpop.f32.mrf.mxu0 }
 0x501   : > { %v5636_v17 = vld [vmem:[#allocation2 + $0x138] sm:$0xff] }
 0x502   : > { %v4010_v28 = vpop.f32.mrf.mxu1  ;;  %9019 = vmatmul.mubr.f32.gmra.mxu1 %v4555_v27  ;;  %v13227_v16 = vpop.f32.mrf.mxu0  ;;  %9394 = vmatmul.mubr.f32.gmra.mxu0 %v5635_v60 }
 0x503   : > { %14700 = vst [vmem:[#allocation37_spill] sm:$0xff] %v13227_v16  ;;  %v13229_v1 = vadd.f32 %v4010_v28, %v3756_v57  ;;  %9021 = vmatprep.mubr.msk.f32.mxu1 %vm9718_vm3, %v14534_v11  ;;  %9396 = vmatprep.mubr.msk.f32.mxu0 %vm9718_vm3, %v14534_v11  ;;  %v5246_v28 = vld [vmem:[#allocation2 + $0x3a] sm:$0xff] }
 0x504   : > { %v8719_v39 = vpop.f32.mrf.mxu1  ;;  %v9094_v36 = vpop.f32.mrf.mxu0 }
 0x505   : > { %v6326_v39 = vld [vmem:[#allocation2 + $0x4c] sm:$0xff] }
 0x506   : > { %v4015_v40 = vpop.f32.mrf.mxu1  ;;  %9022 = vmatmul.mubr.f32.gmra.mxu1 %v4556_v44  ;;  %v13237_v2 = vpop.f32.mrf.mxu0  ;;  %9397 = vmatmul.mubr.f32.gmra.mxu0 %v5636_v17  ;;  %v6042_v44 = vld [vmem:[%s14361_s2 + $0x6f0] sm:$0xff] }
 0x507   : > { %14701 = vst [vmem:[#allocation95_spill] sm:$0xff] %v13237_v2  ;;  %v13239_v57 = vadd.f32 %v4015_v40, %v3757_v63  ;;  %9181 = vmatprep.mubr.msk.f32.mxu1 %vm9718_vm3, %v14534_v11  ;;  %9556 = vmatprep.mubr.msk.f32.mxu0 %vm9718_vm3, %v14534_v11 }
 0x508   : > { %v8722_v27 = vpop.f32.mrf.mxu1  ;;  %v9097_v60 = vpop.f32.mrf.mxu0 }
 0x509   : > { %v6327_v60 = vld [vmem:[#allocation2 + $0x54] sm:$0xff] }
 0x50a   : > { %v4020_v36 = vpop.f32.mrf.mxu1  ;;  %v13250_v63 = vpop.f32.mrf.mxu0  ;;  %9182 = vmatmul.mubr.f32.vlgmr.msra.gmra.mxu1 %v5246_v28  ;;  %9557 = vmatmul.mubr.f32.vlgmr.msra.gmra.mxu0 %v6326_v39 }
 0x50b   : > { %14702 = vst [vmem:[#allocation36_spill] sm:$0xff] %v13250_v63  ;;  %v13255_v17 = vadd.f32 %v4020_v36, %v3758_v50  ;;  %9400 = vmatpush3.msra.mxu1 %v6043_v14  ;;  %9184 = vmatprep.mubr.msk.f32.mxu1 %vm9718_vm3, %v14534_v11  ;;  %v6041_v14 = vld [vmem:[%s14361_s2 + $0x6e8] sm:$0xff]  ;;  %v3760_v36 = vadd.f32 %v12322_v31, %v12851_v4 }
 0x50c   : > { %v8725_v40 = vpop.f32.mrf.mxu1  ;;  %v9100_v27 = vpop.f32.mrf.mxu0  ;;  %9559 = vmatprep.mubr.msk.f32.mxu0 %vm9718_vm3, %v14534_v11  ;;  %9401 = vmatprep.subr.mxu1 %v14534_v11 }
 0x50d   : > { %9402 = vmatpush3.msra.mxu1 %v6042_v44  ;;  %v13278_v44 = vld [vmem:[#allocation2 + $0x4a] sm:$0xff]  ;;  %v6328_v40 = vld [vmem:[#allocation2 + $0x5c] sm:$0xff] }
 0x50e   : > { %v4025_v28 = vpop.f32.mrf.mxu1  ;;  %v13264_v50 = vpop.f32.mrf.mxu0  ;;  %9185 = vmatmul.mubr.f32.gmra.mxu1 %v5247_v5  ;;  %9560 = vmatmul.mubr.f32.gmra.mxu0 %v6327_v60  ;;  %v6040_v5 = vld [vmem:[%s14361_s2 + $0x6e0] sm:$0xff] }
 0x50f   : > { %14703 = vst [vmem:[#allocation97_spill] sm:$0xff] %v13264_v50  ;;  %v13269_v39 = vadd.f32 %v4025_v28, %v3759_v62  ;;  %9187 = vmatprep.mubr.msk.f32.mxu1 %vm9718_vm3, %v14534_v11  ;;  %9562 = vmatprep.mubr.msk.f32.mxu0 %vm9718_vm3, %v14534_v11  ;;  %v3761_v28 = vadd.f32 %v12343_v48, %v12869_v21 }
 0x510   : > { %v8728_v45 = vpop.f32.mrf.mxu1  ;;  %v9103_v33 = vpop.f32.mrf.mxu0  ;;  %9403 = vmatprep.subr.mxu1 %v14534_v11 }
 0x511   : > { %9404 = vmatpush3.msra.mxu1 %v6041_v14  ;;  %v13295_v14 = vld [vmem:[#allocation2 + $0x52] sm:$0xff]  ;;  %v6329_v45 = vld [vmem:[#allocation2 + $0x64] sm:$0xff] }
 0x512   : > { %v4030_v27 = vpop.f32.mrf.mxu1  ;;  %v13280_v62 = vpop.f32.mrf.mxu0  ;;  %9188 = vmatmul.mubr.f32.gmra.mxu1 %v13278_v44  ;;  %9563 = vmatmul.mubr.f32.gmra.mxu0 %v6328_v40  ;;  %v6039_v40 = vld [vmem:[%s14361_s2 + $0x6d8] sm:$0xff] }
 0x513   : > { %14704 = vst [vmem:[#allocation98_spill] sm:$0xff] %v13280_v62  ;;  %v13286_v60 = vadd.f32 %v4030_v27, %v3760_v36  ;;  %9190 = vmatprep.mubr.msk.f32.mxu1 %vm9718_vm3, %v14534_v11  ;;  %9565 = vmatprep.mubr.msk.f32.mxu0 %vm9718_vm3, %v14534_v11 }
 0x514   : > { %v8731_v31 = vpop.f32.mrf.mxu1  ;;  %v9106_v4 = vpop.f32.mrf.mxu0  ;;  %9405 = vmatprep.subr.mxu1 %v14534_v11 }
 0x515   : > { %9406 = vmatpush3.msra.mxu1 %v6040_v5  ;;  %v14706_v5 = vld [vmem:[#allocation6_spill] sm:$0xff]  ;;  %v13312_v4 = vld [vmem:[#allocation2 + $0x5a] sm:$0xff] }
 0x516   : > { %v4035_v33 = vpop.f32.mrf.mxu1  ;;  %v13297_v36 = vpop.f32.mrf.mxu0  ;;  %9191 = vmatmul.mubr.f32.gmra.mxu1 %v13295_v14  ;;  %9566 = vmatmul.mubr.f32.gmra.mxu0 %v6329_v45  ;;  %v3762_v31 = vadd.f32 %v14706_v5, %v12887_v42  ;;  %v6330_v45 = vld [vmem:[#allocation2 + $0x6c] sm:$0xff] }
 0x517   : > { %14705 = vst [vmem:[#allocation39_spill] sm:$0xff] %v13297_v36  ;;  %v13303_v27 = vadd.f32 %v4035_v33, %v3761_v28  ;;  %9193 = vmatprep.mubr.msk.f32.mxu1 %vm9718_vm3, %v14534_v11  ;;  %9568 = vmatprep.mubr.msk.f32.mxu0 %vm9718_vm3, %v14534_v11  ;;  %v6038_v33 = vld [vmem:[%s14361_s2 + $0x6d0] sm:$0xff] }
 0x518   : > { %v8734_v48 = vpop.f32.mrf.mxu1  ;;  %v9109_v21 = vpop.f32.mrf.mxu0  ;;  %9407 = vmatprep.subr.mxu1 %v14534_v11 }
 0x519   : > { %9408 = vmatpush3.msra.mxu1 %v6039_v40  ;;  %v14708_v21 = vld [vmem:[#allocation5_spill] sm:$0xff] }
 0x51a   : > { %v4040_v36 = vpop.f32.mrf.mxu1  ;;  %v13314_v28 = vpop.f32.mrf.mxu0  ;;  %9194 = vmatmul.mubr.f32.gmra.mxu1 %v13312_v4  ;;  %9569 = vmatmul.mubr.f32.gmra.mxu0 %v6330_v45  ;;  %v3763_v5 = vadd.f32 %v14708_v21, %v12905_v46  ;;  %v13329_v45 = vld [vmem:[#allocation2 + $0x62] sm:$0xff] }
 0x51b   : > { %14707 = vst [vmem:[#allocation99_spill] sm:$0xff] %v13314_v28  ;;  %v13320_v48 = vadd.f32 %v4040_v36, %v3762_v31  ;;  %9196 = vmatprep.mubr.msk.f32.mxu1 %vm9718_vm3, %v14534_v11  ;;  %9571 = vmatprep.mubr.msk.f32.mxu0 %vm9718_vm3, %v14534_v11  ;;  %v6331_v28 = vld [vmem:[#allocation2 + $0x74] sm:$0xff]  ;;  %v6037_v31 = vld [vmem:[%s14361_s2 + $0x6c8] sm:$0xff] }
 0x51c   : > { %v8737_v42 = vpop.f32.mrf.mxu1  ;;  %v9112_v40 = vpop.f32.mrf.mxu0  ;;  %9409 = vmatprep.subr.mxu1 %v14534_v11 }
 0x51d   : > { %9410 = vmatpush3.msra.mxu1 %v6038_v33  ;;  %v14710_v40 = vld [vmem:[#allocation17_spill] sm:$0xff] }
 0x51e   : > { %v4045_v62 = vpop.f32.mrf.mxu1  ;;  %v13331_v36 = vpop.f32.mrf.mxu0  ;;  %9197 = vmatmul.mubr.f32.gmra.mxu1 %v13329_v45  ;;  %9572 = vmatmul.mubr.f32.gmra.mxu0 %v6331_v28  ;;  %v3764_v21 = vadd.f32 %v14710_v40, %v12923_v59  ;;  %v13346_v28 = vld [vmem:[#allocation2 + $0x6a] sm:$0xff] }
 0x51f   : > { %14709 = vst [vmem:[#allocation38_spill] sm:$0xff] %v13331_v36  ;;  %v13337_v42 = vadd.f32 %v4045_v62, %v3763_v5  ;;  %9199 = vmatprep.mubr.msk.f32.mxu1 %vm9718_vm3, %v14534_v11  ;;  %9574 = vmatprep.mubr.msk.f32.mxu0 %vm9718_vm3, %v14534_v11  ;;  %v6332_v36 = vld [vmem:[#allocation2 + $0x7c] sm:$0xff] }
 0x520   : > { %v8740_v46 = vpop.f32.mrf.mxu1  ;;  %v9115_v33 = vpop.f32.mrf.mxu0  ;;  %9411 = vmatprep.subr.mxu1 %v14534_v11  ;;  %v6036_v5 = vld [vmem:[%s14361_s2 + $0x6c0] sm:$0xff] }
 0x521   : > { %9412 = vmatpush3.msra.mxu1 %v6037_v31  ;;  %v14712_v33 = vld [vmem:[#allocation16_spill] sm:$0xff] }
 0x522   : > { %v4050_v50 = vpop.f32.mrf.mxu1  ;;  %v13348_v62 = vpop.f32.mrf.mxu0  ;;  %9200 = vmatmul.mubr.f32.gmra.mxu1 %v13346_v28  ;;  %9575 = vmatmul.mubr.f32.gmra.mxu0 %v6332_v36  ;;  %v3765_v40 = vadd.f32 %v14712_v33, %v12941_v30  ;;  %v13363_v36 = vld [vmem:[#allocation2 + $0x72] sm:$0xff] }
 0x523   : > { %14711 = vst [vmem:[#allocation101_spill] sm:$0xff] %v13348_v62  ;;  %v13354_v46 = vadd.f32 %v4050_v50, %v3764_v21  ;;  %9202 = vmatprep.mubr.msk.f32.mxu1 %vm9718_vm3, %v14534_v11  ;;  %9577 = vmatprep.mubr.msk.f32.mxu0 %vm9718_vm3, %v14534_v11  ;;  %v6333_v62 = vld [vmem:[#allocation2 + $0x84] sm:$0xff]  ;;  %v6035_v21 = vld [vmem:[%s14361_s2 + $0x6b8] sm:$0xff] }
 0x524   : > { %v8743_v59 = vpop.f32.mrf.mxu1  ;;  %v9118_v31 = vpop.f32.mrf.mxu0  ;;  %9413 = vmatprep.subr.mxu1 %v14534_v11 }
 0x525   : > { %9414 = vmatpush3.msra.mxu1 %v6036_v5  ;;  %v14714_v31 = vld [vmem:[#allocation19_spill] sm:$0xff] }
 0x526   : > { %v4055_v63 = vpop.f32.mrf.mxu1  ;;  %v13365_v50 = vpop.f32.mrf.mxu0  ;;  %9203 = vmatmul.mubr.f32.gmra.mxu1 %v13363_v36  ;;  %9578 = vmatmul.mubr.f32.gmra.mxu0 %v6333_v62  ;;  %v3766_v33 = vadd.f32 %v14714_v31, %v12959_v49  ;;  %v13380_v62 = vld [vmem:[#allocation2 + $0x7a] sm:$0xff] }
 0x527   : > { %14713 = vst [vmem:[#allocation102_spill] sm:$0xff] %v13365_v50  ;;  %v13371_v59 = vadd.f32 %v4055_v63, %v3765_v40  ;;  %9205 = vmatprep.mubr.msk.f32.mxu1 %vm9718_vm3, %v14534_v11  ;;  %9580 = vmatprep.mubr.msk.f32.mxu0 %vm9718_vm3, %v14534_v11  ;;  %v6334_v50 = vld [vmem:[#allocation2 + $0x8c] sm:$0xff] }
 0x528   : > { %v8746_v30 = vpop.f32.mrf.mxu1  ;;  %v9121_v5 = vpop.f32.mrf.mxu0  ;;  %9415 = vmatprep.subr.mxu1 %v14534_v11  ;;  %v6034_v40 = vld [vmem:[%s14361_s2 + $0x6b0] sm:$0xff] }
 0x529   : > { %9416 = vmatpush3.msra.mxu1 %v6035_v21  ;;  %v14716_v5 = vld [vmem:[#allocation18_spill] sm:$0xff] }
 0x52a   : > { %v4060_v2 = vpop.f32.mrf.mxu1  ;;  %v13382_v63 = vpop.f32.mrf.mxu0  ;;  %9206 = vmatmul.mubr.f32.gmra.mxu1 %v13380_v62  ;;  %9581 = vmatmul.mubr.f32.gmra.mxu0 %v6334_v50  ;;  %v3767_v31 = vadd.f32 %v14716_v5, %v12977_v23  ;;  %v13397_v50 = vld [vmem:[#allocation2 + $0x82] sm:$0xff] }
 0x52b   : > { %14715 = vst [vmem:[#allocation41_spill] sm:$0xff] %v13382_v63  ;;  %v13388_v30 = vadd.f32 %v4060_v2, %v3766_v33  ;;  %9208 = vmatprep.mubr.msk.f32.mxu1 %vm9718_vm3, %v14534_v11  ;;  %9583 = vmatprep.mubr.msk.f32.mxu0 %vm9718_vm3, %v14534_v11  ;;  %v6335_v63 = vld [vmem:[#allocation2 + $0x94] sm:$0xff]  ;;  %v6033_v33 = vld [vmem:[%s14361_s2 + $0x6a8] sm:$0xff] }
 0x52c   : > { %v8749_v49 = vpop.f32.mrf.mxu1  ;;  %v9124_v21 = vpop.f32.mrf.mxu0  ;;  %9417 = vmatprep.subr.mxu1 %v14534_v11 }
 0x52d   : > { %9418 = vmatpush3.msra.mxu1 %v6034_v40  ;;  %v14718_v21 = vld [vmem:[#allocation20_spill] sm:$0xff] }
 0x52e   : > { %v4065_v16 = vpop.f32.mrf.mxu1  ;;  %v13399_v2 = vpop.f32.mrf.mxu0  ;;  %9209 = vmatmul.mubr.f32.gmra.mxu1 %v13397_v50  ;;  %9584 = vmatmul.mubr.f32.gmra.mxu0 %v6335_v63  ;;  %v3768_v5 = vadd.f32 %v14718_v21, %v12995_v43  ;;  %v13414_v63 = vld [vmem:[#allocation2 + $0x8a] sm:$0xff] }
 0x52f   : > { %14717 = vst [vmem:[#allocation103_spill] sm:$0xff] %v13399_v2  ;;  %v13405_v49 = vadd.f32 %v4065_v16, %v3767_v31  ;;  %9211 = vmatprep.mubr.msk.f32.mxu1 %vm9718_vm3, %v14534_v11  ;;  %9586 = vmatprep.mubr.msk.f32.mxu0 %vm9718_vm3, %v14534_v11  ;;  %v6336_v2 = vld [vmem:[#allocation2 + $0x9c] sm:$0xff] }
 0x530   : > { %v8752_v23 = vpop.f32.mrf.mxu1  ;;  %v9127_v40 = vpop.f32.mrf.mxu0  ;;  %9419 = vmatprep.subr.mxu1 %v14534_v11  ;;  %v6032_v31 = vld [vmem:[%s14361_s2 + $0x6a0] sm:$0xff] }
 0x531   : > { %9420 = vmatpush3.msra.mxu1 %v6033_v33  ;;  %v14720_v40 = vld [vmem:[#allocation21_spill] sm:$0xff] }
 0x532   : > { %v4070_v58 = vpop.f32.mrf.mxu1  ;;  %v13416_v16 = vpop.f32.mrf.mxu0  ;;  %9212 = vmatmul.mubr.f32.gmra.mxu1 %v13414_v63  ;;  %9587 = vmatmul.mubr.f32.gmra.mxu0 %v6336_v2  ;;  %v3769_v21 = vadd.f32 %v14720_v40, %v13013_v10  ;;  %v13431_v2 = vld [vmem:[#allocation2 + $0x92] sm:$0xff] }
 0x533   : > { %14719 = vst [vmem:[#allocation40_spill] sm:$0xff] %v13416_v16  ;;  %v13422_v23 = vadd.f32 %v4070_v58, %v3768_v5  ;;  %9214 = vmatprep.mubr.msk.f32.mxu1 %vm9718_vm3, %v14534_v11  ;;  %9589 = vmatprep.mubr.msk.f32.mxu0 %vm9718_vm3, %v14534_v11  ;;  %v6337_v16 = vld [vmem:[#allocation2 + $0xa4] sm:$0xff]  ;;  %v6031_v5 = vld [vmem:[%s14361_s2 + $0x698] sm:$0xff] }
 0x534   : > { %v8755_v43 = vpop.f32.mrf.mxu1  ;;  %v9130_v33 = vpop.f32.mrf.mxu0  ;;  %9421 = vmatprep.subr.mxu1 %v14534_v11 }
 0x535   : > { %9422 = vmatpush3.msra.mxu1 %v6032_v31  ;;  %v14722_v33 = vld [vmem:[#allocation65_spill] sm:$0xff] }
 0x536   : > { %v4075_v18 = vpop.f32.mrf.mxu1  ;;  %v13433_v58 = vpop.f32.mrf.mxu0  ;;  %9215 = vmatmul.mubr.f32.gmra.mxu1 %v13431_v2  ;;  %9590 = vmatmul.mubr.f32.gmra.mxu0 %v6337_v16  ;;  %v3770_v40 = vadd.f32 %v14722_v33, %v13031_v20  ;;  %v13448_v16 = vld [vmem:[#allocation2 + $0x9a] sm:$0xff] }
 0x537   : > { %14721 = vst [vmem:[#allocation43_spill] sm:$0xff] %v13433_v58  ;;  %v13439_v43 = vadd.f32 %v4075_v18, %v3769_v21  ;;  %9217 = vmatprep.mubr.msk.f32.mxu1 %vm9718_vm3, %v14534_v11  ;;  %9592 = vmatprep.mubr.msk.f32.mxu0 %vm9718_vm3, %v14534_v11  ;;  %v6338_v58 = vld [vmem:[#allocation2 + $0xac] sm:$0xff]  ;;  %v6339_v33 = vld [vmem:[#allocation2 + $0xb4] sm:$0xff] }
 0x538   : > { %v8758_v10 = vpop.f32.mrf.mxu1  ;;  %v9133_v31 = vpop.f32.mrf.mxu0  ;;  %9423 = vmatprep.subr.mxu1 %v14534_v11  ;;  %v6030_v21 = vld [vmem:[%s14361_s2 + $0x690] sm:$0xff] }
 0x539   : > { %9424 = vmatpush3.msra.mxu1 %v6031_v5  ;;  %v3771_v31 = vadd.f32 %v12553_v61, %v13049_v8 }
 0x53a   : > { %v4080_v3 = vpop.f32.mrf.mxu1  ;;  %v13450_v18 = vpop.f32.mrf.mxu0  ;;  %9218 = vmatmul.mubr.f32.gmra.mxu1 %v13448_v16  ;;  %9593 = vmatmul.mubr.f32.gmra.mxu0 %v6338_v58  ;;  %v13465_v58 = vld [vmem:[#allocation2 + $0xa2] sm:$0xff] }
 0x53b   : > { %14723 = vst [vmem:[#allocation105_spill] sm:$0xff] %v13450_v18  ;;  %v13456_v10 = vadd.f32 %v4080_v3, %v3770_v40  ;;  %9220 = vmatprep.mubr.msk.f32.mxu1 %vm9718_vm3, %v14534_v11  ;;  %9595 = vmatprep.mubr.msk.f32.mxu0 %vm9718_vm3, %v14534_v11  ;;  %v6029_v40 = vld [vmem:[%s14361_s2 + $0x688] sm:$0xff] }
 0x53c   : > { %v8761_v20 = vpop.f32.mrf.mxu1  ;;  %v9136_v5 = vpop.f32.mrf.mxu0  ;;  %9425 = vmatprep.subr.mxu1 %v14534_v11 }
 0x53d   : > { %9426 = vmatpush3.msra.mxu1 %v6030_v21  ;;  %v14725_v21 = vld [vmem:[#allocation66_spill] sm:$0xff] }
 0x53e   : > { %v4085_v18 = vpop.f32.mrf.mxu1  ;;  %v13467_v3 = vpop.f32.mrf.mxu0  ;;  %9221 = vmatmul.mubr.f32.gmra.mxu1 %v13465_v58  ;;  %9596 = vmatmul.mubr.f32.gmra.mxu0 %v6339_v33  ;;  %v3772_v5 = vadd.f32 %v14725_v21, %v13067_v0  ;;  %v13482_v33 = vld [vmem:[#allocation2 + $0xaa] sm:$0xff] }
 0x53f   : > { %14724 = vst [vmem:[#allocation42_spill] sm:$0xff] %v13467_v3  ;;  %v13473_v20 = vadd.f32 %v4085_v18, %v3771_v31  ;;  %9223 = vmatprep.mubr.msk.f32.mxu1 %vm9718_vm3, %v14534_v11  ;;  %9598 = vmatprep.mubr.msk.f32.mxu0 %vm9718_vm3, %v14534_v11  ;;  %v6340_v3 = vld [vmem:[#allocation2 + $0xbc] sm:$0xff]  ;;  %v6341_v21 = vld [vmem:[#allocation2 + $0xc4] sm:$0xff] }
 0x540   : > { %v8764_v61 = vpop.f32.mrf.mxu1  ;;  %v9139_v8 = vpop.f32.mrf.mxu0  ;;  %9427 = vmatprep.subr.mxu1 %v14534_v11  ;;  %v6028_v31 = vld [vmem:[%s14361_s2 + $0x680] sm:$0xff] }
 0x541   : > { %9428 = vmatpush3.msra.mxu1 %v6029_v40  ;;  %v3773_v8 = vadd.f32 %v12595_v51, %v13082_v32  ;;  %v3774_v32 = vadd.f32 %v12611_v6, %v13094_v29  ;;  %v4464_v6 = vadd.f32 %v12625_v26, %v13104_v24  ;;  %v13526_v29 = vld [vmem:[#allocation2 + $0xc2] sm:$0xff]  ;;  %v4465_v26 = vadd.f32 %v12637_v22, %v13114_v37  ;;  %v13539_v24 = vld [vmem:[#allocation2 + $0xca] sm:$0xff]  ;;  %v13552_v37 = vld [vmem:[#allocation2 + $0xd2] sm:$0xff] }
 0x542   : > { %v4090_v41 = vpop.f32.mrf.mxu1  ;;  %v13484_v18 = vpop.f32.mrf.mxu0  ;;  %9224 = vmatmul.mubr.f32.gmra.mxu1 %v13482_v33  ;;  %9599 = vmatmul.mubr.f32.gmra.mxu0 %v6340_v3  ;;  %v13499_v3 = vld [vmem:[#allocation2 + $0xb2] sm:$0xff]  ;;  %v4466_v22 = vadd.f32 %v12649_v47, %v13124_v35  ;;  %v4467_v47 = vadd.f32 %v12661_v54, %v13134_v53  ;;  %v13565_v35 = vld [vmem:[#allocation2 + $0xda] sm:$0xff]  ;;  %v4468_v54 = vadd.f32 %v12673_v9, %v13144_v52  ;;  %v13578_v53 = vld [vmem:[#allocation2 + $0xe2] sm:$0xff] }
 0x543   : > { %14726 = vst [vmem:[#allocation107_spill] sm:$0xff] %v13484_v18  ;;  %v13490_v61 = vadd.f32 %v4090_v41, %v3772_v5  ;;  %9226 = vmatprep.mubr.msk.f32.mxu1 %vm9718_vm3, %v14534_v11  ;;  %9601 = vmatprep.mubr.msk.f32.mxu0 %vm9718_vm3, %v14534_v11  ;;  %v4469_v9 = vadd.f32 %v12685_v25, %v13154_v55  ;;  %v13591_v52 = vld [vmem:[#allocation2 + $0xea] sm:$0xff]  ;;  %v13604_v55 = vld [vmem:[#allocation2 + $0xf2] sm:$0xff] }
 0x544   : > { %v8767_v0 = vpop.f32.mrf.mxu1  ;;  %v9142_v40 = vpop.f32.mrf.mxu0  ;;  %9429 = vmatprep.subr.mxu1 %v14534_v11  ;;  %v4470_v25 = vadd.f32 %v12697_v38, %v13164_v19  ;;  %v4471_v38 = vadd.f32 %v12709_v12, %v13174_v56  ;;  %v13617_v19 = vld [vmem:[#allocation2 + $0xfa] sm:$0xff] }
 0x545   : > { %9430 = vmatpush3.msra.mxu1 %v6028_v31  ;;  %v13513_v31 = vld [vmem:[#allocation2 + $0xba] sm:$0xff]  ;;  %v6342_v40 = vld [vmem:[#allocation2 + $0xcc] sm:$0xff] }
 0x546   : > { %v4095_v18 = vpop.f32.mrf.mxu1  ;;  %v13501_v41 = vpop.f32.mrf.mxu0  ;;  %9227 = vmatmul.mubr.f32.gmra.mxu1 %v13499_v3  ;;  %9602 = vmatmul.mubr.f32.gmra.mxu0 %v6341_v21  ;;  %v14740_v12 = vld [vmem:[#allocation23_spill] sm:$0xff] }
 0x547   : > { %14727 = vst [vmem:[#allocation44_spill] sm:$0xff] %v13501_v41  ;;  %v13504_v5 = vadd.f32 %v4095_v18, %v3773_v8  ;;  %9229 = vmatprep.mubr.msk.f32.mxu1 %vm9718_vm3, %v14534_v11  ;;  %9604 = vmatprep.mubr.msk.f32.mxu0 %vm9718_vm3, %v14534_v11  ;;  %v4472_v56 = vadd.f32 %v14740_v12, %v13184_v7  ;;  %v13641_v7 = vld [vmem:[#allocation2 + $0x10a] sm:$0xff] }
 0x548   : > { %v8770_v0 = vpop.f32.mrf.mxu1  ;;  %v9145_v51 = vpop.f32.mrf.mxu0  ;;  %9649 = vmatprep.subr.mxu1 %v14534_v11 }
 0x549   : > { %v6343_v51 = vld [vmem:[#allocation2 + $0xd4] sm:$0xff] }
 0x54a   : > { %v4100_v41 = vpop.f32.mrf.mxu1  ;;  %v13515_v21 = vpop.f32.mrf.mxu0  ;;  %9230 = vmatmul.mubr.f32.gmra.mxu1 %v13513_v31  ;;  %9605 = vmatmul.mubr.f32.gmra.mxu0 %v6342_v40 }
 0x54b   : > { %14728 = vst [vmem:[#allocation45_spill] sm:$0xff] %v13515_v21  ;;  %v13518_v18 = vadd.f32 %v4100_v41, %v3774_v32  ;;  %9232 = vmatprep.mubr.msk.f32.mxu1 %vm9718_vm3, %v14534_v11  ;;  %9607 = vmatprep.mubr.msk.f32.mxu0 %vm9718_vm3, %v14534_v11 }
 0x54c   : > { %v8773_v8 = vpop.f32.mrf.mxu1  ;;  %v9148_v0 = vpop.f32.mrf.mxu0 }
 0x54d   : > { %14729 = vst [vmem:[#allocation46_spill] sm:$0xff] %v13518_v18  ;;  %v6344_v0 = vld [vmem:[#allocation2 + $0xdc] sm:$0xff] }
 0x54e   : > { %v4670_v21 = vpop.f32.mrf.mxu1  ;;  %9233 = vmatmul.mubr.f32.gmra.mxu1 %v13526_v29  ;;  %v13529_v40 = vpop.f32.mrf.mxu0  ;;  %9608 = vmatmul.mubr.f32.gmra.mxu0 %v6343_v51 }
 0x54f   : > { %14730 = vst [vmem:[#allocation47_spill] sm:$0xff] %v13529_v40  ;;  %v13531_v41 = vadd.f32 %v4670_v21, %v4464_v6  ;;  %9235 = vmatprep.mubr.msk.f32.mxu1 %vm9718_vm3, %v14534_v11  ;;  %9610 = vmatprep.mubr.msk.f32.mxu0 %vm9718_vm3, %v14534_v11 }
 0x550   : > { %v8933_v32 = vpop.f32.mrf.mxu1  ;;  %v9308_v8 = vpop.f32.mrf.mxu0 }
 0x551   : > { %v6345_v8 = vld [vmem:[#allocation2 + $0xe4] sm:$0xff] }
 0x552   : > { %v4675_v18 = vpop.f32.mrf.mxu1  ;;  %9236 = vmatmul.mubr.f32.gmra.mxu1 %v13539_v24  ;;  %v13542_v51 = vpop.f32.mrf.mxu0  ;;  %9611 = vmatmul.mubr.f32.gmra.mxu0 %v6344_v0 }
 0x553   : > { %14731 = vst [vmem:[#allocation48_spill] sm:$0xff] %v13542_v51  ;;  %v13544_v21 = vadd.f32 %v4675_v18, %v4465_v26  ;;  %9238 = vmatprep.mubr.msk.f32.mxu1 %vm9718_vm3, %v14534_v11  ;;  %9613 = vmatprep.mubr.msk.f32.mxu0 %vm9718_vm3, %v14534_v11 }
 0x554   : > { %v8936_v6 = vpop.f32.mrf.mxu1  ;;  %v9311_v32 = vpop.f32.mrf.mxu0 }
 0x555   : > { %v6346_v32 = vld [vmem:[#allocation2 + $0xec] sm:$0xff] }
 0x556   : > { %v4680_v40 = vpop.f32.mrf.mxu1  ;;  %9239 = vmatmul.mubr.f32.gmra.mxu1 %v13552_v37  ;;  %v13555_v0 = vpop.f32.mrf.mxu0  ;;  %9614 = vmatmul.mubr.f32.gmra.mxu0 %v6345_v8 }
 0x557   : > { %14732 = vst [vmem:[#allocation49_spill] sm:$0xff] %v13555_v0  ;;  %v13557_v18 = vadd.f32 %v4680_v40, %v4466_v22  ;;  %9241 = vmatprep.mubr.msk.f32.mxu1 %vm9718_vm3, %v14534_v11  ;;  %9616 = vmatprep.mubr.msk.f32.mxu0 %vm9718_vm3, %v14534_v11 }
 0x558   : > { %v8939_v26 = vpop.f32.mrf.mxu1  ;;  %v9314_v6 = vpop.f32.mrf.mxu0 }
 0x559   : > { %v6347_v6 = vld [vmem:[#allocation2 + $0xf4] sm:$0xff] }
 0x55a   : > { %v4685_v51 = vpop.f32.mrf.mxu1  ;;  %9242 = vmatmul.mubr.f32.gmra.mxu1 %v13565_v35  ;;  %v13568_v8 = vpop.f32.mrf.mxu0  ;;  %9617 = vmatmul.mubr.f32.gmra.mxu0 %v6346_v32 }
 0x55b   : > { %14733 = vst [vmem:[#allocation50_spill] sm:$0xff] %v13568_v8  ;;  %v13570_v40 = vadd.f32 %v4685_v51, %v4467_v47  ;;  %9244 = vmatprep.mubr.msk.f32.mxu1 %vm9718_vm3, %v14534_v11  ;;  %9619 = vmatprep.mubr.msk.f32.mxu0 %vm9718_vm3, %v14534_v11 }
 0x55c   : > { %v8942_v22 = vpop.f32.mrf.mxu1  ;;  %v9317_v26 = vpop.f32.mrf.mxu0 }
 0x55d   : > { %v6348_v26 = vld [vmem:[#allocation2 + $0xfc] sm:$0xff] }
 0x55e   : > { %v4690_v0 = vpop.f32.mrf.mxu1  ;;  %9245 = vmatmul.mubr.f32.gmra.mxu1 %v13578_v53  ;;  %v13581_v32 = vpop.f32.mrf.mxu0  ;;  %9620 = vmatmul.mubr.f32.gmra.mxu0 %v6347_v6 }
 0x55f   : > { %14734 = vst [vmem:[#allocation115_spill] sm:$0xff] %v13581_v32  ;;  %v13583_v51 = vadd.f32 %v4690_v0, %v4468_v54  ;;  %9247 = vmatprep.mubr.msk.f32.mxu1 %vm9718_vm3, %v14534_v11  ;;  %9622 = vmatprep.mubr.msk.f32.mxu0 %vm9718_vm3, %v14534_v11 }
 0x560   : > { %v8945_v47 = vpop.f32.mrf.mxu1  ;;  %v9320_v22 = vpop.f32.mrf.mxu0 }
 0x561   : > { %v6349_v22 = vld [vmem:[#allocation2 + $0x104] sm:$0xff] }
 0x562   : > { %v4695_v8 = vpop.f32.mrf.mxu1  ;;  %9248 = vmatmul.mubr.f32.gmra.mxu1 %v13591_v52  ;;  %v13594_v6 = vpop.f32.mrf.mxu0  ;;  %9623 = vmatmul.mubr.f32.gmra.mxu0 %v6348_v26 }
 0x563   : > { %14735 = vst [vmem:[#allocation51_spill] sm:$0xff] %v13594_v6  ;;  %v13596_v0 = vadd.f32 %v4695_v8, %v4469_v9  ;;  %9250 = vmatprep.mubr.msk.f32.mxu1 %vm9718_vm3, %v14534_v11  ;;  %9625 = vmatprep.mubr.msk.f32.mxu0 %vm9718_vm3, %v14534_v11 }
 0x564   : > { %v8948_v54 = vpop.f32.mrf.mxu1  ;;  %v9323_v47 = vpop.f32.mrf.mxu0 }
 0x565   : > { %v6350_v47 = vld [vmem:[#allocation2 + $0x10c] sm:$0xff] }
 0x566   : > { %v4700_v32 = vpop.f32.mrf.mxu1  ;;  %9251 = vmatmul.mubr.f32.gmra.mxu1 %v13604_v55  ;;  %v13607_v26 = vpop.f32.mrf.mxu0  ;;  %9626 = vmatmul.mubr.f32.gmra.mxu0 %v6349_v22 }
 0x567   : > { %14736 = vst [vmem:[#allocation7_spill] sm:$0xff] %v13607_v26  ;;  %v13609_v8 = vadd.f32 %v4700_v32, %v4470_v25  ;;  %9253 = vmatprep.mubr.msk.f32.mxu1 %vm9718_vm3, %v14534_v11  ;;  %9628 = vmatprep.mubr.msk.f32.mxu0 %vm9718_vm3, %v14534_v11  ;;  %v6351_v26 = vld [vmem:[#allocation2 + $0x114] sm:$0xff] }
 0x568   : > { %v8951_v9 = vpop.f32.mrf.mxu1  ;;  %v9326_v54 = vpop.f32.mrf.mxu0 }
 0x569   : > { %14737 = vst [vmem:[#allocation117_spill] sm:$0xff] %v13609_v8  ;;  %v13630_v54 = vld [vmem:[#allocation2 + $0x102] sm:$0xff] }
 0x56a   : > { %v4705_v6 = vpop.f32.mrf.mxu1  ;;  %9254 = vmatmul.mubr.f32.gmra.mxu1 %v13617_v19  ;;  %v13620_v22 = vpop.f32.mrf.mxu0  ;;  %9629 = vmatmul.mubr.f32.gmra.mxu0 %v6350_v47  ;;  %14741 = vst [vmem:[#allocation119_spill] sm:$0xff] %v13630_v54 }
 0x56b   : > { %14738 = vst [vmem:[#allocation52_spill] sm:$0xff] %v13620_v22  ;;  %v13622_v32 = vadd.f32 %v4705_v6, %v4471_v38  ;;  %9256 = vmatprep.mubr.msk.f32.mxu1 %vm9718_vm3, %v14534_v11  ;;  %9631 = vmatprep.mubr.msk.f32.mxu0 %vm9718_vm3, %v14534_v11 }
 0x56c   : > { %v8954_v25 = vpop.f32.mrf.mxu1  ;;  %v9329_v9 = vpop.f32.mrf.mxu0 }
 0x56d   : > { %14739 = vst [vmem:[#allocation9_spill] sm:$0xff] %v13622_v32  ;;  %v14743_v9 = vld [vmem:[#allocation67_spill] sm:$0xff] }
 0x56e   : > { %v4710_v8 = vpop.f32.mrf.mxu1  ;;  %9257 = vmatmul.mubr.f32.gmra.mxu1 %v13630_v54  ;;  %v13633_v47 = vpop.f32.mrf.mxu0  ;;  %9632 = vmatmul.mubr.f32.gmra.mxu0 %v6351_v26  ;;  %v4473_v22 = vadd.f32 %v14743_v9, %v13194_v34 }
 0x56f   : > { %14742 = vst [vmem:[#allocation53_spill] sm:$0xff] %v13633_v47  ;;  %v13635_v6 = vadd.f32 %v4710_v8, %v4472_v56  ;;  %9259 = vmatprep.mubr.msk.f32.mxu1 %vm9718_vm3, %v14534_v11  ;;  %v14746_v56 = vld [vmem:[#allocation22_spill] sm:$0xff] }
 0x570   : > { %v8957_v38 = vpop.f32.mrf.mxu1  ;;  %v9332_v25 = vpop.f32.mrf.mxu0 }
 0x571   : > { %v4474_v38 = vadd.f32 %v14746_v56, %v13207_v13  ;;  %v13652_v25 = vld [vmem:[#allocation2 + $0x112] sm:$0xff] }
 0x572   : > { %v4715_v12 = vpop.f32.mrf.mxu1  ;;  %9260 = vmatmul.mubr.f32.gmra.mxu1 %v13641_v7  ;;  %v13644_v32 = vpop.f32.mrf.mxu0 }
 0x573   : > { %14744 = vst [vmem:[#allocation11_spill] sm:$0xff] %v13644_v32  ;;  %v13646_v54 = vadd.f32 %v4715_v12, %v4473_v22  ;;  %9262 = vmatprep.mubr.msk.f32.mxu1 %vm9718_vm3, %v14534_v11  ;;  %v13663_v32 = vld [vmem:[#allocation2 + $0x11a] sm:$0xff] }
 0x574   : > { %v8960_v26 = vpop.f32.mrf.mxu1  ;;  %v9335_v8 = vpop.f32.mrf.mxu0 }
 0x575   : > { %14745 = vst [vmem:[#allocation10_spill] sm:$0xff] %v13646_v54  ;;  %v14749_v26 = vld [vmem:[#allocation69_spill] sm:$0xff] }
 0x576   : > { %v4720_v34 = vpop.f32.mrf.mxu1  ;;  %9263 = vmatmul.mubr.f32.gmra.mxu1 %v13652_v25  ;;  %v13655_v9 = vpop.f32.mrf.mxu0  ;;  %v4475_v8 = vadd.f32 %v14749_v26, %v13219_v15 }
 0x577   : > { %14747 = vst [vmem:[#allocation120_spill] sm:$0xff] %v13655_v9  ;;  %v13657_v47 = vadd.f32 %v4720_v34, %v4474_v38  ;;  %9265 = vmatprep.mubr.msk.f32.mxu1 %vm9718_vm3, %v14534_v11  ;;  %v13674_v9 = vld [vmem:[#allocation2 + $0x122] sm:$0xff] }
 0x578   : > { %v8963_v22 = vpop.f32.mrf.mxu1  ;;  %v9338_v12 = vpop.f32.mrf.mxu0 }
 0x579   : > { %14748 = vst [vmem:[#allocation54_spill] sm:$0xff] %v13657_v47  ;;  %v14752_v22 = vld [vmem:[#allocation70_spill] sm:$0xff] }
 0x57a   : > { %v4725_v13 = vpop.f32.mrf.mxu1  ;;  %9266 = vmatmul.mubr.f32.gmra.mxu1 %v13663_v32  ;;  %v13666_v56 = vpop.f32.mrf.mxu0  ;;  %v4476_v12 = vadd.f32 %v14752_v22, %v13229_v1 }
 0x57b   : > { %14750 = vst [vmem:[#allocation122_spill] sm:$0xff] %v13666_v56  ;;  %v13668_v54 = vadd.f32 %v4725_v13, %v4475_v8  ;;  %9268 = vmatprep.mubr.msk.f32.mxu1 %vm9718_vm3, %v14534_v11  ;;  %v13685_v56 = vld [vmem:[#allocation2 + $0x12a] sm:$0xff] }
 0x57c   : > { %v8966_v38 = vpop.f32.mrf.mxu1  ;;  %v9341_v34 = vpop.f32.mrf.mxu0 }
 0x57d   : > { %14751 = vst [vmem:[#allocation55_spill] sm:$0xff] %v13668_v54  ;;  %v14755_v38 = vld [vmem:[#allocation25_spill] sm:$0xff] }
 0x57e   : > { %v4730_v15 = vpop.f32.mrf.mxu1  ;;  %9269 = vmatmul.mubr.f32.gmra.mxu1 %v13674_v9  ;;  %v13677_v26 = vpop.f32.mrf.mxu0  ;;  %v4477_v34 = vadd.f32 %v14755_v38, %v13239_v57  ;;  %v9692_v38 = vld [vmem:[%s14361_s2 + $0x778] sm:$0xff] }
 0x57f   : > { %14753 = vst [vmem:[#allocation15_spill] sm:$0xff] %v13677_v26  ;;  %v13679_v47 = vadd.f32 %v4730_v15, %v4476_v12  ;;  %9271 = vmatprep.mubr.msk.f32.mxu1 %vm9718_vm3, %v14534_v11 }
 0x580   : > { %v8969_v8 = vpop.f32.mrf.mxu1  ;;  %v9344_v13 = vpop.f32.mrf.mxu0 }
 0x581   : > { %14754 = vst [vmem:[#allocation14_spill] sm:$0xff] %v13679_v47  ;;  %v14756_v8 = vld [vmem:[#allocation71_spill] sm:$0xff] }
 0x582   : > { %v4735_v1 = vpop.f32.mrf.mxu1  ;;  %9272 = vmatmul.mubr.f32.gmra.mxu1 %v13685_v56  ;;  %v13688_v22 = vpop.f32.mrf.mxu0  ;;  %v4478_v13 = vadd.f32 %v14756_v8, %v13255_v17  ;;  %v14757_v17 = vld [vmem:[#allocation24_spill] sm:$0xff] }
 0x583   : > { %v13690_v54 = vadd.f32 %v4735_v1, %v4477_v34  ;;  %9431 = vmatprep.mubr.msk.f32.mxu1 %vm9718_vm3, %v14534_v11 }
 0x584   : > { %v8972_v12 = vpop.f32.mrf.mxu1  ;;  %v9347_v15 = vpop.f32.mrf.mxu0 }
 0x585   : > { %v4479_v12 = vadd.f32 %v14757_v17, %v13269_v39  ;;  %v9694_v39 = vld [vmem:[%s14361_s2 + $0x768] sm:$0xff] }
 0x586   : > { %v4740_v26 = vpop.f32.mrf.mxu1  ;;  %v13696_v47 = vpop.f32.mrf.mxu0  ;;  %9432 = vmatmul.mubr.f32.vlgmr.msra.gmra.mxu1 %v13278_v44  ;;  %v9693_v44 = vld [vmem:[%s14361_s2 + $0x770] sm:$0xff] }
 0x587   : > { %v13699_v57 = vadd.f32 %v4740_v26, %v4478_v13  ;;  %9665 = vmatpush3.msra.mxu1 %v9692_v38  ;;  %9434 = vmatprep.mubr.msk.f32.mxu1 %vm9718_vm3, %v14534_v11 }
 0x588   : > { %v8975_v34 = vpop.f32.mrf.mxu1  ;;  %v9350_v1 = vpop.f32.mrf.mxu0  ;;  %9650 = vmatprep.subr.mxu1 %v14534_v11 }
 0x589   : > { %9666 = vmatpush3.msra.mxu1 %v9693_v44  ;;  %v14758_v34 = vld [vmem:[#allocation73_spill] sm:$0xff] }
 0x58a   : > { %v4745_v26 = vpop.f32.mrf.mxu1  ;;  %v13712_v15 = vpop.f32.mrf.mxu0  ;;  %9435 = vmatmul.mubr.f32.gmra.mxu1 %v13295_v14  ;;  %9651 = vmatprep.subr.mxu1 %v14534_v11  ;;  %v4480_v1 = vadd.f32 %v14758_v34, %v13286_v60  ;;  %v9695_v14 = vld [vmem:[%s14361_s2 + $0x760] sm:$0xff]  ;;  %v9696_v60 = vld [vmem:[%s14361_s2 + $0x758] sm:$0xff] }
 0x58b   : > { %v13716_v8 = vadd.f32 %v4745_v26, %v4479_v12  ;;  %9437 = vmatprep.mubr.msk.f32.mxu1 %vm9718_vm3, %v14534_v11  ;;  %9667 = vmatpush3.msra.mxu1 %v9694_v39 }
 0x58c   : > { %v8978_v13 = vpop.f32.mrf.mxu1  ;;  %v9353_v38 = vpop.f32.mrf.mxu0  ;;  %9652 = vmatprep.subr.mxu1 %v14534_v11 }
 0x58d   : > { %9668 = vmatpush3.msra.mxu1 %v9695_v14  ;;  %v14760_v13 = vld [vmem:[#allocation74_spill] sm:$0xff] }
 0x58e   : > { %v4750_v17 = vpop.f32.mrf.mxu1  ;;  %v13729_v12 = vpop.f32.mrf.mxu0  ;;  %9438 = vmatmul.mubr.f32.gmra.mxu1 %v13312_v4  ;;  %9653 = vmatprep.subr.mxu1 %v14534_v11  ;;  %v4481_v38 = vadd.f32 %v14760_v13, %v13303_v27  ;;  %v9697_v4 = vld [vmem:[%s14361_s2 + $0x750] sm:$0xff]  ;;  %v9698_v27 = vld [vmem:[%s14361_s2 + $0x748] sm:$0xff] }
 0x58f   : > { %14759 = vst [vmem:[#allocation12_spill] sm:$0xff] %v13729_v12  ;;  %v13733_v44 = vadd.f32 %v4750_v17, %v4480_v1  ;;  %9440 = vmatprep.mubr.msk.f32.mxu1 %vm9718_vm3, %v14534_v11  ;;  %9669 = vmatpush3.msra.mxu1 %v9696_v60 }
 0x590   : > { %v8981_v26 = vpop.f32.mrf.mxu1  ;;  %v9356_v39 = vpop.f32.mrf.mxu0  ;;  %9654 = vmatprep.subr.mxu1 %v14534_v11 }
 0x591   : > { %9670 = vmatpush3.msra.mxu1 %v9697_v4  ;;  %v14762_v26 = vld [vmem:[#allocation27_spill] sm:$0xff] }
 0x592   : > { %v4755_v34 = vpop.f32.mrf.mxu1  ;;  %v13746_v1 = vpop.f32.mrf.mxu0  ;;  %9441 = vmatmul.mubr.f32.gmra.mxu1 %v13329_v45  ;;  %9655 = vmatprep.subr.mxu1 %v14534_v11  ;;  %v4482_v39 = vadd.f32 %v14762_v26, %v13320_v48  ;;  %v9699_v45 = vld [vmem:[%s14361_s2 + $0x740] sm:$0xff]  ;;  %v9700_v48 = vld [vmem:[%s14361_s2 + $0x738] sm:$0xff] }
 0x593   : > { %14761 = vst [vmem:[#allocation56_spill] sm:$0xff] %v13746_v1  ;;  %v13750_v14 = vadd.f32 %v4755_v34, %v4481_v38  ;;  %9443 = vmatprep.mubr.msk.f32.mxu1 %vm9718_vm3, %v14534_v11  ;;  %9671 = vmatpush3.msra.mxu1 %v9698_v27 }
 0x594   : > { %v8984_v17 = vpop.f32.mrf.mxu1  ;;  %v9359_v60 = vpop.f32.mrf.mxu0  ;;  %9656 = vmatprep.subr.mxu1 %v14534_v11 }
 0x595   : > { %9672 = vmatpush3.msra.mxu1 %v9699_v45  ;;  %v14764_v17 = vld [vmem:[#allocation75_spill] sm:$0xff] }
 0x596   : > { %v4760_v13 = vpop.f32.mrf.mxu1  ;;  %v13763_v38 = vpop.f32.mrf.mxu0  ;;  %9444 = vmatmul.mubr.f32.gmra.mxu1 %v13346_v28  ;;  %9657 = vmatprep.subr.mxu1 %v14534_v11  ;;  %v4483_v60 = vadd.f32 %v14764_v17, %v13337_v42  ;;  %v9701_v28 = vld [vmem:[%s14361_s2 + $0x730] sm:$0xff]  ;;  %v9702_v42 = vld [vmem:[%s14361_s2 + $0x728] sm:$0xff] }
 0x597   : > { %14763 = vst [vmem:[#allocation124_spill] sm:$0xff] %v13763_v38  ;;  %v13767_v4 = vadd.f32 %v4760_v13, %v4482_v39  ;;  %9446 = vmatprep.mubr.msk.f32.mxu1 %vm9718_vm3, %v14534_v11  ;;  %9673 = vmatpush3.msra.mxu1 %v9700_v48 }
 0x598   : > { %v8987_v34 = vpop.f32.mrf.mxu1  ;;  %v9362_v27 = vpop.f32.mrf.mxu0  ;;  %9658 = vmatprep.subr.mxu1 %v14534_v11 }
 0x599   : > { %9674 = vmatpush3.msra.mxu1 %v9701_v28  ;;  %v14766_v34 = vld [vmem:[#allocation26_spill] sm:$0xff] }
 0x59a   : > { %v4765_v26 = vpop.f32.mrf.mxu1  ;;  %v13780_v39 = vpop.f32.mrf.mxu0  ;;  %9447 = vmatmul.mubr.f32.gmra.mxu1 %v13363_v36  ;;  %9659 = vmatprep.subr.mxu1 %v14534_v11  ;;  %v4484_v27 = vadd.f32 %v14766_v34, %v13354_v46  ;;  %v9703_v36 = vld [vmem:[%s14361_s2 + $0x720] sm:$0xff]  ;;  %v9704_v46 = vld [vmem:[%s14361_s2 + $0x718] sm:$0xff] }
 0x59b   : > { %14765 = vst [vmem:[#allocation57_spill] sm:$0xff] %v13780_v39  ;;  %v13784_v45 = vadd.f32 %v4765_v26, %v4483_v60  ;;  %9449 = vmatprep.mubr.msk.f32.mxu1 %vm9718_vm3, %v14534_v11  ;;  %9675 = vmatpush3.msra.mxu1 %v9702_v42 }
 0x59c   : > { %v8990_v13 = vpop.f32.mrf.mxu1  ;;  %v9365_v48 = vpop.f32.mrf.mxu0  ;;  %9660 = vmatprep.subr.mxu1 %v14534_v11 }
 0x59d   : > { %9676 = vmatpush3.msra.mxu1 %v9703_v36  ;;  %v14768_v13 = vld [vmem:[#allocation77_spill] sm:$0xff] }
 0x59e   : > { %v4770_v17 = vpop.f32.mrf.mxu1  ;;  %v13797_v60 = vpop.f32.mrf.mxu0  ;;  %9450 = vmatmul.mubr.f32.gmra.mxu1 %v13380_v62  ;;  %9661 = vmatprep.subr.mxu1 %v14534_v11  ;;  %v4485_v48 = vadd.f32 %v14768_v13, %v13371_v59  ;;  %v9705_v62 = vld [vmem:[%s14361_s2 + $0x710] sm:$0xff]  ;;  %v9706_v59 = vld [vmem:[%s14361_s2 + $0x708] sm:$0xff] }
 0x59f   : > { %14767 = vst [vmem:[#allocation58_spill] sm:$0xff] %v13797_v60  ;;  %v13801_v28 = vadd.f32 %v4770_v17, %v4484_v27  ;;  %9452 = vmatprep.mubr.msk.f32.mxu1 %vm9718_vm3, %v14534_v11  ;;  %9677 = vmatpush3.msra.mxu1 %v9704_v46 }
 0x5a0   : > { %v8993_v26 = vpop.f32.mrf.mxu1  ;;  %v9368_v42 = vpop.f32.mrf.mxu0  ;;  %9662 = vmatprep.subr.mxu1 %v14534_v11 }
 0x5a1   : > { %9678 = vmatpush3.msra.mxu1 %v9705_v62  ;;  %v14770_v26 = vld [vmem:[#allocation78_spill] sm:$0xff] }
 0x5a2   : > { %v4775_v34 = vpop.f32.mrf.mxu1  ;;  %v13814_v27 = vpop.f32.mrf.mxu0  ;;  %9453 = vmatmul.mubr.f32.gmra.mxu1 %v13397_v50  ;;  %9663 = vmatprep.subr.mxu1 %v14534_v11  ;;  %v4486_v42 = vadd.f32 %v14770_v26, %v13388_v30  ;;  %v9707_v50 = vld [vmem:[%s14361_s2 + $0x700] sm:$0xff] }
 0x5a3   : > { %14769 = vst [vmem:[#allocation59_spill] sm:$0xff] %v13814_v27  ;;  %v13818_v36 = vadd.f32 %v4775_v34, %v4485_v48  ;;  %9455 = vmatprep.mubr.msk.f32.mxu1 %vm9718_vm3, %v14534_v11  ;;  %9679 = vmatpush3.msra.mxu1 %v9706_v59 }
 0x5a4   : > { %v8996_v17 = vpop.f32.mrf.mxu1  ;;  %v9371_v46 = vpop.f32.mrf.mxu0  ;;  %9664 = vmatprep.subr.mxu1 %v14534_v11 }
 0x5a5   : > { %9680 = vmatpush3.msra.mxu1 %v9707_v50  ;;  %v14772_v17 = vld [vmem:[#allocation29_spill] sm:$0xff] }
 0x5a6   : > { %v4780_v13 = vpop.f32.mrf.mxu1  ;;  %v13831_v48 = vpop.f32.mrf.mxu0  ;;  %9456 = vmatmul.mubr.f32.gmra.mxu1 %v13414_v63  ;;  %v4487_v30 = vadd.f32 %v14772_v17, %v13405_v49 }
 0x5a7   : > { %14771 = vst [vmem:[#allocation60_spill] sm:$0xff] %v13831_v48  ;;  %v13834_v62 = vadd.f32 %v4780_v13, %v4486_v42  ;;  %9458 = vmatprep.mubr.msk.f32.mxu1 %vm9718_vm3, %v14534_v11  ;;  %v14774_v13 = vld [vmem:[#allocation79_spill] sm:$0xff] }
 0x5a8   : > { %v8999_v34 = vpop.f32.mrf.mxu1  ;;  %v9374_v59 = vpop.f32.mrf.mxu0  ;;  %v4488_v48 = vadd.f32 %v14774_v13, %v13422_v23  ;;  %v14778_v13 = vld [vmem:[#allocation81_spill] sm:$0xff] }
 0x5aa   : > { %v4785_v46 = vpop.f32.mrf.mxu1  ;;  %v13840_v26 = vpop.f32.mrf.mxu0  ;;  %9459 = vmatmul.mubr.f32.gmra.mxu1 %v13431_v2 }
 0x5ab   : > { %14773 = vst [vmem:[#allocation61_spill] sm:$0xff] %v13840_v26  ;;  %v13843_v50 = vadd.f32 %v4785_v46, %v4487_v30  ;;  %9461 = vmatprep.mubr.msk.f32.mxu1 %vm9718_vm3, %v14534_v11  ;;  %v14776_v30 = vld [vmem:[#allocation28_spill] sm:$0xff] }
 0x5ac   : > { %v9002_v63 = vpop.f32.mrf.mxu1  ;;  %v9377_v42 = vpop.f32.mrf.mxu0  ;;  %v4489_v46 = vadd.f32 %v14776_v30, %v13439_v43 }
 0x5ae   : > { %v4790_v34 = vpop.f32.mrf.mxu1  ;;  %v13849_v59 = vpop.f32.mrf.mxu0  ;;  %9462 = vmatmul.mubr.f32.gmra.mxu1 %v13448_v16 }
 0x5af   : > { %14775 = vst [vmem:[#allocation62_spill] sm:$0xff] %v13849_v59  ;;  %v13852_v49 = vadd.f32 %v4790_v34, %v4488_v48  ;;  %9464 = vmatprep.mubr.msk.f32.mxu1 %vm9718_vm3, %v14534_v11  ;;  %v4490_v34 = vadd.f32 %v14778_v13, %v13456_v10 }
 0x5b0   : > { %v9005_v2 = vpop.f32.mrf.mxu1  ;;  %v9380_v17 = vpop.f32.mrf.mxu0 }
 0x5b2   : > { %v4795_v63 = vpop.f32.mrf.mxu1  ;;  %v13858_v42 = vpop.f32.mrf.mxu0  ;;  %9465 = vmatmul.mubr.f32.gmra.mxu1 %v13465_v58 }
 0x5b3   : > { %14777 = vst [vmem:[#allocation63_spill] sm:$0xff] %v13858_v42  ;;  %v13861_v23 = vadd.f32 %v4795_v63, %v4489_v46  ;;  %9467 = vmatprep.mubr.msk.f32.mxu1 %vm9718_vm3, %v14534_v11  ;;  %v14780_v46 = vld [vmem:[#allocation82_spill] sm:$0xff] }
 0x5b4   : > { %v9008_v16 = vpop.f32.mrf.mxu1  ;;  %v9383_v48 = vpop.f32.mrf.mxu0  ;;  %v4491_v63 = vadd.f32 %v14780_v46, %v13473_v20 }
 0x5b6   : > { %v4800_v2 = vpop.f32.mrf.mxu1  ;;  %v13867_v17 = vpop.f32.mrf.mxu0  ;;  %9468 = vmatmul.mubr.f32.gmra.mxu1 %v13482_v33 }
 0x5b7   : > { %14779 = vst [vmem:[#allocation64_spill] sm:$0xff] %v13867_v17  ;;  %v13870_v43 = vadd.f32 %v4800_v2, %v4490_v34  ;;  %9470 = vmatprep.mubr.msk.f32.mxu1 %vm9718_vm3, %v14534_v11  ;;  %v14782_v34 = vld [vmem:[#allocation31_spill] sm:$0xff] }
 0x5b8   : > { %v9011_v58 = vpop.f32.mrf.mxu1  ;;  %v9386_v30 = vpop.f32.mrf.mxu0  ;;  %v4492_v2 = vadd.f32 %v14782_v34, %v13490_v61 }
 0x5ba   : > { %v4805_v16 = vpop.f32.mrf.mxu1  ;;  %v13876_v48 = vpop.f32.mrf.mxu0  ;;  %9471 = vmatmul.mubr.f32.gmra.mxu1 %v13499_v3 }
 0x5bb   : > { %14781 = vst [vmem:[#allocation68_spill] sm:$0xff] %v13876_v48  ;;  %v13879_v10 = vadd.f32 %v4805_v16, %v4491_v63  ;;  %9473 = vmatprep.mubr.msk.f32.mxu1 %vm9718_vm3, %v14534_v11  ;;  %v14784_v63 = vld [vmem:[#allocation83_spill] sm:$0xff] }
 0x5bc   : > { %v9014_v33 = vpop.f32.mrf.mxu1  ;;  %v9389_v13 = vpop.f32.mrf.mxu0  ;;  %v4493_v16 = vadd.f32 %v14784_v63, %v13504_v5 }
 0x5be   : > { %v4810_v58 = vpop.f32.mrf.mxu1  ;;  %v13885_v30 = vpop.f32.mrf.mxu0  ;;  %9474 = vmatmul.mubr.f32.gmra.mxu1 %v13513_v31 }
 0x5bf   : > { %14783 = vst [vmem:[#allocation72_spill] sm:$0xff] %v13885_v30  ;;  %v13888_v20 = vadd.f32 %v4810_v58, %v4492_v2  ;;  %9476 = vmatprep.mubr.msk.f32.mxu1 %vm9718_vm3, %v14534_v11  ;;  %v14786_v2 = vld [vmem:[#allocation46_spill] sm:$0xff] }
 0x5c0   : > { %v9017_v3 = vpop.f32.mrf.mxu1  ;;  %v9392_v46 = vpop.f32.mrf.mxu0  ;;  %v14787_v58 = vld [vmem:[#allocation30_spill] sm:$0xff] }
 0x5c1   : > { %v4494_v30 = vadd.f32 %v14787_v58, %v14786_v2  ;;  %v14790_v58 = vld [vmem:[#allocation86_spill] sm:$0xff] }
 0x5c2   : > { %v4815_v33 = vpop.f32.mrf.mxu1  ;;  %v13894_v13 = vpop.f32.mrf.mxu0  ;;  %9477 = vmatmul.mubr.f32.gmra.mxu1 %v13526_v29 }
 0x5c3   : > { %14785 = vst [vmem:[#allocation76_spill] sm:$0xff] %v13894_v13  ;;  %v13897_v61 = vadd.f32 %v4815_v33, %v4493_v16  ;;  %9479 = vmatprep.mubr.msk.f32.mxu1 %vm9718_vm3, %v14534_v11  ;;  %v14789_v16 = vld [vmem:[#allocation85_spill] sm:$0xff] }
 0x5c4   : > { %v9020_v31 = vpop.f32.mrf.mxu1  ;;  %v9395_v34 = vpop.f32.mrf.mxu0  ;;  %v5184_v33 = vadd.f32 %v14789_v16, %v13531_v41 }
 0x5c6   : > { %v4820_v3 = vpop.f32.mrf.mxu1  ;;  %v13903_v46 = vpop.f32.mrf.mxu0  ;;  %9480 = vmatmul.mubr.f32.gmra.mxu1 %v13539_v24 }
 0x5c7   : > { %14788 = vst [vmem:[#allocation80_spill] sm:$0xff] %v13903_v46  ;;  %v13906_v5 = vadd.f32 %v4820_v3, %v4494_v30  ;;  %9482 = vmatprep.mubr.msk.f32.mxu1 %vm9718_vm3, %v14534_v11  ;;  %v5185_v3 = vadd.f32 %v14790_v58, %v13544_v21 }
 0x5c8   : > { %v9023_v29 = vpop.f32.mrf.mxu1  ;;  %v9398_v63 = vpop.f32.mrf.mxu0 }
 0x5ca   : > { %v5390_v31 = vpop.f32.mrf.mxu1  ;;  %9483 = vmatmul.mubr.f32.gmra.mxu1 %v13552_v37  ;;  %v13913_v34 = vpop.f32.mrf.mxu0 }
 0x5cb   : > { %v13915_v2 = vadd.f32 %v5390_v31, %v5184_v33  ;;  %9485 = vmatprep.mubr.msk.f32.mxu1 %vm9718_vm3, %v14534_v11  ;;  %v14791_v33 = vld [vmem:[#allocation33_spill] sm:$0xff] }
 0x5cc   : > { %v9183_v24 = vpop.f32.mrf.mxu1  ;;  %v9558_v30 = vpop.f32.mrf.mxu0  ;;  %v5186_v31 = vadd.f32 %v14791_v33, %v13557_v18 }
 0x5ce   : > { %v5395_v29 = vpop.f32.mrf.mxu1  ;;  %9486 = vmatmul.mubr.f32.gmra.mxu1 %v13565_v35  ;;  %v13922_v63 = vpop.f32.mrf.mxu0 }
 0x5cf   : > { %v13924_v41 = vadd.f32 %v5395_v29, %v5185_v3  ;;  %9488 = vmatprep.mubr.msk.f32.mxu1 %vm9718_vm3, %v14534_v11  ;;  %v14792_v3 = vld [vmem:[#allocation87_spill] sm:$0xff] }
 0x5d0   : > { %v9186_v37 = vpop.f32.mrf.mxu1  ;;  %v9561_v16 = vpop.f32.mrf.mxu0  ;;  %v5187_v29 = vadd.f32 %v14792_v3, %v13570_v40 }
 0x5d2   : > { %v5400_v24 = vpop.f32.mrf.mxu1  ;;  %9489 = vmatmul.mubr.f32.gmra.mxu1 %v13578_v53  ;;  %v13931_v30 = vpop.f32.mrf.mxu0 }
 0x5d3   : > { %v13933_v21 = vadd.f32 %v5400_v24, %v5186_v31  ;;  %9491 = vmatprep.mubr.msk.f32.mxu1 %vm9718_vm3, %v14534_v11  ;;  %v14793_v31 = vld [vmem:[#allocation32_spill] sm:$0xff] }
 0x5d4   : > { %v9189_v35 = vpop.f32.mrf.mxu1  ;;  %v9564_v58 = vpop.f32.mrf.mxu0  ;;  %v5188_v24 = vadd.f32 %v14793_v31, %v13583_v51 }
 0x5d6   : > { %v5405_v37 = vpop.f32.mrf.mxu1  ;;  %9492 = vmatmul.mubr.f32.gmra.mxu1 %v13591_v52  ;;  %v13940_v16 = vpop.f32.mrf.mxu0 }
 0x5d7   : > { %v13942_v18 = vadd.f32 %v5405_v37, %v5187_v29  ;;  %9494 = vmatprep.mubr.msk.f32.mxu1 %vm9718_vm3, %v14534_v11  ;;  %v14794_v29 = vld [vmem:[#allocation89_spill] sm:$0xff] }
 0x5d8   : > { %v9192_v53 = vpop.f32.mrf.mxu1  ;;  %v9567_v33 = vpop.f32.mrf.mxu0  ;;  %v5189_v37 = vadd.f32 %v14794_v29, %v13596_v0 }
 0x5da   : > { %v5410_v35 = vpop.f32.mrf.mxu1  ;;  %9495 = vmatmul.mubr.f32.gmra.mxu1 %v13604_v55  ;;  %v13949_v58 = vpop.f32.mrf.mxu0 }
 0x5db   : > { %v13951_v40 = vadd.f32 %v5410_v35, %v5188_v24  ;;  %9497 = vmatprep.mubr.msk.f32.mxu1 %vm9718_vm3, %v14534_v11  ;;  %v14795_v24 = vld [vmem:[#allocation117_spill] sm:$0xff]  ;;  %v14796_v35 = vld [vmem:[#allocation90_spill] sm:$0xff] }
 0x5dc   : > { %v9195_v52 = vpop.f32.mrf.mxu1  ;;  %v9570_v3 = vpop.f32.mrf.mxu0  ;;  %v5190_v46 = vadd.f32 %v14796_v35, %v14795_v24 }
 0x5dd   : > { %v14797_v3 = vld [vmem:[#allocation119_spill] sm:$0xff] }
 0x5de   : > { %v5415_v53 = vpop.f32.mrf.mxu1  ;;  %9498 = vmatmul.mubr.f32.gmra.mxu1 %v13617_v19  ;;  %v13958_v33 = vpop.f32.mrf.mxu0 }
 0x5df   : > { %v13960_v51 = vadd.f32 %v5415_v53, %v5189_v37  ;;  %9500 = vmatprep.mubr.msk.f32.mxu1 %vm9718_vm3, %v14534_v11  ;;  %v14798_v37 = vld [vmem:[#allocation9_spill] sm:$0xff]  ;;  %v14799_v53 = vld [vmem:[#allocation35_spill] sm:$0xff] }
 0x5e0   : > { %v9198_v55 = vpop.f32.mrf.mxu1  ;;  %v9573_v31 = vpop.f32.mrf.mxu0  ;;  %v5191_v48 = vadd.f32 %v14799_v53, %v14798_v37  ;;  %v14801_v53 = vld [vmem:[#allocation10_spill] sm:$0xff] }
 0x5e2   : > { %v5420_v52 = vpop.f32.mrf.mxu1  ;;  %9501 = vmatmul.mubr.f32.gmra.mxu1 %v14797_v3  ;;  %v13967_v13 = vpop.f32.mrf.mxu0 }
 0x5e3   : > { %v13969_v0 = vadd.f32 %v5420_v52, %v5190_v46  ;;  %9503 = vmatprep.mubr.msk.f32.mxu1 %vm9718_vm3, %v14534_v11  ;;  %v14800_v52 = vld [vmem:[#allocation91_spill] sm:$0xff] }
 0x5e4   : > { %v9201_v19 = vpop.f32.mrf.mxu1  ;;  %v9576_v29 = vpop.f32.mrf.mxu0  ;;  %v5192_v3 = vadd.f32 %v14800_v52, %v13635_v6 }
 0x5e6   : > { %v5425_v55 = vpop.f32.mrf.mxu1  ;;  %9504 = vmatmul.mubr.f32.gmra.mxu1 %v13641_v7  ;;  %v13976_v31 = vpop.f32.mrf.mxu0 }
 0x5e7   : > { %v13978_v24 = vadd.f32 %v5425_v55, %v5191_v48  ;;  %9506 = vmatprep.mubr.msk.f32.mxu1 %vm9718_vm3, %v14534_v11  ;;  %v14802_v55 = vld [vmem:[#allocation34_spill] sm:$0xff] }
 0x5e8   : > { %v9204_v46 = vpop.f32.mrf.mxu1  ;;  %v9579_v35 = vpop.f32.mrf.mxu0  ;;  %v5193_v17 = vadd.f32 %v14802_v55, %v14801_v53  ;;  %v14805_v55 = vld [vmem:[#allocation55_spill] sm:$0xff] }
 0x5ea   : > { %v5430_v19 = vpop.f32.mrf.mxu1  ;;  %9507 = vmatmul.mubr.f32.gmra.mxu1 %v13652_v25  ;;  %v13985_v29 = vpop.f32.mrf.mxu0 }
 0x5eb   : > { %v13987_v37 = vadd.f32 %v5430_v19, %v5192_v3  ;;  %9509 = vmatprep.mubr.msk.f32.mxu1 %vm9718_vm3, %v14534_v11  ;;  %v14803_v3 = vld [vmem:[#allocation54_spill] sm:$0xff]  ;;  %v14804_v19 = vld [vmem:[#allocation93_spill] sm:$0xff] }
 0x5ec   : > { %v9207_v7 = vpop.f32.mrf.mxu1  ;;  %v9582_v48 = vpop.f32.mrf.mxu0  ;;  %v5194_v42 = vadd.f32 %v14804_v19, %v14803_v3  ;;  %v14807_v19 = vld [vmem:[#allocation14_spill] sm:$0xff] }
 0x5ee   : > { %v5435_v46 = vpop.f32.mrf.mxu1  ;;  %9510 = vmatmul.mubr.f32.gmra.mxu1 %v13663_v32  ;;  %v13994_v35 = vpop.f32.mrf.mxu0 }
 0x5ef   : > { %v13996_v6 = vadd.f32 %v5435_v46, %v5193_v17  ;;  %9512 = vmatprep.mubr.msk.f32.mxu1 %vm9718_vm3, %v14534_v11  ;;  %v14806_v46 = vld [vmem:[#allocation94_spill] sm:$0xff] }
 0x5f0   : > { %v9210_v25 = vpop.f32.mrf.mxu1  ;;  %v9585_v52 = vpop.f32.mrf.mxu0  ;;  %v5195_v59 = vadd.f32 %v14806_v46, %v14805_v55  ;;  %v14809_v46 = vld [vmem:[#allocation95_spill] sm:$0xff] }
 0x5f2   : > { %v5440_v7 = vpop.f32.mrf.mxu1  ;;  %9513 = vmatmul.mubr.f32.gmra.mxu1 %v13674_v9  ;;  %v14003_v48 = vpop.f32.mrf.mxu0 }
 0x5f3   : > { %v14005_v53 = vadd.f32 %v5440_v7, %v5194_v42  ;;  %9515 = vmatprep.mubr.msk.f32.mxu1 %vm9718_vm3, %v14534_v11  ;;  %v14808_v7 = vld [vmem:[#allocation37_spill] sm:$0xff] }
 0x5f4   : > { %v9213_v32 = vpop.f32.mrf.mxu1  ;;  %v9588_v17 = vpop.f32.mrf.mxu0  ;;  %v5196_v26 = vadd.f32 %v14808_v7, %v14807_v19 }
 0x5f5   : > { %v5995_v32 = vld [vmem:[#allocation2 + $0x132] sm:$0xff] }
 0x5f6   : > { %v5445_v25 = vpop.f32.mrf.mxu1  ;;  %9516 = vmatmul.mubr.f32.gmra.mxu1 %v13685_v56  ;;  %v14012_v52 = vpop.f32.mrf.mxu0 }
 0x5f7   : > { %v14014_v3 = vadd.f32 %v5445_v25, %v5195_v59  ;;  %9518 = vmatprep.mubr.msk.f32.mxu1 %vm9718_vm3, %v14534_v11  ;;  %v5197_v25 = vadd.f32 %v14809_v46, %v13690_v54 }
 0x5f8   : > { %v9216_v9 = vpop.f32.mrf.mxu1  ;;  %v9591_v42 = vpop.f32.mrf.mxu0 }
 0x5f9   : > { %v5996_v9 = vld [vmem:[#allocation2 + $0x13a] sm:$0xff] }
 0x5fa   : > { %v5450_v17 = vpop.f32.mrf.mxu1  ;;  %9519 = vmatmul.mubr.f32.gmra.mxu1 %v5995_v32  ;;  %v14020_v27 = vpop.f32.mrf.mxu0  ;;  %v14810_v32 = vld [vmem:[#allocation36_spill] sm:$0xff] }
 0x5fb   : > { %v14022_v55 = vadd.f32 %v5450_v17, %v5196_v26  ;;  %9521 = vmatprep.mubr.msk.f32.mxu1 %vm9718_vm3, %v14534_v11  ;;  %v5198_v17 = vadd.f32 %v14810_v32, %v13699_v57 }
 0x5fc   : > { %v9219_v56 = vpop.f32.mrf.mxu1  ;;  %v9594_v59 = vpop.f32.mrf.mxu0 }
 0x5fd   : > { %v6352_v56 = vld [vmem:[#allocation2 + $0x11c] sm:$0xff] }
 0x5fe   : > { %v5455_v42 = vpop.f32.mrf.mxu1  ;;  %9522 = vmatmul.mubr.f32.gmra.mxu1 %v5996_v9  ;;  %v14028_v60 = vpop.f32.mrf.mxu0  ;;  %v14811_v9 = vld [vmem:[#allocation97_spill] sm:$0xff] }
 0x5ff   : > { %v14030_v19 = vadd.f32 %v5455_v42, %v5197_v25  ;;  %9634 = vmatprep.mubr.msk.f32.mxu1 %vm9718_vm3, %v14534_v11  ;;  %v5199_v42 = vadd.f32 %v14811_v9, %v13716_v8 }
 0x600   : > { %v9222_v26 = vpop.f32.mrf.mxu1  ;;  %v9597_v7 = vpop.f32.mrf.mxu0 }
 0x601   : > { %v6353_v26 = vld [vmem:[#allocation2 + $0x124] sm:$0xff] }
 0x602   : > { %v5460_v59 = vpop.f32.mrf.mxu1  ;;  %v14036_v39 = vpop.f32.mrf.mxu0  ;;  %9635 = vmatmul.mubr.f32.vlgmr.msra.gmra.mxu1 %v6352_v56  ;;  %v14812_v56 = vld [vmem:[#allocation98_spill] sm:$0xff] }
 0x603   : > { %v14038_v54 = vadd.f32 %v5460_v59, %v5198_v17  ;;  %9637 = vmatprep.mubr.msk.f32.mxu1 %vm9718_vm3, %v14534_v11  ;;  %v5200_v59 = vadd.f32 %v14812_v56, %v13733_v44 }
 0x604   : > { %v9225_v46 = vpop.f32.mrf.mxu1  ;;  %v9600_v25 = vpop.f32.mrf.mxu0 }
 0x605   : > { %v6354_v46 = vld [vmem:[#allocation2 + $0x12c] sm:$0xff] }
 0x606   : > { %v5465_v7 = vpop.f32.mrf.mxu1  ;;  %v14044_v38 = vpop.f32.mrf.mxu0  ;;  %9638 = vmatmul.mubr.f32.gmra.mxu1 %v6353_v26  ;;  %v14815_v26 = vld [vmem:[#allocation39_spill] sm:$0xff] }
 0x607   : > { %v14046_v57 = vadd.f32 %v5465_v7, %v5199_v42  ;;  %9640 = vmatprep.mubr.msk.f32.mxu1 %vm9718_vm3, %v14534_v11  ;;  %v5201_v7 = vadd.f32 %v14815_v26, %v13750_v14 }
 0x608   : > { %v9228_v32 = vpop.f32.mrf.mxu1  ;;  %v9603_v17 = vpop.f32.mrf.mxu0 }
 0x609   : > { %v6355_v32 = vld [vmem:[#allocation2 + $0x134] sm:$0xff] }
 0x60a   : > { %v5470_v25 = vpop.f32.mrf.mxu1  ;;  %v14052_v1 = vpop.f32.mrf.mxu0  ;;  %9641 = vmatmul.mubr.f32.gmra.mxu1 %v6354_v46  ;;  %v14818_v46 = vld [vmem:[#allocation99_spill] sm:$0xff] }
 0x60b   : > { %14813 = vst [vmem:[#allocation84_spill] sm:$0xff] %v14052_v1  ;;  %v14054_v8 = vadd.f32 %v5470_v25, %v5200_v59  ;;  %9643 = vmatprep.mubr.msk.f32.mxu1 %vm9718_vm3, %v14534_v11  ;;  %v5202_v25 = vadd.f32 %v14818_v46, %v13767_v4  ;;  %v14822_v4 = vld [vmem:[#allocation101_spill] sm:$0xff] }
 0x60c   : > { %v9231_v9 = vpop.f32.mrf.mxu1  ;;  %v9606_v42 = vpop.f32.mrf.mxu0  ;;  %v5204_v46 = vadd.f32 %v14822_v4, %v13801_v28 }
 0x60d   : > { %14814 = vst [vmem:[#allocation88_spill] sm:$0xff] %v14054_v8  ;;  %v6356_v9 = vld [vmem:[#allocation2 + $0x13c] sm:$0xff] }
 0x60e   : > { %v5475_v17 = vpop.f32.mrf.mxu1  ;;  %v14060_v12 = vpop.f32.mrf.mxu0  ;;  %9644 = vmatmul.mubr.f32.gmra.mxu1 %v6355_v32 }
 0x60f   : > { %14816 = vst [vmem:[#allocation92_spill] sm:$0xff] %v14060_v12  ;;  %v14062_v44 = vadd.f32 %v5475_v17, %v5201_v7  ;;  %9646 = vmatprep.mubr.msk.f32.mxu1 %vm9718_vm3, %v14534_v11  ;;  %v14820_v7 = vld [vmem:[#allocation38_spill] sm:$0xff] }
 0x610   : > { %v9234_v56 = vpop.f32.mrf.mxu1  ;;  %v9609_v59 = vpop.f32.mrf.mxu0  ;;  %v5203_v32 = vadd.f32 %v14820_v7, %v13784_v45 }
 0x611   : > { %14817 = vst [vmem:[#allocation96_spill] sm:$0xff] %v14062_v44 }
 0x612   : > { %v5480_v42 = vpop.f32.mrf.mxu1  ;;  %v14068_v1 = vpop.f32.mrf.mxu0  ;;  %9647 = vmatmul.mubr.f32.gmra.mxu1 %v6356_v9 }
 0x613   : > { %14819 = vst [vmem:[#allocation100_spill] sm:$0xff] %v14068_v1  ;;  %v14070_v14 = vadd.f32 %v5480_v42, %v5202_v25  ;;  %v14824_v42 = vld [vmem:[#allocation102_spill] sm:$0xff] }
 0x614   : > { %v9237_v26 = vpop.f32.mrf.mxu1  ;;  %v9612_v12 = vpop.f32.mrf.mxu0  ;;  %v5205_v45 = vadd.f32 %v14824_v42, %v13818_v36 }
 0x616   : > { %v5485_v17 = vpop.f32.mrf.mxu1  ;;  %v14074_v44 = vpop.f32.mrf.mxu0 }
 0x617   : > { %14821 = vst [vmem:[#allocation104_spill] sm:$0xff] %v14074_v44  ;;  %v14076_v11 = vadd.f32 %v5485_v17, %v5203_v32 }
 0x618   : > { %v9240_v56 = vpop.f32.mrf.mxu1  ;;  %v9615_v59 = vpop.f32.mrf.mxu0 }
 0x619   : > { %v14826_v59 = vld [vmem:[#allocation41_spill] sm:$0xff] }
 0x61a   : > { %v5490_v8 = vpop.f32.mrf.mxu1  ;;  %v14080_v1 = vpop.f32.mrf.mxu0  ;;  %v5206_v28 = vadd.f32 %v14826_v59, %v13834_v62 }
 0x61b   : > { %14823 = vst [vmem:[#allocation106_spill] sm:$0xff] %v14080_v1  ;;  %v14082_v25 = vadd.f32 %v5490_v8, %v5204_v46 }
 0x61c   : > { %v9243_v9 = vpop.f32.mrf.mxu1  ;;  %v9618_v12 = vpop.f32.mrf.mxu0 }
 0x61d   : > { %v14828_v12 = vld [vmem:[#allocation103_spill] sm:$0xff] }
 0x61e   : > { %v5495_v26 = vpop.f32.mrf.mxu1  ;;  %v14086_v7 = vpop.f32.mrf.mxu0  ;;  %v5207_v36 = vadd.f32 %v14828_v12, %v13843_v50 }
 0x61f   : > { %14825 = vst [vmem:[#allocation108_spill] sm:$0xff] %v14086_v7  ;;  %v14088_v32 = vadd.f32 %v5495_v26, %v5205_v45 }
 0x620   : > { %v9246_v17 = vpop.f32.mrf.mxu1  ;;  %v9621_v56 = vpop.f32.mrf.mxu0 }
 0x621   : > { %v14830_v56 = vld [vmem:[#allocation40_spill] sm:$0xff] }
 0x622   : > { %v5500_v4 = vpop.f32.mrf.mxu1  ;;  %v14092_v44 = vpop.f32.mrf.mxu0  ;;  %v5208_v62 = vadd.f32 %v14830_v56, %v13852_v49 }
 0x623   : > { %14827 = vst [vmem:[#allocation109_spill] sm:$0xff] %v14092_v44  ;;  %v14094_v8 = vadd.f32 %v5500_v4, %v5206_v28 }
 0x624   : > { %v9249_v46 = vpop.f32.mrf.mxu1  ;;  %v9624_v9 = vpop.f32.mrf.mxu0 }
 0x625   : > { %v14832_v9 = vld [vmem:[#allocation43_spill] sm:$0xff] }
 0x626   : > { %v5505_v42 = vpop.f32.mrf.mxu1  ;;  %v14098_v1 = vpop.f32.mrf.mxu0  ;;  %v5209_v50 = vadd.f32 %v14832_v9, %v13861_v23  ;;  %v14835_v9 = vld [vmem:[#allocation107_spill] sm:$0xff] }
 0x627   : > { %14829 = vst [vmem:[#allocation110_spill] sm:$0xff] %v14098_v1  ;;  %v14100_v45 = vadd.f32 %v5505_v42, %v5207_v36 }
 0x628   : > { %v9252_v26 = vpop.f32.mrf.mxu1  ;;  %v9627_v17 = vpop.f32.mrf.mxu0 }
 0x629   : > { %v14833_v17 = vld [vmem:[#allocation105_spill] sm:$0xff] }
 0x62a   : > { %v5510_v59 = vpop.f32.mrf.mxu1  ;;  %v14104_v7 = vpop.f32.mrf.mxu0  ;;  %v5210_v49 = vadd.f32 %v14833_v17, %v13870_v43  ;;  %v14836_v43 = vld [vmem:[#allocation44_spill] sm:$0xff] }
 0x62b   : > { %14831 = vst [vmem:[#allocation111_spill] sm:$0xff] %v14104_v7  ;;  %v14106_v28 = vadd.f32 %v5510_v59, %v5208_v62  ;;  %v14834_v59 = vld [vmem:[#allocation42_spill] sm:$0xff]  ;;  %v5213_v17 = vadd.f32 %v14836_v43, %v13897_v61  ;;  %v14139_v61 = vld [vmem:[%s14362_s3] ss:$0 sm:$0xff] }
 0x62c   : > { %v9255_v4 = vpop.f32.mrf.mxu1  ;;  %v9630_v46 = vpop.f32.mrf.mxu0 }
 0x62d   : > { %v5211_v4 = vadd.f32 %v14834_v59, %v13879_v10  ;;  %v14837_v10 = vld [vmem:[#allocation45_spill] sm:$0xff] }
 0x62e   : > { %v5515_v12 = vpop.f32.mrf.mxu1  ;;  %v14110_v44 = vpop.f32.mrf.mxu0  ;;  %v5214_v59 = vadd.f32 %v14837_v10, %v13906_v5 }
 0x62f   : > { %v14112_v36 = vadd.f32 %v5515_v12, %v5209_v50  ;;  %v5212_v50 = vadd.f32 %v14835_v9, %v13888_v20  ;;  %v14838_v20 = vld [vmem:[#allocation47_spill] sm:$0xff] }
 0x630   : > { %v9258_v42 = vpop.f32.mrf.mxu1  ;;  %v9633_v26 = vpop.f32.mrf.mxu0  ;;  %v5904_v9 = vadd.f32 %v14838_v20, %v13915_v2 }
 0x632   : > { %v5520_v56 = vpop.f32.mrf.mxu1 }
 0x633   : > { %v14116_v1 = vadd.f32 %v5520_v56, %v5210_v49 }
 0x634   : > { %v9261_v62 = vpop.f32.mrf.mxu1 }
 0x636   : > { %v5525_v46 = vpop.f32.mrf.mxu1 }
 0x637   : > { %v14120_v7 = vadd.f32 %v5525_v46, %v5211_v4 }
 0x638   : > { %v9264_v23 = vpop.f32.mrf.mxu1 }
 0x63a   : > { %v5530_v12 = vpop.f32.mrf.mxu1 }
 0x63b   : > { %v14124_v42 = vadd.f32 %v5530_v12, %v5212_v50 }
 0x63c   : > { %v9267_v26 = vpop.f32.mrf.mxu1 }
 0x63e   : > { %v5535_v49 = vpop.f32.mrf.mxu1 }
 0x63f   : > { %v14128_v56 = vadd.f32 %v5535_v49, %v5213_v17  ;;  %v14839_v17 = vld [vmem:[#allocation48_spill] sm:$0xff] }
 0x640   : > { %v9270_v62 = vpop.f32.mrf.mxu1  ;;  %v5905_v5 = vadd.f32 %v14839_v17, %v13924_v41 }
 0x642   : > { %v5540_v4 = vpop.f32.mrf.mxu1 }
 0x643   : > { %v14132_v46 = vadd.f32 %v5540_v4, %v5214_v59  ;;  %v14840_v4 = vld [vmem:[#allocation49_spill] sm:$0xff] }
 0x644   : > { %v9273_v23 = vpop.f32.mrf.mxu1 }
 0x645   : > { %v5906_v23 = vadd.f32 %v14840_v4, %v13933_v21 }
 0x646   : > { %v6110_v50 = vpop.f32.mrf.mxu1 }
 0x647   : > { %v6264_v12 = vadd.f32 %v6110_v50, %v5904_v9  ;;  %v6848_v9 = vld [vmem:[%s14363_s4] sm:$0xff] }
 0x648   : > { %v9433_v26 = vpop.f32.mrf.mxu1 }
 0x649   : > { %v6624_v43 = vadd.f32 %v13913_v34, %v6264_v12 }
 0x64a   : > { %v6115_v49 = vpop.f32.mrf.mxu1 }
 0x64b   : > { %v6724_v62 = vadd.f32 %v14139_v61, %v6624_v43  ;;  %v6265_v10 = vadd.f32 %v6115_v49, %v5905_v5  ;;  %v6849_v49 = vld [vmem:[%s14363_s4 + $0x8] sm:$0xff] }
 0x64c   : > { %v9436_v59 = vpop.f32.mrf.mxu1 }
 0x64d   : > { %v6625_v2 = vadd.f32 %v13922_v63, %v6265_v10  ;;  %vm6755_vm1 = vcmp.ge.f32.partialorder %v6724_v62, 0.0  ;;  %v6786_v20 = vmul.f32 0.2, %v6724_v62  ;;  %v14841_v63 = vld [vmem:[#allocation50_spill] sm:$0xff] }
 0x64e   : > { %v6120_v34 = vpop.f32.mrf.mxu1  ;;  %v5907_v5 = vadd.f32 %v14841_v63, %v13942_v18 }
 0x64f   : > { %v6725_v50 = vadd.f32 %v14139_v61, %v6625_v2  ;;  %v6266_v41 = vadd.f32 %v6120_v34, %v5906_v23  ;;  %v6817_v12 = vsel %vm6755_vm1, %v6724_v62, %v6786_v20  ;;  %v6850_v34 = vld [vmem:[%s14363_s4 + $0x10] sm:$0xff] }
 0x650   : > { %v9439_v26 = vpop.f32.mrf.mxu1  ;;  %v6879_v43 = vmul.f32 %v6848_v9, %v6817_v12 }
 0x651   : > { %v6626_v17 = vadd.f32 %v13931_v30, %v6266_v41  ;;  %vm6756_vm3 = vcmp.ge.f32.partialorder %v6725_v50, 0.0  ;;  %v6787_v21 = vmul.f32 0.2, %v6725_v50  ;;  %v14842_v30 = vld [vmem:[#allocation115_spill] sm:$0xff] }
 0x652   : > { %v6125_v10 = vpop.f32.mrf.mxu1  ;;  %6910 = vadd.xlane.f32.xlu0 %v6879_v43  ;;  %v5908_v9 = vadd.f32 %v14842_v30, %v13951_v40  ;;  %v6852_v30 = vld [vmem:[%s14363_s4 + $0x20] sm:$0xff] }
 0x653   : > { %v6726_v59 = vadd.f32 %v14139_v61, %v6626_v17  ;;  %v6267_v2 = vadd.f32 %v6125_v10, %v5907_v5  ;;  %v6818_v4 = vsel %vm6756_vm3, %v6725_v50, %v6787_v21  ;;  %v6851_v21 = vld [vmem:[%s14363_s4 + $0x18] sm:$0xff] }
 0x654   : > { %v9442_v62 = vpop.f32.mrf.mxu1  ;;  %v6880_v23 = vmul.f32 %v6849_v49, %v6818_v4 }
 0x655   : > { %v6627_v20 = vadd.f32 %v13940_v16, %v6267_v2  ;;  %vm6757_vm6 = vcmp.ge.f32.partialorder %v6726_v59, 0.0  ;;  %v6788_v18 = vmul.f32 0.2, %v6726_v59  ;;  %v14843_v16 = vld [vmem:[#allocation51_spill] sm:$0xff] }
 0x656   : > { %v6130_v41 = vpop.f32.mrf.mxu1  ;;  %6912 = vadd.xlane.f32.xlu1 %v6880_v23  ;;  %v5909_v5 = vadd.f32 %v14843_v16, %v13960_v51 }
 0x657   : > { %v6727_v12 = vadd.f32 %v14139_v61, %v6627_v20  ;;  %v6268_v26 = vadd.f32 %v6130_v41, %v5908_v9  ;;  %v6819_v43 = vsel %vm6757_vm6, %v6726_v59, %v6788_v18 }
 0x658   : > { %v9445_v50 = vpop.f32.mrf.mxu1  ;;  %v6881_v17 = vmul.f32 %v6850_v34, %v6819_v43 }
 0x659   : > { %v6628_v63 = vadd.f32 %v13949_v58, %v6268_v26  ;;  %vm6758_vm4 = vcmp.ge.f32.partialorder %v6727_v12, 0.0  ;;  %v6789_v40 = vmul.f32 0.2, %v6727_v12  ;;  %v14844_v58 = vld [vmem:[#allocation7_spill] sm:$0xff] }
 0x65a   : > { %v6135_v49 = vpop.f32.mrf.mxu1  ;;  %6914 = vadd.xlane.f32.xlu0 %v6881_v17  ;;  %v5910_v20 = vadd.f32 %v14844_v58, %v13969_v0  ;;  %v6853_v17 = vld [vmem:[%s14363_s4 + $0x28] sm:$0xff] }
 0x65b   : > { %v6728_v10 = vadd.f32 %v14139_v61, %v6628_v63  ;;  %v6269_v2 = vadd.f32 %v6135_v49, %v5909_v5  ;;  %v6820_v4 = vsel %vm6758_vm4, %v6727_v12, %v6789_v40 }
 0x65c   : > { %v9448_v59 = vpop.f32.mrf.mxu1  ;;  %v6882_v62 = vmul.f32 %v6851_v21, %v6820_v4  ;;  %v6854_v4 = vld [vmem:[%s14363_s4 + $0x30] sm:$0xff] }
 0x65d   : > { %v6629_v23 = vadd.f32 %v13958_v33, %v6269_v2  ;;  %vm6759_vm5 = vcmp.ge.f32.partialorder %v6728_v10, 0.0  ;;  %v6790_v51 = vmul.f32 0.2, %v6728_v10  ;;  %v14845_v33 = vld [vmem:[#allocation52_spill] sm:$0xff] }
 0x65e   : > { %v6140_v9 = vpop.f32.mrf.mxu1  ;;  %6916 = vadd.xlane.f32.xlu0 %v6882_v62  ;;  %v5911_v50 = vadd.f32 %v14845_v33, %v13978_v24 }
 0x65f   : > { %v6729_v18 = vadd.f32 %v14139_v61, %v6629_v23  ;;  %v6270_v34 = vadd.f32 %v6140_v9, %v5910_v20  ;;  %v6821_v41 = vsel %vm6759_vm5, %v6728_v10, %v6790_v51 }
 0x660   : > { %v9451_v12 = vpop.f32.mrf.mxu1  ;;  %v6883_v26 = vmul.f32 %v6852_v30, %v6821_v41 }
 0x661   : > { %v6630_v43 = vadd.f32 %v13967_v13, %v6270_v34  ;;  %vm6760_vm7 = vcmp.ge.f32.partialorder %v6729_v18, 0.0  ;;  %v6791_v0 = vmul.f32 0.2, %v6729_v18  ;;  %v14846_v13 = vld [vmem:[#allocation53_spill] sm:$0xff] }
 0x662   : > { %v6145_v63 = vpop.f32.mrf.mxu1  ;;  %6918 = vadd.xlane.f32.xlu1 %v6883_v26  ;;  %v5912_v2 = vadd.f32 %v14846_v13, %v13987_v37 }
 0x663   : > { %v6730_v16 = vadd.f32 %v14139_v61, %v6630_v43  ;;  %v6271_v5 = vadd.f32 %v6145_v63, %v5911_v50  ;;  %v6822_v40 = vsel %vm6760_vm7, %v6729_v18, %v6791_v0  ;;  %v6855_v18 = vld [vmem:[%s14363_s4 + $0x38] sm:$0xff] }
 0x664   : > { %v9454_v21 = vpop.f32.mrf.mxu1  ;;  %v6884_v49 = vmul.f32 %v6853_v17, %v6822_v40  ;;  %v6856_v17 = vld [vmem:[%s14363_s4 + $0x40] sm:$0xff] }
 0x665   : > { %v6631_v10 = vadd.f32 %v13976_v31, %v6271_v5  ;;  %vm6761_vm8 = vcmp.ge.f32.partialorder %v6730_v16, 0.0  ;;  %v6792_v24 = vmul.f32 0.2, %v6730_v16  ;;  %v14847_v31 = vld [vmem:[#allocation11_spill] sm:$0xff] }
 0x666   : > { %v6150_v59 = vpop.f32.mrf.mxu1  ;;  %6920 = vadd.xlane.f32.xlu0 %v6884_v49  ;;  %v5913_v9 = vadd.f32 %v14847_v31, %v13996_v6 }
 0x667   : > { %v6731_v62 = vadd.f32 %v14139_v61, %v6631_v10  ;;  %v6272_v23 = vadd.f32 %v6150_v59, %v5912_v2  ;;  %v6823_v58 = vsel %vm6761_vm8, %v6730_v16, %v6792_v24  ;;  %v6857_v2 = vld [vmem:[%s14363_s4 + $0x48] sm:$0xff] }
 0x668   : > { %v9457_v20 = vpop.f32.mrf.mxu1  ;;  %v6885_v51 = vmul.f32 %v6854_v4, %v6823_v58 }
 0x669   : > { %v6632_v30 = vadd.f32 %v13985_v29, %v6272_v23  ;;  %vm6762_vm9 = vcmp.ge.f32.partialorder %v6731_v62, 0.0  ;;  %v6793_v37 = vmul.f32 0.2, %v6731_v62  ;;  %v14848_v29 = vld [vmem:[#allocation120_spill] sm:$0xff] }
 0x66a   : > { %v6155_v34 = vpop.f32.mrf.mxu1  ;;  %6922 = vadd.xlane.f32.xlu1 %v6885_v51  ;;  %v5914_v0 = vadd.f32 %v14848_v29, %v14005_v53 }
 0x66b   : > { %v6732_v41 = vadd.f32 %v14139_v61, %v6632_v30  ;;  %v6273_v12 = vadd.f32 %v6155_v34, %v5913_v9  ;;  %v6824_v26 = vsel %vm6762_vm9, %v6731_v62, %v6793_v37  ;;  %v6858_v30 = vld [vmem:[%s14363_s4 + $0x50] sm:$0xff] }
 0x66c   : > { %v9460_v43 = vpop.f32.mrf.mxu1  ;;  %v6886_v33 = vmul.f32 %v6855_v18, %v6824_v26  ;;  %v6859_v26 = vld [vmem:[%s14363_s4 + $0x58] sm:$0xff] }
 0x66d   : > { %v6633_v50 = vadd.f32 %v13994_v35, %v6273_v12  ;;  %vm6763_vm10 = vcmp.ge.f32.partialorder %v6732_v41, 0.0  ;;  %v6794_v6 = vmul.f32 0.2, %v6732_v41  ;;  %v14849_v35 = vld [vmem:[#allocation122_spill] sm:$0xff] }
 0x66e   : > { %v6160_v63 = vpop.f32.mrf.mxu1  ;;  %6924 = vadd.xlane.f32.xlu0 %v6886_v33  ;;  %v5915_v13 = vadd.f32 %v14849_v35, %v14014_v3 }
 0x66f   : > { %v6733_v16 = vadd.f32 %v14139_v61, %v6633_v50  ;;  %v6274_v5 = vadd.f32 %v6160_v63, %v5914_v0  ;;  %v6825_v40 = vsel %vm6763_vm10, %v6732_v41, %v6794_v6 }
 0x670   : > { %v9463_v21 = vpop.f32.mrf.mxu1  ;;  %v6887_v49 = vmul.f32 %v6856_v17, %v6825_v40 }
 0x671   : > { %v6634_v10 = vadd.f32 %v14003_v48, %v6274_v5  ;;  %vm6764_vm11 = vcmp.ge.f32.partialorder %v6733_v16, 0.0  ;;  %v6795_v53 = vmul.f32 0.2, %v6733_v16  ;;  %v14850_v48 = vld [vmem:[#allocation15_spill] sm:$0xff] }
 0x672   : > { %v6165_v24 = vpop.f32.mrf.mxu1  ;;  %6926 = vadd.xlane.f32.xlu1 %v6887_v49  ;;  %v5916_v51 = vadd.f32 %v14850_v48, %v14022_v55 }
 0x673   : > { %v6734_v4 = vadd.f32 %v14139_v61, %v6634_v10  ;;  %v6275_v59 = vadd.f32 %v6165_v24, %v5915_v13  ;;  %v6826_v62 = vsel %vm6764_vm11, %v6733_v16, %v6795_v53 }
 0x674   : > { %v9466_v23 = vpop.f32.mrf.mxu1  ;;  %v6888_v58 = vmul.f32 %v6857_v2, %v6826_v62  ;;  %v14852_v62 = vld [vmem:[#allocation12_spill] sm:$0xff] }
 0x675   : > { %v6635_v20 = vadd.f32 %v14012_v52, %v6275_v59  ;;  %vm6765_vm12 = vcmp.ge.f32.partialorder %v6734_v4, 0.0  ;;  %v6796_v3 = vmul.f32 0.2, %v6734_v4  ;;  %v5917_v52 = vadd.f32 %v13688_v22, %v14030_v19  ;;  %v6860_v19 = vld [vmem:[%s14363_s4 + $0x60] sm:$0xff] }
 0x676   : > { %v6170_v31 = vpop.f32.mrf.mxu1  ;;  %6928 = vadd.xlane.f32.xlu0 %v6888_v58 }
 0x677   : > { %v6735_v9 = vadd.f32 %v14139_v61, %v6635_v20  ;;  %v6276_v37 = vadd.f32 %v6170_v31, %v5916_v51  ;;  %v6827_v18 = vsel %vm6765_vm12, %v6734_v4, %v6796_v3 }
 0x678   : > { %v9469_v34 = vpop.f32.mrf.mxu1  ;;  %v6889_v41 = vmul.f32 %v6858_v30, %v6827_v18  ;;  %v14855_v18 = vld [vmem:[#allocation56_spill] sm:$0xff] }
 0x679   : > { %v6636_v12 = vadd.f32 %v14020_v27, %v6276_v37  ;;  %vm6766_vm13 = vcmp.ge.f32.partialorder %v6735_v9, 0.0  ;;  %v6797_v55 = vmul.f32 0.2, %v6735_v9  ;;  %v5918_v27 = vadd.f32 %v13696_v47, %v14038_v54  ;;  %v6861_v54 = vld [vmem:[%s14363_s4 + $0x68] sm:$0xff]  ;;  %v14854_v37 = vld [vmem:[#allocation96_spill] sm:$0xff] }
 0x67a   : > { %v6175_v43 = vpop.f32.mrf.mxu1  ;;  %6930 = vadd.xlane.f32.xlu1 %v6889_v41  ;;  %v5921_v34 = vadd.f32 %v14855_v18, %v14854_v37  ;;  %v6863_v41 = vld [vmem:[%s14363_s4 + $0x78] sm:$0xff] }
 0x67b   : > { %v6736_v33 = vadd.f32 %v14139_v61, %v6636_v12  ;;  %v6277_v50 = vadd.f32 %v6175_v43, %v5917_v52  ;;  %v6828_v29 = vsel %vm6766_vm13, %v6735_v9, %v6797_v55  ;;  %v14853_v9 = vld [vmem:[#allocation84_spill] sm:$0xff] }
 0x67c   : > { %v9472_v0 = vpop.f32.mrf.mxu1  ;;  %v6890_v6 = vmul.f32 %v6859_v26, %v6828_v29 }
 0x67d   : > { %v6637_v17 = vadd.f32 %v14028_v60, %v6277_v50  ;;  %vm6767_vm14 = vcmp.ge.f32.partialorder %v6736_v33, 0.0  ;;  %v6798_v22 = vmul.f32 0.2, %v6736_v33  ;;  %v5919_v60 = vadd.f32 %v13712_v15, %v14046_v57  ;;  %v6862_v57 = vld [vmem:[%s14363_s4 + $0x70] sm:$0xff]  ;;  %v14856_v50 = vld [vmem:[#allocation92_spill] sm:$0xff] }
 0x67e   : > { %v6180_v63 = vpop.f32.mrf.mxu1  ;;  %6932 = vadd.xlane.f32.xlu0 %v6890_v6  ;;  %v14857_v0 = vld [vmem:[#allocation124_spill] sm:$0xff] }
 0x67f   : > { %v6737_v16 = vadd.f32 %v14139_v61, %v6637_v17  ;;  %v6278_v5 = vadd.f32 %v6180_v63, %v5918_v27  ;;  %v6829_v40 = vsel %vm6767_vm14, %v6736_v33, %v6798_v22  ;;  %v5922_v6 = vadd.f32 %v14857_v0, %v14070_v14  ;;  %v6864_v27 = vld [vmem:[%s14363_s4 + $0x80] sm:$0xff] }
 0x680   : > { %v9475_v21 = vpop.f32.mrf.mxu1  ;;  %v6891_v49 = vmul.f32 %v6860_v19, %v6829_v40 }
 0x681   : > { %v6638_v10 = vadd.f32 %v14036_v39, %v6278_v5  ;;  %vm6768_vm15 = vcmp.ge.f32.partialorder %v6737_v16, 0.0  ;;  %v6799_v47 = vmul.f32 0.2, %v6737_v16  ;;  %v14851_v39 = vld [vmem:[#allocation88_spill] sm:$0xff] }
 0x682   : > { %v6185_v35 = vpop.f32.mrf.mxu1  ;;  %6934 = vadd.xlane.f32.xlu1 %v6891_v49  ;;  %v5920_v23 = vadd.f32 %v14852_v62, %v14851_v39  ;;  %v14858_v49 = vld [vmem:[#allocation100_spill] sm:$0xff]  ;;  %v14861_v62 = vld [vmem:[#allocation58_spill] sm:$0xff] }
 0x683   : > { %v6738_v13 = vadd.f32 %v14139_v61, %v6638_v10  ;;  %v6279_v53 = vadd.f32 %v6185_v35, %v5919_v60  ;;  %v6830_v2 = vsel %vm6768_vm15, %v6737_v16, %v6799_v47  ;;  %v14859_v60 = vld [vmem:[#allocation57_spill] sm:$0xff] }
 0x684   : > { %v9478_v24 = vpop.f32.mrf.mxu1  ;;  %v6892_v4 = vmul.f32 %v6861_v54, %v6830_v2  ;;  %v5923_v14 = vadd.f32 %v14859_v60, %v14076_v11  ;;  %v6865_v47 = vld [vmem:[%s14363_s4 + $0x88] sm:$0xff]  ;;  %v6866_v11 = vld [vmem:[%s14363_s4 + $0x90] sm:$0xff] }
 0x685   : > { %v6639_v59 = vadd.f32 %v14044_v38, %v6279_v53  ;;  %vm6769_vm0 = vcmp.ge.f32.partialorder %v6738_v13, 0.0  ;;  %v6800_v15 = vmul.f32 0.2, %v6738_v13 }
 0x686   : > { %v6190_v58 = vpop.f32.mrf.mxu1  ;;  %6936 = vadd.xlane.f32.xlu0 %v6892_v4 }
 0x687   : > { %v6739_v20 = vadd.f32 %v14139_v61, %v6639_v59  ;;  %v6280_v48 = vadd.f32 %v6190_v58, %v5920_v23  ;;  %v6831_v51 = vsel %vm6769_vm0, %v6738_v13, %v6800_v15  ;;  %v14860_v59 = vld [vmem:[#allocation104_spill] sm:$0xff]  ;;  %v5924_v23 = vadd.f32 %v14861_v62, %v14082_v25  ;;  %v6867_v25 = vld [vmem:[%s14363_s4 + $0x98] sm:$0xff] }
 0x688   : > { %v9481_v3 = vpop.f32.mrf.mxu1  ;;  %v6893_v30 = vmul.f32 %v6862_v57, %v6831_v51 }
 0x689   : > { %v6801_v31 = vmul.f32 0.2, %v6739_v20  ;;  %v6640_v38 = vadd.f32 %v14853_v9, %v6280_v48  ;;  %vm6770_vm2 = vcmp.ge.f32.partialorder %v6739_v20, 0.0  ;;  %v14863_v9 = vld [vmem:[#allocation59_spill] sm:$0xff] }
 0x68a   : > { %v6195_v12 = vpop.f32.mrf.mxu1  ;;  %6938 = vadd.xlane.f32.xlu1 %v6893_v30  ;;  %v14862_v30 = vld [vmem:[#allocation106_spill] sm:$0xff] }
 0x68b   : > { %v6740_v52 = vadd.f32 %v14139_v61, %v6640_v38  ;;  %v6281_v55 = vadd.f32 %v6195_v12, %v5921_v34  ;;  %v6832_v26 = vsel %vm6770_vm2, %v6739_v20, %v6801_v31  ;;  %v5925_v38 = vadd.f32 %v14863_v9, %v14088_v32  ;;  %v6868_v32 = vld [vmem:[%s14363_s4 + $0xa0] sm:$0xff] }
 0x68c   : > { %v9484_v43 = vpop.f32.mrf.mxu1  ;;  %v6894_v33 = vmul.f32 %v6863_v41, %v6832_v26  ;;  %v14864_v26 = vld [vmem:[#allocation108_spill] sm:$0xff]  ;;  %vm7011_vm2 = vcmask 0  }
 0x68d   : > { %v6641_v29 = vadd.f32 %v14856_v50, %v6281_v55  ;;  %vm6771_vm1 = vcmp.ge.f32.partialorder %v6740_v52, 0.0  ;;  %v6802_v17 = vmul.f32 0.2, %v6740_v52 }
 0x68e   : > { %v6200_v22 = vpop.f32.mrf.mxu1  ;;  %6940 = vadd.xlane.f32.xlu0 %v6894_v33  ;;  %v14865_v33 = vld [vmem:[#allocation60_spill] sm:$0xff] }
 0x68f   : > { %v6741_v19 = vadd.f32 %v14139_v61, %v6641_v29  ;;  %v6282_v63 = vadd.f32 %v6200_v22, %v5922_v6  ;;  %v6833_v16 = vsel %vm6771_vm1, %v6740_v52, %v6802_v17  ;;  %v5926_v50 = vadd.f32 %v14865_v33, %v14094_v8  ;;  %v6869_v8 = vld [vmem:[%s14363_s4 + $0xa8] sm:$0xff] }
 0x690   : > { %v9487_v5 = vpop.f32.mrf.mxu1  ;;  %v6895_v40 = vmul.f32 %v6864_v27, %v6833_v16 }
 0x691   : > { %v6803_v21 = vmul.f32 0.2, %v6741_v19  ;;  %v6642_v10 = vadd.f32 %v14858_v49, %v6282_v63  ;;  %vm6772_vm3 = vcmp.ge.f32.partialorder %v6741_v19, 0.0  ;;  %v14866_v63 = vld [vmem:[#allocation109_spill] sm:$0xff] }
 0x692   : > { %v6205_v54 = vpop.f32.mrf.mxu1  ;;  %6942 = vadd.xlane.f32.xlu1 %v6895_v40  ;;  %v14867_v5 = vld [vmem:[#allocation61_spill] sm:$0xff] }
 0x693   : > { %v6742_v35 = vadd.f32 %v14139_v61, %v6642_v10  ;;  %v6283_v13 = vadd.f32 %v6205_v54, %v5923_v14  ;;  %v6834_v53 = vsel %vm6772_vm3, %v6741_v19, %v6803_v21  ;;  %v5927_v40 = vadd.f32 %v14867_v5, %v14100_v45  ;;  %v6870_v45 = vld [vmem:[%s14363_s4 + $0xb0] sm:$0xff] }
 0x694   : > { %v9490_v2 = vpop.f32.mrf.mxu1  ;;  %v6896_v24 = vmul.f32 %v6865_v47, %v6834_v53  ;;  %v14869_v53 = vld [vmem:[#allocation62_spill] sm:$0xff] }
 0x695   : > { %v6804_v4 = vmul.f32 0.2, %v6742_v35  ;;  %v6643_v39 = vadd.f32 %v14860_v59, %v6283_v13  ;;  %vm6773_vm6 = vcmp.ge.f32.partialorder %v6742_v35, 0.0  ;;  %v5928_v2 = vadd.f32 %v14869_v53, %v14106_v28  ;;  %v6871_v28 = vld [vmem:[%s14363_s4 + $0xb8] sm:$0xff] }
 0x696   : > { %v6210_v15 = vpop.f32.mrf.mxu1  ;;  %6944 = vadd.xlane.f32.xlu0 %v6896_v24 }
 0x697   : > { %v6743_v57 = vadd.f32 %v14139_v61, %v6643_v39  ;;  %v6284_v58 = vadd.f32 %v6210_v15, %v5924_v23  ;;  %v6835_v20 = vsel %vm6773_vm6, %v6742_v35, %v6804_v4  ;;  %v14868_v35 = vld [vmem:[#allocation110_spill] sm:$0xff]  ;;  %v14870_v15 = vld [vmem:[#allocation111_spill] sm:$0xff] }
 0x698   : > { %v9493_v48 = vpop.f32.mrf.mxu1  ;;  %v6897_v51 = vmul.f32 %v6866_v11, %v6835_v20 }
 0x699   : > { %v6805_v3 = vmul.f32 0.2, %v6743_v57  ;;  %v6644_v31 = vadd.f32 %v14862_v30, %v6284_v58  ;;  %vm6774_vm4 = vcmp.ge.f32.partialorder %v6743_v57, 0.0  ;;  %v14871_v58 = vld [vmem:[#allocation63_spill] sm:$0xff] }
 0x69a   : > { %v6215_v37 = vpop.f32.mrf.mxu1  ;;  %6946 = vadd.xlane.f32.xlu1 %v6897_v51  ;;  %v5929_v20 = vadd.f32 %v14871_v58, %v14112_v36  ;;  %v6872_v36 = vld [vmem:[%s14363_s4 + $0xc0] sm:$0xff] }
 0x69b   : > { %v6744_v18 = vadd.f32 %v14139_v61, %v6644_v31  ;;  %v6285_v34 = vadd.f32 %v6215_v37, %v5925_v38  ;;  %v6836_v41 = vsel %vm6774_vm4, %v6743_v57, %v6805_v3 }
 0x69c   : > { %v9496_v12 = vpop.f32.mrf.mxu1  ;;  %v6898_v52 = vmul.f32 %v6867_v25, %v6836_v41 }
 0x69d   : > { %v6806_v55 = vmul.f32 0.2, %v6744_v18  ;;  %v6645_v43 = vadd.f32 %v14864_v26, %v6285_v34  ;;  %vm6775_vm5 = vcmp.ge.f32.partialorder %v6744_v18, 0.0 }
 0x69e   : > { %v6220_v29 = vpop.f32.mrf.mxu1  ;;  %6948 = vadd.xlane.f32.xlu0 %v6898_v52 }
 0x69f   : > { %v6745_v0 = vadd.f32 %v14139_v61, %v6645_v43  ;;  %v6286_v6 = vadd.f32 %v6220_v29, %v5926_v50  ;;  %v6837_v17 = vsel %vm6775_vm5, %v6744_v18, %v6806_v55  ;;  %v6873_v55 = vld [vmem:[%s14363_s4 + $0xc8] sm:$0xff] }
 0x6a0   : > { %v9499_v27 = vpop.f32.mrf.mxu1  ;;  %v6899_v22 = vmul.f32 %v6868_v32, %v6837_v17  ;;  %v14872_v17 = vld [vmem:[#allocation64_spill] sm:$0xff] }
 0x6a1   : > { %v6807_v19 = vmul.f32 0.2, %v6745_v0  ;;  %v6646_v16 = vadd.f32 %v14866_v63, %v6286_v6  ;;  %vm6776_vm7 = vcmp.ge.f32.partialorder %v6745_v0, 0.0  ;;  %v5930_v27 = vadd.f32 %v14872_v17, %v14116_v1  ;;  %v6874_v1 = vld [vmem:[%s14363_s4 + $0xd0] sm:$0xff] }
 0x6a2   : > { %v6225_v21 = vpop.f32.mrf.mxu1  ;;  %6950 = vadd.xlane.f32.xlu1 %v6899_v22 }
 0x6a3   : > { %v6746_v49 = vadd.f32 %v14139_v61, %v6646_v16  ;;  %v6287_v10 = vadd.f32 %v6225_v21, %v5927_v40  ;;  %v6838_v60 = vsel %vm6776_vm7, %v6745_v0, %v6807_v19  ;;  %v14873_v16 = vld [vmem:[#allocation68_spill] sm:$0xff] }
 0x6a4   : > { %v9502_v14 = vpop.f32.mrf.mxu1  ;;  %v6900_v47 = vmul.f32 %v6869_v8, %v6838_v60  ;;  %v5931_v5 = vadd.f32 %v14873_v16, %v14120_v7  ;;  %v14874_v60 = vld [vmem:[#allocation72_spill] sm:$0xff] }
 0x6a5   : > { %v6808_v54 = vmul.f32 0.2, %v6746_v49  ;;  %v6647_v13 = vadd.f32 %v14868_v35, %v6287_v10  ;;  %vm6777_vm8 = vcmp.ge.f32.partialorder %v6746_v49, 0.0  ;;  %v5932_v14 = vadd.f32 %v14874_v60, %v14124_v42 }
 0x6a6   : > { %v6230_v24 = vpop.f32.mrf.mxu1  ;;  %6952 = vadd.xlane.f32.xlu0 %v6900_v47 }
 0x6a7   : > { %v6747_v4 = vadd.f32 %v14139_v61, %v6647_v13  ;;  %v6288_v59 = vadd.f32 %v6230_v24, %v5928_v2  ;;  %v6839_v39 = vsel %vm6777_vm8, %v6746_v49, %v6808_v54  ;;  %v14875_v24 = vld [vmem:[#allocation76_spill] sm:$0xff] }
 0x6a8   : > { %v9505_v62 = vpop.f32.mrf.mxu1  ;;  %v6901_v23 = vmul.f32 %v6870_v45, %v6839_v39  ;;  %v6875_v39 = vld [vmem:[%s14363_s4 + $0xd8] sm:$0xff] }
 0x6a9   : > { %v6809_v11 = vmul.f32 0.2, %v6747_v4  ;;  %v6648_v57 = vadd.f32 %v14870_v15, %v6288_v59  ;;  %vm6778_vm9 = vcmp.ge.f32.partialorder %v6747_v4, 0.0 }
 0x6aa   : > { %v6235_v48 = vpop.f32.mrf.mxu1  ;;  %6954 = vadd.xlane.f32.xlu1 %v6901_v23 }
 0x6ab   : > { %v6748_v51 = vadd.f32 %v14139_v61, %v6648_v57  ;;  %v6289_v3 = vadd.f32 %v6235_v48, %v5929_v20  ;;  %v6840_v30 = vsel %vm6778_vm9, %v6747_v4, %v6809_v11  ;;  %v5933_v4 = vadd.f32 %v14875_v24, %v14128_v56  ;;  %v14876_v20 = vld [vmem:[#allocation80_spill] sm:$0xff] }
 0x6ac   : > { %v9508_v31 = vpop.f32.mrf.mxu1  ;;  %v6902_v9 = vmul.f32 %v6871_v28, %v6840_v30  ;;  %v5934_v28 = vadd.f32 %v14876_v20, %v14132_v46  ;;  %v6877_v46 = vld [vmem:[%s14363_s4 + $0xe8] sm:$0xff] }
 0x6ad   : > { %v6810_v38 = vmul.f32 0.2, %v6748_v51  ;;  %v6649_v25 = vadd.f32 %v14110_v44, %v6289_v3  ;;  %vm6779_vm10 = vcmp.ge.f32.partialorder %v6748_v51, 0.0 }
 0x6ae   : > { %v6240_v37 = vpop.f32.mrf.mxu1  ;;  %6956 = vadd.xlane.f32.xlu0 %v6902_v9 }
 0x6af   : > { %v6749_v18 = vadd.f32 %v14139_v61, %v6649_v25  ;;  %v6841_v34 = vsel %vm6779_vm10, %v6748_v51, %v6810_v38  ;;  %v6290_v19 = vadd.f32 %v6240_v37, %v5930_v27  ;;  %v6876_v51 = vld [vmem:[%s14363_s4 + $0xe0] sm:$0xff] }
 0x6b0   : > { %v9511_v41 = vpop.f32.mrf.mxu1  ;;  %v6903_v12 = vmul.f32 %v6872_v36, %v6841_v34 }
 0x6b1   : > { %v6811_v52 = vmul.f32 0.2, %v6749_v18  ;;  %vm6780_vm11 = vcmp.ge.f32.partialorder %v6749_v18, 0.0 }
 0x6b2   : > { %v6245_v26 = vpop.f32.mrf.mxu1  ;;  %6958 = vadd.xlane.f32.xlu1 %v6903_v12 }
 0x6b3   : > { %v6842_v44 = vsel %vm6780_vm11, %v6749_v18, %v6811_v52  ;;  %v6291_v21 = vadd.f32 %v6245_v26, %v5931_v5 }
 0x6b4   : > { %v9514_v43 = vpop.f32.mrf.mxu1  ;;  %v6904_v33 = vmul.f32 %v6873_v55, %v6842_v44  ;;  %v6878_v55 = vld [vmem:[%s14363_s4 + $0xf0] sm:$0xff] }
 0x6b6   : > { %v6250_v50 = vpop.f32.mrf.mxu1  ;;  %6960 = vadd.xlane.f32.xlu0 %v6904_v33 }
 0x6b7   : > { %v6292_v13 = vadd.f32 %v6250_v50, %v5932_v14 }
 0x6b8   : > { %v9517_v32 = vpop.f32.mrf.mxu1 }
 0x6ba   : > { %v6255_v29 = vpop.f32.mrf.mxu1 }
 0x6bb   : > { %v6293_v23 = vadd.f32 %v6255_v29, %v5933_v4 }
 0x6bc   : > { %v9520_v0 = vpop.f32.mrf.mxu1 }
 0x6be   : > { %v6260_v6 = vpop.f32.mrf.mxu1 }
 0x6bf   : > { %v6294_v30 = vadd.f32 %v6260_v6, %v5934_v28 }
 0x6c0   : > { %v9523_v22 = vpop.f32.mrf.mxu1 }
 0x6c2   : > { %v6600_v63 = vpop.f32.mrf.mxu1 }
 0x6c3   : > { %v6650_v40 = vadd.f32 %v6600_v63, %v6290_v19 }
 0x6c4   : > { %v9636_v8 = vpop.f32.mrf.mxu1 }
 0x6c5   : > { %v6750_v49 = vadd.f32 %v14139_v61, %v6650_v40 }
 0x6c6   : > { %v6605_v10 = vpop.f32.mrf.mxu1 }
 0x6c7   : > { %vm6781_vm12 = vcmp.ge.f32.partialorder %v6750_v49, 0.0  ;;  %v6812_v47 = vmul.f32 0.2, %v6750_v49  ;;  %v6651_v54 = vadd.f32 %v6605_v10, %v6291_v21 }
 0x6c8   : > { %v9639_v35 = vpop.f32.mrf.mxu1 }
 0x6c9   : > { %v6751_v7 = vadd.f32 %v14139_v61, %v6651_v54  ;;  %v6843_v53 = vsel %vm6781_vm12, %v6750_v49, %v6812_v47 }
 0x6ca   : > { %v6610_v2 = vpop.f32.mrf.mxu1  ;;  %v6905_v45 = vmul.f32 %v6874_v1, %v6843_v53 }
 0x6cb   : > { %vm6782_vm13 = vcmp.ge.f32.partialorder %v6751_v7, 0.0  ;;  %v6813_v59 = vmul.f32 0.2, %v6751_v7  ;;  %v6652_v42 = vadd.f32 %v6610_v2, %v6292_v13 }
 0x6cc   : > { %v9642_v62 = vpop.f32.mrf.mxu1  ;;  %6962 = vadd.xlane.f32.xlu1 %v6905_v45 }
 0x6cd   : > { %v6752_v11 = vadd.f32 %v14139_v61, %v6652_v42  ;;  %v6844_v15 = vsel %vm6782_vm13, %v6751_v7, %v6813_v59 }
 0x6ce   : > { %v6615_v57 = vpop.f32.mrf.mxu1  ;;  %v6906_v58 = vmul.f32 %v6875_v39, %v6844_v15 }
 0x6cf   : > { %vm6783_vm14 = vcmp.ge.f32.partialorder %v6752_v11, 0.0  ;;  %v6814_v56 = vmul.f32 0.2, %v6752_v11  ;;  %v6653_v48 = vadd.f32 %v6615_v57, %v6293_v23 }
 0x6d0   : > { %v9645_v3 = vpop.f32.mrf.mxu1  ;;  %6964 = vadd.xlane.f32.xlu0 %v6906_v58 }
 0x6d1   : > { %v6753_v31 = vadd.f32 %v14139_v61, %v6653_v48  ;;  %v6845_v9 = vsel %vm6783_vm14, %v6752_v11, %v6814_v56 }
 0x6d2   : > { %v6620_v38 = vpop.f32.mrf.mxu1  ;;  %v6907_v25 = vmul.f32 %v6876_v51, %v6845_v9 }
 0x6d3   : > { %vm6784_vm15 = vcmp.ge.f32.partialorder %v6753_v31, 0.0  ;;  %v6815_v36 = vmul.f32 0.2, %v6753_v31  ;;  %v6654_v37 = vadd.f32 %v6620_v38, %v6294_v30 }
 0x6d4   : > { %v9648_v18 = vpop.f32.mrf.mxu1  ;;  %6966 = vadd.xlane.f32.xlu1 %v6907_v25 }
 0x6d5   : > { %v6754_v34 = vadd.f32 %v14139_v61, %v6654_v37  ;;  %v6846_v41 = vsel %vm6784_vm15, %v6753_v31, %v6815_v36 }
 0x6d6   : > { %v6908_v12 = vmul.f32 %v6877_v46, %v6846_v41 }
 0x6d7   : > { %vm6785_vm0 = vcmp.ge.f32.partialorder %v6754_v34, 0.0  ;;  %v6816_v52 = vmul.f32 0.2, %v6754_v34 }
 0x6d8   : > { %6968 = vadd.xlane.f32.xlu0 %v6908_v12 }
 0x6d9   : > { %v6847_v26 = vsel %vm6785_vm0, %v6754_v34, %v6816_v52 }
 0x6da   : > { %v6909_v44 = vmul.f32 %v6878_v55, %v6847_v26 }
 0x6db   : > { %v6911_v43 = vpop.xlane.xlu0 %6910 }
 0x6dc   : > { %6970 = vadd.xlane.f32.xlu1 %v6909_v44 }
 0x6df   : > { %v6913_v50 = vpop.xlane.xlu1 %6912 }
 0x6e0   : > { %v6972_v32 = vadd.f32 %v6913_v50, %v6911_v43  ;;  %v7009_v50 = vstv %s7008_s20 }
 0x6e3   : > { %v6915_v33 = vpop.xlane.xlu0 %6914 }
 0x6e4   : > { %v6973_v0 = vadd.f32 %v6972_v32, %v6915_v33 }
 0x6e7   : > { %v6917_v29 = vpop.xlane.xlu0 %6916 }
 0x6e8   : > { %v6974_v61 = vadd.f32 %v6973_v0, %v6917_v29 }
 0x6eb   : > { %v6919_v6 = vpop.xlane.xlu1 %6918 }
 0x6ec   : > { %v6975_v27 = vadd.f32 %v6974_v61, %v6919_v6 }
 0x6ef   : > { %v6921_v17 = vpop.xlane.xlu0 %6920 }
 0x6f0   : > { %v6976_v19 = vadd.f32 %v6975_v27, %v6921_v17 }
 0x6f3   : > { %v6923_v22 = vpop.xlane.xlu1 %6922 }
 0x6f4   : > { %v6977_v16 = vadd.f32 %v6976_v19, %v6923_v22 }
 0x6f7   : > { %v6925_v63 = vpop.xlane.xlu0 %6924 }
 0x6f8   : > { %v6978_v40 = vadd.f32 %v6977_v16, %v6925_v63 }
 0x6fb   : > { %v6927_v5 = vpop.xlane.xlu1 %6926 }
 0x6fc   : > { %v6979_v21 = vadd.f32 %v6978_v40, %v6927_v5 }
 0x6ff   : > { %v6929_v8 = vpop.xlane.xlu0 %6928 }
 0x700   : > { %v6980_v10 = vadd.f32 %v6979_v21, %v6929_v8 }
 0x703   : > { %v6931_v49 = vpop.xlane.xlu1 %6930 }
 0x704   : > { %v6981_v14 = vadd.f32 %v6980_v10, %v6931_v49 }
 0x707   : > { %v6933_v60 = vpop.xlane.xlu0 %6932 }
 0x708   : > { %v6982_v54 = vadd.f32 %v6981_v14, %v6933_v60 }
 0x70b   : > { %v6935_v47 = vpop.xlane.xlu1 %6934 }
 0x70c   : > { %v6983_v35 = vadd.f32 %v6982_v54, %v6935_v47 }
 0x70f   : > { %v6937_v1 = vpop.xlane.xlu0 %6936 }
 0x710   : > { %v6984_v7 = vadd.f32 %v6983_v35, %v6937_v1 }
 0x713   : > { %v6939_v13 = vpop.xlane.xlu1 %6938 }
 0x714   : > { %v6985_v2 = vadd.f32 %v6984_v7, %v6939_v13 }
 0x717   : > { %v6941_v53 = vpop.xlane.xlu0 %6940 }
 0x718   : > { %v6986_v24 = vadd.f32 %v6985_v2, %v6941_v53 }
 0x71b   : > { %v6943_v45 = vpop.xlane.xlu1 %6942 }
 0x71c   : > { %v6987_v59 = vadd.f32 %v6986_v24, %v6943_v45 }
 0x71f   : > { %v6945_v4 = vpop.xlane.xlu0 %6944 }
 0x720   : > { %v6988_v39 = vadd.f32 %v6987_v59, %v6945_v4 }
 0x723   : > { %v6947_v42 = vpop.xlane.xlu1 %6946 }
 0x724   : > { %v6989_v23 = vadd.f32 %v6988_v39, %v6947_v42 }
 0x727   : > { %v6949_v62 = vpop.xlane.xlu0 %6948 }
 0x728   : > { %v6990_v15 = vadd.f32 %v6989_v23, %v6949_v62 }
 0x72b   : > { %v6951_v11 = vpop.xlane.xlu1 %6950 }
 0x72c   : > { %v6991_v58 = vadd.f32 %v6990_v15, %v6951_v11 }
 0x72f   : > { %v6953_v57 = vpop.xlane.xlu0 %6952 }
 0x730   : > { %v6992_v28 = vadd.f32 %v6991_v58, %v6953_v57 }
 0x733   : > { %v6955_v20 = vpop.xlane.xlu1 %6954 }
 0x734   : > { %v6993_v48 = vadd.f32 %v6992_v28, %v6955_v20 }
 0x737   : > { %v6957_v56 = vpop.xlane.xlu0 %6956 }
 0x738   : > { %v6994_v3 = vadd.f32 %v6993_v48, %v6957_v56 }
 0x73b   : > { %v6959_v51 = vpop.xlane.xlu1 %6958 }
 0x73c   : > { %v6995_v31 = vadd.f32 %v6994_v3, %v6959_v51 }
 0x73f   : > { %v6961_v30 = vpop.xlane.xlu0 %6960 }
 0x740   : > { %v6996_v38 = vadd.f32 %v6995_v31, %v6961_v30 }
 0x755   : > { %v6963_v9 = vpop.xlane.xlu1 %6962 }
 0x756   : > { %v6997_v36 = vadd.f32 %v6996_v38, %v6963_v9 }
 0x759   : > { %v6965_v25 = vpop.xlane.xlu0 %6964 }
 0x75a   : > { %v6998_v46 = vadd.f32 %v6997_v36, %v6965_v25 }
 0x75d   : > { %v6967_v37 = vpop.xlane.xlu1 %6966 }
 0x75e   : > { %v6999_v34 = vadd.f32 %v6998_v46, %v6967_v37 }
 0x761   : > { %v6969_v18 = vpop.xlane.xlu0 %6968 }
 0x762   : > { %v7000_v41 = vadd.f32 %v6999_v34, %v6969_v18 }
 0x765   : > { %v6971_v12 = vpop.xlane.xlu1 %6970 }
 0x766   : > { %v7001_v52 = vadd.f32 %v7000_v41, %v6971_v12 }
 0x768   : > { %v7002_v55 = vrot.slane %v7001_v52, 4 }
 0x76a   : > { %v7003_v26 = vadd.f32 %v7002_v55, %v7001_v52 }
 0x76c   : > { %v7004_v44 = vrot.slane %v7003_v26, 2 }
 0x76e   : > { %v7005_v43 = vadd.f32 %v7004_v44, %v7003_v26 }
 0x770   : > { %v7006_v33 = vrot.slane %v7005_v43, 1 }
 0x772   : > { %v7007_v32 = vadd.f32 %v7006_v33, %v7005_v43 }
 0x774   : > { %v7010_v29 = vadd.f32 %v7009_v50, %v7007_v32 }
 0x776   : > { %7012 = vst.msk [vmem:[%s250_s26] sm:$0x1] %vm7011_vm2, %v7010_v29 }
 0x777 PF: > { %s17_s23 = sadd.s32 1, %s9714_s23  }
 0x778   : > { %p14_p5 = scmp.ge.s32.totalorder %s17_s23, 4  }
 0x77a   :  { %16 = sbr.rel (!%p14_p5) target bundleno = 2 (0x2), region = 74 }

</bundles_post_ra>
